<compile_context>
chip_gen: v5e
topology: v5e:2x2
jax: 0.10.0
libtpu: 0.0.40
codegen_flags: <defaults>
</compile_context>

<pallas_src>
import math
import functools

import jax
import jax.numpy as jnp
from jax import lax
from jax.experimental import pallas as pl
from jax.experimental.pallas import tpu as pltpu

VOCAB = 21128          # fixed by the PyTorch module's .view(-1, 21128)

HIDDEN = 32
NUM_HEADS = 4
HEAD_DIM = HIDDEN // NUM_HEADS
NUM_LAYERS = 2
INTERMEDIATE = 64
MAX_POS = 16
LN_EPS = 1e-12


def _choose_vocab_tiles():
    """2 'parallel' vocab tiles lets v7x's two TensorCores each stream half the
    decoder weight; single-TensorCore chips (v5e/v6e) prefer one full-width
    tile (one fewer ~0.35us pipeline step on a ~2us memory-bound kernel)."""
    try:
        kind = jax.devices()[0].device_kind.lower()
    except Exception:
        return 1
    return 2 if "7" in kind else 1


N_VOCAB_TILES = _choose_vocab_tiles()
if N_VOCAB_TILES == 1:
    VOCAB_PAD = VOCAB                                   # full-array blocks, no padding needed
else:
    _Q = 128 * N_VOCAB_TILES
    VOCAB_PAD = _Q * math.ceil(VOCAB / _Q)              # 21248 = 2 * 83 * 128 for 2 tiles
VOCAB_TILE = VOCAB_PAD // N_VOCAB_TILES


# ----------------------------- helpers --------------------------------------

def _gelu(x):
    # tanh approximation of GELU (lowers cleanly to the EUP).
    c = math.sqrt(2.0 / math.pi)
    return 0.5 * x * (1.0 + jnp.tanh(c * (x + 0.044715 * x * x * x)))


# ------------------------- fused encoder kernel ------------------------------

def _fused_encoder_kernel(x_ref, mask_ref, ln_g_ref, ln_b_ref,
                          wqkv_ref, bqkv_ref, wo_ref, bo_ref,
                          w1_ref, b1_ref, w2_ref, b2_ref,
                          mlm_w_ref, mlm_b_ref,
                          out_ref, *, B, S):
    """Embedding LN + NUM_LAYERS transformer layers + MLM head (dense/GELU/LN).

    Everything lives in VMEM; loops over layers/heads are fully unrolled at
    trace time (tiny static extents). Attention is batched over B per head via
    dot_general batch dims; head contexts are concatenated lane-dense (no
    masked sub-lane scratch stores).
    """
    H, nH, Dh = HIDDEN, NUM_HEADS, HEAD_DIM
    scale = 1.0 / math.sqrt(Dh)

    def ln(v, idx):
        mu = jnp.mean(v, axis=-1, keepdims=True)
        vc = v - mu
        var = jnp.mean(vc * vc, axis=-1, keepdims=True)
        return (vc * lax.rsqrt(var + LN_EPS)
                * ln_g_ref[idx:idx + 1, :] + ln_b_ref[idx:idx + 1, :])

    # Embedding LayerNorm (no residual).
    x = ln(x_ref[...], 0)

    # BERT-style additive mask on the key axis: (B, 1, S), hoisted out of loops.
    mask_bias = ((1.0 - mask_ref[...]) * -10000.0)[:, None, :]

    for l in range(NUM_LAYERS):
        # Fused QKV projection: one (M, 3H) matmul per layer.
        qkv = (jnp.dot(x, wqkv_ref[l], preferred_element_type=jnp.float32)
               + bqkv_ref[l])                                   # (B*S, 3H)
        qkv3 = qkv.reshape(B, S, 3 * H)                         # leading-dim split only

        heads = []
        for h in range(nH):
            c0 = h * Dh
            q = qkv3[:, :, c0:c0 + Dh]                          # (B, S, Dh)
            k = qkv3[:, :, H + c0:H + c0 + Dh]
            v = qkv3[:, :, 2 * H + c0:2 * H + c0 + Dh]
            s = jnp.einsum('bqd,bkd->bqk', q, k,
                           preferred_element_type=jnp.float32) * scale
            s = s + mask_bias
            s = s - jnp.max(s, axis=-1, keepdims=True)
            p = jnp.exp(s)
            denom = jnp.sum(p, axis=-1, keepdims=True)
            p = p * pl.reciprocal(denom, approx=True)           # EUP, frees VALU
            heads.append(jnp.einsum('bqk,bkd->bqd', p, v,
                                    preferred_element_type=jnp.float32))

        # Single lane-dense context assembly (no masked 8-lane scratch stores).
        ctx = jnp.concatenate(heads, axis=-1).reshape(B * S, H)

        attn_out = (jnp.dot(ctx, wo_ref[l],
                            preferred_element_type=jnp.float32) + bo_ref[l])
        x = ln(attn_out + x, 1 + 2 * l)

        mid = _gelu(jnp.dot(x, w1_ref[l],
                            preferred_element_type=jnp.float32) + b1_ref[l])
        ffn = jnp.dot(mid, w2_ref[l],
                      preferred_element_type=jnp.float32) + b2_ref[l]
        x = ln(ffn + x, 2 + 2 * l)

    # MLM head transform: dense + GELU + LN; emit bf16 for the decoder matmul.
    hmlm = _gelu(jnp.dot(x, mlm_w_ref[...],
                         preferred_element_type=jnp.float32) + mlm_b_ref[...])
    out_ref[...] = ln(hmlm, 1 + 2 * NUM_LAYERS).astype(out_ref.dtype)


def fused_encoder(x_emb, mask, p):
    M, H = x_emb.shape
    B, S = mask.shape
    kern = functools.partial(_fused_encoder_kernel, B=B, S=S)
    return pl.pallas_call(
        kern,
        out_shape=jax.ShapeDtypeStruct((M, H), jnp.bfloat16),
    )(x_emb, mask,
      p["ln_g"], p["ln_b"],
      p["wqkv"], p["bqkv"], p["wo"], p["bo"],
      p["w1"], p["b1"], p["w2"], p["b2"],
      p["mlm_w"], p["mlm_b"])


# ----------------------------- vocab decoder ---------------------------------

def _decoder_kernel(x_ref, w_ref, b_ref, o_ref):
    """scores_tile = (x @ W_dec_tile) + b_tile, bf16 operands, f32 accumulate."""
    o_ref[...] = (jnp.dot(x_ref[...], w_ref[...],
                          preferred_element_type=jnp.float32) + b_ref[...])


def vocab_decoder(x_bf16, w_bf16, b, n_tiles):
    M, H = x_bf16.shape
    Np = w_bf16.shape[1]           # padded vocab width (per-tile lane dense)
    tn = Np // n_tiles
    cost = pl.CostEstimate(
        flops=2 * M * H * Np,
        transcendentals=0,
        bytes_accessed=H * Np * 2 + Np * 4 + M * VOCAB * 4 + M * H * 2,
    )
    # Output is the EXACT (M, 21128) array: writes to the ragged last-tile
    # padding (columns >= 21128) are dropped by Pallas, so no un-pad copy.
    return pl.pallas_call(
        _decoder_kernel,
        out_shape=jax.ShapeDtypeStruct((M, VOCAB), jnp.float32),
        grid=(n_tiles,),
        in_specs=[
            pl.BlockSpec((M, H), lambda j: (0, 0)),
            pl.BlockSpec((H, tn), lambda j: (0, j)),
            pl.BlockSpec((1, tn), lambda j: (0, j)),
        ],
        out_specs=pl.BlockSpec((M, tn), lambda j: (0, j)),
        compiler_params=pltpu.CompilerParams(
            dimension_semantics=("parallel",)),
        cost_estimate=cost,
    )(x_bf16, w_bf16, b)


# ----------------------------- parameters ------------------------------------

def init_params(key):
    cnt = [0]

    def nk():
        cnt[0] += 1
        return jax.random.fold_in(key, cnt[0])

    def normal(shape, scale=0.02):
        return scale * jax.random.normal(nk(), shape, dtype=jnp.float32)

    H, I, L = HIDDEN, INTERMEDIATE, NUM_LAYERS
    word_emb = normal((VOCAB, H))

    p = {
        "word_emb": word_emb,
        "pos_emb": normal((MAX_POS, H)),
        "type_emb": normal((2, H)),
        # fused per-layer weights, stacked along a leading layer axis
        "wqkv": jnp.stack([jnp.concatenate(
            [normal((H, H)), normal((H, H)), normal((H, H))], axis=1)
            for _ in range(L)]),                                   # (L, H, 3H)
        "bqkv": jnp.zeros((L, 1, 3 * H), jnp.float32),
        "wo": jnp.stack([normal((H, H)) for _ in range(L)]),       # (L, H, H)
        "bo": jnp.zeros((L, 1, H), jnp.float32),
        "w1": jnp.stack([normal((H, I)) for _ in range(L)]),       # (L, H, I)
        "b1": jnp.zeros((L, 1, I), jnp.float32),
        "w2": jnp.stack([normal((I, H)) for _ in range(L)]),       # (L, I, H)
        "b2": jnp.zeros((L, 1, H), jnp.float32),
        # LayerNorms: [emb, (ln1, ln2) per layer, mlm] -> (2L + 2, H)
        "ln_g": jnp.ones((2 * L + 2, H), jnp.float32),
        "ln_b": jnp.zeros((2 * L + 2, H), jnp.float32),
        # MLM head transform
        "mlm_w": normal((H, H)),
        "mlm_b": jnp.zeros((1, H), jnp.float32),
    }

    # Decoder: weight tied to word embeddings, cast to bf16 (the decoder is
    # HBM-bandwidth bound).  Padded to a multiple of (128 * n_tiles) only when
    # tiling; with a single tile the full-array block needs no padding.
    dec_w = word_emb.T                                             # (H, VOCAB)
    dec_b = normal((VOCAB,))
    pad = VOCAB_PAD - VOCAB
    p["dec_w"] = jnp.pad(dec_w, ((0, 0), (0, pad))).astype(jnp.bfloat16)
    p["dec_b"] = jnp.pad(dec_b, (0, pad)).reshape(1, VOCAB_PAD)
    return p


# ------------------------------ forward --------------------------------------

def mybert_v2_forward(params, input_ids, attention_mask):
    B, S = input_ids.shape
    H = HIDDEN

    # Embedding gather is glue in plain JAX; everything else is Pallas.
    emb = (params["word_emb"][input_ids]
           + params["pos_emb"][:S][None, :, :]
           + params["type_emb"][0][None, None, :])                 # (B, S, H)
    x_emb = emb.reshape(B * S, H)
    mask = attention_mask.astype(jnp.float32)                      # (B, S)

    # One fused kernel: embedding LN + 2 transformer layers + MLM transform.
    h = fused_encoder(x_emb, mask, params)                         # (B*S, H) bf16

    # Tied-weight vocab projection, bf16 weights, exact (B*S, 21128) f32 output.
    scores = vocab_decoder(h, params["dec_w"], params["dec_b"], N_VOCAB_TILES)
    # Equivalent of `prediction_scores.view(-1, 21128)` (already exact width).
    return scores.reshape(-1, VOCAB)


# ------------------------------- main -----------------------------------------

if __name__ == "__main__":
    key = jax.random.PRNGKey(0)
    params = init_params(key)

    B, S = 2, 8
    kid = jax.random.fold_in(key, 12345)
    input_ids = jax.random.randint(kid, (B, S), 0, VOCAB, dtype=jnp.int32)
    attention_mask = jnp.ones((B, S), dtype=jnp.int32)

    fwd = jax.jit(mybert_v2_forward)
    out = fwd(params, input_ids, attention_mask)
    out = jax.block_until_ready(out)

    assert out.shape == (B * S, VOCAB), out.shape
    assert out.dtype == jnp.float32
    assert bool(jnp.all(jnp.isfinite(out)))
    print("KERNEL_OK")
</pallas_src>

<mosaic_0001>
module attributes {stable_mosaic.version = 11 : i64} {
  func.func @_decoder_kernel(%arg0: i32, %arg1: memref<16x32xbf16, #tpu.memory_space<vmem>>, %arg2: memref<32x21128xbf16, #tpu.memory_space<vmem>>, %arg3: memref<1x21128xf32, #tpu.memory_space<vmem>>, %arg4: memref<16x21128xf32, #tpu.memory_space<vmem>>) attributes {dimension_semantics = [#tpu.dimension_semantics<parallel>], iteration_bounds = array<i64: 1>, scalar_prefetch = 0 : i64, scratch_operands = 0 : i64, tpu.core_type = #tpu.core_type<tc>, window_params = [{pipeline_mode = #tpu.pipeline_mode<synchronous>, transform_indices = @transform_0, window_bounds = array<i64: 16, 32>}, {transform_indices = @transform_1, window_bounds = array<i64: 32, 21128>}, {transform_indices = @transform_2, window_bounds = array<i64: 1, 21128>}, {transform_indices = @transform_3, window_bounds = array<i64: 16, 21128>}]} {
    %c0 = arith.constant 0 : index
    %c0_0 = arith.constant 0 : index
    %0 = vector.load %arg1[%c0, %c0_0] : memref<16x32xbf16, #tpu.memory_space<vmem>>, vector<16x32xbf16>
    %c0_1 = arith.constant 0 : index
    %c0_2 = arith.constant 0 : index
    %1 = vector.load %arg2[%c0_1, %c0_2] : memref<32x21128xbf16, #tpu.memory_space<vmem>>, vector<32x21128xbf16>
    %cst = arith.constant dense<0.000000e+00> : vector<16x21128xf32>
    %2 = tpu.matmul %0, %1, %cst {dimension_numbers = #tpu.dot_dimension_numbers<[1], [0], [0], [1], [0, 0, 1, 1], [], []>} : vector<16x32xbf16>, vector<32x21128xbf16>, vector<16x21128xf32> -> vector<16x21128xf32>
    %c0_3 = arith.constant 0 : index
    %c0_4 = arith.constant 0 : index
    %3 = vector.load %arg3[%c0_3, %c0_4] : memref<1x21128xf32, #tpu.memory_space<vmem>>, vector<1x21128xf32>
    %4 = vector.broadcast %3 : vector<1x21128xf32> to vector<16x21128xf32>
    %5 = arith.addf %2, %4 : vector<16x21128xf32>
    %c0_5 = arith.constant 0 : index
    %c0_6 = arith.constant 0 : index
    %6 = vector.load %arg4[%c0_5, %c0_6] : memref<16x21128xf32, #tpu.memory_space<vmem>>, vector<16x21128xf32>
    tpu.vector_store %arg4[%c0_5, %c0_6], %5 {strides = array<i32>} : memref<16x21128xf32, #tpu.memory_space<vmem>>, vector<16x21128xf32>,
    return
  }
  func.func @transform_0(%arg0: i32) -> (i32, i32) {
    %c0_i32 = arith.constant 0 : i32
    %c0_i32_0 = arith.constant 0 : i32
    %c0_i32_1 = arith.constant 0 : i32
    return %c0_i32, %c0_i32_0 : i32, i32
  }
  func.func @transform_1(%arg0: i32) -> (i32, i32) {
    %c0_i32 = arith.constant 0 : i32
    %c0_i32_0 = arith.constant 0 : i32
    return %c0_i32, %arg0 : i32, i32
  }
  func.func @transform_2(%arg0: i32) -> (i32, i32) {
    %c0_i32 = arith.constant 0 : i32
    %c0_i32_0 = arith.constant 0 : i32
    return %c0_i32, %arg0 : i32, i32
  }
  func.func @transform_3(%arg0: i32) -> (i32, i32) {
    %c0_i32 = arith.constant 0 : i32
    %c0_i32_0 = arith.constant 0 : i32
    return %c0_i32, %arg0 : i32, i32
  }
}

module attributes {stable_mosaic.version = 11 : i64} {
  func.func @_fused_encoder_kernel(%arg0: memref<16x32xf32, #tpu.memory_space<vmem>>, %arg1: memref<2x8xf32, #tpu.memory_space<vmem>>, %arg2: memref<6x32xf32, #tpu.memory_space<vmem>>, %arg3: memref<6x32xf32, #tpu.memory_space<vmem>>, %arg4: memref<2x32x96xf32, #tpu.memory_space<vmem>>, %arg5: memref<2x1x96xf32, #tpu.memory_space<vmem>>, %arg6: memref<2x32x32xf32, #tpu.memory_space<vmem>>, %arg7: memref<2x1x32xf32, #tpu.memory_space<vmem>>, %arg8: memref<2x32x64xf32, #tpu.memory_space<vmem>>, %arg9: memref<2x1x64xf32, #tpu.memory_space<vmem>>, %arg10: memref<2x64x32xf32, #tpu.memory_space<vmem>>, %arg11: memref<2x1x32xf32, #tpu.memory_space<vmem>>, %arg12: memref<32x32xf32, #tpu.memory_space<vmem>>, %arg13: memref<1x32xf32, #tpu.memory_space<vmem>>, %arg14: memref<16x32xbf16, #tpu.memory_space<vmem>>) attributes {dimension_semantics = [], scalar_prefetch = 0 : i64, scratch_operands = 0 : i64, tpu.core_type = #tpu.core_type<tc>} {
    %c0 = arith.constant 0 : index
    %c0_0 = arith.constant 0 : index
    %0 = vector.load %arg0[%c0, %c0_0] : memref<16x32xf32, #tpu.memory_space<vmem>>, vector<16x32xf32>
    %cst = arith.constant dense<0.000000e+00> : vector<16xf32>
    %1 = vector.multi_reduction <add>, %0, %cst [1] : vector<16x32xf32> to vector<16xf32>
    %2 = vector.shape_cast %1 : vector<16xf32> to vector<16x1xf32>
    %cst_1 = arith.constant 3.200000e+01 : f32
    %3 = vector.broadcast %cst_1 : f32 to vector<16x1xf32>
    %4 = arith.divf %2, %3 : vector<16x1xf32>
    %5 = vector.broadcast %4 : vector<16x1xf32> to vector<16x32xf32>
    %6 = arith.subf %0, %5 : vector<16x32xf32>
    %7 = arith.mulf %6, %6 : vector<16x32xf32>
    %cst_2 = arith.constant dense<0.000000e+00> : vector<16xf32>
    %8 = vector.multi_reduction <add>, %7, %cst_2 [1] : vector<16x32xf32> to vector<16xf32>
    %9 = vector.shape_cast %8 : vector<16xf32> to vector<16x1xf32>
    %cst_3 = arith.constant 3.200000e+01 : f32
    %10 = vector.broadcast %cst_3 : f32 to vector<16x1xf32>
    %11 = arith.divf %9, %10 : vector<16x1xf32>
    %cst_4 = arith.constant 9.99999996E-13 : f32
    %12 = vector.broadcast %cst_4 : f32 to vector<16x1xf32>
    %13 = arith.addf %11, %12 : vector<16x1xf32>
    %14 = math.rsqrt %13 : vector<16x1xf32>
    %15 = vector.broadcast %14 : vector<16x1xf32> to vector<16x32xf32>
    %16 = arith.mulf %6, %15 : vector<16x32xf32>
    %c0_5 = arith.constant 0 : index
    %c0_6 = arith.constant 0 : index
    %17 = vector.load %arg2[%c0_5, %c0_6] : memref<6x32xf32, #tpu.memory_space<vmem>>, vector<1x32xf32>
    %18 = vector.broadcast %17 : vector<1x32xf32> to vector<16x32xf32>
    %19 = arith.mulf %16, %18 : vector<16x32xf32>
    %c0_7 = arith.constant 0 : index
    %c0_8 = arith.constant 0 : index
    %20 = vector.load %arg3[%c0_7, %c0_8] : memref<6x32xf32, #tpu.memory_space<vmem>>, vector<1x32xf32>
    %21 = vector.broadcast %20 : vector<1x32xf32> to vector<16x32xf32>
    %22 = arith.addf %19, %21 : vector<16x32xf32>
    %c0_9 = arith.constant 0 : index
    %c0_10 = arith.constant 0 : index
    %23 = vector.load %arg1[%c0_9, %c0_10] : memref<2x8xf32, #tpu.memory_space<vmem>>, vector<2x8xf32>
    %cst_11 = arith.constant 1.000000e+00 : f32
    %24 = vector.broadcast %cst_11 : f32 to vector<2x8xf32>
    %25 = arith.subf %24, %23 : vector<2x8xf32>
    %cst_12 = arith.constant -1.000000e+04 : f32
    %26 = vector.broadcast %cst_12 : f32 to vector<2x8xf32>
    %27 = arith.mulf %25, %26 : vector<2x8xf32>
    %28 = vector.shape_cast %27 : vector<2x8xf32> to vector<2x1x8xf32>
    %c0_13 = arith.constant 0 : index
    %c0_14 = arith.constant 0 : index
    %c0_15 = arith.constant 0 : index
    %29 = vector.load %arg4[%c0_13, %c0_14, %c0_15] : memref<2x32x96xf32, #tpu.memory_space<vmem>>, vector<1x32x96xf32>
    %30 = vector.shape_cast %29 : vector<1x32x96xf32> to vector<32x96xf32>
    %cst_16 = arith.constant dense<0.000000e+00> : vector<16x96xf32>
    %31 = tpu.matmul %22, %30, %cst_16 {dimension_numbers = #tpu.dot_dimension_numbers<[1], [0], [0], [1], [0, 0, 1, 1], [], []>} : vector<16x32xf32>, vector<32x96xf32>, vector<16x96xf32> -> vector<16x96xf32>
    %c0_17 = arith.constant 0 : index
    %c0_18 = arith.constant 0 : index
    %c0_19 = arith.constant 0 : index
    %32 = vector.load %arg5[%c0_17, %c0_18, %c0_19] : memref<2x1x96xf32, #tpu.memory_space<vmem>>, vector<1x1x96xf32>
    %33 = vector.shape_cast %32 : vector<1x1x96xf32> to vector<1x96xf32>
    %34 = vector.broadcast %33 : vector<1x96xf32> to vector<16x96xf32>
    %35 = arith.addf %31, %34 : vector<16x96xf32>
    %36 = vector.shape_cast %35 : vector<16x96xf32> to vector<2x8x96xf32>
    %37 = vector.extract_strided_slice %36 {offsets = [0, 0, 0], sizes = [2, 8, 8], strides = [1, 1, 1]} : vector<2x8x96xf32> to vector<2x8x8xf32>
    %38 = vector.extract_strided_slice %36 {offsets = [0, 0, 32], sizes = [2, 8, 8], strides = [1, 1, 1]} : vector<2x8x96xf32> to vector<2x8x8xf32>
    %39 = vector.extract_strided_slice %36 {offsets = [0, 0, 64], sizes = [2, 8, 8], strides = [1, 1, 1]} : vector<2x8x96xf32> to vector<2x8x8xf32>
    "tpu.trace_start"() <{level = 10 : i32, message = "bqd,bkd->bqk"}> : () -> ()
    %cst_20 = arith.constant dense<0.000000e+00> : vector<2x8x8xf32>
    %40 = tpu.matmul %37, %38, %cst_20 {dimension_numbers = #tpu.dot_dimension_numbers<[2], [2], [1], [1], [0, 0, 0, 1, 1, 1], [0], [0]>} : vector<2x8x8xf32>, vector<2x8x8xf32>, vector<2x8x8xf32> -> vector<2x8x8xf32>
    "tpu.trace_stop"() : () -> ()
    %cst_21 = arith.constant 0.353553385 : f32
    %41 = vector.broadcast %cst_21 : f32 to vector<2x8x8xf32>
    %42 = arith.mulf %40, %41 : vector<2x8x8xf32>
    %43 = vector.broadcast %28 : vector<2x1x8xf32> to vector<2x8x8xf32>
    %44 = arith.addf %42, %43 : vector<2x8x8xf32>
    %cst_22 = arith.constant dense<0xFF800000> : vector<2x8xf32>
    %45 = vector.multi_reduction <maximumf>, %44, %cst_22 [2] : vector<2x8x8xf32> to vector<2x8xf32>
    %46 = vector.shape_cast %45 : vector<2x8xf32> to vector<2x8x1xf32>
    %47 = vector.broadcast %46 : vector<2x8x1xf32> to vector<2x8x8xf32>
    %48 = arith.subf %44, %47 : vector<2x8x8xf32>
    %49 = math.exp %48 : vector<2x8x8xf32>
    %cst_23 = arith.constant dense<0.000000e+00> : vector<2x8xf32>
    %50 = vector.multi_reduction <add>, %49, %cst_23 [2] : vector<2x8x8xf32> to vector<2x8xf32>
    %51 = vector.shape_cast %50 : vector<2x8xf32> to vector<2x8x1xf32>
    %52 = tpu.reciprocal %51 {approx = true} : vector<2x8x1xf32> -> vector<2x8x1xf32>
    %53 = vector.broadcast %52 : vector<2x8x1xf32> to vector<2x8x8xf32>
    %54 = arith.mulf %49, %53 : vector<2x8x8xf32>
    "tpu.trace_start"() <{level = 10 : i32, message = "bqk,bkd->bqd"}> : () -> ()
    %cst_24 = arith.constant dense<0.000000e+00> : vector<2x8x8xf32>
    %55 = tpu.matmul %54, %39, %cst_24 {dimension_numbers = #tpu.dot_dimension_numbers<[2], [1], [1], [2], [0, 0, 0, 1, 1, 2], [0], [0]>} : vector<2x8x8xf32>, vector<2x8x8xf32>, vector<2x8x8xf32> -> vector<2x8x8xf32>
    "tpu.trace_stop"() : () -> ()
    %56 = vector.extract_strided_slice %36 {offsets = [0, 0, 8], sizes = [2, 8, 8], strides = [1, 1, 1]} : vector<2x8x96xf32> to vector<2x8x8xf32>
    %57 = vector.extract_strided_slice %36 {offsets = [0, 0, 40], sizes = [2, 8, 8], strides = [1, 1, 1]} : vector<2x8x96xf32> to vector<2x8x8xf32>
    %58 = vector.extract_strided_slice %36 {offsets = [0, 0, 72], sizes = [2, 8, 8], strides = [1, 1, 1]} : vector<2x8x96xf32> to vector<2x8x8xf32>
    "tpu.trace_start"() <{level = 10 : i32, message = "bqd,bkd->bqk"}> : () -> ()
    %cst_25 = arith.constant dense<0.000000e+00> : vector<2x8x8xf32>
    %59 = tpu.matmul %56, %57, %cst_25 {dimension_numbers = #tpu.dot_dimension_numbers<[2], [2], [1], [1], [0, 0, 0, 1, 1, 1], [0], [0]>} : vector<2x8x8xf32>, vector<2x8x8xf32>, vector<2x8x8xf32> -> vector<2x8x8xf32>
    "tpu.trace_stop"() : () -> ()
    %cst_26 = arith.constant 0.353553385 : f32
    %60 = vector.broadcast %cst_26 : f32 to vector<2x8x8xf32>
    %61 = arith.mulf %59, %60 : vector<2x8x8xf32>
    %62 = vector.broadcast %28 : vector<2x1x8xf32> to vector<2x8x8xf32>
    %63 = arith.addf %61, %62 : vector<2x8x8xf32>
    %cst_27 = arith.constant dense<0xFF800000> : vector<2x8xf32>
    %64 = vector.multi_reduction <maximumf>, %63, %cst_27 [2] : vector<2x8x8xf32> to vector<2x8xf32>
    %65 = vector.shape_cast %64 : vector<2x8xf32> to vector<2x8x1xf32>
    %66 = vector.broadcast %65 : vector<2x8x1xf32> to vector<2x8x8xf32>
    %67 = arith.subf %63, %66 : vector<2x8x8xf32>
    %68 = math.exp %67 : vector<2x8x8xf32>
    %cst_28 = arith.constant dense<0.000000e+00> : vector<2x8xf32>
    %69 = vector.multi_reduction <add>, %68, %cst_28 [2] : vector<2x8x8xf32> to vector<2x8xf32>
    %70 = vector.shape_cast %69 : vector<2x8xf32> to vector<2x8x1xf32>
    %71 = tpu.reciprocal %70 {approx = true} : vector<2x8x1xf32> -> vector<2x8x1xf32>
    %72 = vector.broadcast %71 : vector<2x8x1xf32> to vector<2x8x8xf32>
    %73 = arith.mulf %68, %72 : vector<2x8x8xf32>
    "tpu.trace_start"() <{level = 10 : i32, message = "bqk,bkd->bqd"}> : () -> ()
    %cst_29 = arith.constant dense<0.000000e+00> : vector<2x8x8xf32>
    %74 = tpu.matmul %73, %58, %cst_29 {dimension_numbers = #tpu.dot_dimension_numbers<[2], [1], [1], [2], [0, 0, 0, 1, 1, 2], [0], [0]>} : vector<2x8x8xf32>, vector<2x8x8xf32>, vector<2x8x8xf32> -> vector<2x8x8xf32>
    "tpu.trace_stop"() : () -> ()
    %75 = vector.extract_strided_slice %36 {offsets = [0, 0, 16], sizes = [2, 8, 8], strides = [1, 1, 1]} : vector<2x8x96xf32> to vector<2x8x8xf32>
    %76 = vector.extract_strided_slice %36 {offsets = [0, 0, 48], sizes = [2, 8, 8], strides = [1, 1, 1]} : vector<2x8x96xf32> to vector<2x8x8xf32>
    %77 = vector.extract_strided_slice %36 {offsets = [0, 0, 80], sizes = [2, 8, 8], strides = [1, 1, 1]} : vector<2x8x96xf32> to vector<2x8x8xf32>
    "tpu.trace_start"() <{level = 10 : i32, message = "bqd,bkd->bqk"}> : () -> ()
    %cst_30 = arith.constant dense<0.000000e+00> : vector<2x8x8xf32>
    %78 = tpu.matmul %75, %76, %cst_30 {dimension_numbers = #tpu.dot_dimension_numbers<[2], [2], [1], [1], [0, 0, 0, 1, 1, 1], [0], [0]>} : vector<2x8x8xf32>, vector<2x8x8xf32>, vector<2x8x8xf32> -> vector<2x8x8xf32>
    "tpu.trace_stop"() : () -> ()
    %cst_31 = arith.constant 0.353553385 : f32
    %79 = vector.broadcast %cst_31 : f32 to vector<2x8x8xf32>
    %80 = arith.mulf %78, %79 : vector<2x8x8xf32>
    %81 = vector.broadcast %28 : vector<2x1x8xf32> to vector<2x8x8xf32>
    %82 = arith.addf %80, %81 : vector<2x8x8xf32>
    %cst_32 = arith.constant dense<0xFF800000> : vector<2x8xf32>
    %83 = vector.multi_reduction <maximumf>, %82, %cst_32 [2] : vector<2x8x8xf32> to vector<2x8xf32>
    %84 = vector.shape_cast %83 : vector<2x8xf32> to vector<2x8x1xf32>
    %85 = vector.broadcast %84 : vector<2x8x1xf32> to vector<2x8x8xf32>
    %86 = arith.subf %82, %85 : vector<2x8x8xf32>
    %87 = math.exp %86 : vector<2x8x8xf32>
    %cst_33 = arith.constant dense<0.000000e+00> : vector<2x8xf32>
    %88 = vector.multi_reduction <add>, %87, %cst_33 [2] : vector<2x8x8xf32> to vector<2x8xf32>
    %89 = vector.shape_cast %88 : vector<2x8xf32> to vector<2x8x1xf32>
    %90 = tpu.reciprocal %89 {approx = true} : vector<2x8x1xf32> -> vector<2x8x1xf32>
    %91 = vector.broadcast %90 : vector<2x8x1xf32> to vector<2x8x8xf32>
    %92 = arith.mulf %87, %91 : vector<2x8x8xf32>
    "tpu.trace_start"() <{level = 10 : i32, message = "bqk,bkd->bqd"}> : () -> ()
    %cst_34 = arith.constant dense<0.000000e+00> : vector<2x8x8xf32>
    %93 = tpu.matmul %92, %77, %cst_34 {dimension_numbers = #tpu.dot_dimension_numbers<[2], [1], [1], [2], [0, 0, 0, 1, 1, 2], [0], [0]>} : vector<2x8x8xf32>, vector<2x8x8xf32>, vector<2x8x8xf32> -> vector<2x8x8xf32>
    "tpu.trace_stop"() : () -> ()
    %94 = vector.extract_strided_slice %36 {offsets = [0, 0, 24], sizes = [2, 8, 8], strides = [1, 1, 1]} : vector<2x8x96xf32> to vector<2x8x8xf32>
    %95 = vector.extract_strided_slice %36 {offsets = [0, 0, 56], sizes = [2, 8, 8], strides = [1, 1, 1]} : vector<2x8x96xf32> to vector<2x8x8xf32>
    %96 = vector.extract_strided_slice %36 {offsets = [0, 0, 88], sizes = [2, 8, 8], strides = [1, 1, 1]} : vector<2x8x96xf32> to vector<2x8x8xf32>
    "tpu.trace_start"() <{level = 10 : i32, message = "bqd,bkd->bqk"}> : () -> ()
    %cst_35 = arith.constant dense<0.000000e+00> : vector<2x8x8xf32>
    %97 = tpu.matmul %94, %95, %cst_35 {dimension_numbers = #tpu.dot_dimension_numbers<[2], [2], [1], [1], [0, 0, 0, 1, 1, 1], [0], [0]>} : vector<2x8x8xf32>, vector<2x8x8xf32>, vector<2x8x8xf32> -> vector<2x8x8xf32>
    "tpu.trace_stop"() : () -> ()
    %cst_36 = arith.constant 0.353553385 : f32
    %98 = vector.broadcast %cst_36 : f32 to vector<2x8x8xf32>
    %99 = arith.mulf %97, %98 : vector<2x8x8xf32>
    %100 = vector.broadcast %28 : vector<2x1x8xf32> to vector<2x8x8xf32>
    %101 = arith.addf %99, %100 : vector<2x8x8xf32>
    %cst_37 = arith.constant dense<0xFF800000> : vector<2x8xf32>
    %102 = vector.multi_reduction <maximumf>, %101, %cst_37 [2] : vector<2x8x8xf32> to vector<2x8xf32>
    %103 = vector.shape_cast %102 : vector<2x8xf32> to vector<2x8x1xf32>
    %104 = vector.broadcast %103 : vector<2x8x1xf32> to vector<2x8x8xf32>
    %105 = arith.subf %101, %104 : vector<2x8x8xf32>
    %106 = math.exp %105 : vector<2x8x8xf32>
    %cst_38 = arith.constant dense<0.000000e+00> : vector<2x8xf32>
    %107 = vector.multi_reduction <add>, %106, %cst_38 [2] : vector<2x8x8xf32> to vector<2x8xf32>
    %108 = vector.shape_cast %107 : vector<2x8xf32> to vector<2x8x1xf32>
    %109 = tpu.reciprocal %108 {approx = true} : vector<2x8x1xf32> -> vector<2x8x1xf32>
    %110 = vector.broadcast %109 : vector<2x8x1xf32> to vector<2x8x8xf32>
    %111 = arith.mulf %106, %110 : vector<2x8x8xf32>
    "tpu.trace_start"() <{level = 10 : i32, message = "bqk,bkd->bqd"}> : () -> ()
    %cst_39 = arith.constant dense<0.000000e+00> : vector<2x8x8xf32>
    %112 = tpu.matmul %111, %96, %cst_39 {dimension_numbers = #tpu.dot_dimension_numbers<[2], [1], [1], [2], [0, 0, 0, 1, 1, 2], [0], [0]>} : vector<2x8x8xf32>, vector<2x8x8xf32>, vector<2x8x8xf32> -> vector<2x8x8xf32>
    "tpu.trace_stop"() : () -> ()
    %113 = tpu.concatenate %55, %74, %93, %112 in 2 : vector<2x8x8xf32>, vector<2x8x8xf32>, vector<2x8x8xf32>, vector<2x8x8xf32> -> vector<2x8x32xf32>
    %114 = vector.shape_cast %113 : vector<2x8x32xf32> to vector<16x32xf32>
    %c0_40 = arith.constant 0 : index
    %c0_41 = arith.constant 0 : index
    %c0_42 = arith.constant 0 : index
    %115 = vector.load %arg6[%c0_40, %c0_41, %c0_42] : memref<2x32x32xf32, #tpu.memory_space<vmem>>, vector<1x32x32xf32>
    %116 = vector.shape_cast %115 : vector<1x32x32xf32> to vector<32x32xf32>
    %cst_43 = arith.constant dense<0.000000e+00> : vector<16x32xf32>
    %117 = tpu.matmul %114, %116, %cst_43 {dimension_numbers = #tpu.dot_dimension_numbers<[1], [0], [0], [1], [0, 0, 1, 1], [], []>} : vector<16x32xf32>, vector<32x32xf32>, vector<16x32xf32> -> vector<16x32xf32>
    %c0_44 = arith.constant 0 : index
    %c0_45 = arith.constant 0 : index
    %c0_46 = arith.constant 0 : index
    %118 = vector.load %arg7[%c0_44, %c0_45, %c0_46] : memref<2x1x32xf32, #tpu.memory_space<vmem>>, vector<1x1x32xf32>
    %119 = vector.shape_cast %118 : vector<1x1x32xf32> to vector<1x32xf32>
    %120 = vector.broadcast %119 : vector<1x32xf32> to vector<16x32xf32>
    %121 = arith.addf %117, %120 : vector<16x32xf32>
    %122 = arith.addf %121, %22 : vector<16x32xf32>
    %cst_47 = arith.constant dense<0.000000e+00> : vector<16xf32>
    %123 = vector.multi_reduction <add>, %122, %cst_47 [1] : vector<16x32xf32> to vector<16xf32>
    %124 = vector.shape_cast %123 : vector<16xf32> to vector<16x1xf32>
    %cst_48 = arith.constant 3.200000e+01 : f32
    %125 = vector.broadcast %cst_48 : f32 to vector<16x1xf32>
    %126 = arith.divf %124, %125 : vector<16x1xf32>
    %127 = vector.broadcast %126 : vector<16x1xf32> to vector<16x32xf32>
    %128 = arith.subf %122, %127 : vector<16x32xf32>
    %129 = arith.mulf %128, %128 : vector<16x32xf32>
    %cst_49 = arith.constant dense<0.000000e+00> : vector<16xf32>
    %130 = vector.multi_reduction <add>, %129, %cst_49 [1] : vector<16x32xf32> to vector<16xf32>
    %131 = vector.shape_cast %130 : vector<16xf32> to vector<16x1xf32>
    %cst_50 = arith.constant 3.200000e+01 : f32
    %132 = vector.broadcast %cst_50 : f32 to vector<16x1xf32>
    %133 = arith.divf %131, %132 : vector<16x1xf32>
    %cst_51 = arith.constant 9.99999996E-13 : f32
    %134 = vector.broadcast %cst_51 : f32 to vector<16x1xf32>
    %135 = arith.addf %133, %134 : vector<16x1xf32>
    %136 = math.rsqrt %135 : vector<16x1xf32>
    %137 = vector.broadcast %136 : vector<16x1xf32> to vector<16x32xf32>
    %138 = arith.mulf %128, %137 : vector<16x32xf32>
    %c1 = arith.constant 1 : index
    %c0_52 = arith.constant 0 : index
    %139 = vector.load %arg2[%c1, %c0_52] : memref<6x32xf32, #tpu.memory_space<vmem>>, vector<1x32xf32>
    %140 = vector.broadcast %139 : vector<1x32xf32> to vector<16x32xf32>
    %141 = arith.mulf %138, %140 : vector<16x32xf32>
    %c1_53 = arith.constant 1 : index
    %c0_54 = arith.constant 0 : index
    %142 = vector.load %arg3[%c1_53, %c0_54] : memref<6x32xf32, #tpu.memory_space<vmem>>, vector<1x32xf32>
    %143 = vector.broadcast %142 : vector<1x32xf32> to vector<16x32xf32>
    %144 = arith.addf %141, %143 : vector<16x32xf32>
    %c0_55 = arith.constant 0 : index
    %c0_56 = arith.constant 0 : index
    %c0_57 = arith.constant 0 : index
    %145 = vector.load %arg8[%c0_55, %c0_56, %c0_57] : memref<2x32x64xf32, #tpu.memory_space<vmem>>, vector<1x32x64xf32>
    %146 = vector.shape_cast %145 : vector<1x32x64xf32> to vector<32x64xf32>
    %cst_58 = arith.constant dense<0.000000e+00> : vector<16x64xf32>
    %147 = tpu.matmul %144, %146, %cst_58 {dimension_numbers = #tpu.dot_dimension_numbers<[1], [0], [0], [1], [0, 0, 1, 1], [], []>} : vector<16x32xf32>, vector<32x64xf32>, vector<16x64xf32> -> vector<16x64xf32>
    %c0_59 = arith.constant 0 : index
    %c0_60 = arith.constant 0 : index
    %c0_61 = arith.constant 0 : index
    %148 = vector.load %arg9[%c0_59, %c0_60, %c0_61] : memref<2x1x64xf32, #tpu.memory_space<vmem>>, vector<1x1x64xf32>
    %149 = vector.shape_cast %148 : vector<1x1x64xf32> to vector<1x64xf32>
    %150 = vector.broadcast %149 : vector<1x64xf32> to vector<16x64xf32>
    %151 = arith.addf %147, %150 : vector<16x64xf32>
    %cst_62 = arith.constant 5.000000e-01 : f32
    %152 = vector.broadcast %cst_62 : f32 to vector<16x64xf32>
    %153 = arith.mulf %152, %151 : vector<16x64xf32>
    %cst_63 = arith.constant 4.471500e-02 : f32
    %154 = vector.broadcast %cst_63 : f32 to vector<16x64xf32>
    %155 = arith.mulf %154, %151 : vector<16x64xf32>
    %156 = arith.mulf %155, %151 : vector<16x64xf32>
    %157 = arith.mulf %156, %151 : vector<16x64xf32>
    %158 = arith.addf %151, %157 : vector<16x64xf32>
    %cst_64 = arith.constant 0.797884583 : f32
    %159 = vector.broadcast %cst_64 : f32 to vector<16x64xf32>
    %160 = arith.mulf %159, %158 : vector<16x64xf32>
    %161 = math.tanh %160 : vector<16x64xf32>
    %cst_65 = arith.constant 1.000000e+00 : f32
    %162 = vector.broadcast %cst_65 : f32 to vector<16x64xf32>
    %163 = arith.addf %162, %161 : vector<16x64xf32>
    %164 = arith.mulf %153, %163 : vector<16x64xf32>
    %c0_66 = arith.constant 0 : index
    %c0_67 = arith.constant 0 : index
    %c0_68 = arith.constant 0 : index
    %165 = vector.load %arg10[%c0_66, %c0_67, %c0_68] : memref<2x64x32xf32, #tpu.memory_space<vmem>>, vector<1x64x32xf32>
    %166 = vector.shape_cast %165 : vector<1x64x32xf32> to vector<64x32xf32>
    %cst_69 = arith.constant dense<0.000000e+00> : vector<16x32xf32>
    %167 = tpu.matmul %164, %166, %cst_69 {dimension_numbers = #tpu.dot_dimension_numbers<[1], [0], [0], [1], [0, 0, 1, 1], [], []>} : vector<16x64xf32>, vector<64x32xf32>, vector<16x32xf32> -> vector<16x32xf32>
    %c0_70 = arith.constant 0 : index
    %c0_71 = arith.constant 0 : index
    %c0_72 = arith.constant 0 : index
    %168 = vector.load %arg11[%c0_70, %c0_71, %c0_72] : memref<2x1x32xf32, #tpu.memory_space<vmem>>, vector<1x1x32xf32>
    %169 = vector.shape_cast %168 : vector<1x1x32xf32> to vector<1x32xf32>
    %170 = vector.broadcast %169 : vector<1x32xf32> to vector<16x32xf32>
    %171 = arith.addf %167, %170 : vector<16x32xf32>
    %172 = arith.addf %171, %144 : vector<16x32xf32>
    %cst_73 = arith.constant dense<0.000000e+00> : vector<16xf32>
    %173 = vector.multi_reduction <add>, %172, %cst_73 [1] : vector<16x32xf32> to vector<16xf32>
    %174 = vector.shape_cast %173 : vector<16xf32> to vector<16x1xf32>
    %cst_74 = arith.constant 3.200000e+01 : f32
    %175 = vector.broadcast %cst_74 : f32 to vector<16x1xf32>
    %176 = arith.divf %174, %175 : vector<16x1xf32>
    %177 = vector.broadcast %176 : vector<16x1xf32> to vector<16x32xf32>
    %178 = arith.subf %172, %177 : vector<16x32xf32>
    %179 = arith.mulf %178, %178 : vector<16x32xf32>
    %cst_75 = arith.constant dense<0.000000e+00> : vector<16xf32>
    %180 = vector.multi_reduction <add>, %179, %cst_75 [1] : vector<16x32xf32> to vector<16xf32>
    %181 = vector.shape_cast %180 : vector<16xf32> to vector<16x1xf32>
    %cst_76 = arith.constant 3.200000e+01 : f32
    %182 = vector.broadcast %cst_76 : f32 to vector<16x1xf32>
    %183 = arith.divf %181, %182 : vector<16x1xf32>
    %cst_77 = arith.constant 9.99999996E-13 : f32
    %184 = vector.broadcast %cst_77 : f32 to vector<16x1xf32>
    %185 = arith.addf %183, %184 : vector<16x1xf32>
    %186 = math.rsqrt %185 : vector<16x1xf32>
    %187 = vector.broadcast %186 : vector<16x1xf32> to vector<16x32xf32>
    %188 = arith.mulf %178, %187 : vector<16x32xf32>
    %c2 = arith.constant 2 : index
    %c0_78 = arith.constant 0 : index
    %189 = vector.load %arg2[%c2, %c0_78] : memref<6x32xf32, #tpu.memory_space<vmem>>, vector<1x32xf32>
    %190 = vector.broadcast %189 : vector<1x32xf32> to vector<16x32xf32>
    %191 = arith.mulf %188, %190 : vector<16x32xf32>
    %c2_79 = arith.constant 2 : index
    %c0_80 = arith.constant 0 : index
    %192 = vector.load %arg3[%c2_79, %c0_80] : memref<6x32xf32, #tpu.memory_space<vmem>>, vector<1x32xf32>
    %193 = vector.broadcast %192 : vector<1x32xf32> to vector<16x32xf32>
    %194 = arith.addf %191, %193 : vector<16x32xf32>
    %c1_81 = arith.constant 1 : index
    %c0_82 = arith.constant 0 : index
    %c0_83 = arith.constant 0 : index
    %195 = vector.load %arg4[%c1_81, %c0_82, %c0_83] : memref<2x32x96xf32, #tpu.memory_space<vmem>>, vector<1x32x96xf32>
    %196 = vector.shape_cast %195 : vector<1x32x96xf32> to vector<32x96xf32>
    %cst_84 = arith.constant dense<0.000000e+00> : vector<16x96xf32>
    %197 = tpu.matmul %194, %196, %cst_84 {dimension_numbers = #tpu.dot_dimension_numbers<[1], [0], [0], [1], [0, 0, 1, 1], [], []>} : vector<16x32xf32>, vector<32x96xf32>, vector<16x96xf32> -> vector<16x96xf32>
    %c1_85 = arith.constant 1 : index
    %c0_86 = arith.constant 0 : index
    %c0_87 = arith.constant 0 : index
    %198 = vector.load %arg5[%c1_85, %c0_86, %c0_87] : memref<2x1x96xf32, #tpu.memory_space<vmem>>, vector<1x1x96xf32>
    %199 = vector.shape_cast %198 : vector<1x1x96xf32> to vector<1x96xf32>
    %200 = vector.broadcast %199 : vector<1x96xf32> to vector<16x96xf32>
    %201 = arith.addf %197, %200 : vector<16x96xf32>
    %202 = vector.shape_cast %201 : vector<16x96xf32> to vector<2x8x96xf32>
    %203 = vector.extract_strided_slice %202 {offsets = [0, 0, 0], sizes = [2, 8, 8], strides = [1, 1, 1]} : vector<2x8x96xf32> to vector<2x8x8xf32>
    %204 = vector.extract_strided_slice %202 {offsets = [0, 0, 32], sizes = [2, 8, 8], strides = [1, 1, 1]} : vector<2x8x96xf32> to vector<2x8x8xf32>
    %205 = vector.extract_strided_slice %202 {offsets = [0, 0, 64], sizes = [2, 8, 8], strides = [1, 1, 1]} : vector<2x8x96xf32> to vector<2x8x8xf32>
    "tpu.trace_start"() <{level = 10 : i32, message = "bqd,bkd->bqk"}> : () -> ()
    %cst_88 = arith.constant dense<0.000000e+00> : vector<2x8x8xf32>
    %206 = tpu.matmul %203, %204, %cst_88 {dimension_numbers = #tpu.dot_dimension_numbers<[2], [2], [1], [1], [0, 0, 0, 1, 1, 1], [0], [0]>} : vector<2x8x8xf32>, vector<2x8x8xf32>, vector<2x8x8xf32> -> vector<2x8x8xf32>
    "tpu.trace_stop"() : () -> ()
    %cst_89 = arith.constant 0.353553385 : f32
    %207 = vector.broadcast %cst_89 : f32 to vector<2x8x8xf32>
    %208 = arith.mulf %206, %207 : vector<2x8x8xf32>
    %209 = vector.broadcast %28 : vector<2x1x8xf32> to vector<2x8x8xf32>
    %210 = arith.addf %208, %209 : vector<2x8x8xf32>
    %cst_90 = arith.constant dense<0xFF800000> : vector<2x8xf32>
    %211 = vector.multi_reduction <maximumf>, %210, %cst_90 [2] : vector<2x8x8xf32> to vector<2x8xf32>
    %212 = vector.shape_cast %211 : vector<2x8xf32> to vector<2x8x1xf32>
    %213 = vector.broadcast %212 : vector<2x8x1xf32> to vector<2x8x8xf32>
    %214 = arith.subf %210, %213 : vector<2x8x8xf32>
    %215 = math.exp %214 : vector<2x8x8xf32>
    %cst_91 = arith.constant dense<0.000000e+00> : vector<2x8xf32>
    %216 = vector.multi_reduction <add>, %215, %cst_91 [2] : vector<2x8x8xf32> to vector<2x8xf32>
    %217 = vector.shape_cast %216 : vector<2x8xf32> to vector<2x8x1xf32>
    %218 = tpu.reciprocal %217 {approx = true} : vector<2x8x1xf32> -> vector<2x8x1xf32>
    %219 = vector.broadcast %218 : vector<2x8x1xf32> to vector<2x8x8xf32>
    %220 = arith.mulf %215, %219 : vector<2x8x8xf32>
    "tpu.trace_start"() <{level = 10 : i32, message = "bqk,bkd->bqd"}> : () -> ()
    %cst_92 = arith.constant dense<0.000000e+00> : vector<2x8x8xf32>
    %221 = tpu.matmul %220, %205, %cst_92 {dimension_numbers = #tpu.dot_dimension_numbers<[2], [1], [1], [2], [0, 0, 0, 1, 1, 2], [0], [0]>} : vector<2x8x8xf32>, vector<2x8x8xf32>, vector<2x8x8xf32> -> vector<2x8x8xf32>
    "tpu.trace_stop"() : () -> ()
    %222 = vector.extract_strided_slice %202 {offsets = [0, 0, 8], sizes = [2, 8, 8], strides = [1, 1, 1]} : vector<2x8x96xf32> to vector<2x8x8xf32>
    %223 = vector.extract_strided_slice %202 {offsets = [0, 0, 40], sizes = [2, 8, 8], strides = [1, 1, 1]} : vector<2x8x96xf32> to vector<2x8x8xf32>
    %224 = vector.extract_strided_slice %202 {offsets = [0, 0, 72], sizes = [2, 8, 8], strides = [1, 1, 1]} : vector<2x8x96xf32> to vector<2x8x8xf32>
    "tpu.trace_start"() <{level = 10 : i32, message = "bqd,bkd->bqk"}> : () -> ()
    %cst_93 = arith.constant dense<0.000000e+00> : vector<2x8x8xf32>
    %225 = tpu.matmul %222, %223, %cst_93 {dimension_numbers = #tpu.dot_dimension_numbers<[2], [2], [1], [1], [0, 0, 0, 1, 1, 1], [0], [0]>} : vector<2x8x8xf32>, vector<2x8x8xf32>, vector<2x8x8xf32> -> vector<2x8x8xf32>
    "tpu.trace_stop"() : () -> ()
    %cst_94 = arith.constant 0.353553385 : f32
    %226 = vector.broadcast %cst_94 : f32 to vector<2x8x8xf32>
    %227 = arith.mulf %225, %226 : vector<2x8x8xf32>
    %228 = vector.broadcast %28 : vector<2x1x8xf32> to vector<2x8x8xf32>
    %229 = arith.addf %227, %228 : vector<2x8x8xf32>
    %cst_95 = arith.constant dense<0xFF800000> : vector<2x8xf32>
    %230 = vector.multi_reduction <maximumf>, %229, %cst_95 [2] : vector<2x8x8xf32> to vector<2x8xf32>
    %231 = vector.shape_cast %230 : vector<2x8xf32> to vector<2x8x1xf32>
    %232 = vector.broadcast %231 : vector<2x8x1xf32> to vector<2x8x8xf32>
    %233 = arith.subf %229, %232 : vector<2x8x8xf32>
    %234 = math.exp %233 : vector<2x8x8xf32>
    %cst_96 = arith.constant dense<0.000000e+00> : vector<2x8xf32>
    %235 = vector.multi_reduction <add>, %234, %cst_96 [2] : vector<2x8x8xf32> to vector<2x8xf32>
    %236 = vector.shape_cast %235 : vector<2x8xf32> to vector<2x8x1xf32>
    %237 = tpu.reciprocal %236 {approx = true} : vector<2x8x1xf32> -> vector<2x8x1xf32>
    %238 = vector.broadcast %237 : vector<2x8x1xf32> to vector<2x8x8xf32>
    %239 = arith.mulf %234, %238 : vector<2x8x8xf32>
    "tpu.trace_start"() <{level = 10 : i32, message = "bqk,bkd->bqd"}> : () -> ()
    %cst_97 = arith.constant dense<0.000000e+00> : vector<2x8x8xf32>
    %240 = tpu.matmul %239, %224, %cst_97 {dimension_numbers = #tpu.dot_dimension_numbers<[2], [1], [1], [2], [0, 0, 0, 1, 1, 2], [0], [0]>} : vector<2x8x8xf32>, vector<2x8x8xf32>, vector<2x8x8xf32> -> vector<2x8x8xf32>
    "tpu.trace_stop"() : () -> ()
    %241 = vector.extract_strided_slice %202 {offsets = [0, 0, 16], sizes = [2, 8, 8], strides = [1, 1, 1]} : vector<2x8x96xf32> to vector<2x8x8xf32>
    %242 = vector.extract_strided_slice %202 {offsets = [0, 0, 48], sizes = [2, 8, 8], strides = [1, 1, 1]} : vector<2x8x96xf32> to vector<2x8x8xf32>
    %243 = vector.extract_strided_slice %202 {offsets = [0, 0, 80], sizes = [2, 8, 8], strides = [1, 1, 1]} : vector<2x8x96xf32> to vector<2x8x8xf32>
    "tpu.trace_start"() <{level = 10 : i32, message = "bqd,bkd->bqk"}> : () -> ()
    %cst_98 = arith.constant dense<0.000000e+00> : vector<2x8x8xf32>
    %244 = tpu.matmul %241, %242, %cst_98 {dimension_numbers = #tpu.dot_dimension_numbers<[2], [2], [1], [1], [0, 0, 0, 1, 1, 1], [0], [0]>} : vector<2x8x8xf32>, vector<2x8x8xf32>, vector<2x8x8xf32> -> vector<2x8x8xf32>
    "tpu.trace_stop"() : () -> ()
    %cst_99 = arith.constant 0.353553385 : f32
    %245 = vector.broadcast %cst_99 : f32 to vector<2x8x8xf32>
    %246 = arith.mulf %244, %245 : vector<2x8x8xf32>
    %247 = vector.broadcast %28 : vector<2x1x8xf32> to vector<2x8x8xf32>
    %248 = arith.addf %246, %247 : vector<2x8x8xf32>
    %cst_100 = arith.constant dense<0xFF800000> : vector<2x8xf32>
    %249 = vector.multi_reduction <maximumf>, %248, %cst_100 [2] : vector<2x8x8xf32> to vector<2x8xf32>
    %250 = vector.shape_cast %249 : vector<2x8xf32> to vector<2x8x1xf32>
    %251 = vector.broadcast %250 : vector<2x8x1xf32> to vector<2x8x8xf32>
    %252 = arith.subf %248, %251 : vector<2x8x8xf32>
    %253 = math.exp %252 : vector<2x8x8xf32>
    %cst_101 = arith.constant dense<0.000000e+00> : vector<2x8xf32>
    %254 = vector.multi_reduction <add>, %253, %cst_101 [2] : vector<2x8x8xf32> to vector<2x8xf32>
    %255 = vector.shape_cast %254 : vector<2x8xf32> to vector<2x8x1xf32>
    %256 = tpu.reciprocal %255 {approx = true} : vector<2x8x1xf32> -> vector<2x8x1xf32>
    %257 = vector.broadcast %256 : vector<2x8x1xf32> to vector<2x8x8xf32>
    %258 = arith.mulf %253, %257 : vector<2x8x8xf32>
    "tpu.trace_start"() <{level = 10 : i32, message = "bqk,bkd->bqd"}> : () -> ()
    %cst_102 = arith.constant dense<0.000000e+00> : vector<2x8x8xf32>
    %259 = tpu.matmul %258, %243, %cst_102 {dimension_numbers = #tpu.dot_dimension_numbers<[2], [1], [1], [2], [0, 0, 0, 1, 1, 2], [0], [0]>} : vector<2x8x8xf32>, vector<2x8x8xf32>, vector<2x8x8xf32> -> vector<2x8x8xf32>
    "tpu.trace_stop"() : () -> ()
    %260 = vector.extract_strided_slice %202 {offsets = [0, 0, 24], sizes = [2, 8, 8], strides = [1, 1, 1]} : vector<2x8x96xf32> to vector<2x8x8xf32>
    %261 = vector.extract_strided_slice %202 {offsets = [0, 0, 56], sizes = [2, 8, 8], strides = [1, 1, 1]} : vector<2x8x96xf32> to vector<2x8x8xf32>
    %262 = vector.extract_strided_slice %202 {offsets = [0, 0, 88], sizes = [2, 8, 8], strides = [1, 1, 1]} : vector<2x8x96xf32> to vector<2x8x8xf32>
    "tpu.trace_start"() <{level = 10 : i32, message = "bqd,bkd->bqk"}> : () -> ()
    %cst_103 = arith.constant dense<0.000000e+00> : vector<2x8x8xf32>
    %263 = tpu.matmul %260, %261, %cst_103 {dimension_numbers = #tpu.dot_dimension_numbers<[2], [2], [1], [1], [0, 0, 0, 1, 1, 1], [0], [0]>} : vector<2x8x8xf32>, vector<2x8x8xf32>, vector<2x8x8xf32> -> vector<2x8x8xf32>
    "tpu.trace_stop"() : () -> ()
    %cst_104 = arith.constant 0.353553385 : f32
    %264 = vector.broadcast %cst_104 : f32 to vector<2x8x8xf32>
    %265 = arith.mulf %263, %264 : vector<2x8x8xf32>
    %266 = vector.broadcast %28 : vector<2x1x8xf32> to vector<2x8x8xf32>
    %267 = arith.addf %265, %266 : vector<2x8x8xf32>
    %cst_105 = arith.constant dense<0xFF800000> : vector<2x8xf32>
    %268 = vector.multi_reduction <maximumf>, %267, %cst_105 [2] : vector<2x8x8xf32> to vector<2x8xf32>
    %269 = vector.shape_cast %268 : vector<2x8xf32> to vector<2x8x1xf32>
    %270 = vector.broadcast %269 : vector<2x8x1xf32> to vector<2x8x8xf32>
    %271 = arith.subf %267, %270 : vector<2x8x8xf32>
    %272 = math.exp %271 : vector<2x8x8xf32>
    %cst_106 = arith.constant dense<0.000000e+00> : vector<2x8xf32>
    %273 = vector.multi_reduction <add>, %272, %cst_106 [2] : vector<2x8x8xf32> to vector<2x8xf32>
    %274 = vector.shape_cast %273 : vector<2x8xf32> to vector<2x8x1xf32>
    %275 = tpu.reciprocal %274 {approx = true} : vector<2x8x1xf32> -> vector<2x8x1xf32>
    %276 = vector.broadcast %275 : vector<2x8x1xf32> to vector<2x8x8xf32>
    %277 = arith.mulf %272, %276 : vector<2x8x8xf32>
    "tpu.trace_start"() <{level = 10 : i32, message = "bqk,bkd->bqd"}> : () -> ()
    %cst_107 = arith.constant dense<0.000000e+00> : vector<2x8x8xf32>
    %278 = tpu.matmul %277, %262, %cst_107 {dimension_numbers = #tpu.dot_dimension_numbers<[2], [1], [1], [2], [0, 0, 0, 1, 1, 2], [0], [0]>} : vector<2x8x8xf32>, vector<2x8x8xf32>, vector<2x8x8xf32> -> vector<2x8x8xf32>
    "tpu.trace_stop"() : () -> ()
    %279 = tpu.concatenate %221, %240, %259, %278 in 2 : vector<2x8x8xf32>, vector<2x8x8xf32>, vector<2x8x8xf32>, vector<2x8x8xf32> -> vector<2x8x32xf32>
    %280 = vector.shape_cast %279 : vector<2x8x32xf32> to vector<16x32xf32>
    %c1_108 = arith.constant 1 : index
    %c0_109 = arith.constant 0 : index
    %c0_110 = arith.constant 0 : index
    %281 = vector.load %arg6[%c1_108, %c0_109, %c0_110] : memref<2x32x32xf32, #tpu.memory_space<vmem>>, vector<1x32x32xf32>
    %282 = vector.shape_cast %281 : vector<1x32x32xf32> to vector<32x32xf32>
    %cst_111 = arith.constant dense<0.000000e+00> : vector<16x32xf32>
    %283 = tpu.matmul %280, %282, %cst_111 {dimension_numbers = #tpu.dot_dimension_numbers<[1], [0], [0], [1], [0, 0, 1, 1], [], []>} : vector<16x32xf32>, vector<32x32xf32>, vector<16x32xf32> -> vector<16x32xf32>
    %c1_112 = arith.constant 1 : index
    %c0_113 = arith.constant 0 : index
    %c0_114 = arith.constant 0 : index
    %284 = vector.load %arg7[%c1_112, %c0_113, %c0_114] : memref<2x1x32xf32, #tpu.memory_space<vmem>>, vector<1x1x32xf32>
    %285 = vector.shape_cast %284 : vector<1x1x32xf32> to vector<1x32xf32>
    %286 = vector.broadcast %285 : vector<1x32xf32> to vector<16x32xf32>
    %287 = arith.addf %283, %286 : vector<16x32xf32>
    %288 = arith.addf %287, %194 : vector<16x32xf32>
    %cst_115 = arith.constant dense<0.000000e+00> : vector<16xf32>
    %289 = vector.multi_reduction <add>, %288, %cst_115 [1] : vector<16x32xf32> to vector<16xf32>
    %290 = vector.shape_cast %289 : vector<16xf32> to vector<16x1xf32>
    %cst_116 = arith.constant 3.200000e+01 : f32
    %291 = vector.broadcast %cst_116 : f32 to vector<16x1xf32>
    %292 = arith.divf %290, %291 : vector<16x1xf32>
    %293 = vector.broadcast %292 : vector<16x1xf32> to vector<16x32xf32>
    %294 = arith.subf %288, %293 : vector<16x32xf32>
    %295 = arith.mulf %294, %294 : vector<16x32xf32>
    %cst_117 = arith.constant dense<0.000000e+00> : vector<16xf32>
    %296 = vector.multi_reduction <add>, %295, %cst_117 [1] : vector<16x32xf32> to vector<16xf32>
    %297 = vector.shape_cast %296 : vector<16xf32> to vector<16x1xf32>
    %cst_118 = arith.constant 3.200000e+01 : f32
    %298 = vector.broadcast %cst_118 : f32 to vector<16x1xf32>
    %299 = arith.divf %297, %298 : vector<16x1xf32>
    %cst_119 = arith.constant 9.99999996E-13 : f32
    %300 = vector.broadcast %cst_119 : f32 to vector<16x1xf32>
    %301 = arith.addf %299, %300 : vector<16x1xf32>
    %302 = math.rsqrt %301 : vector<16x1xf32>
    %303 = vector.broadcast %302 : vector<16x1xf32> to vector<16x32xf32>
    %304 = arith.mulf %294, %303 : vector<16x32xf32>
    %c3 = arith.constant 3 : index
    %c0_120 = arith.constant 0 : index
    %305 = vector.load %arg2[%c3, %c0_120] : memref<6x32xf32, #tpu.memory_space<vmem>>, vector<1x32xf32>
    %306 = vector.broadcast %305 : vector<1x32xf32> to vector<16x32xf32>
    %307 = arith.mulf %304, %306 : vector<16x32xf32>
    %c3_121 = arith.constant 3 : index
    %c0_122 = arith.constant 0 : index
    %308 = vector.load %arg3[%c3_121, %c0_122] : memref<6x32xf32, #tpu.memory_space<vmem>>, vector<1x32xf32>
    %309 = vector.broadcast %308 : vector<1x32xf32> to vector<16x32xf32>
    %310 = arith.addf %307, %309 : vector<16x32xf32>
    %c1_123 = arith.constant 1 : index
    %c0_124 = arith.constant 0 : index
    %c0_125 = arith.constant 0 : index
    %311 = vector.load %arg8[%c1_123, %c0_124, %c0_125] : memref<2x32x64xf32, #tpu.memory_space<vmem>>, vector<1x32x64xf32>
    %312 = vector.shape_cast %311 : vector<1x32x64xf32> to vector<32x64xf32>
    %cst_126 = arith.constant dense<0.000000e+00> : vector<16x64xf32>
    %313 = tpu.matmul %310, %312, %cst_126 {dimension_numbers = #tpu.dot_dimension_numbers<[1], [0], [0], [1], [0, 0, 1, 1], [], []>} : vector<16x32xf32>, vector<32x64xf32>, vector<16x64xf32> -> vector<16x64xf32>
    %c1_127 = arith.constant 1 : index
    %c0_128 = arith.constant 0 : index
    %c0_129 = arith.constant 0 : index
    %314 = vector.load %arg9[%c1_127, %c0_128, %c0_129] : memref<2x1x64xf32, #tpu.memory_space<vmem>>, vector<1x1x64xf32>
    %315 = vector.shape_cast %314 : vector<1x1x64xf32> to vector<1x64xf32>
    %316 = vector.broadcast %315 : vector<1x64xf32> to vector<16x64xf32>
    %317 = arith.addf %313, %316 : vector<16x64xf32>
    %cst_130 = arith.constant 5.000000e-01 : f32
    %318 = vector.broadcast %cst_130 : f32 to vector<16x64xf32>
    %319 = arith.mulf %318, %317 : vector<16x64xf32>
    %cst_131 = arith.constant 4.471500e-02 : f32
    %320 = vector.broadcast %cst_131 : f32 to vector<16x64xf32>
    %321 = arith.mulf %320, %317 : vector<16x64xf32>
    %322 = arith.mulf %321, %317 : vector<16x64xf32>
    %323 = arith.mulf %322, %317 : vector<16x64xf32>
    %324 = arith.addf %317, %323 : vector<16x64xf32>
    %cst_132 = arith.constant 0.797884583 : f32
    %325 = vector.broadcast %cst_132 : f32 to vector<16x64xf32>
    %326 = arith.mulf %325, %324 : vector<16x64xf32>
    %327 = math.tanh %326 : vector<16x64xf32>
    %cst_133 = arith.constant 1.000000e+00 : f32
    %328 = vector.broadcast %cst_133 : f32 to vector<16x64xf32>
    %329 = arith.addf %328, %327 : vector<16x64xf32>
    %330 = arith.mulf %319, %329 : vector<16x64xf32>
    %c1_134 = arith.constant 1 : index
    %c0_135 = arith.constant 0 : index
    %c0_136 = arith.constant 0 : index
    %331 = vector.load %arg10[%c1_134, %c0_135, %c0_136] : memref<2x64x32xf32, #tpu.memory_space<vmem>>, vector<1x64x32xf32>
    %332 = vector.shape_cast %331 : vector<1x64x32xf32> to vector<64x32xf32>
    %cst_137 = arith.constant dense<0.000000e+00> : vector<16x32xf32>
    %333 = tpu.matmul %330, %332, %cst_137 {dimension_numbers = #tpu.dot_dimension_numbers<[1], [0], [0], [1], [0, 0, 1, 1], [], []>} : vector<16x64xf32>, vector<64x32xf32>, vector<16x32xf32> -> vector<16x32xf32>
    %c1_138 = arith.constant 1 : index
    %c0_139 = arith.constant 0 : index
    %c0_140 = arith.constant 0 : index
    %334 = vector.load %arg11[%c1_138, %c0_139, %c0_140] : memref<2x1x32xf32, #tpu.memory_space<vmem>>, vector<1x1x32xf32>
    %335 = vector.shape_cast %334 : vector<1x1x32xf32> to vector<1x32xf32>
    %336 = vector.broadcast %335 : vector<1x32xf32> to vector<16x32xf32>
    %337 = arith.addf %333, %336 : vector<16x32xf32>
    %338 = arith.addf %337, %310 : vector<16x32xf32>
    %cst_141 = arith.constant dense<0.000000e+00> : vector<16xf32>
    %339 = vector.multi_reduction <add>, %338, %cst_141 [1] : vector<16x32xf32> to vector<16xf32>
    %340 = vector.shape_cast %339 : vector<16xf32> to vector<16x1xf32>
    %cst_142 = arith.constant 3.200000e+01 : f32
    %341 = vector.broadcast %cst_142 : f32 to vector<16x1xf32>
    %342 = arith.divf %340, %341 : vector<16x1xf32>
    %343 = vector.broadcast %342 : vector<16x1xf32> to vector<16x32xf32>
    %344 = arith.subf %338, %343 : vector<16x32xf32>
    %345 = arith.mulf %344, %344 : vector<16x32xf32>
    %cst_143 = arith.constant dense<0.000000e+00> : vector<16xf32>
    %346 = vector.multi_reduction <add>, %345, %cst_143 [1] : vector<16x32xf32> to vector<16xf32>
    %347 = vector.shape_cast %346 : vector<16xf32> to vector<16x1xf32>
    %cst_144 = arith.constant 3.200000e+01 : f32
    %348 = vector.broadcast %cst_144 : f32 to vector<16x1xf32>
    %349 = arith.divf %347, %348 : vector<16x1xf32>
    %cst_145 = arith.constant 9.99999996E-13 : f32
    %350 = vector.broadcast %cst_145 : f32 to vector<16x1xf32>
    %351 = arith.addf %349, %350 : vector<16x1xf32>
    %352 = math.rsqrt %351 : vector<16x1xf32>
    %353 = vector.broadcast %352 : vector<16x1xf32> to vector<16x32xf32>
    %354 = arith.mulf %344, %353 : vector<16x32xf32>
    %c4 = arith.constant 4 : index
    %c0_146 = arith.constant 0 : index
    %355 = vector.load %arg2[%c4, %c0_146] : memref<6x32xf32, #tpu.memory_space<vmem>>, vector<1x32xf32>
    %356 = vector.broadcast %355 : vector<1x32xf32> to vector<16x32xf32>
    %357 = arith.mulf %354, %356 : vector<16x32xf32>
    %c4_147 = arith.constant 4 : index
    %c0_148 = arith.constant 0 : index
    %358 = vector.load %arg3[%c4_147, %c0_148] : memref<6x32xf32, #tpu.memory_space<vmem>>, vector<1x32xf32>
    %359 = vector.broadcast %358 : vector<1x32xf32> to vector<16x32xf32>
    %360 = arith.addf %357, %359 : vector<16x32xf32>
    %c0_149 = arith.constant 0 : index
    %c0_150 = arith.constant 0 : index
    %361 = vector.load %arg12[%c0_149, %c0_150] : memref<32x32xf32, #tpu.memory_space<vmem>>, vector<32x32xf32>
    %cst_151 = arith.constant dense<0.000000e+00> : vector<16x32xf32>
    %362 = tpu.matmul %360, %361, %cst_151 {dimension_numbers = #tpu.dot_dimension_numbers<[1], [0], [0], [1], [0, 0, 1, 1], [], []>} : vector<16x32xf32>, vector<32x32xf32>, vector<16x32xf32> -> vector<16x32xf32>
    %c0_152 = arith.constant 0 : index
    %c0_153 = arith.constant 0 : index
    %363 = vector.load %arg13[%c0_152, %c0_153] : memref<1x32xf32, #tpu.memory_space<vmem>>, vector<1x32xf32>
    %364 = vector.broadcast %363 : vector<1x32xf32> to vector<16x32xf32>
    %365 = arith.addf %362, %364 : vector<16x32xf32>
    %cst_154 = arith.constant 5.000000e-01 : f32
    %366 = vector.broadcast %cst_154 : f32 to vector<16x32xf32>
    %367 = arith.mulf %366, %365 : vector<16x32xf32>
    %cst_155 = arith.constant 4.471500e-02 : f32
    %368 = vector.broadcast %cst_155 : f32 to vector<16x32xf32>
    %369 = arith.mulf %368, %365 : vector<16x32xf32>
    %370 = arith.mulf %369, %365 : vector<16x32xf32>
    %371 = arith.mulf %370, %365 : vector<16x32xf32>
    %372 = arith.addf %365, %371 : vector<16x32xf32>
    %cst_156 = arith.constant 0.797884583 : f32
    %373 = vector.broadcast %cst_156 : f32 to vector<16x32xf32>
    %374 = arith.mulf %373, %372 : vector<16x32xf32>
    %375 = math.tanh %374 : vector<16x32xf32>
    %cst_157 = arith.constant 1.000000e+00 : f32
    %376 = vector.broadcast %cst_157 : f32 to vector<16x32xf32>
    %377 = arith.addf %376, %375 : vector<16x32xf32>
    %378 = arith.mulf %367, %377 : vector<16x32xf32>
    %cst_158 = arith.constant dense<0.000000e+00> : vector<16xf32>
    %379 = vector.multi_reduction <add>, %378, %cst_158 [1] : vector<16x32xf32> to vector<16xf32>
    %380 = vector.shape_cast %379 : vector<16xf32> to vector<16x1xf32>
    %cst_159 = arith.constant 3.200000e+01 : f32
    %381 = vector.broadcast %cst_159 : f32 to vector<16x1xf32>
    %382 = arith.divf %380, %381 : vector<16x1xf32>
    %383 = vector.broadcast %382 : vector<16x1xf32> to vector<16x32xf32>
    %384 = arith.subf %378, %383 : vector<16x32xf32>
    %385 = arith.mulf %384, %384 : vector<16x32xf32>
    %cst_160 = arith.constant dense<0.000000e+00> : vector<16xf32>
    %386 = vector.multi_reduction <add>, %385, %cst_160 [1] : vector<16x32xf32> to vector<16xf32>
    %387 = vector.shape_cast %386 : vector<16xf32> to vector<16x1xf32>
    %cst_161 = arith.constant 3.200000e+01 : f32
    %388 = vector.broadcast %cst_161 : f32 to vector<16x1xf32>
    %389 = arith.divf %387, %388 : vector<16x1xf32>
    %cst_162 = arith.constant 9.99999996E-13 : f32
    %390 = vector.broadcast %cst_162 : f32 to vector<16x1xf32>
    %391 = arith.addf %389, %390 : vector<16x1xf32>
    %392 = math.rsqrt %391 : vector<16x1xf32>
    %393 = vector.broadcast %392 : vector<16x1xf32> to vector<16x32xf32>
    %394 = arith.mulf %384, %393 : vector<16x32xf32>
    %c5 = arith.constant 5 : index
    %c0_163 = arith.constant 0 : index
    %395 = vector.load %arg2[%c5, %c0_163] : memref<6x32xf32, #tpu.memory_space<vmem>>, vector<1x32xf32>
    %396 = vector.broadcast %395 : vector<1x32xf32> to vector<16x32xf32>
    %397 = arith.mulf %394, %396 : vector<16x32xf32>
    %c5_164 = arith.constant 5 : index
    %c0_165 = arith.constant 0 : index
    %398 = vector.load %arg3[%c5_164, %c0_165] : memref<6x32xf32, #tpu.memory_space<vmem>>, vector<1x32xf32>
    %399 = vector.broadcast %398 : vector<1x32xf32> to vector<16x32xf32>
    %400 = arith.addf %397, %399 : vector<16x32xf32>
    %401 = arith.truncf %400 : vector<16x32xf32> to vector<16x32xbf16>
    %c0_166 = arith.constant 0 : index
    %c0_167 = arith.constant 0 : index
    %402 = vector.load %arg14[%c0_166, %c0_167] : memref<16x32xbf16, #tpu.memory_space<vmem>>, vector<16x32xbf16>
    tpu.vector_store %arg14[%c0_166, %c0_167], %401 {strides = array<i32>} : memref<16x32xbf16, #tpu.memory_space<vmem>>, vector<16x32xbf16>,
    return
  }
}

</mosaic_0001>

<bundles_post_ra>
// kernel: mybert_v2_forward.2
= control target key start
LH: loop header
LB: loop body
LE: loop exit
PB: predicated region body
PF: predicated region fallthrough
CT: control target
= control target key end

     0   :  { %vm49_vm0 = vcmask 261120   ;;  %v2188_v4 = vmov 32.0   ;;  %s2189_s30 = smov 96   ;;  %s2190_s15 = smov 120   ;;  %vm154_vm8 = vcmask 64512   ;;  %vm716_vm9 = vcmask 130048   ;;  %s2826_s0 = inlined_call_operand.vmem [shape: f32[16,32], index: 0, kind: input, shape index: {}]   ;;  %s2827_s2 = inlined_call_operand.vmem [shape: f32[6,32], index: 2, kind: input, shape index: {}]   ;;  %s2828_s3 = inlined_call_operand.vmem [shape: f32[6,32], index: 3, kind: input, shape index: {}]   ;;  %s2829_s5 = inlined_call_operand.vmem [shape: f32[2,1,96], index: 5, kind: input, shape index: {}]   ;;  %s2830_s4 = inlined_call_operand.vmem [shape: f32[2,32,96], index: 4, kind: input, shape index: {}]   ;;  %s2831_s1 = inlined_call_operand.vmem [shape: f32[2,8], index: 1, kind: input, shape index: {}]   ;;  %s2832_s7 = inlined_call_operand.vmem [shape: f32[2,1,32], index: 7, kind: input, shape index: {}]   ;;  %s2833_s6 = inlined_call_operand.vmem [shape: f32[2,32,32], index: 6, kind: input, shape index: {}]   ;;  %s2834_s9 = inlined_call_operand.vmem [shape: f32[2,1,64], index: 9, kind: input, shape index: {}]   ;;  %s2835_s8 = inlined_call_operand.vmem [shape: f32[2,32,64], index: 8, kind: input, shape index: {}]   ;;  %s2836_s11 = inlined_call_operand.vmem [shape: f32[2,1,32], index: 11, kind: input, shape index: {}]   ;;  %s2837_s10 = inlined_call_operand.vmem [shape: f32[2,64,32], index: 10, kind: input, shape index: {}]   ;;  %s2838_s13 = inlined_call_operand.vmem [shape: f32[1,32], index: 13, kind: input, shape index: {}]   ;;  %s2839_s12 = inlined_call_operand.vmem [shape: f32[32,32], index: 12, kind: input, shape index: {}]   ;;  %s2840_s14 = inlined_call_operand.vmem [shape: bf16[16,32], index: 14, kind: output, shape index: {}]  }
   0x1   :  { %v47_v0 = vld [vmem:[%s2826_s0] sm:$0xff]  ;;  %v48_v2 = vld [vmem:[%s2826_s0 + $0x8] sm:$0xff]  ;;  %2086 = vrcp.f32 %v2188_v4  ;;  %v117_v21 = vld [vmem:[%s2830_s4 + $0x18] sm:$0xff]  ;;  %s2191_s16 = smov 88   ;;  %s2192_s0 = smov 104   ;;  %vm719_vm10 = vcmask 195584  }
   0x2   :  { %v50_v1 = vsel %vm49_vm0, %v47_v0, 0.0  ;;  %v53_v3 = vsel %vm49_vm0, %v48_v2, 0.0  ;;  %140 = vmatpush.msra.mxu0 %v117_v21  ;;  %v116_v22 = vld [vmem:[%s2830_s4 + $0x10] sm:$0xff]  ;;  %v115_v23 = vld [vmem:[%s2830_s4 + $0x8] sm:$0xff]  ;;  %v114_v24 = vld [vmem:[%s2830_s4] sm:$0xff]  ;;  %s2193_s17 = smov 112  }
   0x3   :  { %51 = vadd.xlane.f32.xlu0 %v50_v1  ;;  %v2065_v39 = vld [vmem:[%s2827_s2] ss:$0 sm:$0xff]  ;;  %s2194_s18 = smov 72   ;;  %s2195_s19 = smov 80  }
   0x4   :  { %141 = vmatpush.msra.mxu0 %v116_v22  ;;  %v2066_v43 = vld [vmem:[%s2828_s3] ss:$0 sm:$0xff]  ;;  %s2197_s22 = smov 64   ;;  %s2845_s23 = smov 48  }
   0x5   :  { %v2067_v53 = vld [vmem:[%s2829_s5] ss:$0 sm:$0xff]  ;;  %s2844_s24 = smov 40   ;;  %s2841_s25 = smov 8  }
   0x6   :  { %142 = vmatpush.msra.mxu0 %v115_v23  ;;  %s2848_s26 = smov 16   ;;  %s2846_s27 = smov 24  }
   0x7   :  { %v2087_v5 = vpop.eup %2086 }
   0x8   :  { %v57_v6 = vmul.f32 32.0, %v2087_v5  ;;  %vm61_vm1 = vweird.f32 %v2087_v5  ;;  %143 = vmatpush.msra.mxu0 %v114_v24 }
   0xa   :  { %v58_v7 = vsub.f32 1.0, %v57_v6 }
   0xb   :  { %54 = vadd.xlane.f32.xlu0 %v53_v3 }
   0xc   :  { %v59_v8 = vmul.f32 %v2087_v5, %v58_v7 }
   0xe   :  { %v60_v9 = vadd.f32 %v2087_v5, %v59_v8  ;;  %v109_v8 = vld [vmem:[%s2831_s1] sm:$0x3]  ;;  %s2843_s1 = smov 56  }
  0x10   :  { %v2286_v10 = vsel %vm61_vm1, %v2087_v5, %v60_v9  ;;  %v110_v9 = vsub.f32 1.0, %v109_v8 }
  0x76   :  { %v52_v11 = vpop.xlane.xlu0 %51 }
  0x77   :  { %v63_v12 = vmul.f32 %v2286_v10, %v52_v11  ;;  %v111_v11 = vmul.f32 -10000.0, %v110_v9 }
  0x79   :  { %v65_v13 = vsub.f32 %v47_v0, %v63_v12  ;;  %v2376_v12 = vperm.slane %v111_v11, 0 }
  0x7b   :  { %v67_v14 = vmul.f32 %v65_v13, %v65_v13 }
  0x7d   :  { %v69_v15 = vsel %vm49_vm0, %v67_v14, 0.0 }
  0x7e   :  { %70 = vadd.xlane.f32.xlu1 %v69_v15  ;;  %v55_v16 = vpop.xlane.xlu0 %54 }
  0x7f   :  { %v64_v17 = vmul.f32 %v2286_v10, %v55_v16 }
  0x81   :  { %v66_v18 = vsub.f32 %v48_v2, %v64_v17  ;;  %v113_v17 = vrot.slane %v111_v11, 1 }
  0x83   :  { %v68_v19 = vmul.f32 %v66_v18, %v66_v18 }
  0x85   :  { %v72_v20 = vsel %vm49_vm0, %v68_v19, 0.0 }
  0x86   :  { %73 = vadd.xlane.f32.xlu1 %v72_v20 }
  0xf1   :  { %v71_v25 = vpop.xlane.xlu1 %70 }
  0xf2   :  { %v75_v26 = vmul.f32 %v71_v25, %v2286_v10 }
  0xf4   :  { %v77_v27 = vadd.f32 1e-12, %v75_v26 }
  0xf6   :  { %2088 = vrsqrt.f32 %v77_v27  ;;  %vm85_vm3 = vweird.f32 %v77_v27 }
  0xf9   :  { %v74_v28 = vpop.xlane.xlu1 %73 }
  0xfa   :  { %v76_v29 = vmul.f32 %v74_v28, %v2286_v10 }
  0xfc   :  { %v2089_v30 = vpop.eup %2088  ;;  %v78_v31 = vadd.f32 1e-12, %v76_v29 }
  0xfd   :  { %v80_v32 = vmul.f32 %v2089_v30, %v77_v27  ;;  %vm86_vm2 = vweird.f32 %v2089_v30 }
  0xfe   :  { %2090 = vrsqrt.f32 %v78_v31  ;;  %vm87_vm4 = vmor %vm85_vm3, %vm86_vm2  ;;  %vm95_vm6 = vweird.f32 %v78_v31  ;;  %vm880_vm2 = vcmask 523264  }
  0xff   :  { %v81_v33 = vmul.f32 %v2089_v30, %v80_v32 }
 0x101   :  { %v82_v34 = vmul.f32 0.5, %v81_v33 }
 0x103   :  { %v83_v35 = vsub.f32 1.5, %v82_v34 }
 0x104   :  { %v2091_v36 = vpop.eup %2090 }
 0x105   :  { %v84_v37 = vmul.f32 %v2089_v30, %v83_v35  ;;  %v90_v38 = vmul.f32 %v2091_v36, %v78_v31  ;;  %vm96_vm5 = vweird.f32 %v2091_v36 }
 0x106   :  { %vm97_vm7 = vmor %vm95_vm6, %vm96_vm5 }
 0x107   :  { %v88_v40 = vsel %vm87_vm4, %v2089_v30, %v84_v37  ;;  %v91_v41 = vmul.f32 %v2091_v36, %v90_v38 }
 0x108   :  { %v99_v42 = vmul.f32 %v88_v40, %v65_v13 }
 0x109   :  { %v92_v44 = vmul.f32 0.5, %v91_v41 }
 0x10a   :  { %v103_v45 = vmul.f32 %v2065_v39, %v99_v42 }
 0x10b   :  { %v93_v46 = vsub.f32 1.5, %v92_v44 }
 0x10c   :  { %v2312_v47 = vadd.f32 %v2066_v43, %v103_v45 }
 0x10d   :  { %v94_v48 = vmul.f32 %v2091_v36, %v93_v46 }
 0x10e   :  { %1930 = vmatmul.msk.f32.vlgmr.msra.gmra.mxu0 %vm49_vm0, %v2312_v47 }
 0x10f   :  { %v98_v49 = vsel %vm97_vm7, %v2091_v36, %v94_v48 }
 0x110   :  { %v100_v50 = vmul.f32 %v98_v49, %v66_v18  ;;  %v2380_v18 = vperm.slane %v113_v17, 0 }
 0x112   :  { %v104_v51 = vmul.f32 %v2065_v39, %v100_v50 }
 0x114   :  { %v2316_v52 = vadd.f32 %v2066_v43, %v104_v51 }
 0x116   :  { %1931 = vmatmul.msk.f32.gmra.mxu0 %vm49_vm0, %v2316_v52 }
 0x18b   :  { %v145_v54 = vpop.f32.mrf.mxu0 }
 0x18c   :  { %v2323_v55 = vadd.f32 %v2067_v53, %v145_v54 }
 0x18e   :  { %152 = vrot.lane.b32.xlu2 %v2323_v55, %s2189_s30 }
 0x193   :  { %v148_v56 = vpop.f32.mrf.mxu0 }
 0x194   :  { %v2327_v57 = vadd.f32 %v2067_v53, %v148_v56 }
 0x196   :  { %316 = vrot.lane.b32.xlu1 %v2327_v57, %s2190_s15  ;;  %318 = vrot.lane.b32.xlu0 %v2327_v57, %s2191_s16  ;;  %v2040_v34 = vpack.i.bf16 %v2327_v57, %v2323_v55 }
 0x197   :  { %180 = vrot.lane.b32.xlu2 %v2327_v57, %s2189_s30 }
 0x19e   :  { %556 = vrot.lane.b32.xlu1 %v2323_v55, %s2192_s0  ;;  %422 = vrot.lane.b32.xlu0 %v2323_v55, %s2193_s17 }
 0x19f   :  { %290 = vrot.lane.b32.xlu2 %v2323_v55, %s2191_s16 }
 0x1a6   :  { %586 = vrot.lane.b32.xlu1 %v2327_v57, %s2194_s18  ;;  %452 = vrot.lane.b32.xlu0 %v2327_v57, %s2195_s19 }
 0x1a7   :  { %424 = vrot.lane.b32.xlu2 %v2323_v55, %s2195_s19 }
 0x1ae   :  { %584 = vrot.lane.b32.xlu0 %v2327_v57, %s2192_s0 }
 0x1af   :  { %288 = vrot.lane.b32.xlu2 %v2323_v55, %s2190_s15 }
 0x1b7   :  { %558 = vrot.lane.b32.xlu2 %v2323_v55, %s2194_s18 }
 0x1bf   :  { %450 = vrot.lane.b32.xlu2 %v2327_v57, %s2193_s17 }
 0x1e8   :  { %v153_v58 = vpop.permute.xlu2 %152 }
 0x1e9   :  { %1932 = vmatpush.xpose.msk.msrb.mxu0 %vm154_vm8, %v153_v58 }
 0x1ec   :  { %1933 = vmatmul.msk.f32.vlgmr.msrb.gmra.mxu0 %vm154_vm8, %v2323_v55 }
 0x1f1   :  { %v181_v59 = vpop.permute.xlu2 %180 }
 0x1f2   :  { %1934 = vmatpush.xpose.msk.msra.mxu2 %vm154_vm8, %v181_v59 }
 0x1f5   :  { %1935 = vmatmul.msk.f32.vlgmr.msra.gmra.mxu2 %vm154_vm8, %v2327_v57 }
 0x1f9   :  { %v291_v60 = vpop.permute.xlu2 %290 }
 0x1fa   :  { %1938 = vmatpush.xpose.msk.msra.mxu1 %vm154_vm8, %v291_v60 }
 0x201   :  { %v425_v61 = vpop.permute.xlu2 %424 }
 0x208   :  { %v317_v62 = vpop.permute.xlu1 %316  ;;  %v319_v63 = vpop.permute.xlu0 %318 }
 0x209   :  { %v289_v0 = vpop.permute.xlu2 %288  ;;  %1940 = vmatpush.xpose.msk.msrb.mxu2 %vm154_vm8, %v319_v63 }
 0x20a   :  { %1939 = vmatmul.msk.f32.vlgmr.msra.gmra.mxu1 %vm154_vm8, %v289_v0 }
 0x20c   :  { %1941 = vmatmul.msk.f32.vlgmr.msrb.gmra.mxu2 %vm154_vm8, %v317_v62 }
 0x20d   :  { %1944 = vmatpush.xpose.msk.msra.mxu2 %vm154_vm8, %v425_v61 }
 0x210   :  { %v557_v1 = vpop.permute.xlu1 %556  ;;  %v423_v2 = vpop.permute.xlu0 %422 }
 0x211   :  { %v559_v3 = vpop.permute.xlu2 %558 }
 0x212   :  { %1950 = vmatpush.xpose.msk.msrb.mxu2 %vm154_vm8, %v559_v3 }
 0x214   :  { %1945 = vmatmul.msk.f32.vlgmr.msra.gmra.mxu2 %vm154_vm8, %v423_v2 }
 0x218   :  { %v587_v4 = vpop.permute.xlu1 %586  ;;  %v453_v5 = vpop.permute.xlu0 %452 }
 0x219   :  { %1946 = vmatpush.xpose.msk.msra.mxu0 %vm154_vm8, %v453_v5  ;;  %v451_v6 = vpop.permute.xlu2 %450 }
 0x21c   :  { %1947 = vmatmul.msk.f32.vlgmr.msra.gmra.mxu0 %vm154_vm8, %v451_v6  ;;  %1951 = vmatmul.msk.f32.vlgmr.msrb.gmra.mxu2 %vm154_vm8, %v557_v1 }
 0x21d   :  { %1952 = vmatpush.xpose.msk.msrb.mxu0 %vm154_vm8, %v587_v4 }
 0x220   :  { %v585_v7 = vpop.permute.xlu0 %584 }
 0x224   :  { %1953 = vmatmul.msk.f32.vlgmr.msrb.gmra.mxu0 %vm154_vm8, %v585_v7 }
 0x269   :  { %v176_v13 = vpop.f32.mrf.mxu0 }
 0x26a   :  { %v206_v14 = vmul.f32 0.35355338, %v176_v13 }
 0x26c   :  { %v212_v15 = vadd.f32 %v2376_v12, %v206_v14 }
 0x26e   :  { %v214_v16 = vsel %vm154_vm8, %v212_v15, -inf }
 0x26f   :  { %215 = vmax.xlane.f32.xlu2 %v214_v16 }
 0x278   :  { %v203_v19 = vpop.f32.mrf.mxu2 }
 0x279   :  { %v207_v20 = vmul.f32 0.35355338, %v203_v19 }
 0x27b   :  { %v213_v21 = vadd.f32 %v2380_v18, %v207_v20 }
 0x27d   :  { %v217_v22 = vsel %vm154_vm8, %v213_v21, -inf }
 0x27e   :  { %218 = vmax.xlane.f32.xlu1 %v217_v22 }
 0x287   :  { %v313_v23 = vpop.f32.mrf.mxu1 }
 0x288   :  { %v344_v24 = vmul.f32 0.35355338, %v313_v23 }
 0x28a   :  { %v346_v25 = vadd.f32 %v344_v24, %v2376_v12 }
 0x28c   :  { %v348_v26 = vsel %vm154_vm8, %v346_v25, -inf }
 0x28d   :  { %349 = vmax.xlane.f32.xlu0 %v348_v26 }
 0x28f   :  { %v341_v27 = vpop.f32.mrf.mxu2 }
 0x290   :  { %v345_v39 = vmul.f32 0.35355338, %v341_v27 }
 0x292   :  { %v347_v42 = vadd.f32 %v345_v39, %v2380_v18 }
 0x294   :  { %v351_v43 = vsel %vm154_vm8, %v347_v42, -inf }
 0x297   :  { %v447_v30 = vpop.f32.mrf.mxu2 }
 0x298   :  { %v478_v32 = vmul.f32 0.35355338, %v447_v30 }
 0x299   :  { %v475_v28 = vpop.f32.mrf.mxu0 }
 0x29a   :  { %v479_v29 = vmul.f32 0.35355338, %v475_v28  ;;  %v2392_v37 = vadd.f32 %v478_v32, %v2376_v12 }
 0x29c   :  { %v481_v31 = vadd.f32 %v479_v29, %v2380_v18  ;;  %v482_v41 = vsel %vm154_vm8, %v2392_v37, -inf }
 0x29e   :  { %v485_v33 = vsel %vm154_vm8, %v481_v31, -inf }
 0x29f   :  { %486 = vmax.xlane.f32.xlu2 %v485_v33  ;;  %v581_v44 = vpop.f32.mrf.mxu2 }
 0x2a0   :  { %v612_v45 = vmul.f32 0.35355338, %v581_v44 }
 0x2a1   :  { %2041 = vrot.lane.b32.xlu0 %v2040_v34, %s2843_s1  ;;  %v609_v35 = vpop.f32.mrf.mxu0 }
 0x2a2   :  { %v613_v36 = vmul.f32 0.35355338, %v609_v35  ;;  %v2401_v46 = vadd.f32 %v612_v45, %v2376_v12 }
 0x2a4   :  { %v615_v38 = vadd.f32 %v613_v36, %v2380_v18  ;;  %v616_v48 = vsel %vm154_vm8, %v2401_v46, -inf }
 0x2a6   :  { %v619_v40 = vsel %vm154_vm8, %v615_v38, -inf }
 0x2a7   :  { %620 = vmax.xlane.f32.xlu1 %v619_v40  ;;  %483 = vmax.xlane.f32.xlu2 %v482_v41 }
 0x2af   :  { %352 = vmax.xlane.f32.xlu1 %v351_v43 }
 0x2c8   :  { %2036 = vrot.lane.b32.xlu1 %v2040_v34, %s2197_s22 }
 0x2cb   :  { %617 = vmax.xlane.f32.xlu0 %v616_v48 }
 0x2d0   :  { %504 = vrot.lane.b32.xlu1 %v2323_v55, %s2845_s23 }
 0x2e2   :  { %v216_v49 = vpop.xlane.xlu2 %215 }
 0x2e3   :  { %v220_v50 = vsub.f32 %v212_v15, %v216_v49 }
 0x2e5   :  { %v222_v51 = vmul.f32 1.442695, %v220_v50 }
 0x2e7   :  { %2092 = vpow2.f32 %v222_v51 }
 0x2ed   :  { %v2408_v53 = vpop.eup %2092 }
 0x2ee   :  { %v226_v54 = vsel %vm154_vm8, %v2408_v53, 0.0 }
 0x2ef   :  { %227 = vadd.xlane.f32.xlu0 %v226_v54 }
 0x2f1   :  { %v219_v58 = vpop.xlane.xlu1 %218 }
 0x2f2   :  { %v221_v63 = vsub.f32 %v213_v21, %v219_v58 }
 0x2f4   :  { %v224_v1 = vmul.f32 1.442695, %v221_v63 }
 0x300   :  { %v350_v56 = vpop.xlane.xlu0 %349 }
 0x301   :  { %v354_v3 = vsub.f32 %v346_v25, %v350_v56 }
 0x303   :  { %638 = vrot.lane.b32.xlu0 %v2323_v55, %s2844_s24  ;;  %v356_v7 = vmul.f32 1.442695, %v354_v3 }
 0x312   :  { %v487_v59 = vpop.xlane.xlu2 %486 }
 0x313   :  { %v2042_v60 = vpop.permute.xlu0 %2041  ;;  %v489_v61 = vsub.f32 %v481_v31, %v487_v59 }
 0x314   :  { %v2044_v62 = vunpack.i.h.bf16 %v2042_v60 }
 0x315   :  { %v492_v0 = vmul.f32 1.442695, %v489_v61 }
 0x316   :  { %417 = vmatpush.msrb.mxu1 %v2044_v62 }
 0x317   :  { %2094 = vpow2.f32 %v492_v0 }
 0x318   :  { %2096 = vpow2.f32 %v224_v1 }
 0x31a   :  { %v621_v2 = vpop.xlane.xlu1 %620  ;;  %v484_v8 = vpop.xlane.xlu2 %483 }
 0x31b   :  { %v623_v4 = vsub.f32 %v615_v38, %v621_v2  ;;  %v488_v15 = vsub.f32 %v2392_v37, %v484_v8  ;;  %v2043_v38 = vunpack.i.l.bf16 %v2042_v60 }
 0x31d   :  { %v2414_v5 = vpop.eup %2094  ;;  %v626_v6 = vmul.f32 1.442695, %v623_v4  ;;  %v490_v21 = vmul.f32 1.442695, %v488_v15  ;;  %v722_v15 = vld [vmem:[%s2833_s6] sm:$0xff] }
 0x31e   :  { %v497_v55 = vsel %vm154_vm8, %v2414_v5, 0.0  ;;  %v2097_v11 = vpop.eup %2096 }
 0x31f   :  { %2098 = vpow2.f32 %v626_v6  ;;  %498 = vadd.xlane.f32.xlu2 %v497_v55  ;;  %v229_v19 = vsel %vm154_vm8, %v2097_v11, 0.0 }
 0x320   :  { %2100 = vpow2.f32 %v356_v7 }
 0x322   :  { %v353_v9 = vpop.xlane.xlu1 %352 }
 0x323   :  { %v355_v13 = vsub.f32 %v347_v42, %v353_v9 }
 0x325   :  { %v2418_v14 = vpop.eup %2098  ;;  %v358_v16 = vmul.f32 1.442695, %v355_v13  ;;  %v724_v13 = vld [vmem:[%s2833_s6 + $0x10] sm:$0xff] }
 0x326   :  { %v631_v17 = vsel %vm154_vm8, %v2418_v14, 0.0  ;;  %v2101_v20 = vpop.eup %2100 }
 0x327   :  { %2102 = vpow2.f32 %v358_v16  ;;  %632 = vadd.xlane.f32.xlu1 %v631_v17  ;;  %230 = vadd.xlane.f32.xlu2 %v229_v19  ;;  %v360_v22 = vsel %vm154_vm8, %v2101_v20, 0.0 }
 0x328   :  { %2104 = vpow2.f32 %v490_v21 }
 0x32d   :  { %v2103_v23 = vpop.eup %2102  ;;  %361 = vadd.xlane.f32.xlu0 %v360_v22 }
 0x32e   :  { %v363_v24 = vsel %vm154_vm8, %v2103_v23, 0.0  ;;  %v2105_v25 = vpop.eup %2104 }
 0x32f   :  { %364 = vadd.xlane.f32.xlu2 %v363_v24  ;;  %v494_v26 = vsel %vm154_vm8, %v2105_v25, 0.0 }
 0x337   :  { %495 = vadd.xlane.f32.xlu2 %v494_v26 }
 0x33a   :  { %v2037_v27 = vpop.permute.xlu1 %2036 }
 0x33b   :  { %v2038_v28 = vunpack.i.l.bf16 %v2037_v27  ;;  %v2039_v29 = vunpack.i.h.bf16 %v2037_v27 }
 0x33d   :  { %257 = vmatpush.msra.mxu3 %v2038_v28 }
 0x33e   :  { %v618_v30 = vpop.xlane.xlu0 %617 }
 0x33f   :  { %283 = vmatpush.msrb.mxu3 %v2039_v29  ;;  %v622_v31 = vsub.f32 %v2401_v46, %v618_v30  ;;  %v2068_v29 = vld [vmem:[%s2832_s7] ss:$0 sm:$0xff] }
 0x341   :  { %v624_v32 = vmul.f32 1.442695, %v622_v31  ;;  %664 = vrot.lane.b32.xlu0 %v2327_v57, %s2844_s24 }
 0x342   :  { %v505_v46 = vpop.permute.xlu1 %504 }
 0x343   :  { %2106 = vpow2.f32 %v624_v32 }
 0x349   :  { %v2107_v33 = vpop.eup %2106 }
 0x34a   :  { %v628_v34 = vsel %vm154_vm8, %v2107_v33, 0.0 }
 0x34b   :  { %629 = vadd.xlane.f32.xlu2 %v628_v34 }
 0x362   :  { %v228_v35 = vpop.xlane.xlu0 %227 }
 0x363   :  { %2108 = vrcp.f32 %v228_v35  ;;  %530 = vrot.lane.b32.xlu2 %v2327_v57, %s2845_s23 }
 0x369   :  { %v2109_v36 = vpop.eup %2108 }
 0x36a   :  { %v234_v37 = vmul.f32 %v2109_v36, %v2408_v53 }
 0x36c   :  { %1936 = vmatmul.msk.f32.vlgmr.msra.gmra.mxu3 %vm154_vm8, %v234_v37 }
 0x36d   :  { %391 = vmatpush.msra.mxu3 %v2043_v38 }
 0x375   :  { %v639_v40 = vpop.permute.xlu0 %638 }
 0x392   :  { %v499_v39 = vpop.xlane.xlu2 %498 }
 0x39a   :  { %v231_v41 = vpop.xlane.xlu2 %230  ;;  %v633_v58 = vpop.xlane.xlu1 %632 }
 0x39b   :  { %2110 = vrcp.f32 %v231_v41 }
 0x3a0   :  { %v362_v42 = vpop.xlane.xlu0 %361 }
 0x3a1   :  { %v2111_v43 = vpop.eup %2110  ;;  %2112 = vrcp.f32 %v362_v42 }
 0x3a2   :  { %v365_v44 = vpop.xlane.xlu2 %364  ;;  %v235_v45 = vmul.f32 %v2111_v43, %v2097_v11  ;;  %v725_v11 = vld [vmem:[%s2833_s6 + $0x18] sm:$0xff] }
 0x3a3   :  { %2114 = vrcp.f32 %v365_v44  ;;  %748 = vmatpush.msra.mxu2 %v725_v11 }
 0x3a4   :  { %1937 = vmatmul.msk.f32.vlgmr.msrb.gmra.mxu3 %vm154_vm8, %v235_v45 }
 0x3a5   :  { %525 = vmatpush.msrb.mxu3 %v505_v46  ;;  %749 = vmatpush.msra.mxu2 %v724_v13 }
 0x3a7   :  { %v2113_v57 = vpop.eup %2112 }
 0x3a8   :  { %v368_v51 = vmul.f32 %v2113_v57, %v2101_v20  ;;  %v815_v57 = vld [vmem:[%s2835_s8 + $0x10] sm:$0xff] }
 0x3a9   :  { %v2115_v48 = vpop.eup %2114 }
 0x3aa   :  { %v496_v49 = vpop.xlane.xlu2 %495  ;;  %v369_v50 = vmul.f32 %v2115_v48, %v2103_v23  ;;  %v814_v48 = vld [vmem:[%s2835_s8 + $0x8] sm:$0xff] }
 0x3ab   :  { %2116 = vrcp.f32 %v496_v49  ;;  %v813_v49 = vld [vmem:[%s2835_s8] sm:$0xff] }
 0x3ac   :  { %1943 = vmatmul.msk.f32.vlgmr.msrb.gmra.mxu1 %vm154_vm8, %v369_v50  ;;  %1942 = vmatmul.msk.f32.vlgmr.msra.gmra.mxu3 %vm154_vm8, %v368_v51  ;;  %2118 = vrcp.f32 %v499_v39 }
 0x3ad   :  { %659 = vmatpush.msra.mxu3 %v639_v40 }
 0x3b1   :  { %v2117_v53 = vpop.eup %2116 }
 0x3b2   :  { %v502_v54 = vmul.f32 %v2117_v53, %v2105_v25  ;;  %v2119_v59 = vpop.eup %2118 }
 0x3b3   :  { %v503_v61 = vmul.f32 %v2119_v59, %v2414_v5  ;;  %v665_v0 = vpop.permute.xlu0 %664 }
 0x3b4   :  { %1948 = vmatmul.msk.f32.vlgmr.msrb.gmra.mxu3 %vm154_vm8, %v502_v54 }
 0x3be   :  { %v630_v56 = vpop.xlane.xlu2 %629 }
 0x3bf   :  { %2120 = vrcp.f32 %v630_v56 }
 0x3c0   :  { %2122 = vrcp.f32 %v633_v58 }
 0x3c5   :  { %v2121_v60 = vpop.eup %2120 }
 0x3c6   :  { %v636_v62 = vmul.f32 %v2121_v60, %v2107_v33  ;;  %v531_v63 = vpop.permute.xlu2 %530  ;;  %v2123_v1 = vpop.eup %2122 }
 0x3c7   :  { %551 = vmatpush.msra.mxu1 %v531_v63  ;;  %v637_v2 = vmul.f32 %v2123_v1, %v2418_v14  ;;  %v723_v14 = vld [vmem:[%s2833_s6 + $0x8] sm:$0xff]  ;;  %v2069_v63 = vld [vmem:[%s2827_s2 + $0x1] ss:$0 sm:$0xff] }
 0x3c8   :  { %1949 = vmatmul.msk.f32.vlgmr.msra.gmra.mxu1 %vm154_vm8, %v503_v61  ;;  %1954 = vmatmul.msk.f32.vlgmr.msra.gmra.mxu3 %vm154_vm8, %v636_v62 }
 0x3c9   :  { %685 = vmatpush.msrb.mxu1 %v665_v0  ;;  %750 = vmatpush.msra.mxu2 %v723_v14 }
 0x3cb   :  { %751 = vmatpush.msra.mxu2 %v722_v15 }
 0x3d0   :  { %1955 = vmatmul.msk.f32.vlgmr.msrb.gmra.mxu1 %vm154_vm8, %v637_v2 }
 0x3ef   :  { %v259_v3 = vpop.f32.mrf.mxu3 }
 0x427   :  { %v285_v4 = vpop.f32.mrf.mxu3 }
 0x429   :  { %v419_v55 = vpop.f32.mrf.mxu1 }
 0x42f   :  { %v393_v6 = vpop.f32.mrf.mxu3 }
 0x430   :  { %692 = vrot.lane.b32.xlu0 %v393_v6, %s2841_s25 }
 0x437   :  { %v527_v5 = vpop.f32.mrf.mxu3 }
 0x438   :  { %700 = vrot.lane.b32.xlu0 %v527_v5, %s2848_s26 }
 0x440   :  { %694 = vrot.lane.b32.xlu0 %v419_v55, %s2841_s25 }
 0x445   :  { %v553_v7 = vpop.f32.mrf.mxu1 }
 0x44b   :  { %v661_v8 = vpop.f32.mrf.mxu3 }
 0x44c   :  { %708 = vrot.lane.b32.xlu2 %v661_v8, %s2846_s27 }
 0x44d   :  { %v687_v9 = vpop.f32.mrf.mxu1 }
 0x44e   :  { %710 = vrot.lane.b32.xlu0 %v687_v9, %s2846_s27 }
 0x454   :  { %702 = vrot.lane.b32.xlu2 %v553_v7, %s2848_s26 }
 0x4a2   :  { %v693_v16 = vpop.permute.xlu0 %692 }
 0x4a3   :  { %v714_v17 = vsel %vm154_vm8, %v259_v3, %v693_v16 }
 0x4a6   :  { %v709_v20 = vpop.permute.xlu2 %708 }
 0x4aa   :  { %v701_v19 = vpop.permute.xlu0 %700 }
 0x4ab   :  { %v717_v21 = vsel %vm716_vm9, %v714_v17, %v701_v19  ;;  %v875_v19 = vld [vmem:[%s2837_s10 + $0x38] sm:$0xff] }
 0x4ac   :  { %v720_v22 = vsel %vm719_vm10, %v717_v21, %v709_v20  ;;  %895 = vmatpush.msrb.mxu3 %v875_v19  ;;  %v874_v20 = vld [vmem:[%s2837_s10 + $0x30] sm:$0xff]  ;;  %v873_v21 = vld [vmem:[%s2837_s10 + $0x28] sm:$0xff] }
 0x4ad   :  { %1956 = vmatmul.msk.f32.vlgmr.msra.gmra.mxu2 %vm49_vm0, %v720_v22  ;;  %v872_v22 = vld [vmem:[%s2837_s10 + $0x20] sm:$0xff] }
 0x4ae   :  { %v703_v25 = vpop.permute.xlu2 %702  ;;  %896 = vmatpush.msrb.mxu3 %v874_v20 }
 0x4b0   :  { %897 = vmatpush.msrb.mxu3 %v873_v21 }
 0x4b2   :  { %v695_v23 = vpop.permute.xlu0 %694  ;;  %898 = vmatpush.msrb.mxu3 %v872_v22  ;;  %v2073_v22 = vld [vmem:[%s2827_s2 + $0x2] ss:$0 sm:$0xff] }
 0x4b3   :  { %v715_v24 = vsel %vm154_vm8, %v285_v4, %v695_v23  ;;  %v2070_v4 = vld [vmem:[%s2828_s3 + $0x1] ss:$0 sm:$0xff]  ;;  %v871_v23 = vld [vmem:[%s2837_s10 + $0x18] sm:$0xff] }
 0x4b4   :  { %v718_v27 = vsel %vm716_vm9, %v715_v24, %v703_v25  ;;  %v870_v24 = vld [vmem:[%s2837_s10 + $0x10] sm:$0xff]  ;;  %899 = vmatpush.msrb.mxu3 %v871_v23  ;;  %v869_v25 = vld [vmem:[%s2837_s10 + $0x8] sm:$0xff] }
 0x4b6   :  { %900 = vmatpush.msrb.mxu3 %v870_v24 }
 0x4b8   :  { %901 = vmatpush.msrb.mxu3 %v869_v25 }
 0x4c0   :  { %v711_v26 = vpop.permute.xlu0 %710 }
 0x4c1   :  { %v721_v28 = vsel %vm719_vm10, %v718_v27, %v711_v26  ;;  %v868_v26 = vld [vmem:[%s2837_s10] sm:$0xff] }
 0x4c2   :  { %1957 = vmatmul.msk.f32.gmra.mxu2 %vm49_vm0, %v721_v28  ;;  %902 = vmatpush.msrb.mxu3 %v868_v26  ;;  %v2071_v27 = vld [vmem:[%s2834_s9] ss:$0 sm:$0xff] }
 0x530   :  { %v753_v30 = vpop.f32.mrf.mxu2 }
 0x531   :  { %v754_v31 = vadd.f32 %v2068_v29, %v753_v30 }
 0x533   :  { %v759_v32 = vadd.f32 %v754_v31, %v2312_v47 }
 0x535   :  { %v761_v33 = vsel %vm49_vm0, %v759_v32, 0.0 }
 0x536   :  { %762 = vadd.xlane.f32.xlu1 %v761_v33 }
 0x545   :  { %v756_v34 = vpop.f32.mrf.mxu2 }
 0x546   :  { %v757_v35 = vadd.f32 %v2068_v29, %v756_v34 }
 0x548   :  { %v760_v36 = vadd.f32 %v757_v35, %v2316_v52  ;;  %v816_v52 = vld [vmem:[%s2835_s8 + $0x18] sm:$0xff] }
 0x549   :  { %839 = vmatpush.msra.mxu0 %v816_v52 }
 0x54a   :  { %v764_v37 = vsel %vm49_vm0, %v760_v36, 0.0 }
 0x54b   :  { %765 = vadd.xlane.f32.xlu2 %v764_v37  ;;  %840 = vmatpush.msra.mxu0 %v815_v57 }
 0x54d   :  { %841 = vmatpush.msra.mxu0 %v814_v48  ;;  %v2072_v48 = vld [vmem:[%s2836_s11] ss:$0 sm:$0xff] }
 0x54f   :  { %842 = vmatpush.msra.mxu0 %v813_v49 }
 0x5a9   :  { %v763_v38 = vpop.xlane.xlu1 %762 }
 0x5aa   :  { %v767_v39 = vmul.f32 %v763_v38, %v2286_v10 }
 0x5ac   :  { %v769_v40 = vsub.f32 %v759_v32, %v767_v39 }
 0x5ae   :  { %v771_v41 = vmul.f32 %v769_v40, %v769_v40 }
 0x5b0   :  { %v773_v42 = vsel %vm49_vm0, %v771_v41, 0.0 }
 0x5b1   :  { %774 = vadd.xlane.f32.xlu0 %v773_v42 }
 0x5be   :  { %v766_v43 = vpop.xlane.xlu2 %765 }
 0x5bf   :  { %v768_v47 = vmul.f32 %v766_v43, %v2286_v10 }
 0x5c1   :  { %v770_v44 = vsub.f32 %v760_v36, %v768_v47 }
 0x5c3   :  { %v772_v45 = vmul.f32 %v770_v44, %v770_v44 }
 0x5c5   :  { %v776_v46 = vsel %vm49_vm0, %v772_v45, 0.0 }
 0x5c6   :  { %777 = vadd.xlane.f32.xlu1 %v776_v46 }
 0x624   :  { %v775_v50 = vpop.xlane.xlu0 %774 }
 0x625   :  { %v779_v51 = vmul.f32 %v775_v50, %v2286_v10 }
 0x627   :  { %v781_v53 = vadd.f32 1e-12, %v779_v51 }
 0x629   :  { %2124 = vrsqrt.f32 %v781_v53  ;;  %vm789_vm12 = vweird.f32 %v781_v53 }
 0x62f   :  { %v2125_v54 = vpop.eup %2124 }
 0x630   :  { %v784_v56 = vmul.f32 %v2125_v54, %v781_v53  ;;  %vm790_vm11 = vweird.f32 %v2125_v54 }
 0x631   :  { %vm791_vm13 = vmor %vm789_vm12, %vm790_vm11 }
 0x632   :  { %v785_v58 = vmul.f32 %v2125_v54, %v784_v56 }
 0x634   :  { %v786_v59 = vmul.f32 0.5, %v785_v58 }
 0x636   :  { %v787_v60 = vsub.f32 1.5, %v786_v59 }
 0x638   :  { %v788_v61 = vmul.f32 %v2125_v54, %v787_v60 }
 0x639   :  { %v778_v62 = vpop.xlane.xlu1 %777 }
 0x63a   :  { %v780_v0 = vmul.f32 %v778_v62, %v2286_v10  ;;  %v792_v1 = vsel %vm791_vm13, %v2125_v54, %v788_v61 }
 0x63b   :  { %v803_v2 = vmul.f32 %v792_v1, %v769_v40 }
 0x63c   :  { %v782_v3 = vadd.f32 1e-12, %v780_v0 }
 0x63d   :  { %v807_v6 = vmul.f32 %v2069_v63, %v803_v2 }
 0x63e   :  { %2126 = vrsqrt.f32 %v782_v3  ;;  %vm799_vm15 = vweird.f32 %v782_v3 }
 0x63f   :  { %v2501_v5 = vadd.f32 %v2070_v4, %v807_v6 }
 0x641   :  { %1958 = vmatmul.msk.f32.vlgmr.msra.gmra.mxu0 %vm49_vm0, %v2501_v5 }
 0x644   :  { %v2127_v55 = vpop.eup %2126 }
 0x645   :  { %v794_v7 = vmul.f32 %v2127_v55, %v782_v3  ;;  %vm800_vm14 = vweird.f32 %v2127_v55 }
 0x646   :  { %vm801_vm1 = vmor %vm799_vm15, %vm800_vm14 }
 0x647   :  { %v795_v8 = vmul.f32 %v2127_v55, %v794_v7  ;;  %v1963_v7 = vld [vmem:[%s2830_s4 + $0x28] sm:$0xff] }
 0x649   :  { %v796_v9 = vmul.f32 0.5, %v795_v8  ;;  %v1962_v8 = vld [vmem:[%s2830_s4 + $0x20] sm:$0xff] }
 0x64b   :  { %v797_v11 = vsub.f32 1.5, %v796_v9 }
 0x64d   :  { %v798_v13 = vmul.f32 %v2127_v55, %v797_v11 }
 0x64f   :  { %v802_v14 = vsel %vm801_vm1, %v2127_v55, %v798_v13  ;;  %v1964_v55 = vld [vmem:[%s2830_s4 + $0x30] sm:$0xff] }
 0x650   :  { %v804_v15 = vmul.f32 %v802_v14, %v770_v44 }
 0x652   :  { %v808_v16 = vmul.f32 %v2069_v63, %v804_v15 }
 0x654   :  { %v812_v17 = vadd.f32 %v2070_v4, %v808_v16 }
 0x656   :  { %1959 = vmatmul.msk.f32.gmra.mxu0 %vm49_vm0, %v812_v17 }
 0x6be   :  { %v844_v28 = vpop.f32.mrf.mxu0 }
 0x6bf   :  { %v845_v29 = vadd.f32 %v2071_v27, %v844_v28 }
 0x6c1   :  { %v852_v30 = vmul.f32 0.044715, %v845_v29  ;;  %v850_v36 = vmul.f32 0.5, %v845_v29 }
 0x6c3   :  { %v854_v31 = vmul.f32 %v852_v30, %v845_v29 }
 0x6c5   :  { %v856_v32 = vmul.f32 %v854_v31, %v845_v29 }
 0x6c7   :  { %v858_v33 = vadd.f32 %v856_v32, %v845_v29 }
 0x6c9   :  { %v860_v34 = vmul.f32 0.7978846, %v858_v33 }
 0x6cb   :  { %2128 = vtanh.f32 %v860_v34 }
 0x6d1   :  { %v2129_v35 = vpop.eup %2128 }
 0x6d2   :  { %v864_v38 = vadd.f32 1.0, %v2129_v35 }
 0x6d3   :  { %v847_v37 = vpop.f32.mrf.mxu0 }
 0x6d4   :  { %v848_v39 = vadd.f32 %v2071_v27, %v847_v37  ;;  %v866_v40 = vmul.f32 %v864_v38, %v850_v36  ;;  %v2074_v27 = vld [vmem:[%s2828_s3 + $0x2] ss:$0 sm:$0xff] }
 0x6d6   :  { %v853_v41 = vmul.f32 0.044715, %v848_v39  ;;  %1960 = vmatmul.msk.f32.vlgmr.msrb.gmra.mxu3 %vm880_vm2, %v866_v40  ;;  %v851_v46 = vmul.f32 0.5, %v848_v39  ;;  %v2075_v40 = vld [vmem:[%s2829_s5 + $0x1] ss:$0 sm:$0xff]  ;;  %s2850_s5 = smov 48  }
 0x6d8   :  { %v855_v42 = vmul.f32 %v853_v41, %v848_v39 }
 0x6da   :  { %v857_v43 = vmul.f32 %v855_v42, %v848_v39 }
 0x6dc   :  { %v859_v47 = vadd.f32 %v857_v43, %v848_v39 }
 0x6de   :  { %v861_v44 = vmul.f32 0.7978846, %v859_v47 }
 0x6e0   :  { %2130 = vtanh.f32 %v861_v44 }
 0x6e6   :  { %v2131_v45 = vpop.eup %2130 }
 0x6e7   :  { %v865_v52 = vadd.f32 1.0, %v2131_v45 }
 0x6e9   :  { %v867_v57 = vmul.f32 %v865_v52, %v851_v46 }
 0x6eb   :  { %1961 = vmatmul.msk.f32.gmra.mxu3 %vm880_vm2, %v867_v57 }
 0x759   :  { %v904_v49 = vpop.f32.mrf.mxu3 }
 0x75a   :  { %v905_v50 = vadd.f32 %v2072_v48, %v904_v49 }
 0x75c   :  { %v910_v51 = vadd.f32 %v905_v50, %v2501_v5  ;;  %v1965_v5 = vld [vmem:[%s2830_s4 + $0x38] sm:$0xff] }
 0x75d   :  { %992 = vmatpush.msra.mxu1 %v1965_v5 }
 0x75e   :  { %v912_v53 = vsel %vm49_vm0, %v910_v51, 0.0 }
 0x75f   :  { %913 = vadd.xlane.f32.xlu1 %v912_v53  ;;  %993 = vmatpush.msra.mxu1 %v1964_v55 }
 0x761   :  { %994 = vmatpush.msra.mxu1 %v1963_v7 }
 0x763   :  { %995 = vmatpush.msra.mxu1 %v1962_v8 }
 0x76e   :  { %v907_v54 = vpop.f32.mrf.mxu3 }
 0x76f   :  { %v908_v56 = vadd.f32 %v2072_v48, %v907_v54 }
 0x771   :  { %v911_v58 = vadd.f32 %v908_v56, %v812_v17 }
 0x773   :  { %v915_v59 = vsel %vm49_vm0, %v911_v58, 0.0 }
 0x774   :  { %916 = vadd.xlane.f32.xlu1 %v915_v59 }
 0x7d2   :  { %v914_v60 = vpop.xlane.xlu1 %913 }
 0x7d3   :  { %v918_v61 = vmul.f32 %v914_v60, %v2286_v10 }
 0x7d5   :  { %v920_v62 = vsub.f32 %v910_v51, %v918_v61 }
 0x7d7   :  { %v922_v63 = vmul.f32 %v920_v62, %v920_v62 }
 0x7d9   :  { %v924_v0 = vsel %vm49_vm0, %v922_v63, 0.0 }
 0x7da   :  { %925 = vadd.xlane.f32.xlu1 %v924_v0 }
 0x7e7   :  { %v917_v1 = vpop.xlane.xlu1 %916 }
 0x7e8   :  { %v919_v2 = vmul.f32 %v917_v1, %v2286_v10 }
 0x7ea   :  { %v921_v3 = vsub.f32 %v911_v58, %v919_v2 }
 0x7ec   :  { %v923_v4 = vmul.f32 %v921_v3, %v921_v3 }
 0x7ee   :  { %v927_v6 = vsel %vm49_vm0, %v923_v4, 0.0 }
 0x7ef   :  { %928 = vadd.xlane.f32.xlu1 %v927_v6 }
 0x84d   :  { %v926_v9 = vpop.xlane.xlu1 %925 }
 0x84e   :  { %v930_v11 = vmul.f32 %v926_v9, %v2286_v10 }
 0x850   :  { %v932_v13 = vadd.f32 1e-12, %v930_v11 }
 0x852   :  { %2132 = vrsqrt.f32 %v932_v13  ;;  %vm940_vm4 = vweird.f32 %v932_v13 }
 0x858   :  { %v2133_v14 = vpop.eup %2132 }
 0x859   :  { %v935_v15 = vmul.f32 %v2133_v14, %v932_v13  ;;  %vm941_vm3 = vweird.f32 %v2133_v14 }
 0x85a   :  { %vm942_vm5 = vmor %vm940_vm4, %vm941_vm3 }
 0x85b   :  { %v936_v16 = vmul.f32 %v2133_v14, %v935_v15 }
 0x85d   :  { %v937_v17 = vmul.f32 0.5, %v936_v16 }
 0x85f   :  { %v938_v19 = vsub.f32 1.5, %v937_v17 }
 0x861   :  { %v939_v20 = vmul.f32 %v2133_v14, %v938_v19 }
 0x862   :  { %v929_v21 = vpop.xlane.xlu1 %928 }
 0x863   :  { %v931_v23 = vmul.f32 %v929_v21, %v2286_v10  ;;  %v943_v24 = vsel %vm942_vm5, %v2133_v14, %v939_v20 }
 0x864   :  { %v954_v25 = vmul.f32 %v943_v24, %v920_v62 }
 0x865   :  { %v933_v26 = vadd.f32 1e-12, %v931_v23 }
 0x866   :  { %v958_v28 = vmul.f32 %v2073_v22, %v954_v25 }
 0x867   :  { %2134 = vrsqrt.f32 %v933_v26  ;;  %vm950_vm7 = vweird.f32 %v933_v26 }
 0x868   :  { %v2565_v29 = vadd.f32 %v2074_v27, %v958_v28 }
 0x86a   :  { %1967 = vmatmul.msk.f32.vlgmr.msra.gmra.mxu1 %vm49_vm0, %v2565_v29 }
 0x86d   :  { %v2135_v30 = vpop.eup %2134 }
 0x86e   :  { %v945_v31 = vmul.f32 %v2135_v30, %v933_v26  ;;  %vm951_vm6 = vweird.f32 %v2135_v30 }
 0x86f   :  { %vm952_vm11 = vmor %vm950_vm7, %vm951_vm6 }
 0x870   :  { %v946_v32 = vmul.f32 %v2135_v30, %v945_v31 }
 0x872   :  { %v947_v33 = vmul.f32 0.5, %v946_v32 }
 0x874   :  { %v948_v34 = vsub.f32 1.5, %v947_v33 }
 0x876   :  { %v949_v35 = vmul.f32 %v2135_v30, %v948_v34 }
 0x878   :  { %v953_v36 = vsel %vm952_vm11, %v2135_v30, %v949_v35  ;;  %vm1923_vm11 = vcmask 257024  }
 0x879   :  { %v955_v37 = vmul.f32 %v953_v36, %v921_v3 }
 0x87b   :  { %v959_v38 = vmul.f32 %v2073_v22, %v955_v37 }
 0x87d   :  { %v2569_v39 = vadd.f32 %v2074_v27, %v959_v38 }
 0x87f   :  { %1968 = vmatmul.msk.f32.gmra.mxu1 %vm49_vm0, %v2569_v39 }
 0x8e7   :  { %v997_v41 = vpop.f32.mrf.mxu1 }
 0x8e8   :  { %v2576_v42 = vadd.f32 %v2075_v40, %v997_v41 }
 0x8ea   :  { %1004 = vrot.lane.b32.xlu2 %v2576_v42, %s2189_s30 }
 0x8f2   :  { %1137 = vrot.lane.b32.xlu2 %v2576_v42, %s2191_s16 }
 0x8fc   :  { %v1000_v43 = vpop.f32.mrf.mxu1 }
 0x8fd   :  { %v2582_v47 = vadd.f32 %v2075_v40, %v1000_v43 }
 0x8ff   :  { %1297 = vrot.lane.b32.xlu2 %v2582_v47, %s2193_s17  ;;  %1165 = vrot.lane.b32.xlu1 %v2582_v47, %s2191_s16  ;;  %v2045_v31 = vpack.i.bf16 %v2582_v47, %v2576_v42  ;;  %s2853_s16 = smov 8  }
 0x900   :  { %1031 = vrot.lane.b32.xlu0 %v2582_v47, %s2189_s30  ;;  %s2851_s30 = smov 40  }
 0x907   :  { %1433 = vrot.lane.b32.xlu2 %v2582_v47, %s2194_s18  ;;  %1135 = vrot.lane.b32.xlu1 %v2576_v42, %s2190_s15 }
 0x908   :  { %1163 = vrot.lane.b32.xlu0 %v2582_v47, %s2190_s15  ;;  %s2852_s15 = smov 56  }
 0x90f   :  { %1403 = vrot.lane.b32.xlu2 %v2576_v42, %s2192_s0  ;;  %1271 = vrot.lane.b32.xlu1 %v2576_v42, %s2195_s19 }
 0x910   :  { %1299 = vrot.lane.b32.xlu0 %v2582_v47, %s2195_s19 }
 0x917   :  { %1431 = vrot.lane.b32.xlu1 %v2582_v47, %s2192_s0  ;;  %s2854_s0 = smov 16  }
 0x918   :  { %1269 = vrot.lane.b32.xlu0 %v2576_v42, %s2193_s17  ;;  %s2855_s17 = smov 24  }
 0x920   :  { %1405 = vrot.lane.b32.xlu0 %v2576_v42, %s2194_s18 }
 0x944   :  { %v1005_v44 = vpop.permute.xlu2 %1004 }
 0x945   :  { %1969 = vmatpush.xpose.msk.msrb.mxu2 %vm154_vm8, %v1005_v44 }
 0x948   :  { %1970 = vmatmul.msk.f32.vlgmr.msrb.gmra.mxu2 %vm154_vm8, %v2576_v42 }
 0x94c   :  { %v1138_v45 = vpop.permute.xlu2 %1137 }
 0x959   :  { %v1298_v57 = vpop.permute.xlu2 %1297 }
 0x961   :  { %v1434_v53 = vpop.permute.xlu2 %1433 }
 0x969   :  { %v1404_v59 = vpop.permute.xlu2 %1403 }
 0x971   :  { %v1166_v46 = vpop.permute.xlu1 %1165 }
 0x972   :  { %v1032_v52 = vpop.permute.xlu0 %1031  ;;  %1977 = vmatpush.xpose.msk.msra.mxu3 %vm154_vm8, %v1166_v46 }
 0x973   :  { %1971 = vmatpush.xpose.msk.msrb.mxu0 %vm154_vm8, %v1032_v52 }
 0x976   :  { %1972 = vmatmul.msk.f32.vlgmr.msrb.gmra.mxu0 %vm154_vm8, %v2582_v47 }
 0x977   :  { %1975 = vmatpush.xpose.msk.msra.mxu0 %vm154_vm8, %v1138_v45 }
 0x979   :  { %v1136_v48 = vpop.permute.xlu1 %1135 }
 0x97a   :  { %v1164_v49 = vpop.permute.xlu0 %1163 }
 0x97b   :  { %1978 = vmatmul.msk.f32.vlgmr.msra.gmra.mxu3 %vm154_vm8, %v1164_v49 }
 0x97e   :  { %1976 = vmatmul.msk.f32.vlgmr.msra.gmra.mxu0 %vm154_vm8, %v1136_v48 }
 0x981   :  { %v1272_v50 = vpop.permute.xlu1 %1271 }
 0x982   :  { %v1300_v51 = vpop.permute.xlu0 %1299  ;;  %1981 = vmatpush.xpose.msk.msrb.mxu0 %vm154_vm8, %v1272_v50 }
 0x983   :  { %1983 = vmatpush.xpose.msk.msrb.mxu3 %vm154_vm8, %v1300_v51 }
 0x986   :  { %1984 = vmatmul.msk.f32.vlgmr.msrb.gmra.mxu3 %vm154_vm8, %v1298_v57 }
 0x987   :  { %1989 = vmatpush.xpose.msk.msra.mxu3 %vm154_vm8, %v1434_v53 }
 0x989   :  { %v1432_v56 = vpop.permute.xlu1 %1431 }
 0x98a   :  { %v1270_v54 = vpop.permute.xlu0 %1269 }
 0x98b   :  { %1982 = vmatmul.msk.f32.vlgmr.msrb.gmra.mxu0 %vm154_vm8, %v1270_v54 }
 0x98e   :  { %1990 = vmatmul.msk.f32.vlgmr.msra.gmra.mxu3 %vm154_vm8, %v1432_v56 }
 0x992   :  { %v1406_v58 = vpop.permute.xlu0 %1405 }
 0x993   :  { %1987 = vmatpush.xpose.msk.msra.mxu0 %vm154_vm8, %v1406_v58 }
 0x996   :  { %1988 = vmatmul.msk.f32.vlgmr.msra.gmra.mxu0 %vm154_vm8, %v1404_v59 }
 0x9cb   :  { %v1027_v60 = vpop.f32.mrf.mxu2 }
 0x9cc   :  { %v1057_v61 = vmul.f32 0.35355338, %v1027_v60 }
 0x9ce   :  { %v1059_v62 = vadd.f32 %v1057_v61, %v2376_v12 }
 0x9d0   :  { %v1061_v63 = vsel %vm154_vm8, %v1059_v62, -inf }
 0x9d1   :  { %1062 = vmax.xlane.f32.xlu1 %v1061_v63 }
 0x9f3   :  { %v1054_v0 = vpop.f32.mrf.mxu0 }
 0x9f4   :  { %v1058_v1 = vmul.f32 0.35355338, %v1054_v0 }
 0x9f6   :  { %v1060_v2 = vadd.f32 %v1058_v1, %v2380_v18 }
 0x9f8   :  { %v1064_v3 = vsel %vm154_vm8, %v1060_v2, -inf }
 0x9f9   :  { %1065 = vmax.xlane.f32.xlu0 %v1064_v3 }
 0x9fb   :  { %v1160_v4 = vpop.f32.mrf.mxu0 }
 0x9fc   :  { %v1191_v6 = vmul.f32 0.35355338, %v1160_v4 }
 0x9fe   :  { %v1188_v5 = vpop.f32.mrf.mxu3  ;;  %v1193_v55 = vadd.f32 %v1191_v6, %v2376_v12 }
 0x9ff   :  { %v1192_v7 = vmul.f32 0.35355338, %v1188_v5 }
 0xa00   :  { %v1195_v8 = vsel %vm154_vm8, %v1193_v55, -inf }
 0xa01   :  { %1196 = vmax.xlane.f32.xlu2 %v1195_v8  ;;  %v1194_v9 = vadd.f32 %v1192_v7, %v2380_v18 }
 0xa03   :  { %v1198_v11 = vsel %vm154_vm8, %v1194_v9, -inf }
 0xa04   :  { %1199 = vmax.xlane.f32.xlu1 %v1198_v11 }
 0xa08   :  { %v1294_v13 = vpop.f32.mrf.mxu0 }
 0xa09   :  { %v1325_v14 = vmul.f32 0.35355338, %v1294_v13  ;;  %v1322_v15 = vpop.f32.mrf.mxu3 }
 0xa0a   :  { %v1326_v16 = vmul.f32 0.35355338, %v1322_v15 }
 0xa0b   :  { %v1327_v17 = vadd.f32 %v1325_v14, %v2376_v12 }
 0xa0c   :  { %v1328_v19 = vadd.f32 %v1326_v16, %v2380_v18 }
 0xa0d   :  { %v1329_v20 = vsel %vm154_vm8, %v1327_v17, -inf }
 0xa0e   :  { %1330 = vmax.xlane.f32.xlu0 %v1329_v20  ;;  %v1332_v21 = vsel %vm154_vm8, %v1328_v19, -inf }
 0xa0f   :  { %1333 = vmax.xlane.f32.xlu2 %v1332_v21 }
 0xa11   :  { %v1456_v22 = vpop.f32.mrf.mxu3 }
 0xa12   :  { %v1460_v23 = vmul.f32 0.35355338, %v1456_v22 }
 0xa13   :  { %v1428_v24 = vpop.f32.mrf.mxu0 }
 0xa14   :  { %v1459_v25 = vmul.f32 0.35355338, %v1428_v24  ;;  %v2639_v26 = vadd.f32 %v1460_v23, %v2380_v18 }
 0xa16   :  { %v1466_v27 = vsel %vm154_vm8, %v2639_v26, -inf  ;;  %v1461_v28 = vadd.f32 %v1459_v25, %v2376_v12 }
 0xa17   :  { %1467 = vmax.xlane.f32.xlu0 %v1466_v27 }
 0xa18   :  { %v1463_v30 = vsel %vm154_vm8, %v1461_v28, -inf }
 0xa19   :  { %1464 = vmax.xlane.f32.xlu1 %v1463_v30 }
 0xa27   :  { %2046 = vrot.lane.b32.xlu2 %v2045_v31, %s2197_s22 }
 0xa44   :  { %v1063_v32 = vpop.xlane.xlu1 %1062 }
 0xa45   :  { %v1067_v33 = vsub.f32 %v1059_v62, %v1063_v32 }
 0xa47   :  { %v1069_v34 = vmul.f32 1.442695, %v1067_v33 }
 0xa49   :  { %2136 = vpow2.f32 %v1069_v34 }
 0xa4f   :  { %v2648_v18 = vpop.eup %2136 }
 0xa50   :  { %v1073_v35 = vsel %vm154_vm8, %v2648_v18, 0.0 }
 0xa51   :  { %1074 = vadd.xlane.f32.xlu2 %v1073_v35 }
 0xa69   :  { %2056 = vrot.lane.b32.xlu2 %v2045_v31, %s2850_s5 }
 0xa6c   :  { %v1066_v12 = vpop.xlane.xlu0 %1065 }
 0xa6d   :  { %v1068_v36 = vsub.f32 %v1060_v2, %v1066_v12 }
 0xa6f   :  { %v1071_v37 = vmul.f32 1.442695, %v1068_v36 }
 0xa71   :  { %2138 = vpow2.f32 %v1071_v37  ;;  %2061 = vrot.lane.b32.xlu2 %v2045_v31, %s2851_s30 }
 0xa74   :  { %v1197_v38 = vpop.xlane.xlu2 %1196 }
 0xa75   :  { %v1201_v40 = vsub.f32 %v1193_v55, %v1197_v38 }
 0xa77   :  { %v2139_v41 = vpop.eup %2138  ;;  %v1203_v42 = vmul.f32 1.442695, %v1201_v40  ;;  %v1200_v43 = vpop.xlane.xlu1 %1199 }
 0xa78   :  { %v1202_v47 = vsub.f32 %v1194_v9, %v1200_v43  ;;  %v1076_v44 = vsel %vm154_vm8, %v2139_v41, 0.0 }
 0xa79   :  { %2140 = vpow2.f32 %v1203_v42  ;;  %1077 = vadd.xlane.f32.xlu1 %v1076_v44 }
 0xa7a   :  { %v1205_v45 = vmul.f32 1.442695, %v1202_v47 }
 0xa7c   :  { %2142 = vpow2.f32 %v1205_v45 }
 0xa7f   :  { %v2655_v46 = vpop.eup %2140 }
 0xa80   :  { %v1207_v52 = vsel %vm154_vm8, %v2655_v46, 0.0 }
 0xa81   :  { %1208 = vadd.xlane.f32.xlu0 %v1207_v52  ;;  %v1331_v48 = vpop.xlane.xlu0 %1330 }
 0xa82   :  { %v2659_v57 = vpop.eup %2142  ;;  %v1334_v49 = vpop.xlane.xlu2 %1333  ;;  %v1335_v53 = vsub.f32 %v1327_v17, %v1331_v48 }
 0xa83   :  { %v1336_v50 = vsub.f32 %v1328_v19, %v1334_v49  ;;  %v1210_v51 = vsel %vm154_vm8, %v2659_v57, 0.0 }
 0xa84   :  { %1211 = vadd.xlane.f32.xlu1 %v1210_v51  ;;  %v1337_v56 = vmul.f32 1.442695, %v1335_v53  ;;  %v1996_v53 = vld [vmem:[%s2833_s6 + $0x38] sm:$0xff] }
 0xa85   :  { %v1339_v54 = vmul.f32 1.442695, %v1336_v50  ;;  %1595 = vmatpush.msrb.mxu0 %v1996_v53 }
 0xa87   :  { %2144 = vpow2.f32 %v1339_v54  ;;  %v1995_v54 = vld [vmem:[%s2833_s6 + $0x30] sm:$0xff] }
 0xa88   :  { %2146 = vpow2.f32 %v1337_v56  ;;  %v1994_v56 = vld [vmem:[%s2833_s6 + $0x28] sm:$0xff]  ;;  %1596 = vmatpush.msrb.mxu0 %v1995_v54 }
 0xa8a   :  { %v2047_v58 = vpop.permute.xlu2 %2046  ;;  %v1468_v2 = vpop.xlane.xlu0 %1467  ;;  %1597 = vmatpush.msrb.mxu0 %v1994_v56 }
 0xa8b   :  { %v2049_v59 = vunpack.i.h.bf16 %v2047_v58  ;;  %v2048_v60 = vunpack.i.l.bf16 %v2047_v58  ;;  %v1470_v4 = vsub.f32 %v2639_v26, %v1468_v2  ;;  %v1993_v58 = vld [vmem:[%s2833_s6 + $0x20] sm:$0xff] }
 0xa8c   :  { %v1465_v61 = vpop.xlane.xlu1 %1464  ;;  %1598 = vmatpush.msrb.mxu0 %v1993_v58 }
 0xa8d   :  { %v2663_v62 = vpop.eup %2144  ;;  %v1469_v63 = vsub.f32 %v1461_v28, %v1465_v61  ;;  %1104 = vmatpush.msrb.mxu1 %v2048_v60  ;;  %1130 = vmatpush.msra.mxu2 %v2049_v59  ;;  %v1473_v5 = vmul.f32 1.442695, %v1470_v4 }
 0xa8e   :  { %v1344_v0 = vsel %vm154_vm8, %v2663_v62, 0.0  ;;  %v2147_v3 = vpop.eup %2146 }
 0xa8f   :  { %1345 = vadd.xlane.f32.xlu0 %v1344_v0  ;;  %v1471_v1 = vmul.f32 1.442695, %v1469_v63  ;;  %v1341_v6 = vsel %vm154_vm8, %v2147_v3, 0.0 }
 0xa91   :  { %2148 = vpow2.f32 %v1471_v1 }
 0xa92   :  { %2150 = vpow2.f32 %v1473_v5 }
 0xa97   :  { %1342 = vadd.xlane.f32.xlu0 %v1341_v6  ;;  %v2149_v55 = vpop.eup %2148 }
 0xa98   :  { %v1475_v7 = vsel %vm154_vm8, %v2149_v55, 0.0  ;;  %v2151_v8 = vpop.eup %2150 }
 0xa99   :  { %v1478_v9 = vsel %vm154_vm8, %v2151_v8, 0.0 }
 0xa9d   :  { %2051 = vrot.lane.b32.xlu1 %v2045_v31, %s2852_s15 }
 0xa9f   :  { %1476 = vadd.xlane.f32.xlu0 %v1475_v7 }
 0xaa7   :  { %1479 = vadd.xlane.f32.xlu0 %v1478_v9 }
 0xac4   :  { %v1075_v11 = vpop.xlane.xlu2 %1074 }
 0xac5   :  { %2152 = vrcp.f32 %v1075_v11 }
 0xacb   :  { %v2153_v13 = vpop.eup %2152 }
 0xacc   :  { %v1081_v14 = vmul.f32 %v2153_v13, %v2648_v18  ;;  %v2057_v22 = vpop.permute.xlu2 %2056 }
 0xacd   :  { %v2059_v33 = vunpack.i.h.bf16 %v2057_v22  ;;  %v2058_v34 = vunpack.i.l.bf16 %v2057_v22 }
 0xace   :  { %1973 = vmatmul.msk.f32.vlgmr.msrb.gmra.mxu1 %vm154_vm8, %v1081_v14 }
 0xad4   :  { %v2062_v27 = vpop.permute.xlu2 %2061 }
 0xad5   :  { %v2064_v35 = vunpack.i.h.bf16 %v2062_v27  ;;  %v2063_v12 = vunpack.i.l.bf16 %v2062_v27  ;;  %v2002_v27 = vld [vmem:[%s2835_s8 + $0x30] sm:$0xff] }
 0xaec   :  { %v1078_v15 = vpop.xlane.xlu1 %1077 }
 0xaed   :  { %2154 = vrcp.f32 %v1078_v15 }
 0xaf3   :  { %v2155_v16 = vpop.eup %2154 }
 0xaf4   :  { %v1082_v17 = vmul.f32 %v2155_v16, %v2139_v41  ;;  %v1209_v19 = vpop.xlane.xlu0 %1208 }
 0xaf5   :  { %2156 = vrcp.f32 %v1209_v19 }
 0xaf6   :  { %1974 = vmatmul.msk.f32.vlgmr.msra.gmra.mxu2 %vm154_vm8, %v1082_v17 }
 0xaf7   :  { %v1212_v21 = vpop.xlane.xlu1 %1211 }
 0xaf8   :  { %2158 = vrcp.f32 %v1212_v21 }
 0xafb   :  { %v2157_v24 = vpop.eup %2156 }
 0xafc   :  { %v1215_v31 = vmul.f32 %v2157_v24, %v2655_v46 }
 0xafe   :  { %v2159_v25 = vpop.eup %2158 }
 0xaff   :  { %v1216_v32 = vmul.f32 %v2159_v25, %v2659_v57 }
 0xb02   :  { %v1346_v20 = vpop.xlane.xlu0 %1345 }
 0xb03   :  { %2160 = vrcp.f32 %v1346_v20 }
 0xb09   :  { %v2161_v36 = vpop.eup %2160 }
 0xb0a   :  { %v1343_v23 = vpop.xlane.xlu0 %1342  ;;  %v1350_v38 = vmul.f32 %v2161_v36, %v2663_v62 }
 0xb0b   :  { %2162 = vrcp.f32 %v1343_v23 }
 0xb0f   :  { %v2052_v26 = vpop.permute.xlu1 %2051 }
 0xb10   :  { %v2054_v28 = vunpack.i.h.bf16 %v2052_v26  ;;  %v2053_v30 = vunpack.i.l.bf16 %v2052_v26 }
 0xb11   :  { %v2163_v37 = vpop.eup %2162 }
 0xb12   :  { %1238 = vmatpush.msra.mxu1 %v2053_v30  ;;  %1264 = vmatpush.msrb.mxu2 %v2054_v28  ;;  %v1477_v18 = vpop.xlane.xlu0 %1476  ;;  %v1349_v40 = vmul.f32 %v2163_v37, %v2147_v3  ;;  %v2001_v28 = vld [vmem:[%s2835_s8 + $0x28] sm:$0xff]  ;;  %v2000_v30 = vld [vmem:[%s2835_s8 + $0x20] sm:$0xff] }
 0xb13   :  { %1979 = vmatmul.msk.f32.vlgmr.msra.gmra.mxu1 %vm154_vm8, %v1215_v31  ;;  %1980 = vmatmul.msk.f32.vlgmr.msrb.gmra.mxu2 %vm154_vm8, %v1216_v32  ;;  %2164 = vrcp.f32 %v1477_v18 }
 0xb14   :  { %1372 = vmatpush.msrb.mxu1 %v2058_v34  ;;  %1398 = vmatpush.msra.mxu2 %v2059_v33 }
 0xb16   :  { %1506 = vmatpush.msra.mxu1 %v2063_v12  ;;  %1532 = vmatpush.msrb.mxu2 %v2064_v35 }
 0xb19   :  { %v2165_v42 = vpop.eup %2164 }
 0xb1a   :  { %v1480_v41 = vpop.xlane.xlu0 %1479  ;;  %v1483_v47 = vmul.f32 %v2165_v42, %v2149_v55  ;;  %v2076_v55 = vld [vmem:[%s2832_s7 + $0x1] ss:$0 sm:$0xff]  ;;  %v2077_v42 = vld [vmem:[%s2827_s2 + $0x3] ss:$0 sm:$0xff] }
 0xb1b   :  { %2166 = vrcp.f32 %v1480_v41  ;;  %1985 = vmatmul.msk.f32.vlgmr.msrb.gmra.mxu1 %vm154_vm8, %v1349_v40  ;;  %1986 = vmatmul.msk.f32.vlgmr.msra.gmra.mxu2 %vm154_vm8, %v1350_v38 }
 0xb21   :  { %v2167_v43 = vpop.eup %2166 }
 0xb22   :  { %v1484_v44 = vmul.f32 %v2167_v43, %v2151_v8 }
 0xb23   :  { %1991 = vmatmul.msk.f32.vlgmr.msra.gmra.mxu1 %vm154_vm8, %v1483_v47 }
 0xb24   :  { %1992 = vmatmul.msk.f32.vlgmr.msrb.gmra.mxu2 %vm154_vm8, %v1484_v44  ;;  %v2078_v44 = vld [vmem:[%s2828_s3 + $0x3] ss:$0 sm:$0xff] }
 0xb4b   :  { %v1106_v45 = vpop.f32.mrf.mxu1 }
 0xb79   :  { %v1132_v46 = vpop.f32.mrf.mxu2 }
 0xb90   :  { %v1240_v52 = vpop.f32.mrf.mxu1 }
 0xb91   :  { %1539 = vrot.lane.b32.xlu0 %v1240_v52, %s2853_s16 }
 0xb96   :  { %v1266_v57 = vpop.f32.mrf.mxu2 }
 0xb98   :  { %v1374_v48 = vpop.f32.mrf.mxu1 }
 0xb99   :  { %1547 = vrot.lane.b32.xlu1 %v1374_v48, %s2854_s0 }
 0xb9e   :  { %v1400_v49 = vpop.f32.mrf.mxu2 }
 0xba0   :  { %v1508_v50 = vpop.f32.mrf.mxu1 }
 0xba1   :  { %1541 = vrot.lane.b32.xlu1 %v1266_v57, %s2853_s16  ;;  %1555 = vrot.lane.b32.xlu2 %v1508_v50, %s2855_s17 }
 0xba7   :  { %v1534_v51 = vpop.f32.mrf.mxu2 }
 0xba9   :  { %1549 = vrot.lane.b32.xlu2 %v1400_v49, %s2854_s0  ;;  %1557 = vrot.lane.b32.xlu1 %v1534_v51, %s2855_s17 }
 0xbfb   :  { %v1556_v62 = vpop.permute.xlu2 %1555 }
 0xc03   :  { %v1540_v59 = vpop.permute.xlu0 %1539  ;;  %v1550_v3 = vpop.permute.xlu2 %1549 }
 0xc04   :  { %v1561_v60 = vsel %vm154_vm8, %v1106_v45, %v1540_v59  ;;  %v2014_v59 = vld [vmem:[%s2837_s10 + $0x78] sm:$0xff] }
 0xc05   :  { %1745 = vmatpush.msrb.mxu1 %v2014_v59 }
 0xc0b   :  { %v1548_v61 = vpop.permute.xlu1 %1547 }
 0xc0c   :  { %v1563_v63 = vsel %vm716_vm9, %v1561_v60, %v1548_v61  ;;  %v2013_v60 = vld [vmem:[%s2837_s10 + $0x70] sm:$0xff]  ;;  %v2012_v61 = vld [vmem:[%s2837_s10 + $0x68] sm:$0xff] }
 0xc0d   :  { %v1565_v0 = vsel %vm719_vm10, %v1563_v63, %v1556_v62  ;;  %1746 = vmatpush.msrb.mxu1 %v2013_v60  ;;  %v2011_v62 = vld [vmem:[%s2837_s10 + $0x60] sm:$0xff]  ;;  %v2010_v63 = vld [vmem:[%s2837_s10 + $0x58] sm:$0xff] }
 0xc0e   :  { %1998 = vmatmul.msk.f32.vlgmr.msrb.gmra.mxu0 %vm49_vm0, %v1565_v0  ;;  %v2009_v0 = vld [vmem:[%s2837_s10 + $0x50] sm:$0xff] }
 0xc0f   :  { %1747 = vmatpush.msrb.mxu1 %v2012_v61 }
 0xc11   :  { %1748 = vmatpush.msrb.mxu1 %v2011_v62  ;;  %v2081_v62 = vld [vmem:[%s2827_s2 + $0x4] ss:$0 sm:$0xff] }
 0xc13   :  { %v1542_v1 = vpop.permute.xlu1 %1541  ;;  %1749 = vmatpush.msrb.mxu1 %v2010_v63 }
 0xc14   :  { %v1562_v2 = vsel %vm154_vm8, %v1132_v46, %v1542_v1  ;;  %v2008_v1 = vld [vmem:[%s2837_s10 + $0x48] sm:$0xff] }
 0xc15   :  { %v1564_v6 = vsel %vm716_vm9, %v1562_v2, %v1550_v3  ;;  %1750 = vmatpush.msrb.mxu1 %v2009_v0  ;;  %v2007_v2 = vld [vmem:[%s2837_s10 + $0x40] sm:$0xff] }
 0xc16   :  { %v2079_v3 = vld [vmem:[%s2834_s9 + $0x1] ss:$0 sm:$0xff] }
 0xc17   :  { %1751 = vmatpush.msrb.mxu1 %v2008_v1  ;;  %v2082_v1 = vld [vmem:[%s2828_s3 + $0x4] ss:$0 sm:$0xff] }
 0xc19   :  { %1752 = vmatpush.msrb.mxu1 %v2007_v2 }
 0xc1b   :  { %v1558_v4 = vpop.permute.xlu1 %1557 }
 0xc1c   :  { %v1566_v5 = vsel %vm719_vm10, %v1564_v6, %v1558_v4 }
 0xc1d   :  { %1999 = vmatmul.msk.f32.gmra.mxu0 %vm49_vm0, %v1566_v5 }
 0xc8b   :  { %v1600_v7 = vpop.f32.mrf.mxu0 }
 0xc8c   :  { %v1601_v8 = vadd.f32 %v2076_v55, %v1600_v7 }
 0xc8e   :  { %v1606_v9 = vadd.f32 %v1601_v8, %v2565_v29 }
 0xc90   :  { %v1608_v11 = vsel %vm49_vm0, %v1606_v9, 0.0 }
 0xc91   :  { %1609 = vadd.xlane.f32.xlu2 %v1608_v11 }
 0xc9a   :  { %v1603_v13 = vpop.f32.mrf.mxu0 }
 0xc9b   :  { %v1604_v14 = vadd.f32 %v2076_v55, %v1603_v13 }
 0xc9d   :  { %v1607_v15 = vadd.f32 %v1604_v14, %v2569_v39  ;;  %v2003_v39 = vld [vmem:[%s2835_s8 + $0x38] sm:$0xff] }
 0xc9e   :  { %1688 = vmatpush.msrb.mxu3 %v2003_v39  ;;  %v2080_v39 = vld [vmem:[%s2836_s11 + $0x1] ss:$0 sm:$0xff] }
 0xc9f   :  { %v1611_v16 = vsel %vm49_vm0, %v1607_v15, 0.0 }
 0xca0   :  { %1612 = vadd.xlane.f32.xlu0 %v1611_v16  ;;  %1689 = vmatpush.msrb.mxu3 %v2002_v27 }
 0xca2   :  { %1690 = vmatpush.msrb.mxu3 %v2001_v28 }
 0xca4   :  { %1691 = vmatpush.msrb.mxu3 %v2000_v30 }
 0xd04   :  { %v1610_v17 = vpop.xlane.xlu2 %1609 }
 0xd05   :  { %v1614_v19 = vmul.f32 %v1610_v17, %v2286_v10 }
 0xd07   :  { %v1616_v20 = vsub.f32 %v1606_v9, %v1614_v19 }
 0xd09   :  { %v1618_v21 = vmul.f32 %v1616_v20, %v1616_v20 }
 0xd0b   :  { %v1620_v22 = vsel %vm49_vm0, %v1618_v21, 0.0 }
 0xd0c   :  { %1621 = vadd.xlane.f32.xlu1 %v1620_v22 }
 0xd13   :  { %v1613_v23 = vpop.xlane.xlu0 %1612 }
 0xd14   :  { %v1615_v29 = vmul.f32 %v1613_v23, %v2286_v10 }
 0xd16   :  { %v1617_v24 = vsub.f32 %v1607_v15, %v1615_v29 }
 0xd18   :  { %v1619_v25 = vmul.f32 %v1617_v24, %v1617_v24 }
 0xd1a   :  { %v1623_v26 = vsel %vm49_vm0, %v1619_v25, 0.0 }
 0xd1b   :  { %1624 = vadd.xlane.f32.xlu2 %v1623_v26 }
 0xd7f   :  { %v1622_v31 = vpop.xlane.xlu1 %1621 }
 0xd80   :  { %v1626_v32 = vmul.f32 %v1622_v31, %v2286_v10 }
 0xd82   :  { %v1628_v33 = vadd.f32 1e-12, %v1626_v32 }
 0xd84   :  { %2168 = vrsqrt.f32 %v1628_v33  ;;  %vm1636_vm9 = vweird.f32 %v1628_v33 }
 0xd8a   :  { %v2169_v34 = vpop.eup %2168 }
 0xd8b   :  { %v1631_v18 = vmul.f32 %v2169_v34, %v1628_v33  ;;  %vm1637_vm8 = vweird.f32 %v2169_v34 }
 0xd8c   :  { %vm1638_vm10 = vmor %vm1636_vm9, %vm1637_vm8 }
 0xd8d   :  { %v1632_v35 = vmul.f32 %v2169_v34, %v1631_v18 }
 0xd8e   :  { %v1625_v12 = vpop.xlane.xlu2 %1624 }
 0xd8f   :  { %v1633_v36 = vmul.f32 0.5, %v1632_v35  ;;  %v1627_v37 = vmul.f32 %v1625_v12, %v2286_v10 }
 0xd91   :  { %v1634_v38 = vsub.f32 1.5, %v1633_v36  ;;  %v1629_v40 = vadd.f32 1e-12, %v1627_v37 }
 0xd93   :  { %v1635_v41 = vmul.f32 %v2169_v34, %v1634_v38  ;;  %2170 = vrsqrt.f32 %v1629_v40  ;;  %vm1646_vm13 = vweird.f32 %v1629_v40 }
 0xd95   :  { %v1639_v43 = vsel %vm1638_vm10, %v2169_v34, %v1635_v41 }
 0xd96   :  { %v1650_v47 = vmul.f32 %v1639_v43, %v1616_v20 }
 0xd98   :  { %v1654_v45 = vmul.f32 %v2077_v42, %v1650_v47 }
 0xd99   :  { %v2171_v46 = vpop.eup %2170 }
 0xd9a   :  { %v1641_v52 = vmul.f32 %v2171_v46, %v1629_v40  ;;  %v1658_v57 = vadd.f32 %v2078_v44, %v1654_v45  ;;  %vm1647_vm12 = vweird.f32 %v2171_v46  ;;  %v1816_v45 = vld [vmem:[%s2839_s12 + $0x10] sm:$0xff] }
 0xd9b   :  { %vm1648_vm14 = vmor %vm1646_vm13, %vm1647_vm12 }
 0xd9c   :  { %v1642_v48 = vmul.f32 %v2171_v46, %v1641_v52  ;;  %2005 = vmatmul.msk.f32.vlgmr.msrb.gmra.mxu3 %vm49_vm0, %v1658_v57  ;;  %v1814_v52 = vld [vmem:[%s2839_s12] sm:$0xff] }
 0xd9e   :  { %v1643_v49 = vmul.f32 0.5, %v1642_v48 }
 0xda0   :  { %v1644_v50 = vsub.f32 1.5, %v1643_v49 }
 0xda2   :  { %v1645_v51 = vmul.f32 %v2171_v46, %v1644_v50 }
 0xda4   :  { %v1649_v53 = vsel %vm1648_vm14, %v2171_v46, %v1645_v51  ;;  %v1815_v46 = vld [vmem:[%s2839_s12 + $0x8] sm:$0xff] }
 0xda5   :  { %v1651_v54 = vmul.f32 %v1649_v53, %v1617_v24 }
 0xda7   :  { %v1655_v56 = vmul.f32 %v2077_v42, %v1651_v54 }
 0xda9   :  { %v1659_v58 = vadd.f32 %v2078_v44, %v1655_v56  ;;  %v1817_v44 = vld [vmem:[%s2839_s12 + $0x18] sm:$0xff] }
 0xdaa   :  { %1840 = vmatpush.msra.mxu2 %v1817_v44 }
 0xdab   :  { %2006 = vmatmul.msk.f32.gmra.mxu3 %vm49_vm0, %v1659_v58 }
 0xdac   :  { %1841 = vmatpush.msra.mxu2 %v1816_v45 }
 0xdae   :  { %1842 = vmatpush.msra.mxu2 %v1815_v46 }
 0xdb0   :  { %1843 = vmatpush.msra.mxu2 %v1814_v52 }
 0xe1f   :  { %v1693_v4 = vpop.f32.mrf.mxu3 }
 0xe20   :  { %v1694_v6 = vadd.f32 %v2079_v3, %v1693_v4 }
 0xe22   :  { %v1701_v5 = vmul.f32 0.044715, %v1694_v6  ;;  %v1699_v16 = vmul.f32 0.5, %v1694_v6 }
 0xe24   :  { %v1703_v55 = vmul.f32 %v1701_v5, %v1694_v6 }
 0xe26   :  { %v1705_v7 = vmul.f32 %v1703_v55, %v1694_v6 }
 0xe28   :  { %v1707_v8 = vadd.f32 %v1705_v7, %v1694_v6 }
 0xe2a   :  { %v1709_v9 = vmul.f32 0.7978846, %v1707_v8 }
 0xe2c   :  { %2172 = vtanh.f32 %v1709_v9 }
 0xe2e   :  { %v1696_v11 = vpop.f32.mrf.mxu3 }
 0xe2f   :  { %v1697_v13 = vadd.f32 %v2079_v3, %v1696_v11 }
 0xe31   :  { %v1702_v14 = vmul.f32 0.044715, %v1697_v13  ;;  %v1700_v24 = vmul.f32 0.5, %v1697_v13 }
 0xe32   :  { %v2173_v15 = vpop.eup %2172 }
 0xe33   :  { %v1713_v17 = vadd.f32 1.0, %v2173_v15  ;;  %v1704_v19 = vmul.f32 %v1702_v14, %v1697_v13  ;;  %v2083_v15 = vld [vmem:[%s2838_s13] ss:$0 sm:$0xff] }
 0xe35   :  { %v1715_v20 = vmul.f32 %v1713_v17, %v1699_v16  ;;  %v1706_v21 = vmul.f32 %v1704_v19, %v1697_v13 }
 0xe37   :  { %2016 = vmatmul.msk.f32.vlgmr.msrb.gmra.mxu1 %vm880_vm2, %v1715_v20  ;;  %v1708_v22 = vadd.f32 %v1706_v21, %v1697_v13 }
 0xe39   :  { %v1710_v23 = vmul.f32 0.7978846, %v1708_v22 }
 0xe3b   :  { %2174 = vtanh.f32 %v1710_v23 }
 0xe41   :  { %v2175_v29 = vpop.eup %2174 }
 0xe42   :  { %v1714_v25 = vadd.f32 1.0, %v2175_v29 }
 0xe44   :  { %v1716_v26 = vmul.f32 %v1714_v25, %v1700_v24 }
 0xe46   :  { %2017 = vmatmul.msk.f32.gmra.mxu1 %vm880_vm2, %v1716_v26 }
 0xeb4   :  { %v1754_v27 = vpop.f32.mrf.mxu1 }
 0xeb5   :  { %v1755_v28 = vadd.f32 %v2080_v39, %v1754_v27 }
 0xeb7   :  { %v1760_v30 = vadd.f32 %v1755_v28, %v1658_v57 }
 0xeb9   :  { %v1762_v31 = vsel %vm49_vm0, %v1760_v30, 0.0 }
 0xeba   :  { %1763 = vadd.xlane.f32.xlu0 %v1762_v31 }
 0xec3   :  { %v1757_v32 = vpop.f32.mrf.mxu1 }
 0xec4   :  { %v1758_v33 = vadd.f32 %v2080_v39, %v1757_v32 }
 0xec6   :  { %v1761_v34 = vadd.f32 %v1758_v33, %v1659_v58 }
 0xec8   :  { %v1765_v18 = vsel %vm49_vm0, %v1761_v34, 0.0 }
 0xec9   :  { %1766 = vadd.xlane.f32.xlu1 %v1765_v18 }
 0xf2d   :  { %v1764_v35 = vpop.xlane.xlu0 %1763 }
 0xf2e   :  { %v1768_v12 = vmul.f32 %v1764_v35, %v2286_v10 }
 0xf30   :  { %v1770_v36 = vsub.f32 %v1760_v30, %v1768_v12 }
 0xf32   :  { %v1772_v37 = vmul.f32 %v1770_v36, %v1770_v36 }
 0xf34   :  { %v1774_v38 = vsel %vm49_vm0, %v1772_v37, 0.0 }
 0xf35   :  { %1775 = vadd.xlane.f32.xlu2 %v1774_v38 }
 0xf3c   :  { %v1767_v40 = vpop.xlane.xlu1 %1766 }
 0xf3d   :  { %v1769_v41 = vmul.f32 %v1767_v40, %v2286_v10 }
 0xf3f   :  { %v1771_v42 = vsub.f32 %v1761_v34, %v1769_v41 }
 0xf41   :  { %v1773_v43 = vmul.f32 %v1771_v42, %v1771_v42 }
 0xf43   :  { %v1777_v47 = vsel %vm49_vm0, %v1773_v43, 0.0 }
 0xf44   :  { %1778 = vadd.xlane.f32.xlu0 %v1777_v47 }
 0xfa8   :  { %v1776_v57 = vpop.xlane.xlu2 %1775 }
 0xfa9   :  { %v1780_v48 = vmul.f32 %v1776_v57, %v2286_v10 }
 0xfab   :  { %v1782_v49 = vadd.f32 1e-12, %v1780_v48 }
 0xfad   :  { %2176 = vrsqrt.f32 %v1782_v49  ;;  %vm1790_vm1 = vweird.f32 %v1782_v49 }
 0xfb3   :  { %v2177_v50 = vpop.eup %2176 }
 0xfb4   :  { %v1785_v51 = vmul.f32 %v2177_v50, %v1782_v49  ;;  %vm1791_vm15 = vweird.f32 %v2177_v50 }
 0xfb5   :  { %vm1792_vm2 = vmor %vm1790_vm1, %vm1791_vm15 }
 0xfb6   :  { %v1786_v53 = vmul.f32 %v2177_v50, %v1785_v51 }
 0xfb7   :  { %v1779_v54 = vpop.xlane.xlu0 %1778 }
 0xfb8   :  { %v1787_v56 = vmul.f32 0.5, %v1786_v53  ;;  %v1781_v58 = vmul.f32 %v1779_v54, %v2286_v10 }
 0xfba   :  { %v1788_v59 = vsub.f32 1.5, %v1787_v56  ;;  %v1783_v60 = vadd.f32 1e-12, %v1781_v58 }
 0xfbc   :  { %v1789_v61 = vmul.f32 %v2177_v50, %v1788_v59  ;;  %2178 = vrsqrt.f32 %v1783_v60  ;;  %vm1800_vm4 = vweird.f32 %v1783_v60 }
 0xfbe   :  { %v1793_v63 = vsel %vm1792_vm2, %v2177_v50, %v1789_v61 }
 0xfbf   :  { %v1804_v0 = vmul.f32 %v1793_v63, %v1770_v36 }
 0xfc1   :  { %v1808_v2 = vmul.f32 %v2081_v62, %v1804_v0  ;;  %v2085_v0 = vld [vmem:[%s2828_s3 + $0x5] ss:$0 sm:$0xff] }
 0xfc2   :  { %v2179_v3 = vpop.eup %2178 }
 0xfc3   :  { %v1795_v4 = vmul.f32 %v2179_v3, %v1783_v60  ;;  %v1812_v6 = vadd.f32 %v2082_v1, %v1808_v2  ;;  %vm1801_vm3 = vweird.f32 %v2179_v3 }
 0xfc4   :  { %vm1802_vm5 = vmor %vm1800_vm4, %vm1801_vm3 }
 0xfc5   :  { %v1796_v5 = vmul.f32 %v2179_v3, %v1795_v4  ;;  %2018 = vmatmul.msk.f32.vlgmr.msra.gmra.mxu2 %vm49_vm0, %v1812_v6 }
 0xfc7   :  { %v1797_v55 = vmul.f32 0.5, %v1796_v5 }
 0xfc9   :  { %v1798_v7 = vsub.f32 1.5, %v1797_v55 }
 0xfcb   :  { %v1799_v8 = vmul.f32 %v2179_v3, %v1798_v7 }
 0xfcd   :  { %v1803_v9 = vsel %vm1802_vm5, %v2179_v3, %v1799_v8 }
 0xfce   :  { %v1805_v11 = vmul.f32 %v1803_v9, %v1771_v42 }
 0xfd0   :  { %v1809_v13 = vmul.f32 %v2081_v62, %v1805_v11  ;;  %v2084_v62 = vld [vmem:[%s2827_s2 + $0x5] ss:$0 sm:$0xff] }
 0xfd2   :  { %v1813_v14 = vadd.f32 %v2082_v1, %v1809_v13 }
 0xfd4   :  { %2019 = vmatmul.msk.f32.gmra.mxu2 %vm49_vm0, %v1813_v14 }
0x1048   :  { %v1845_v16 = vpop.f32.mrf.mxu2 }
0x1049   :  { %v1846_v17 = vadd.f32 %v2083_v15, %v1845_v16 }
0x104b   :  { %v1853_v19 = vmul.f32 0.044715, %v1846_v17  ;;  %v1851_v39 = vmul.f32 0.5, %v1846_v17 }
0x104d   :  { %v1855_v20 = vmul.f32 %v1853_v19, %v1846_v17 }
0x104f   :  { %v1857_v21 = vmul.f32 %v1855_v20, %v1846_v17 }
0x1051   :  { %v1859_v22 = vadd.f32 %v1857_v21, %v1846_v17 }
0x1053   :  { %v1861_v23 = vmul.f32 0.7978846, %v1859_v22 }
0x1055   :  { %2180 = vtanh.f32 %v1861_v23 }
0x1057   :  { %v1848_v29 = vpop.f32.mrf.mxu2 }
0x1058   :  { %v1849_v24 = vadd.f32 %v2083_v15, %v1848_v29 }
0x105a   :  { %v1854_v25 = vmul.f32 0.044715, %v1849_v24  ;;  %v1852_v35 = vmul.f32 0.5, %v1849_v24 }
0x105b   :  { %v2181_v26 = vpop.eup %2180 }
0x105c   :  { %v1865_v27 = vadd.f32 1.0, %v2181_v26  ;;  %v1856_v28 = vmul.f32 %v1854_v25, %v1849_v24 }
0x105e   :  { %v1867_v30 = vmul.f32 %v1865_v27, %v1851_v39  ;;  %v1858_v31 = vmul.f32 %v1856_v28, %v1849_v24 }
0x1060   :  { %v1869_v32 = vsel %vm49_vm0, %v1867_v30, 0.0  ;;  %v1860_v33 = vadd.f32 %v1858_v31, %v1849_v24 }
0x1061   :  { %1870 = vadd.xlane.f32.xlu1 %v1869_v32 }
0x1062   :  { %v1862_v34 = vmul.f32 0.7978846, %v1860_v33 }
0x1064   :  { %2182 = vtanh.f32 %v1862_v34 }
0x106a   :  { %v2183_v18 = vpop.eup %2182 }
0x106b   :  { %v1866_v12 = vadd.f32 1.0, %v2183_v18 }
0x106d   :  { %v1868_v36 = vmul.f32 %v1866_v12, %v1852_v35 }
0x106f   :  { %v1872_v37 = vsel %vm49_vm0, %v1868_v36, 0.0 }
0x1070   :  { %1873 = vadd.xlane.f32.xlu2 %v1872_v37 }
0x10d4   :  { %v1871_v38 = vpop.xlane.xlu1 %1870 }
0x10d5   :  { %v1875_v40 = vmul.f32 %v1871_v38, %v2286_v10 }
0x10d7   :  { %v1877_v41 = vsub.f32 %v1867_v30, %v1875_v40 }
0x10d9   :  { %v1879_v42 = vmul.f32 %v1877_v41, %v1877_v41 }
0x10db   :  { %v1881_v43 = vsel %vm49_vm0, %v1879_v42, 0.0 }
0x10dc   :  { %1882 = vadd.xlane.f32.xlu0 %v1881_v43 }
0x10e3   :  { %v1874_v47 = vpop.xlane.xlu2 %1873 }
0x10e4   :  { %v1876_v44 = vmul.f32 %v1874_v47, %v2286_v10 }
0x10e6   :  { %v1878_v45 = vsub.f32 %v1868_v36, %v1876_v44 }
0x10e8   :  { %v1880_v46 = vmul.f32 %v1878_v45, %v1878_v45 }
0x10ea   :  { %v1884_v52 = vsel %vm49_vm0, %v1880_v46, 0.0 }
0x10eb   :  { %1885 = vadd.xlane.f32.xlu1 %v1884_v52 }
0x114f   :  { %v1883_v57 = vpop.xlane.xlu0 %1882 }
0x1150   :  { %v1887_v48 = vmul.f32 %v1883_v57, %v2286_v10 }
0x1152   :  { %v1889_v49 = vadd.f32 1e-12, %v1887_v48 }
0x1154   :  { %2184 = vrsqrt.f32 %v1889_v49  ;;  %vm1897_vm7 = vweird.f32 %v1889_v49 }
0x115a   :  { %v2185_v50 = vpop.eup %2184 }
0x115b   :  { %v1892_v51 = vmul.f32 %v2185_v50, %v1889_v49  ;;  %vm1898_vm6 = vweird.f32 %v2185_v50 }
0x115c   :  { %vm1899_vm0 = vmor %vm1897_vm7, %vm1898_vm6 }
0x115d   :  { %v1893_v53 = vmul.f32 %v2185_v50, %v1892_v51 }
0x115e   :  { %v1886_v54 = vpop.xlane.xlu1 %1885 }
0x115f   :  { %v1894_v56 = vmul.f32 0.5, %v1893_v53  ;;  %v1888_v58 = vmul.f32 %v1886_v54, %v2286_v10 }
0x1161   :  { %v1895_v59 = vsub.f32 1.5, %v1894_v56  ;;  %v1890_v60 = vadd.f32 1e-12, %v1888_v58 }
0x1163   :  { %v1896_v61 = vmul.f32 %v2185_v50, %v1895_v59  ;;  %2186 = vrsqrt.f32 %v1890_v60  ;;  %vm1907_vm9 = vweird.f32 %v1890_v60 }
0x1165   :  { %v1900_v63 = vsel %vm1899_vm0, %v2185_v50, %v1896_v61 }
0x1166   :  { %v1911_v1 = vmul.f32 %v1900_v63, %v1877_v41 }
0x1168   :  { %v1915_v2 = vmul.f32 %v2084_v62, %v1911_v1 }
0x1169   :  { %v2187_v3 = vpop.eup %2186 }
0x116a   :  { %v1919_v10 = vadd.f32 %v2085_v0, %v1915_v2  ;;  %v1902_v4 = vmul.f32 %v2187_v3, %v1890_v60  ;;  %vm1908_vm8 = vweird.f32 %v2187_v3 }
0x116b   :  { %vm1909_vm10 = vmor %vm1907_vm9, %vm1908_vm8 }
0x116c   :  { %v1921_v6 = vpack.c.bf16 %v1919_v10, %v1919_v10  ;;  %v1903_v5 = vmul.f32 %v2187_v3, %v1902_v4 }
0x116e   :  { %1924 = vst.msk [vmem:[%s2840_s14] sm:$0xf] %vm1923_vm11, %v1921_v6  ;;  %v1904_v55 = vmul.f32 0.5, %v1903_v5 }
0x1170   :  { %v1905_v7 = vsub.f32 1.5, %v1904_v55 }
0x1172   :  { %v1906_v8 = vmul.f32 %v2187_v3, %v1905_v7 }
0x1174   :  { %v1910_v9 = vsel %vm1909_vm10, %v2187_v3, %v1906_v8 }
0x1175   :  { %v1912_v11 = vmul.f32 %v1910_v9, %v1878_v45 }
0x1177   :  { %v1916_v13 = vmul.f32 %v2084_v62, %v1912_v11 }
0x1179   :  { %v1920_v14 = vadd.f32 %v2085_v0, %v1916_v13 }
0x117b   :  { %v1922_v15 = vpack.c.bf16 %v1920_v14, %v1920_v14 }
0x117d   :  { %1925 = vst.msk [vmem:[%s2840_s14 + $0x4] sm:$0xf] %vm1923_vm11, %v1922_v15 }

// kernel: mybert_v2_forward.3
= control target key start
LH: loop header
LB: loop body
LE: loop exit
PB: predicated region body
PF: predicated region fallthrough
CT: control target
= control target key end

     0   :  { %vm2389_vm0 = vcmask 261120   ;;  %s9570_s0 = inlined_call_operand.vmem [shape: bf16[16,32], index: 0, kind: input, shape index: {}]   ;;  %s9571_s1 = inlined_call_operand.vmem [shape: bf16[32,21128], index: 1, kind: input, shape index: {}]   ;;  %s9572_s2 = inlined_call_operand.vmem [shape: f32[1,21128], index: 2, kind: input, shape index: {}]   ;;  %s9573_s3 = inlined_call_operand.hbm [shape: f32[16,21128], index: 3, kind: output, shape index: {}]  }
   0x1   :  { %v5738_v0 = vld [vmem:[%s9571_s1 + $0x530] sm:$0xf]  ;;  %v6816_v1 = vld [vmem:[%s9571_s1 + $0x7c4] sm:$0xf0]  ;;  %v6733_v2 = vld [vmem:[%s9571_s1 + $0x534] sm:$0xf] }
   0x2   :  { %v5739_v3 = vor.u32 %v6816_v1, %v5738_v0  ;;  %v5740_v4 = vld [vmem:[%s9571_s1 + $0x7c8] sm:$0xf0]  ;;  %v5746_v5 = vld [vmem:[%s9571_s1 + $0x538] sm:$0xf]  ;;  %v6817_v6 = vld [vmem:[%s9571_s1 + $0x7cc] sm:$0xf0] }
   0x3   :  { %v5743_v7 = vor.u32 %v6733_v2, %v5740_v4  ;;  %v5747_v8 = vor.u32 %v6817_v6, %v5746_v5  ;;  %v6734_v9 = vld [vmem:[%s9571_s1 + $0x53c] sm:$0xf]  ;;  %v5748_v10 = vld [vmem:[%s9571_s1 + $0x7d0] sm:$0xf0]  ;;  %v5074_v11 = vld [vmem:[%s9571_s1] sm:$0xf] }
   0x4   :  { %2399 = vmatpush.bf16.msra.mxu0 %v5739_v3  ;;  %v5751_v12 = vor.u32 %v6734_v9, %v5748_v10  ;;  %v6650_v13 = vld [vmem:[%s9571_s1 + $0x294] sm:$0xf0]  ;;  %v6567_v14 = vld [vmem:[%s9571_s1 + $0x4] sm:$0xf]  ;;  %v5076_v15 = vld [vmem:[%s9571_s1 + $0x298] sm:$0xf0] }
   0x5   :  { %2413 = vmatpush.bf16.msra.mxu1 %v5743_v7  ;;  %2427 = vmatpush.bf16.msra.mxu2 %v5747_v8  ;;  %v5075_v16 = vor.u32 %v6650_v13, %v5074_v11  ;;  %v5079_v17 = vor.u32 %v6567_v14, %v5076_v15  ;;  %v5082_v18 = vld [vmem:[%s9571_s1 + $0x8] sm:$0xf]  ;;  %v6651_v19 = vld [vmem:[%s9571_s1 + $0x29c] sm:$0xf0]  ;;  %v6568_v20 = vld [vmem:[%s9571_s1 + $0xc] sm:$0xf] }
   0x6   :  { %2441 = vmatpush.bf16.msra.mxu3 %v5751_v12  ;;  %v5083_v21 = vor.u32 %v6651_v19, %v5082_v18  ;;  %v5084_v22 = vld [vmem:[%s9571_s1 + $0x2a0] sm:$0xf0]  ;;  %v5754_v24 = vld [vmem:[%s9571_s1 + $0x540] sm:$0xf]  ;;  %v6818_v26 = vld [vmem:[%s9571_s1 + $0x7d4] sm:$0xf0] }
   0x7   :  { %v7006_v23 = vld [vmem:[%s9570_s0] sm:$0xff]  ;;  %v5087_v25 = vor.u32 %v6568_v20, %v5084_v22  ;;  %v5756_v28 = vld [vmem:[%s9571_s1 + $0x7d8] sm:$0xf0]  ;;  %v5755_v29 = vor.u32 %v6818_v26, %v5754_v24  ;;  %v5090_v31 = vld [vmem:[%s9571_s1 + $0x10] sm:$0xf] }
   0x8   :  { %v6735_v27 = vld [vmem:[%s9571_s1 + $0x544] sm:$0xf]  ;;  %2400 = vmatpush.bf16.msra.mxu0 %v5075_v16  ;;  %v6652_v32 = vld [vmem:[%s9571_s1 + $0x2a4] sm:$0xf0]  ;;  %v6569_v33 = vld [vmem:[%s9571_s1 + $0x14] sm:$0xf] }
   0x9   :  { %v5759_v30 = vor.u32 %v6735_v27, %v5756_v28  ;;  %2414 = vmatpush.bf16.msra.mxu1 %v5079_v17  ;;  %2428 = vmatpush.bf16.msra.mxu2 %v5083_v21  ;;  %v5092_v34 = vld [vmem:[%s9571_s1 + $0x2a8] sm:$0xf0]  ;;  %v5762_v35 = vld [vmem:[%s9571_s1 + $0x548] sm:$0xf]  ;;  %v6819_v36 = vld [vmem:[%s9571_s1 + $0x7dc] sm:$0xf0]  ;;  %v5091_v37 = vor.u32 %v6652_v32, %v5090_v31 }
   0xa   :  { %2442 = vmatpush.bf16.msra.mxu3 %v5087_v25  ;;  %v5763_v38 = vor.u32 %v6819_v36, %v5762_v35  ;;  %v6736_v39 = vld [vmem:[%s9571_s1 + $0x54c] sm:$0xf]  ;;  %v5764_v40 = vld [vmem:[%s9571_s1 + $0x7e0] sm:$0xf0]  ;;  %v5098_v41 = vld [vmem:[%s9571_s1 + $0x18] sm:$0xf]  ;;  %v5095_v42 = vor.u32 %v6569_v33, %v5092_v34 }
   0xb   :  { %6400 = vmatmul.msk.bf16.vlgmr.msra.gmra.mxu0 %vm2389_vm0, %v7006_v23  ;;  %v5767_v43 = vor.u32 %v6736_v39, %v5764_v40  ;;  %v6653_v44 = vld [vmem:[%s9571_s1 + $0x2ac] sm:$0xf0]  ;;  %v6570_v45 = vld [vmem:[%s9571_s1 + $0x1c] sm:$0xf]  ;;  %v5100_v46 = vld [vmem:[%s9571_s1 + $0x2b0] sm:$0xf0] }
   0xc   :  { %2455 = vmatpush.bf16.msrb.mxu0 %v5755_v29  ;;  %6401 = vmatmul.msk.bf16.vlgmr.msra.gmra.mxu1 %vm2389_vm0, %v7006_v23  ;;  %v5770_v47 = vld [vmem:[%s9571_s1 + $0x550] sm:$0xf]  ;;  %v6820_v48 = vld [vmem:[%s9571_s1 + $0x7e4] sm:$0xf0]  ;;  %v6737_v49 = vld [vmem:[%s9571_s1 + $0x554] sm:$0xf]  ;;  %v5099_v50 = vor.u32 %v6653_v44, %v5098_v41  ;;  %v5103_v55 = vor.u32 %v6570_v45, %v5100_v46 }
   0xd   :  { %2469 = vmatpush.bf16.msrb.mxu1 %v5759_v30  ;;  %6402 = vmatmul.msk.bf16.vlgmr.msra.gmra.mxu2 %vm2389_vm0, %v7006_v23  ;;  %v5771_v51 = vor.u32 %v6820_v48, %v5770_v47  ;;  %v5772_v52 = vld [vmem:[%s9571_s1 + $0x7e8] sm:$0xf0]  ;;  %v5106_v53 = vld [vmem:[%s9571_s1 + $0x20] sm:$0xf]  ;;  %v6654_v54 = vld [vmem:[%s9571_s1 + $0x2b4] sm:$0xf0] }
   0xe   :  { %6403 = vmatmul.msk.bf16.vlgmr.msra.gmra.mxu3 %vm2389_vm0, %v7006_v23  ;;  %2483 = vmatpush.bf16.msrb.mxu2 %v5763_v38  ;;  %v5775_v56 = vor.u32 %v6737_v49, %v5772_v52  ;;  %v6571_v57 = vld [vmem:[%s9571_s1 + $0x24] sm:$0xf]  ;;  %v5108_v58 = vld [vmem:[%s9571_s1 + $0x2b8] sm:$0xf0]  ;;  %v5778_v59 = vld [vmem:[%s9571_s1 + $0x558] sm:$0xf]  ;;  %v5107_v60 = vor.u32 %v6654_v54, %v5106_v53 }
   0xf   :  { %2497 = vmatpush.bf16.msrb.mxu3 %v5767_v43  ;;  %v6821_v61 = vld [vmem:[%s9571_s1 + $0x7ec] sm:$0xf0]  ;;  %v6738_v62 = vld [vmem:[%s9571_s1 + $0x55c] sm:$0xf]  ;;  %v5780_v63 = vld [vmem:[%s9571_s1 + $0x7f0] sm:$0xf0]  ;;  %v5111_v0 = vor.u32 %v6571_v57, %v5108_v58 }
  0x10   :  { %2456 = vmatpush.bf16.msrb.mxu0 %v5091_v37  ;;  %v5779_v1 = vor.u32 %v6821_v61, %v5778_v59  ;;  %v5783_v2 = vor.u32 %v6738_v62, %v5780_v63  ;;  %v5114_v3 = vld [vmem:[%s9571_s1 + $0x28] sm:$0xf]  ;;  %v6655_v4 = vld [vmem:[%s9571_s1 + $0x2bc] sm:$0xf0]  ;;  %v6572_v5 = vld [vmem:[%s9571_s1 + $0x2c] sm:$0xf] }
  0x11   :  { %2470 = vmatpush.bf16.msrb.mxu1 %v5095_v42  ;;  %v5116_v6 = vld [vmem:[%s9571_s1 + $0x2c0] sm:$0xf0]  ;;  %v5115_v7 = vor.u32 %v6655_v4, %v5114_v3  ;;  %v5786_v9 = vld [vmem:[%s9571_s1 + $0x560] sm:$0xf]  ;;  %v6822_v10 = vld [vmem:[%s9571_s1 + $0x7f4] sm:$0xf0] }
  0x12   :  { %2484 = vmatpush.bf16.msrb.mxu2 %v5099_v50  ;;  %v5119_v8 = vor.u32 %v6572_v5, %v5116_v6  ;;  %v6739_v11 = vld [vmem:[%s9571_s1 + $0x564] sm:$0xf] }
  0x13   :  { %2498 = vmatpush.bf16.msrb.mxu3 %v5103_v55 }
  0x14   :  { %2511 = vmatpush.bf16.msra.mxu0 %v5771_v51 }
  0x15   :  { %2525 = vmatpush.bf16.msra.mxu1 %v5775_v56 }
  0x16   :  { %2539 = vmatpush.bf16.msra.mxu2 %v5779_v1 }
  0x17   :  { %2553 = vmatpush.bf16.msra.mxu3 %v5783_v2 }
  0x18   :  { %2512 = vmatpush.bf16.msra.mxu0 %v5107_v60 }
  0x19   :  { %2526 = vmatpush.bf16.msra.mxu1 %v5111_v0 }
  0x1a   :  { %2540 = vmatpush.bf16.msra.mxu2 %v5115_v7 }
  0x1b   :  { %8 = vsyncpa [#allocation3], 0  ;;  %2554 = vmatpush.bf16.msra.mxu3 %v5119_v8  ;;  %v5788_v12 = vld [vmem:[%s9571_s1 + $0x7f8] sm:$0xf0]  ;;  %v5794_v13 = vld [vmem:[%s9571_s1 + $0x568] sm:$0xf]  ;;  %v5787_v17 = vor.u32 %v6822_v10, %v5786_v9  ;;  %6404 = vmatmul.msk.bf16.vlgmr.msrb.gmra.mxu0 %vm2389_vm0, %v7006_v23 }
  0x1c   :  { %v6823_v14 = vld [vmem:[%s9571_s1 + $0x7fc] sm:$0xf0]  ;;  %v6740_v15 = vld [vmem:[%s9571_s1 + $0x56c] sm:$0xf]  ;;  %v5796_v16 = vld [vmem:[%s9571_s1 + $0x800] sm:$0xf0]  ;;  %v5791_v18 = vor.u32 %v6739_v11, %v5788_v12  ;;  %6405 = vmatmul.msk.bf16.vlgmr.msrb.gmra.mxu1 %vm2389_vm0, %v7006_v23 }
  0x1d   :  { %v5122_v19 = vld [vmem:[%s9571_s1 + $0x30] sm:$0xf]  ;;  %v6656_v20 = vld [vmem:[%s9571_s1 + $0x2c4] sm:$0xf0]  ;;  %v6573_v21 = vld [vmem:[%s9571_s1 + $0x34] sm:$0xf]  ;;  %v5795_v22 = vor.u32 %v6823_v14, %v5794_v13  ;;  %v5799_v25 = vor.u32 %v6740_v15, %v5796_v16  ;;  %6406 = vmatmul.msk.bf16.vlgmr.msrb.gmra.mxu2 %vm2389_vm0, %v7006_v23  ;;  %2567 = vmatpush.bf16.msrb.mxu0 %v5787_v17 }
  0x1e   :  { %v5124_v24 = vld [vmem:[%s9571_s1 + $0x2c8] sm:$0xf0]  ;;  %v5130_v26 = vld [vmem:[%s9571_s1 + $0x38] sm:$0xf]  ;;  %v6657_v27 = vld [vmem:[%s9571_s1 + $0x2cc] sm:$0xf0]  ;;  %6407 = vmatmul.msk.bf16.vlgmr.msrb.gmra.mxu3 %vm2389_vm0, %v7006_v23  ;;  %v5123_v30 = vor.u32 %v6656_v20, %v5122_v19  ;;  %2581 = vmatpush.bf16.msrb.mxu1 %v5791_v18 }
  0x1f   :  { %v6574_v28 = vld [vmem:[%s9571_s1 + $0x3c] sm:$0xf]  ;;  %v5132_v29 = vld [vmem:[%s9571_s1 + $0x2d0] sm:$0xf0]  ;;  %v5127_v31 = vor.u32 %v6573_v21, %v5124_v24  ;;  %2595 = vmatpush.bf16.msrb.mxu2 %v5795_v22  ;;  %v5131_v32 = vor.u32 %v6657_v27, %v5130_v26  ;;  %2609 = vmatpush.bf16.msrb.mxu3 %v5799_v25  ;;  %v5802_v34 = vld [vmem:[%s9571_s1 + $0x570] sm:$0xf] }
  0x20   :  { %v5135_v33 = vor.u32 %v6574_v28, %v5132_v29  ;;  %v6824_v35 = vld [vmem:[%s9571_s1 + $0x804] sm:$0xf0]  ;;  %v6741_v36 = vld [vmem:[%s9571_s1 + $0x574] sm:$0xf]  ;;  %v5804_v37 = vld [vmem:[%s9571_s1 + $0x808] sm:$0xf0] }
  0x21   :  { %2568 = vmatpush.bf16.msrb.mxu0 %v5123_v30  ;;  %v5810_v38 = vld [vmem:[%s9571_s1 + $0x578] sm:$0xf]  ;;  %v6825_v39 = vld [vmem:[%s9571_s1 + $0x80c] sm:$0xf0]  ;;  %v6742_v40 = vld [vmem:[%s9571_s1 + $0x57c] sm:$0xf]  ;;  %v5803_v42 = vor.u32 %v6824_v35, %v5802_v34  ;;  %v5807_v43 = vor.u32 %v6741_v36, %v5804_v37 }
  0x22   :  { %2582 = vmatpush.bf16.msrb.mxu1 %v5127_v31  ;;  %v5812_v41 = vld [vmem:[%s9571_s1 + $0x810] sm:$0xf0]  ;;  %v5138_v44 = vld [vmem:[%s9571_s1 + $0x40] sm:$0xf]  ;;  %v6658_v45 = vld [vmem:[%s9571_s1 + $0x2d4] sm:$0xf0]  ;;  %v5811_v47 = vor.u32 %v6825_v39, %v5810_v38 }
  0x23   :  { %2596 = vmatpush.bf16.msrb.mxu2 %v5131_v32  ;;  %2610 = vmatpush.bf16.msrb.mxu3 %v5135_v33  ;;  %v6575_v46 = vld [vmem:[%s9571_s1 + $0x44] sm:$0xf]  ;;  %v5140_v48 = vld [vmem:[%s9571_s1 + $0x2d8] sm:$0xf0]  ;;  %v5815_v49 = vor.u32 %v6742_v40, %v5812_v41  ;;  %v5146_v50 = vld [vmem:[%s9571_s1 + $0x48] sm:$0xf]  ;;  %v5139_v54 = vor.u32 %v6658_v45, %v5138_v44 }
  0x24   :  { %v6659_v51 = vld [vmem:[%s9571_s1 + $0x2dc] sm:$0xf0]  ;;  %v6576_v52 = vld [vmem:[%s9571_s1 + $0x4c] sm:$0xf]  ;;  %v5148_v53 = vld [vmem:[%s9571_s1 + $0x2e0] sm:$0xf0]  ;;  %v5143_v55 = vor.u32 %v6575_v46, %v5140_v48 }
  0x25   :  { %v5147_v56 = vor.u32 %v6659_v51, %v5146_v50  ;;  %v5151_v57 = vor.u32 %v6576_v52, %v5148_v53  ;;  %v5818_v58 = vld [vmem:[%s9571_s1 + $0x580] sm:$0xf]  ;;  %v6826_v59 = vld [vmem:[%s9571_s1 + $0x814] sm:$0xf0]  ;;  %v6743_v60 = vld [vmem:[%s9571_s1 + $0x584] sm:$0xf] }
  0x26   :  { %v5820_v61 = vld [vmem:[%s9571_s1 + $0x818] sm:$0xf0]  ;;  %v5826_v62 = vld [vmem:[%s9571_s1 + $0x588] sm:$0xf]  ;;  %v6827_v63 = vld [vmem:[%s9571_s1 + $0x81c] sm:$0xf0]  ;;  %v5819_v2 = vor.u32 %v6826_v59, %v5818_v58 }
  0x27   :  { %v6744_v0 = vld [vmem:[%s9571_s1 + $0x58c] sm:$0xf]  ;;  %v5828_v1 = vld [vmem:[%s9571_s1 + $0x820] sm:$0xf0]  ;;  %v5823_v3 = vor.u32 %v6743_v60, %v5820_v61  ;;  %v5154_v4 = vld [vmem:[%s9571_s1 + $0x50] sm:$0xf]  ;;  %v5827_v7 = vor.u32 %v6827_v63, %v5826_v62 }
  0x28   :  { %v6660_v5 = vld [vmem:[%s9571_s1 + $0x2e4] sm:$0xf0]  ;;  %v6577_v6 = vld [vmem:[%s9571_s1 + $0x54] sm:$0xf]  ;;  %v5156_v8 = vld [vmem:[%s9571_s1 + $0x2e8] sm:$0xf0]  ;;  %v5831_v9 = vor.u32 %v6744_v0, %v5828_v1 }
  0x29   :  { %v5162_v10 = vld [vmem:[%s9571_s1 + $0x58] sm:$0xf]  ;;  %v6661_v11 = vld [vmem:[%s9571_s1 + $0x2ec] sm:$0xf0]  ;;  %v6578_v12 = vld [vmem:[%s9571_s1 + $0x5c] sm:$0xf]  ;;  %v5155_v14 = vor.u32 %v6660_v5, %v5154_v4  ;;  %v5159_v15 = vor.u32 %v6577_v6, %v5156_v8 }
  0x2a   :  { %v5164_v13 = vld [vmem:[%s9571_s1 + $0x2f0] sm:$0xf0]  ;;  %v5163_v16 = vor.u32 %v6661_v11, %v5162_v10  ;;  %v5834_v18 = vld [vmem:[%s9571_s1 + $0x590] sm:$0xf]  ;;  %v6828_v19 = vld [vmem:[%s9571_s1 + $0x824] sm:$0xf0] }
  0x2b   :  { %6408 = vmatmul.msk.bf16.vlgmr.msra.gmra.mxu0 %vm2389_vm0, %v7006_v23  ;;  %v5167_v17 = vor.u32 %v6578_v12, %v5164_v13  ;;  %v6745_v20 = vld [vmem:[%s9571_s1 + $0x594] sm:$0xf]  ;;  %v5836_v21 = vld [vmem:[%s9571_s1 + $0x828] sm:$0xf0]  ;;  %v5842_v22 = vld [vmem:[%s9571_s1 + $0x598] sm:$0xf]  ;;  %v5835_v27 = vor.u32 %v6828_v19, %v5834_v18 }
  0x2c   :  { %6409 = vmatmul.msk.bf16.vlgmr.msra.gmra.mxu1 %vm2389_vm0, %v7006_v23  ;;  %2623 = vmatpush.bf16.msra.mxu0 %v5803_v42  ;;  %v6829_v24 = vld [vmem:[%s9571_s1 + $0x82c] sm:$0xf0]  ;;  %v6746_v25 = vld [vmem:[%s9571_s1 + $0x59c] sm:$0xf]  ;;  %v5844_v26 = vld [vmem:[%s9571_s1 + $0x830] sm:$0xf0]  ;;  %v5839_v28 = vor.u32 %v6745_v20, %v5836_v21 }
  0x2d   :  { %6410 = vmatmul.msk.bf16.vlgmr.msra.gmra.mxu2 %vm2389_vm0, %v7006_v23  ;;  %2637 = vmatpush.bf16.msra.mxu1 %v5807_v43  ;;  %v5170_v29 = vld [vmem:[%s9571_s1 + $0x60] sm:$0xf]  ;;  %v6662_v30 = vld [vmem:[%s9571_s1 + $0x2f4] sm:$0xf0]  ;;  %v6579_v31 = vld [vmem:[%s9571_s1 + $0x64] sm:$0xf]  ;;  %v5843_v32 = vor.u32 %v6829_v24, %v5842_v22  ;;  %v5847_v34 = vor.u32 %v6746_v25, %v5844_v26 }
  0x2e   :  { %6411 = vmatmul.msk.bf16.vlgmr.msra.gmra.mxu3 %vm2389_vm0, %v7006_v23  ;;  %2651 = vmatpush.bf16.msra.mxu2 %v5811_v47  ;;  %v5172_v33 = vld [vmem:[%s9571_s1 + $0x2f8] sm:$0xf0]  ;;  %v5178_v35 = vld [vmem:[%s9571_s1 + $0x68] sm:$0xf]  ;;  %v6663_v36 = vld [vmem:[%s9571_s1 + $0x2fc] sm:$0xf0]  ;;  %v5171_v39 = vor.u32 %v6662_v30, %v5170_v29 }
  0x2f   :  { %2665 = vmatpush.bf16.msra.mxu3 %v5815_v49  ;;  %v6580_v37 = vld [vmem:[%s9571_s1 + $0x6c] sm:$0xf]  ;;  %v5180_v38 = vld [vmem:[%s9571_s1 + $0x300] sm:$0xf0]  ;;  %v5175_v40 = vor.u32 %v6579_v31, %v5172_v33  ;;  %v5179_v41 = vor.u32 %v6663_v36, %v5178_v35  ;;  %v5850_v43 = vld [vmem:[%s9571_s1 + $0x5a0] sm:$0xf] }
  0x30   :  { %2624 = vmatpush.bf16.msra.mxu0 %v5139_v54  ;;  %v5183_v42 = vor.u32 %v6580_v37, %v5180_v38  ;;  %v6830_v44 = vld [vmem:[%s9571_s1 + $0x834] sm:$0xf0]  ;;  %v6747_v45 = vld [vmem:[%s9571_s1 + $0x5a4] sm:$0xf]  ;;  %v5852_v46 = vld [vmem:[%s9571_s1 + $0x838] sm:$0xf0] }
  0x31   :  { %2638 = vmatpush.bf16.msra.mxu1 %v5143_v55  ;;  %v5858_v47 = vld [vmem:[%s9571_s1 + $0x5a8] sm:$0xf]  ;;  %v6831_v48 = vld [vmem:[%s9571_s1 + $0x83c] sm:$0xf0]  ;;  %v6748_v49 = vld [vmem:[%s9571_s1 + $0x5ac] sm:$0xf]  ;;  %v5851_v51 = vor.u32 %v6830_v44, %v5850_v43  ;;  %v5855_v52 = vor.u32 %v6747_v45, %v5852_v46 }
  0x32   :  { %2652 = vmatpush.bf16.msra.mxu2 %v5147_v56  ;;  %v5860_v50 = vld [vmem:[%s9571_s1 + $0x840] sm:$0xf0]  ;;  %v5186_v53 = vld [vmem:[%s9571_s1 + $0x70] sm:$0xf]  ;;  %v6664_v54 = vld [vmem:[%s9571_s1 + $0x304] sm:$0xf0]  ;;  %v5859_v56 = vor.u32 %v6831_v48, %v5858_v47 }
  0x33   :  { %2666 = vmatpush.bf16.msra.mxu3 %v5151_v57  ;;  %v6581_v55 = vld [vmem:[%s9571_s1 + $0x74] sm:$0xf]  ;;  %v5188_v57 = vld [vmem:[%s9571_s1 + $0x308] sm:$0xf0]  ;;  %v5863_v58 = vor.u32 %v6748_v49, %v5860_v50  ;;  %v5194_v59 = vld [vmem:[%s9571_s1 + $0x78] sm:$0xf]  ;;  %v5187_v63 = vor.u32 %v6664_v54, %v5186_v53 }
  0x34   :  { %v6665_v60 = vld [vmem:[%s9571_s1 + $0x30c] sm:$0xf0]  ;;  %v6582_v61 = vld [vmem:[%s9571_s1 + $0x7c] sm:$0xf]  ;;  %v5196_v62 = vld [vmem:[%s9571_s1 + $0x310] sm:$0xf0]  ;;  %v5191_v0 = vor.u32 %v6581_v55, %v5188_v57 }
  0x35   :  { %v5195_v1 = vor.u32 %v6665_v60, %v5194_v59  ;;  %v6832_v4 = vld [vmem:[%s9571_s1 + $0x844] sm:$0xf0]  ;;  %v6749_v5 = vld [vmem:[%s9571_s1 + $0x5b4] sm:$0xf]  ;;  %v5868_v6 = vld [vmem:[%s9571_s1 + $0x848] sm:$0xf0] }
  0x36   :  { %v6833_v8 = vld [vmem:[%s9571_s1 + $0x84c] sm:$0xf0]  ;;  %v5876_v10 = vld [vmem:[%s9571_s1 + $0x850] sm:$0xf0]  ;;  %v5871_v12 = vor.u32 %v6749_v5, %v5868_v6  ;;  %v5202_v13 = vld [vmem:[%s9571_s1 + $0x80] sm:$0xf] }
  0x37   :  { %v5210_v19 = vld [vmem:[%s9571_s1 + $0x88] sm:$0xf]  ;;  %v6667_v20 = vld [vmem:[%s9571_s1 + $0x31c] sm:$0xf0]  ;;  %v6584_v21 = vld [vmem:[%s9571_s1 + $0x8c] sm:$0xf] }
  0x38   :  { %v5212_v22 = vld [vmem:[%s9571_s1 + $0x320] sm:$0xf0]  ;;  %v5211_v26 = vor.u32 %v6667_v20, %v5210_v19  ;;  %v6834_v29 = vld [vmem:[%s9571_s1 + $0x854] sm:$0xf0]  ;;  %v5884_v31 = vld [vmem:[%s9571_s1 + $0x858] sm:$0xf0] }
  0x39   :  { %v6751_v30 = vld [vmem:[%s9571_s1 + $0x5c4] sm:$0xf]  ;;  %v6835_v33 = vld [vmem:[%s9571_s1 + $0x85c] sm:$0xf0]  ;;  %v5218_v38 = vld [vmem:[%s9571_s1 + $0x90] sm:$0xf] }
  0x3a   :  { %v5892_v35 = vld [vmem:[%s9571_s1 + $0x860] sm:$0xf0]  ;;  %v5887_v37 = vor.u32 %v6751_v30, %v5884_v31  ;;  %v5226_v44 = vld [vmem:[%s9571_s1 + $0x98] sm:$0xf]  ;;  %v6669_v45 = vld [vmem:[%s9571_s1 + $0x32c] sm:$0xf0] }
  0x3b   :  { %6412 = vmatmul.msk.bf16.vlgmr.msrb.gmra.mxu0 %vm2389_vm0, %v7006_v23  ;;  %v6586_v46 = vld [vmem:[%s9571_s1 + $0x9c] sm:$0xf]  ;;  %v5228_v47 = vld [vmem:[%s9571_s1 + $0x330] sm:$0xf0]  ;;  %v5227_v50 = vor.u32 %v6669_v45, %v5226_v44  ;;  %v5898_v55 = vld [vmem:[%s9571_s1 + $0x5d0] sm:$0xf] }
  0x3c   :  { %6413 = vmatmul.msk.bf16.vlgmr.msrb.gmra.mxu1 %vm2389_vm0, %v7006_v23  ;;  %2679 = vmatpush.bf16.msrb.mxu0 %v5819_v2  ;;  %v5199_v2 = vor.u32 %v6582_v61, %v5196_v62  ;;  %v6753_v57 = vld [vmem:[%s9571_s1 + $0x5d4] sm:$0xf]  ;;  %v5906_v59 = vld [vmem:[%s9571_s1 + $0x5d8] sm:$0xf]  ;;  %v6837_v60 = vld [vmem:[%s9571_s1 + $0x86c] sm:$0xf0] }
  0x3d   :  { %6414 = vmatmul.msk.bf16.vlgmr.msrb.gmra.mxu2 %vm2389_vm0, %v7006_v23  ;;  %2693 = vmatpush.bf16.msrb.mxu1 %v5823_v3  ;;  %v5866_v3 = vld [vmem:[%s9571_s1 + $0x5b0] sm:$0xf]  ;;  %v6754_v62 = vld [vmem:[%s9571_s1 + $0x5dc] sm:$0xf]  ;;  %v6670_v6 = vld [vmem:[%s9571_s1 + $0x334] sm:$0xf0] }
  0x3e   :  { %6415 = vmatmul.msk.bf16.vlgmr.msrb.gmra.mxu3 %vm2389_vm0, %v7006_v23  ;;  %2707 = vmatpush.bf16.msrb.mxu2 %v5827_v7  ;;  %v5874_v7 = vld [vmem:[%s9571_s1 + $0x5b8] sm:$0xf]  ;;  %v5867_v11 = vor.u32 %v6832_v4, %v5866_v3  ;;  %v5234_v3 = vld [vmem:[%s9571_s1 + $0xa0] sm:$0xf]  ;;  %vm4882_vm1 = vcmask 64512   ;;  %s5056_s12 = sshll.u32 %s9573_s3, 4  ;;  %s5057_s12 = int_to_ptr.hbm [resolvable:$true] %s5056_s12 }
  0x3f   :  { %2721 = vmatpush.bf16.msrb.mxu3 %v5831_v9  ;;  %v6750_v9 = vld [vmem:[%s9571_s1 + $0x5bc] sm:$0xf]  ;;  %s6933_s13 = smov 21248   ;;  %s6934_s14 = smov 1328  }
  0x40   :  { %2680 = vmatpush.bf16.msrb.mxu0 %v5155_v14  ;;  %v6666_v14 = vld [vmem:[%s9571_s1 + $0x314] sm:$0xf0]  ;;  %v5879_v18 = vor.u32 %v6750_v9, %v5876_v10  ;;  %v5907_v9 = vor.u32 %v6837_v60, %v5906_v59  ;;  %v6590_v60 = vld [vmem:[%s9571_s1 + $0xbc] sm:$0xf] }
  0x41   :  { %2694 = vmatpush.bf16.msrb.mxu1 %v5159_v15  ;;  %v6583_v15 = vld [vmem:[%s9571_s1 + $0x84] sm:$0xf]  ;;  %v5203_v24 = vor.u32 %v6666_v14, %v5202_v13  ;;  %v6588_v14 = vld [vmem:[%s9571_s1 + $0xac] sm:$0xf] }
  0x42   :  { %2708 = vmatpush.bf16.msrb.mxu2 %v5163_v16  ;;  %v5875_v16 = vor.u32 %v6833_v8, %v5874_v7  ;;  %v6587_v7 = vld [vmem:[%s9571_s1 + $0xa4] sm:$0xf]  ;;  %v5236_v8 = vld [vmem:[%s9571_s1 + $0x338] sm:$0xf0] }
  0x43   :  { %2722 = vmatpush.bf16.msrb.mxu3 %v5167_v17  ;;  %v5204_v17 = vld [vmem:[%s9571_s1 + $0x318] sm:$0xf0] }
  0x44   :  { %v5207_v25 = vor.u32 %v6583_v15, %v5204_v17  ;;  %v5244_v15 = vld [vmem:[%s9571_s1 + $0x340] sm:$0xf0]  ;;  %v5235_v17 = vor.u32 %v6670_v6, %v5234_v3 }
  0x4b   :  { %6416 = vmatmul.msk.bf16.vlgmr.msra.gmra.mxu0 %vm2389_vm0, %v7006_v23 }
  0x4c   :  { %6417 = vmatmul.msk.bf16.vlgmr.msra.gmra.mxu1 %vm2389_vm0, %v7006_v23  ;;  %2735 = vmatpush.bf16.msra.mxu0 %v5835_v27  ;;  %v5215_v27 = vor.u32 %v6584_v21, %v5212_v22  ;;  %v5247_v21 = vor.u32 %v6588_v14, %v5244_v15  ;;  %v6840_v14 = vld [vmem:[%s9571_s1 + $0x884] sm:$0xf0]  ;;  %v6757_v15 = vld [vmem:[%s9571_s1 + $0x5f4] sm:$0xf] }
  0x4d   :  { %6418 = vmatmul.msk.bf16.vlgmr.msra.gmra.mxu2 %vm2389_vm0, %v7006_v23  ;;  %2749 = vmatpush.bf16.msra.mxu1 %v5839_v28  ;;  %v5882_v28 = vld [vmem:[%s9571_s1 + $0x5c0] sm:$0xf] }
  0x4e   :  { %6419 = vmatmul.msk.bf16.vlgmr.msra.gmra.mxu3 %vm2389_vm0, %v7006_v23  ;;  %2763 = vmatpush.bf16.msra.mxu2 %v5843_v32  ;;  %v5890_v32 = vld [vmem:[%s9571_s1 + $0x5c8] sm:$0xf]  ;;  %v5883_v36 = vor.u32 %v6834_v29, %v5882_v28 }
  0x4f   :  { %2777 = vmatpush.bf16.msra.mxu3 %v5847_v34  ;;  %v6752_v34 = vld [vmem:[%s9571_s1 + $0x5cc] sm:$0xf] }
  0x50   :  { %2736 = vmatpush.bf16.msra.mxu0 %v5171_v39  ;;  %v6668_v39 = vld [vmem:[%s9571_s1 + $0x324] sm:$0xf0]  ;;  %v5895_v43 = vor.u32 %v6752_v34, %v5892_v35  ;;  %v6755_v34 = vld [vmem:[%s9571_s1 + $0x5e4] sm:$0xf] }
  0x51   :  { %2750 = vmatpush.bf16.msra.mxu1 %v5175_v40  ;;  %v6585_v40 = vld [vmem:[%s9571_s1 + $0x94] sm:$0xf]  ;;  %v5219_v48 = vor.u32 %v6668_v39, %v5218_v38  ;;  %v6839_v38 = vld [vmem:[%s9571_s1 + $0x87c] sm:$0xf0] }
  0x52   :  { %2764 = vmatpush.bf16.msra.mxu2 %v5179_v41  ;;  %v5891_v41 = vor.u32 %v6835_v33, %v5890_v32  ;;  %v5914_v32 = vld [vmem:[%s9571_s1 + $0x5e0] sm:$0xf]  ;;  %v6838_v33 = vld [vmem:[%s9571_s1 + $0x874] sm:$0xf0] }
  0x53   :  { %2778 = vmatpush.bf16.msra.mxu3 %v5183_v42  ;;  %v5220_v42 = vld [vmem:[%s9571_s1 + $0x328] sm:$0xf0] }
  0x54   :  { %v5223_v49 = vor.u32 %v6585_v40, %v5220_v42  ;;  %v6756_v42 = vld [vmem:[%s9571_s1 + $0x5ec] sm:$0xf] }
  0x5b   :  { %6420 = vmatmul.msk.bf16.vlgmr.msrb.gmra.mxu0 %vm2389_vm0, %v7006_v23 }
  0x5c   :  { %6421 = vmatmul.msk.bf16.vlgmr.msrb.gmra.mxu1 %vm2389_vm0, %v7006_v23  ;;  %2791 = vmatpush.bf16.msrb.mxu0 %v5851_v51  ;;  %v5231_v51 = vor.u32 %v6586_v46, %v5228_v47  ;;  %v5915_v47 = vor.u32 %v6838_v33, %v5914_v32 }
  0x5d   :  { %6422 = vmatmul.msk.bf16.vlgmr.msrb.gmra.mxu2 %vm2389_vm0, %v7006_v23  ;;  %2805 = vmatpush.bf16.msrb.mxu1 %v5855_v52  ;;  %v7507_v52 = vld [vmem:[%s9572_s2] sm:$0xff] }
  0x5e   :  { %6423 = vmatmul.msk.bf16.vlgmr.msrb.gmra.mxu3 %vm2389_vm0, %v7006_v23  ;;  %2819 = vmatpush.bf16.msrb.mxu2 %v5859_v56  ;;  %v392_v53 = vperm.slane %v7507_v52, 0  ;;  %v393_v54 = vperm.slane %v7507_v52, 1  ;;  %v6836_v56 = vld [vmem:[%s9571_s1 + $0x864] sm:$0xf0]  ;;  %v394_v13 = vperm.slane %v7507_v52, 2  ;;  %v396_v30 = vperm.slane %v7507_v52, 4 }
  0x5f   :  { %2833 = vmatpush.bf16.msrb.mxu3 %v5863_v58  ;;  %v5900_v58 = vld [vmem:[%s9571_s1 + $0x868] sm:$0xf0]  ;;  %v397_v31 = vperm.slane %v7507_v52, 5  ;;  %v398_v59 = vperm.slane %v7507_v52, 6 }
  0x60   :  { %2792 = vmatpush.bf16.msrb.mxu0 %v5187_v63  ;;  %v5908_v63 = vld [vmem:[%s9571_s1 + $0x870] sm:$0xf0]  ;;  %v5903_v5 = vor.u32 %v6753_v57, %v5900_v58  ;;  %v5258_v57 = vld [vmem:[%s9571_s1 + $0xb8] sm:$0xf]  ;;  %v6673_v58 = vld [vmem:[%s9571_s1 + $0x34c] sm:$0xf0] }
  0x61   :  { %2806 = vmatpush.bf16.msrb.mxu1 %v5191_v0  ;;  %v5911_v10 = vor.u32 %v6754_v62, %v5908_v63  ;;  %v399_v62 = vperm.slane %v7507_v52, 7 }
  0x62   :  { %2820 = vmatpush.bf16.msrb.mxu2 %v5195_v1 }
  0x63   :  { %2834 = vmatpush.bf16.msrb.mxu3 %v5199_v2  ;;  %v5899_v2 = vor.u32 %v6836_v56, %v5898_v55 }
  0x6b   :  { %6424 = vmatmul.msk.bf16.vlgmr.msra.gmra.mxu0 %vm2389_vm0, %v7006_v23 }
  0x6c   :  { %6425 = vmatmul.msk.bf16.vlgmr.msra.gmra.mxu1 %vm2389_vm0, %v7006_v23  ;;  %2847 = vmatpush.bf16.msra.mxu0 %v5867_v11  ;;  %v5242_v11 = vld [vmem:[%s9571_s1 + $0xa8] sm:$0xf] }
  0x6d   :  { %6426 = vmatmul.msk.bf16.vlgmr.msra.gmra.mxu2 %vm2389_vm0, %v7006_v23  ;;  %2861 = vmatpush.bf16.msra.mxu1 %v5871_v12  ;;  %v6671_v12 = vld [vmem:[%s9571_s1 + $0x33c] sm:$0xf0] }
  0x6e   :  { %6427 = vmatmul.msk.bf16.vlgmr.msra.gmra.mxu3 %vm2389_vm0, %v7006_v23  ;;  %2875 = vmatpush.bf16.msra.mxu2 %v5875_v16  ;;  %v395_v16 = vperm.slane %v7507_v52, 3  ;;  %v5243_v19 = vor.u32 %v6671_v12, %v5242_v11  ;;  %v7632_v52 = vld [vmem:[%s9572_s2 + $0x8] sm:$0xff] }
  0x6f   :  { %2889 = vmatpush.bf16.msra.mxu3 %v5879_v18  ;;  %v5239_v18 = vor.u32 %v6587_v7, %v5236_v8  ;;  %v400_v11 = vperm.slane %v7632_v52, 0  ;;  %v401_v12 = vperm.slane %v7632_v52, 1 }
  0x70   :  { %2848 = vmatpush.bf16.msra.mxu0 %v5203_v24 }
  0x71   :  { %2862 = vmatpush.bf16.msra.mxu1 %v5207_v25 }
  0x72   :  { %2876 = vmatpush.bf16.msra.mxu2 %v5211_v26 }
  0x73   :  { %2890 = vmatpush.bf16.msra.mxu3 %v5215_v27 }
  0x7b   :  { %6428 = vmatmul.msk.bf16.vlgmr.msrb.gmra.mxu0 %vm2389_vm0, %v7006_v23 }
  0x7c   :  { %6429 = vmatmul.msk.bf16.vlgmr.msrb.gmra.mxu1 %vm2389_vm0, %v7006_v23  ;;  %2903 = vmatpush.bf16.msrb.mxu0 %v5883_v36  ;;  %v5916_v36 = vld [vmem:[%s9571_s1 + $0x878] sm:$0xf0] }
  0x7d   :  { %6430 = vmatmul.msk.bf16.vlgmr.msrb.gmra.mxu2 %vm2389_vm0, %v7006_v23  ;;  %2917 = vmatpush.bf16.msrb.mxu1 %v5887_v37  ;;  %v5922_v37 = vld [vmem:[%s9571_s1 + $0x5e8] sm:$0xf] }
  0x7e   :  { %6431 = vmatmul.msk.bf16.vlgmr.msrb.gmra.mxu3 %vm2389_vm0, %v7006_v23  ;;  %2931 = vmatpush.bf16.msrb.mxu2 %v5891_v41  ;;  %v5923_v55 = vor.u32 %v6839_v38, %v5922_v37  ;;  %v5274_v38 = vld [vmem:[%s9571_s1 + $0xc8] sm:$0xf] }
  0x7f   :  { %2945 = vmatpush.bf16.msrb.mxu3 %v5895_v43  ;;  %v5924_v43 = vld [vmem:[%s9571_s1 + $0x880] sm:$0xf0] }
  0x80   :  { %2904 = vmatpush.bf16.msrb.mxu0 %v5219_v48  ;;  %v5250_v48 = vld [vmem:[%s9571_s1 + $0xb0] sm:$0xf]  ;;  %v5927_v56 = vor.u32 %v6756_v42, %v5924_v43  ;;  %v5276_v42 = vld [vmem:[%s9571_s1 + $0x360] sm:$0xf0]  ;;  %v403_v43 = vperm.slane %v7632_v52, 3 }
  0x81   :  { %2918 = vmatpush.bf16.msrb.mxu1 %v5223_v49  ;;  %v6672_v49 = vld [vmem:[%s9571_s1 + $0x344] sm:$0xf0] }
  0x82   :  { %2932 = vmatpush.bf16.msrb.mxu2 %v5227_v50  ;;  %v5251_v63 = vor.u32 %v6672_v49, %v5250_v48 }
  0x83   :  { %2946 = vmatpush.bf16.msrb.mxu3 %v5231_v51  ;;  %v5919_v51 = vor.u32 %v6755_v34, %v5916_v36  ;;  %v6591_v34 = vld [vmem:[%s9571_s1 + $0xc4] sm:$0xf] }
  0x88   :  { %v2402_v61 = vpop.f32.mrf.mxu0 }
  0x89   :  { %v2403_v0 = vadd.f32 %v2402_v61, %v392_v53  ;;  %v2416_v1 = vpop.f32.mrf.mxu1  ;;  %v5260_v61 = vld [vmem:[%s9571_s1 + $0x350] sm:$0xf0] }
  0x8a   :  { %v2417_v4 = vadd.f32 %v2416_v1, %v393_v54  ;;  %v5259_v1 = vor.u32 %v6673_v58, %v5258_v57  ;;  %v5263_v3 = vor.u32 %v6590_v60, %v5260_v61  ;;  %v405_v57 = vperm.slane %v7632_v52, 5  ;;  %v5946_v58 = vld [vmem:[%s9571_s1 + $0x600] sm:$0xf]  ;;  %v6759_v60 = vld [vmem:[%s9571_s1 + $0x604] sm:$0xf] }
  0x8b   :  { %4717 = vst [vmem:[#allocation2] sm:$0xff] %v2403_v0  ;;  %6432 = vmatmul.msk.bf16.vlgmr.msra.gmra.mxu0 %vm2389_vm0, %v7006_v23 }
  0x8c   :  { %4718 = vst [vmem:[#allocation2 + $0x8] sm:$0xff] %v2417_v4  ;;  %6433 = vmatmul.msk.bf16.vlgmr.msra.gmra.mxu1 %vm2389_vm0, %v7006_v23  ;;  %2959 = vmatpush.bf16.msra.mxu0 %v5899_v2 }
  0x8d   :  { %6434 = vmatmul.msk.bf16.vlgmr.msra.gmra.mxu2 %vm2389_vm0, %v7006_v23  ;;  %2973 = vmatpush.bf16.msra.mxu1 %v5903_v5 }
  0x8e   :  { %6435 = vmatmul.msk.bf16.vlgmr.msra.gmra.mxu3 %vm2389_vm0, %v7006_v23  ;;  %2987 = vmatpush.bf16.msra.mxu2 %v5907_v9 }
  0x8f   :  { %3001 = vmatpush.bf16.msra.mxu3 %v5911_v10 }
  0x90   :  { %v2430_v20 = vpop.f32.mrf.mxu2  ;;  %v2404_v22 = vpop.f32.mrf.mxu0  ;;  %2960 = vmatpush.bf16.msra.mxu0 %v5235_v17  ;;  %v5932_v17 = vld [vmem:[%s9571_s1 + $0x888] sm:$0xf0] }
  0x91   :  { %v2431_v24 = vadd.f32 %v2430_v20, %v394_v13  ;;  %v2444_v25 = vpop.f32.mrf.mxu3  ;;  %v2405_v26 = vadd.f32 %v2404_v22, %v392_v53  ;;  %v2418_v27 = vpop.f32.mrf.mxu1  ;;  %2974 = vmatpush.bf16.msra.mxu1 %v5239_v18  ;;  %v6589_v53 = vld [vmem:[%s9571_s1 + $0xb4] sm:$0xf]  ;;  %v5938_v18 = vld [vmem:[%s9571_s1 + $0x5f8] sm:$0xf]  ;;  %v5935_v33 = vor.u32 %v6757_v15, %v5932_v17  ;;  %v5284_v15 = vld [vmem:[%s9571_s1 + $0x368] sm:$0xf0] }
  0x92   :  { %v2445_v28 = vadd.f32 %v2444_v25, %v395_v16  ;;  %v2419_v29 = vadd.f32 %v2418_v27, %v393_v54  ;;  %2988 = vmatpush.bf16.msra.mxu2 %v5243_v19  ;;  %v5252_v54 = vld [vmem:[%s9571_s1 + $0x348] sm:$0xf0]  ;;  %v6841_v19 = vld [vmem:[%s9571_s1 + $0x88c] sm:$0xf0]  ;;  %v5940_v25 = vld [vmem:[%s9571_s1 + $0x890] sm:$0xf0] }
  0x93   :  { %4719 = vst [vmem:[#allocation2 + $0x10] sm:$0xff] %v2431_v24  ;;  %3002 = vmatpush.bf16.msra.mxu3 %v5247_v21  ;;  %v5255_v0 = vor.u32 %v6589_v53, %v5252_v54  ;;  %v6758_v24 = vld [vmem:[%s9571_s1 + $0x5fc] sm:$0xf]  ;;  %v5939_v36 = vor.u32 %v6841_v19, %v5938_v18  ;;  %v7735_v17 = vld [vmem:[%s9570_s0] sm:$0xff]  ;;  %v5290_v19 = vld [vmem:[%s9571_s1 + $0xd8] sm:$0xf] }
  0x94   :  { %4884 = vst [vmem:[#allocation2 + $0x530] sm:$0xff] %v2405_v26  ;;  %v5943_v37 = vor.u32 %v6758_v24, %v5940_v25  ;;  %v5292_v24 = vld [vmem:[%s9571_s1 + $0x370] sm:$0xf0]  ;;  %v407_v25 = vperm.slane %v7632_v52, 7 }
  0x95   :  { %4885 = vst [vmem:[#allocation2 + $0x538] sm:$0xff] %v2419_v29 }
  0x96   :  { %4720 = vst [vmem:[#allocation2 + $0x18] sm:$0xff] %v2445_v28 }
  0x98   :  { %v2432_v35 = vpop.f32.mrf.mxu2  ;;  %v2458_v41 = vpop.f32.mrf.mxu0 }
  0x99   :  { %v2433_v39 = vadd.f32 %v2432_v35, %v394_v13  ;;  %v2446_v40 = vpop.f32.mrf.mxu3  ;;  %v2459_v45 = vadd.f32 %v2458_v41, %v396_v30  ;;  %v2472_v46 = vpop.f32.mrf.mxu1  ;;  %v5930_v13 = vld [vmem:[%s9571_s1 + $0x5f0] sm:$0xf]  ;;  %v5268_v35 = vld [vmem:[%s9571_s1 + $0x358] sm:$0xf0]  ;;  %v6592_v41 = vld [vmem:[%s9571_s1 + $0xcc] sm:$0xf] }
  0x9a   :  { %v2447_v44 = vadd.f32 %v2446_v40, %v395_v16  ;;  %v2473_v50 = vadd.f32 %v2472_v46, %v397_v31  ;;  %v5931_v29 = vor.u32 %v6840_v14, %v5930_v13  ;;  %v402_v40 = vperm.slane %v7632_v52, 2  ;;  %v6593_v14 = vld [vmem:[%s9571_s1 + $0xd4] sm:$0xf] }
  0x9b   :  { %4886 = vst [vmem:[#allocation2 + $0x540] sm:$0xff] %v2433_v39  ;;  %6436 = vmatmul.msk.bf16.vlgmr.msrb.gmra.mxu0 %vm2389_vm0, %v7006_v23  ;;  %v6675_v39 = vld [vmem:[%s9571_s1 + $0x35c] sm:$0xf0]  ;;  %v5279_v48 = vor.u32 %v6592_v41, %v5276_v42  ;;  %v6844_v41 = vld [vmem:[%s9571_s1 + $0x8a4] sm:$0xf0] }
  0x9c   :  { %4887 = vst [vmem:[#allocation2 + $0x548] sm:$0xff] %v2447_v44  ;;  %6437 = vmatmul.msk.bf16.vlgmr.msrb.gmra.mxu1 %vm2389_vm0, %v7006_v23  ;;  %3015 = vmatpush.bf16.msrb.mxu0 %v5915_v47  ;;  %v5275_v46 = vor.u32 %v6675_v39, %v5274_v38  ;;  %v6761_v42 = vld [vmem:[%s9571_s1 + $0x614] sm:$0xf] }
  0x9d   :  { %4721 = vst [vmem:[#allocation2 + $0x20] sm:$0xff] %v2459_v45  ;;  %6438 = vmatmul.msk.bf16.vlgmr.msrb.gmra.mxu2 %vm2389_vm0, %v7006_v23  ;;  %3029 = vmatpush.bf16.msrb.mxu1 %v5919_v51  ;;  %v5271_v45 = vor.u32 %v6591_v34, %v5268_v35 }
  0x9e   :  { %4722 = vst [vmem:[#allocation2 + $0x28] sm:$0xff] %v2473_v50  ;;  %6439 = vmatmul.msk.bf16.vlgmr.msrb.gmra.mxu3 %vm2389_vm0, %v7006_v23  ;;  %3043 = vmatpush.bf16.msrb.mxu2 %v5923_v55 }
  0x9f   :  { %3057 = vmatpush.bf16.msrb.mxu3 %v5927_v56 }
  0xa0   :  { %v2486_v2 = vpop.f32.mrf.mxu2  ;;  %v2460_v4 = vpop.f32.mrf.mxu0  ;;  %3016 = vmatpush.bf16.msrb.mxu0 %v5251_v63  ;;  %v5954_v63 = vld [vmem:[%s9571_s1 + $0x608] sm:$0xf] }
  0xa1   :  { %v2487_v5 = vadd.f32 %v2486_v2, %v398_v59  ;;  %v2500_v6 = vpop.f32.mrf.mxu3  ;;  %v2461_v7 = vadd.f32 %v2460_v4, %v396_v30  ;;  %v2474_v8 = vpop.f32.mrf.mxu1  ;;  %3030 = vmatpush.bf16.msrb.mxu1 %v5255_v0  ;;  %v5266_v30 = vld [vmem:[%s9571_s1 + $0xc0] sm:$0xf]  ;;  %v6760_v4 = vld [vmem:[%s9571_s1 + $0x60c] sm:$0xf] }
  0xa2   :  { %v2501_v9 = vadd.f32 %v2500_v6, %v399_v62  ;;  %v2475_v10 = vadd.f32 %v2474_v8, %v397_v31  ;;  %3044 = vmatpush.bf16.msrb.mxu2 %v5259_v1  ;;  %v6674_v31 = vld [vmem:[%s9571_s1 + $0x354] sm:$0xf0]  ;;  %v6843_v0 = vld [vmem:[%s9571_s1 + $0x89c] sm:$0xf0] }
  0xa3   :  { %4723 = vst [vmem:[#allocation2 + $0x30] sm:$0xff] %v2487_v5  ;;  %3058 = vmatpush.bf16.msrb.mxu3 %v5263_v3  ;;  %v5267_v44 = vor.u32 %v6674_v31, %v5266_v30  ;;  %v5956_v5 = vld [vmem:[%s9571_s1 + $0x8a0] sm:$0xf0] }
  0xa4   :  { %4888 = vst [vmem:[#allocation2 + $0x550] sm:$0xff] %v2461_v7  ;;  %v5959_v18 = vor.u32 %v6760_v4, %v5956_v5  ;;  %v5308_v4 = vld [vmem:[%s9571_s1 + $0x380] sm:$0xf0] }
  0xa5   :  { %4889 = vst [vmem:[#allocation2 + $0x558] sm:$0xff] %v2475_v10  ;;  %v5282_v10 = vld [vmem:[%s9571_s1 + $0xd0] sm:$0xf] }
  0xa6   :  { %4724 = vst [vmem:[#allocation2 + $0x38] sm:$0xff] %v2501_v9 }
  0xa8   :  { %v2488_v16 = vpop.f32.mrf.mxu2  ;;  %v2514_v22 = vpop.f32.mrf.mxu0 }
  0xa9   :  { %v2489_v20 = vadd.f32 %v2488_v16, %v398_v59  ;;  %v2502_v21 = vpop.f32.mrf.mxu3  ;;  %v2515_v27 = vadd.f32 %v2514_v22, %v400_v11  ;;  %v2528_v28 = vpop.f32.mrf.mxu1  ;;  %v6842_v59 = vld [vmem:[%s9571_s1 + $0x894] sm:$0xf0]  ;;  %v5955_v16 = vor.u32 %v6843_v0, %v5954_v63  ;;  %v6594_v22 = vld [vmem:[%s9571_s1 + $0xdc] sm:$0xf]  ;;  %v5306_v0 = vld [vmem:[%s9571_s1 + $0xe8] sm:$0xf] }
  0xaa   :  { %v2503_v26 = vadd.f32 %v2502_v21, %v399_v62  ;;  %v2529_v32 = vadd.f32 %v2528_v28, %v401_v12  ;;  %v5948_v62 = vld [vmem:[%s9571_s1 + $0x898] sm:$0xf0]  ;;  %v5947_v9 = vor.u32 %v6842_v59, %v5946_v58  ;;  %v406_v21 = vperm.slane %v7632_v52, 6 }
  0xab   :  { %4890 = vst [vmem:[#allocation2 + $0x560] sm:$0xff] %v2489_v20  ;;  %6440 = vmatmul.msk.bf16.vlgmr.msra.gmra.mxu0 %vm2389_vm0, %v7006_v23  ;;  %v5951_v13 = vor.u32 %v6759_v60, %v5948_v62  ;;  %v6677_v20 = vld [vmem:[%s9571_s1 + $0x36c] sm:$0xf0]  ;;  %v5295_v30 = vor.u32 %v6594_v22, %v5292_v24  ;;  %v6595_v60 = vld [vmem:[%s9571_s1 + $0xe4] sm:$0xf] }
  0xac   :  { %4891 = vst [vmem:[#allocation2 + $0x568] sm:$0xff] %v2503_v26  ;;  %6441 = vmatmul.msk.bf16.vlgmr.msra.gmra.mxu1 %vm2389_vm0, %v7006_v23  ;;  %3071 = vmatpush.bf16.msra.mxu0 %v5931_v29  ;;  %v5291_v28 = vor.u32 %v6677_v20, %v5290_v19  ;;  %v6846_v22 = vld [vmem:[%s9571_s1 + $0x8b4] sm:$0xf0]  ;;  %v6763_v24 = vld [vmem:[%s9571_s1 + $0x624] sm:$0xf] }
  0xad   :  { %4725 = vst [vmem:[#allocation2 + $0x40] sm:$0xff] %v2515_v27  ;;  %6442 = vmatmul.msk.bf16.vlgmr.msra.gmra.mxu2 %vm2389_vm0, %v7006_v23  ;;  %3085 = vmatpush.bf16.msra.mxu1 %v5935_v33  ;;  %v5287_v27 = vor.u32 %v6593_v14, %v5284_v15 }
  0xae   :  { %4726 = vst [vmem:[#allocation2 + $0x48] sm:$0xff] %v2529_v32  ;;  %6443 = vmatmul.msk.bf16.vlgmr.msra.gmra.mxu3 %vm2389_vm0, %v7006_v23  ;;  %3099 = vmatpush.bf16.msra.mxu2 %v5939_v36  ;;  %v404_v23 = vperm.slane %v7632_v52, 4  ;;  %v7762_v52 = vld [vmem:[%s9572_s2 + $0x10] sm:$0xff] }
  0xaf   :  { %3113 = vmatpush.bf16.msra.mxu3 %v5943_v37  ;;  %v408_v38 = vperm.slane %v7762_v52, 0  ;;  %v409_v39 = vperm.slane %v7762_v52, 1  ;;  %v411_v5 = vperm.slane %v7762_v52, 3  ;;  %v412_v19 = vperm.slane %v7762_v52, 4 }
  0xb0   :  { %v2542_v47 = vpop.f32.mrf.mxu2  ;;  %v2516_v49 = vpop.f32.mrf.mxu0  ;;  %3072 = vmatpush.bf16.msra.mxu0 %v5267_v44  ;;  %v5964_v44 = vld [vmem:[%s9571_s1 + $0x8a8] sm:$0xf0]  ;;  %v413_v20 = vperm.slane %v7762_v52, 5 }
  0xb1   :  { %v2543_v50 = vadd.f32 %v2542_v47, %v402_v40  ;;  %v2556_v51 = vpop.f32.mrf.mxu3  ;;  %v2517_v53 = vadd.f32 %v2516_v49, %v400_v11  ;;  %v2530_v54 = vpop.f32.mrf.mxu1  ;;  %3086 = vmatpush.bf16.msra.mxu1 %v5271_v45  ;;  %v6676_v11 = vld [vmem:[%s9571_s1 + $0x364] sm:$0xf0]  ;;  %v5970_v45 = vld [vmem:[%s9571_s1 + $0x618] sm:$0xf]  ;;  %v5967_v59 = vor.u32 %v6761_v42, %v5964_v44  ;;  %v6597_v42 = vld [vmem:[%s9571_s1 + $0xf4] sm:$0xf] }
  0xb2   :  { %v2557_v55 = vadd.f32 %v2556_v51, %v403_v43  ;;  %v2531_v56 = vadd.f32 %v2530_v54, %v401_v12  ;;  %3100 = vmatpush.bf16.msra.mxu2 %v5275_v46  ;;  %v5283_v26 = vor.u32 %v6676_v11, %v5282_v10  ;;  %v6845_v46 = vld [vmem:[%s9571_s1 + $0x8ac] sm:$0xf0]  ;;  %v5972_v51 = vld [vmem:[%s9571_s1 + $0x8b0] sm:$0xf0] }
  0xb3   :  { %4727 = vst [vmem:[#allocation2 + $0x50] sm:$0xff] %v2543_v50  ;;  %3114 = vmatpush.bf16.msra.mxu3 %v5279_v48  ;;  %v6762_v50 = vld [vmem:[%s9571_s1 + $0x61c] sm:$0xf]  ;;  %v5971_v62 = vor.u32 %v6845_v46, %v5970_v45  ;;  %v5322_v46 = vld [vmem:[%s9571_s1 + $0xf8] sm:$0xf] }
  0xb4   :  { %4892 = vst [vmem:[#allocation2 + $0x570] sm:$0xff] %v2517_v53  ;;  %v5975_v63 = vor.u32 %v6762_v50, %v5972_v51  ;;  %v5324_v50 = vld [vmem:[%s9571_s1 + $0x390] sm:$0xf0]  ;;  %v415_v51 = vperm.slane %v7762_v52, 7 }
  0xb5   :  { %4893 = vst [vmem:[#allocation2 + $0x578] sm:$0xff] %v2531_v56 }
  0xb6   :  { %4728 = vst [vmem:[#allocation2 + $0x58] sm:$0xff] %v2557_v55 }
  0xb8   :  { %v2544_v61 = vpop.f32.mrf.mxu2  ;;  %v2570_v3 = vpop.f32.mrf.mxu0 }
  0xb9   :  { %v2545_v1 = vadd.f32 %v2544_v61, %v402_v40  ;;  %v2558_v2 = vpop.f32.mrf.mxu3  ;;  %v2571_v7 = vadd.f32 %v2570_v3, %v404_v23  ;;  %v2584_v8 = vpop.f32.mrf.mxu1  ;;  %v5962_v40 = vld [vmem:[%s9571_s1 + $0x610] sm:$0xf]  ;;  %v5300_v61 = vld [vmem:[%s9571_s1 + $0x378] sm:$0xf0]  ;;  %v6596_v3 = vld [vmem:[%s9571_s1 + $0xec] sm:$0xf] }
  0xba   :  { %v2559_v6 = vadd.f32 %v2558_v2, %v403_v43  ;;  %v2585_v12 = vadd.f32 %v2584_v8, %v405_v57  ;;  %v5963_v56 = vor.u32 %v6844_v41, %v5962_v40  ;;  %v410_v2 = vperm.slane %v7762_v52, 2 }
  0xbb   :  { %4894 = vst [vmem:[#allocation2 + $0x580] sm:$0xff] %v2545_v1  ;;  %6444 = vmatmul.msk.bf16.vlgmr.msrb.gmra.mxu0 %vm2389_vm0, %v7735_v17  ;;  %v6679_v1 = vld [vmem:[%s9571_s1 + $0x37c] sm:$0xf0]  ;;  %v5311_v10 = vor.u32 %v6596_v3, %v5308_v4  ;;  %v6848_v3 = vld [vmem:[%s9571_s1 + $0x8c4] sm:$0xf0] }
  0xbc   :  { %4895 = vst [vmem:[#allocation2 + $0x588] sm:$0xff] %v2559_v6  ;;  %6445 = vmatmul.msk.bf16.vlgmr.msrb.gmra.mxu1 %vm2389_vm0, %v7735_v17  ;;  %3127 = vmatpush.bf16.msrb.mxu0 %v5947_v9  ;;  %v5307_v8 = vor.u32 %v6679_v1, %v5306_v0  ;;  %v6765_v4 = vld [vmem:[%s9571_s1 + $0x634] sm:$0xf] }
  0xbd   :  { %4729 = vst [vmem:[#allocation2 + $0x60] sm:$0xff] %v2571_v7  ;;  %6446 = vmatmul.msk.bf16.vlgmr.msrb.gmra.mxu2 %vm2389_vm0, %v7735_v17  ;;  %3141 = vmatpush.bf16.msrb.mxu1 %v5951_v13  ;;  %v5303_v7 = vor.u32 %v6595_v60, %v5300_v61 }
  0xbe   :  { %4730 = vst [vmem:[#allocation2 + $0x68] sm:$0xff] %v2585_v12  ;;  %6447 = vmatmul.msk.bf16.vlgmr.msrb.gmra.mxu3 %vm2389_vm0, %v7735_v17  ;;  %3155 = vmatpush.bf16.msrb.mxu2 %v5955_v16 }
  0xbf   :  { %3169 = vmatpush.bf16.msrb.mxu3 %v5959_v18 }
  0xc0   :  { %v2598_v29 = vpop.f32.mrf.mxu2  ;;  %v2572_v31 = vpop.f32.mrf.mxu0  ;;  %3128 = vmatpush.bf16.msrb.mxu0 %v5283_v26  ;;  %v5980_v26 = vld [vmem:[%s9571_s1 + $0x8b8] sm:$0xf0] }
  0xc1   :  { %v2599_v32 = vadd.f32 %v2598_v29, %v406_v21  ;;  %v2612_v33 = vpop.f32.mrf.mxu3  ;;  %v2573_v34 = vadd.f32 %v2572_v31, %v404_v23  ;;  %v2586_v35 = vpop.f32.mrf.mxu1  ;;  %3142 = vmatpush.bf16.msrb.mxu1 %v5287_v27  ;;  %v5298_v23 = vld [vmem:[%s9571_s1 + $0xe0] sm:$0xf]  ;;  %v5986_v27 = vld [vmem:[%s9571_s1 + $0x628] sm:$0xf]  ;;  %v5983_v41 = vor.u32 %v6763_v24, %v5980_v26  ;;  %v6599_v24 = vld [vmem:[%s9571_s1 + $0x104] sm:$0xf] }
  0xc2   :  { %v2613_v36 = vadd.f32 %v2612_v33, %v407_v25  ;;  %v2587_v37 = vadd.f32 %v2586_v35, %v405_v57  ;;  %3156 = vmatpush.bf16.msrb.mxu2 %v5291_v28  ;;  %v6678_v57 = vld [vmem:[%s9571_s1 + $0x374] sm:$0xf0]  ;;  %v6847_v28 = vld [vmem:[%s9571_s1 + $0x8bc] sm:$0xf0]  ;;  %v5988_v33 = vld [vmem:[%s9571_s1 + $0x8c0] sm:$0xf0] }
  0xc3   :  { %4731 = vst [vmem:[#allocation2 + $0x70] sm:$0xff] %v2599_v32  ;;  %3170 = vmatpush.bf16.msrb.mxu3 %v5295_v30  ;;  %v5299_v6 = vor.u32 %v6678_v57, %v5298_v23  ;;  %v6764_v32 = vld [vmem:[%s9571_s1 + $0x62c] sm:$0xf]  ;;  %v5987_v44 = vor.u32 %v6847_v28, %v5986_v27  ;;  %v5338_v28 = vld [vmem:[%s9571_s1 + $0x108] sm:$0xf] }
  0xc4   :  { %4896 = vst [vmem:[#allocation2 + $0x590] sm:$0xff] %v2573_v34  ;;  %v5991_v45 = vor.u32 %v6764_v32, %v5988_v33  ;;  %v5340_v32 = vld [vmem:[%s9571_s1 + $0x3a0] sm:$0xf0] }
  0xc5   :  { %4897 = vst [vmem:[#allocation2 + $0x598] sm:$0xff] %v2587_v37 }
  0xc6   :  { %4732 = vst [vmem:[#allocation2 + $0x78] sm:$0xff] %v2613_v36 }
  0xc8   :  { %v2600_v43 = vpop.f32.mrf.mxu2  ;;  %v2626_v49 = vpop.f32.mrf.mxu0 }
  0xc9   :  { %v2601_v47 = vadd.f32 %v2600_v43, %v406_v21  ;;  %v2614_v48 = vpop.f32.mrf.mxu3  ;;  %v2627_v54 = vadd.f32 %v2626_v49, %v408_v38  ;;  %v2640_v55 = vpop.f32.mrf.mxu1  ;;  %v5978_v21 = vld [vmem:[%s9571_s1 + $0x620] sm:$0xf]  ;;  %v5316_v43 = vld [vmem:[%s9571_s1 + $0x388] sm:$0xf0]  ;;  %v6598_v49 = vld [vmem:[%s9571_s1 + $0xfc] sm:$0xf] }
  0xca   :  { %v2615_v53 = vadd.f32 %v2614_v48, %v407_v25  ;;  %v2641_v58 = vadd.f32 %v2640_v55, %v409_v39  ;;  %v5979_v37 = vor.u32 %v6846_v22, %v5978_v21  ;;  %v414_v48 = vperm.slane %v7762_v52, 6  ;;  %v7887_v52 = vld [vmem:[%s9572_s2 + $0x18] sm:$0xff] }
  0xcb   :  { %4898 = vst [vmem:[#allocation2 + $0x5a0] sm:$0xff] %v2601_v47  ;;  %6448 = vmatmul.msk.bf16.vlgmr.msra.gmra.mxu0 %vm2389_vm0, %v7735_v17  ;;  %v6681_v47 = vld [vmem:[%s9571_s1 + $0x38c] sm:$0xf0]  ;;  %v5327_v23 = vor.u32 %v6598_v49, %v5324_v50  ;;  %v416_v0 = vperm.slane %v7887_v52, 0  ;;  %v417_v1 = vperm.slane %v7887_v52, 1  ;;  %v419_v33 = vperm.slane %v7887_v52, 3 }
  0xcc   :  { %4899 = vst [vmem:[#allocation2 + $0x5a8] sm:$0xff] %v2615_v53  ;;  %6449 = vmatmul.msk.bf16.vlgmr.msra.gmra.mxu1 %vm2389_vm0, %v7735_v17  ;;  %3183 = vmatpush.bf16.msra.mxu0 %v5963_v56  ;;  %v5323_v55 = vor.u32 %v6681_v47, %v5322_v46  ;;  %v420_v46 = vperm.slane %v7887_v52, 4  ;;  %v421_v47 = vperm.slane %v7887_v52, 5  ;;  %v6850_v49 = vld [vmem:[%s9571_s1 + $0x8d4] sm:$0xf0] }
  0xcd   :  { %4733 = vst [vmem:[#allocation2 + $0x80] sm:$0xff] %v2627_v54  ;;  %6450 = vmatmul.msk.bf16.vlgmr.msra.gmra.mxu2 %vm2389_vm0, %v7735_v17  ;;  %3197 = vmatpush.bf16.msra.mxu1 %v5967_v59  ;;  %v5319_v54 = vor.u32 %v6597_v42, %v5316_v43  ;;  %v6767_v50 = vld [vmem:[%s9571_s1 + $0x644] sm:$0xf] }
  0xce   :  { %4734 = vst [vmem:[#allocation2 + $0x88] sm:$0xff] %v2641_v58  ;;  %6451 = vmatmul.msk.bf16.vlgmr.msra.gmra.mxu3 %vm2389_vm0, %v7735_v17  ;;  %3211 = vmatpush.bf16.msra.mxu2 %v5971_v62 }
  0xcf   :  { %3225 = vmatpush.bf16.msra.mxu3 %v5975_v63 }
  0xd0   :  { %v2654_v9 = vpop.f32.mrf.mxu2  ;;  %v2628_v11 = vpop.f32.mrf.mxu0  ;;  %3184 = vmatpush.bf16.msra.mxu0 %v5299_v6  ;;  %v5996_v6 = vld [vmem:[%s9571_s1 + $0x8c8] sm:$0xf0] }
  0xd1   :  { %v2655_v12 = vadd.f32 %v2654_v9, %v410_v2  ;;  %v2668_v13 = vpop.f32.mrf.mxu3  ;;  %v2629_v14 = vadd.f32 %v2628_v11, %v408_v38  ;;  %v2642_v15 = vpop.f32.mrf.mxu1  ;;  %3198 = vmatpush.bf16.msra.mxu1 %v5303_v7  ;;  %v5314_v38 = vld [vmem:[%s9571_s1 + $0xf0] sm:$0xf]  ;;  %v6002_v7 = vld [vmem:[%s9571_s1 + $0x638] sm:$0xf]  ;;  %v5999_v22 = vor.u32 %v6765_v4, %v5996_v6  ;;  %v6601_v4 = vld [vmem:[%s9571_s1 + $0x114] sm:$0xf] }
  0xd2   :  { %v2669_v16 = vadd.f32 %v2668_v13, %v411_v5  ;;  %v2643_v18 = vadd.f32 %v2642_v15, %v409_v39  ;;  %3212 = vmatpush.bf16.msra.mxu2 %v5307_v8  ;;  %v6680_v39 = vld [vmem:[%s9571_s1 + $0x384] sm:$0xf0]  ;;  %v6849_v8 = vld [vmem:[%s9571_s1 + $0x8cc] sm:$0xf0]  ;;  %v6004_v13 = vld [vmem:[%s9571_s1 + $0x8d0] sm:$0xf0] }
  0xd3   :  { %4735 = vst [vmem:[#allocation2 + $0x90] sm:$0xff] %v2655_v12  ;;  %3226 = vmatpush.bf16.msra.mxu3 %v5311_v10  ;;  %v5315_v53 = vor.u32 %v6680_v39, %v5314_v38  ;;  %v6766_v12 = vld [vmem:[%s9571_s1 + $0x63c] sm:$0xf]  ;;  %v6003_v26 = vor.u32 %v6849_v8, %v6002_v7  ;;  %v5354_v8 = vld [vmem:[%s9571_s1 + $0x118] sm:$0xf] }
  0xd4   :  { %4900 = vst [vmem:[#allocation2 + $0x5b0] sm:$0xff] %v2629_v14  ;;  %v6007_v27 = vor.u32 %v6766_v12, %v6004_v13  ;;  %v5356_v12 = vld [vmem:[%s9571_s1 + $0x3b0] sm:$0xf0]  ;;  %v423_v13 = vperm.slane %v7887_v52, 7 }
  0xd5   :  { %4901 = vst [vmem:[#allocation2 + $0x5b8] sm:$0xff] %v2643_v18 }
  0xd6   :  { %4736 = vst [vmem:[#allocation2 + $0x98] sm:$0xff] %v2669_v16 }
  0xd8   :  { %v2656_v25 = vpop.f32.mrf.mxu2  ;;  %v2682_v31 = vpop.f32.mrf.mxu0 }
  0xd9   :  { %v2657_v29 = vadd.f32 %v2656_v25, %v410_v2  ;;  %v2670_v30 = vpop.f32.mrf.mxu3  ;;  %v2683_v35 = vadd.f32 %v2682_v31, %v412_v19  ;;  %v2696_v36 = vpop.f32.mrf.mxu1  ;;  %v5994_v2 = vld [vmem:[%s9571_s1 + $0x630] sm:$0xf]  ;;  %v5332_v25 = vld [vmem:[%s9571_s1 + $0x398] sm:$0xf0]  ;;  %v6600_v31 = vld [vmem:[%s9571_s1 + $0x10c] sm:$0xf] }
  0xda   :  { %v2671_v34 = vadd.f32 %v2670_v30, %v411_v5  ;;  %v2697_v40 = vadd.f32 %v2696_v36, %v413_v20  ;;  %v5995_v18 = vor.u32 %v6848_v3, %v5994_v2  ;;  %v418_v30 = vperm.slane %v7887_v52, 2 }
  0xdb   :  { %4902 = vst [vmem:[#allocation2 + $0x5c0] sm:$0xff] %v2657_v29  ;;  %6452 = vmatmul.msk.bf16.vlgmr.msrb.gmra.mxu0 %vm2389_vm0, %v7735_v17  ;;  %v6683_v29 = vld [vmem:[%s9571_s1 + $0x39c] sm:$0xf0]  ;;  %v5343_v38 = vor.u32 %v6600_v31, %v5340_v32  ;;  %v6852_v31 = vld [vmem:[%s9571_s1 + $0x8e4] sm:$0xf0] }
  0xdc   :  { %4903 = vst [vmem:[#allocation2 + $0x5c8] sm:$0xff] %v2671_v34  ;;  %6453 = vmatmul.msk.bf16.vlgmr.msrb.gmra.mxu1 %vm2389_vm0, %v7735_v17  ;;  %3239 = vmatpush.bf16.msrb.mxu0 %v5979_v37  ;;  %v5339_v36 = vor.u32 %v6683_v29, %v5338_v28  ;;  %v6769_v32 = vld [vmem:[%s9571_s1 + $0x654] sm:$0xf] }
  0xdd   :  { %4737 = vst [vmem:[#allocation2 + $0xa0] sm:$0xff] %v2683_v35  ;;  %6454 = vmatmul.msk.bf16.vlgmr.msrb.gmra.mxu2 %vm2389_vm0, %v7735_v17  ;;  %3253 = vmatpush.bf16.msrb.mxu1 %v5983_v41  ;;  %v5335_v35 = vor.u32 %v6599_v24, %v5332_v25 }
  0xde   :  { %4738 = vst [vmem:[#allocation2 + $0xa8] sm:$0xff] %v2697_v40  ;;  %6455 = vmatmul.msk.bf16.vlgmr.msrb.gmra.mxu3 %vm2389_vm0, %v7735_v17  ;;  %3267 = vmatpush.bf16.msrb.mxu2 %v5987_v44 }
  0xdf   :  { %3281 = vmatpush.bf16.msrb.mxu3 %v5991_v45 }
  0xe0   :  { %v2710_v56 = vpop.f32.mrf.mxu2  ;;  %v2684_v57 = vpop.f32.mrf.mxu0  ;;  %3240 = vmatpush.bf16.msrb.mxu0 %v5315_v53  ;;  %v6012_v53 = vld [vmem:[%s9571_s1 + $0x8d8] sm:$0xf0] }
  0xe1   :  { %v2711_v58 = vadd.f32 %v2710_v56, %v414_v48  ;;  %v2724_v59 = vpop.f32.mrf.mxu3  ;;  %v2685_v60 = vadd.f32 %v2684_v57, %v412_v19  ;;  %v2698_v61 = vpop.f32.mrf.mxu1  ;;  %3254 = vmatpush.bf16.msrb.mxu1 %v5319_v54  ;;  %v5330_v19 = vld [vmem:[%s9571_s1 + $0x100] sm:$0xf]  ;;  %v6018_v54 = vld [vmem:[%s9571_s1 + $0x648] sm:$0xf]  ;;  %v6015_v3 = vor.u32 %v6767_v50, %v6012_v53  ;;  %v6603_v50 = vld [vmem:[%s9571_s1 + $0x124] sm:$0xf] }
  0xe2   :  { %v2725_v62 = vadd.f32 %v2724_v59, %v415_v51  ;;  %v2699_v63 = vadd.f32 %v2698_v61, %v413_v20  ;;  %3268 = vmatpush.bf16.msrb.mxu2 %v5323_v55  ;;  %v6682_v20 = vld [vmem:[%s9571_s1 + $0x394] sm:$0xf0]  ;;  %v6851_v55 = vld [vmem:[%s9571_s1 + $0x8dc] sm:$0xf0]  ;;  %v6020_v59 = vld [vmem:[%s9571_s1 + $0x8e0] sm:$0xf0] }
  0xe3   :  { %4739 = vst [vmem:[#allocation2 + $0xb0] sm:$0xff] %v2711_v58  ;;  %3282 = vmatpush.bf16.msrb.mxu3 %v5327_v23  ;;  %v5331_v34 = vor.u32 %v6682_v20, %v5330_v19  ;;  %v6768_v58 = vld [vmem:[%s9571_s1 + $0x64c] sm:$0xf]  ;;  %v6019_v6 = vor.u32 %v6851_v55, %v6018_v54  ;;  %v5370_v55 = vld [vmem:[%s9571_s1 + $0x128] sm:$0xf] }
  0xe4   :  { %4904 = vst [vmem:[#allocation2 + $0x5d0] sm:$0xff] %v2685_v60  ;;  %v6023_v7 = vor.u32 %v6768_v58, %v6020_v59  ;;  %v5372_v58 = vld [vmem:[%s9571_s1 + $0x3c0] sm:$0xf0] }
  0xe5   :  { %4905 = vst [vmem:[#allocation2 + $0x5d8] sm:$0xff] %v2699_v63 }
  0xe6   :  { %4740 = vst [vmem:[#allocation2 + $0xb8] sm:$0xff] %v2725_v62 }
  0xe8   :  { %v2712_v5 = vpop.f32.mrf.mxu2  ;;  %v2738_v11 = vpop.f32.mrf.mxu0 }
  0xe9   :  { %v2713_v9 = vadd.f32 %v2712_v5, %v414_v48  ;;  %v2726_v10 = vpop.f32.mrf.mxu3  ;;  %v2739_v15 = vadd.f32 %v2738_v11, %v416_v0  ;;  %v2752_v16 = vpop.f32.mrf.mxu1  ;;  %v6010_v48 = vld [vmem:[%s9571_s1 + $0x640] sm:$0xf]  ;;  %v5348_v5 = vld [vmem:[%s9571_s1 + $0x3a8] sm:$0xf0]  ;;  %v6602_v11 = vld [vmem:[%s9571_s1 + $0x11c] sm:$0xf] }
  0xea   :  { %v2727_v14 = vadd.f32 %v2726_v10, %v415_v51  ;;  %v2753_v21 = vadd.f32 %v2752_v16, %v417_v1  ;;  %v6011_v63 = vor.u32 %v6850_v49, %v6010_v48  ;;  %v422_v10 = vperm.slane %v7887_v52, 6  ;;  %v8012_v52 = vld [vmem:[%s9572_s2 + $0x20] sm:$0xff] }
  0xeb   :  { %4906 = vst [vmem:[#allocation2 + $0x5e0] sm:$0xff] %v2713_v9  ;;  %6456 = vmatmul.msk.bf16.vlgmr.msra.gmra.mxu0 %vm2389_vm0, %v7735_v17  ;;  %v6685_v9 = vld [vmem:[%s9571_s1 + $0x3ac] sm:$0xf0]  ;;  %v5359_v19 = vor.u32 %v6602_v11, %v5356_v12  ;;  %v424_v28 = vperm.slane %v8012_v52, 0  ;;  %v425_v29 = vperm.slane %v8012_v52, 1  ;;  %v427_v59 = vperm.slane %v8012_v52, 3 }
  0xec   :  { %4907 = vst [vmem:[#allocation2 + $0x5e8] sm:$0xff] %v2727_v14  ;;  %6457 = vmatmul.msk.bf16.vlgmr.msra.gmra.mxu1 %vm2389_vm0, %v7735_v17  ;;  %3295 = vmatpush.bf16.msra.mxu0 %v5995_v18  ;;  %v5355_v16 = vor.u32 %v6685_v9, %v5354_v8  ;;  %v428_v8 = vperm.slane %v8012_v52, 4  ;;  %v429_v9 = vperm.slane %v8012_v52, 5  ;;  %v6854_v11 = vld [vmem:[%s9571_s1 + $0x8f4] sm:$0xf0] }
  0xed   :  { %4741 = vst [vmem:[#allocation2 + $0xc0] sm:$0xff] %v2739_v15  ;;  %6458 = vmatmul.msk.bf16.vlgmr.msra.gmra.mxu2 %vm2389_vm0, %v7735_v17  ;;  %3309 = vmatpush.bf16.msra.mxu1 %v5999_v22  ;;  %v5351_v15 = vor.u32 %v6601_v4, %v5348_v5  ;;  %v6771_v12 = vld [vmem:[%s9571_s1 + $0x664] sm:$0xf] }
  0xee   :  { %4742 = vst [vmem:[#allocation2 + $0xc8] sm:$0xff] %v2753_v21  ;;  %6459 = vmatmul.msk.bf16.vlgmr.msra.gmra.mxu3 %vm2389_vm0, %v7735_v17  ;;  %3323 = vmatpush.bf16.msra.mxu2 %v6003_v26 }
  0xef   :  { %3337 = vmatpush.bf16.msra.mxu3 %v6007_v27 }
  0xf0   :  { %v2766_v37 = vpop.f32.mrf.mxu2  ;;  %v2740_v39 = vpop.f32.mrf.mxu0  ;;  %3296 = vmatpush.bf16.msra.mxu0 %v5331_v34  ;;  %v6028_v34 = vld [vmem:[%s9571_s1 + $0x8e8] sm:$0xf0] }
  0xf1   :  { %v2767_v40 = vadd.f32 %v2766_v37, %v418_v30  ;;  %v2780_v41 = vpop.f32.mrf.mxu3  ;;  %v2741_v42 = vadd.f32 %v2740_v39, %v416_v0  ;;  %v2754_v43 = vpop.f32.mrf.mxu1  ;;  %3310 = vmatpush.bf16.msra.mxu1 %v5335_v35  ;;  %v5346_v0 = vld [vmem:[%s9571_s1 + $0x110] sm:$0xf]  ;;  %v6034_v35 = vld [vmem:[%s9571_s1 + $0x658] sm:$0xf]  ;;  %v6031_v49 = vor.u32 %v6769_v32, %v6028_v34  ;;  %v6605_v32 = vld [vmem:[%s9571_s1 + $0x134] sm:$0xf] }
  0xf2   :  { %v2781_v44 = vadd.f32 %v2780_v41, %v419_v33  ;;  %v2755_v45 = vadd.f32 %v2754_v43, %v417_v1  ;;  %3324 = vmatpush.bf16.msra.mxu2 %v5339_v36  ;;  %v6684_v1 = vld [vmem:[%s9571_s1 + $0x3a4] sm:$0xf0]  ;;  %v6853_v36 = vld [vmem:[%s9571_s1 + $0x8ec] sm:$0xf0]  ;;  %v6036_v41 = vld [vmem:[%s9571_s1 + $0x8f0] sm:$0xf0] }
  0xf3   :  { %4743 = vst [vmem:[#allocation2 + $0xd0] sm:$0xff] %v2767_v40  ;;  %3338 = vmatpush.bf16.msra.mxu3 %v5343_v38  ;;  %v5347_v14 = vor.u32 %v6684_v1, %v5346_v0  ;;  %v6770_v40 = vld [vmem:[%s9571_s1 + $0x65c] sm:$0xf]  ;;  %v6035_v53 = vor.u32 %v6853_v36, %v6034_v35  ;;  %v5386_v36 = vld [vmem:[%s9571_s1 + $0x138] sm:$0xf] }
  0xf4   :  { %4908 = vst [vmem:[#allocation2 + $0x5f0] sm:$0xff] %v2741_v42  ;;  %v6039_v54 = vor.u32 %v6770_v40, %v6036_v41  ;;  %v5388_v40 = vld [vmem:[%s9571_s1 + $0x3d0] sm:$0xf0]  ;;  %v431_v41 = vperm.slane %v8012_v52, 7 }
  0xf5   :  { %4909 = vst [vmem:[#allocation2 + $0x5f8] sm:$0xff] %v2755_v45 }
  0xf6   :  { %4744 = vst [vmem:[#allocation2 + $0xd8] sm:$0xff] %v2781_v44 }
  0xf8   :  { %v2768_v51 = vpop.f32.mrf.mxu2  ;;  %v2794_v57 = vpop.f32.mrf.mxu0 }
  0xf9   :  { %v2769_v56 = vadd.f32 %v2768_v51, %v418_v30  ;;  %v2782_v23 = vpop.f32.mrf.mxu3  ;;  %v2795_v61 = vadd.f32 %v2794_v57, %v420_v46  ;;  %v2808_v62 = vpop.f32.mrf.mxu1  ;;  %v6026_v30 = vld [vmem:[%s9571_s1 + $0x650] sm:$0xf]  ;;  %v5364_v51 = vld [vmem:[%s9571_s1 + $0x3b8] sm:$0xf0]  ;;  %v6604_v57 = vld [vmem:[%s9571_s1 + $0x12c] sm:$0xf] }
  0xfa   :  { %v2783_v60 = vadd.f32 %v2782_v23, %v419_v33  ;;  %v2809_v2 = vadd.f32 %v2808_v62, %v421_v47  ;;  %v6027_v45 = vor.u32 %v6852_v31, %v6026_v30  ;;  %v426_v23 = vperm.slane %v8012_v52, 2 }
  0xfb   :  { %4910 = vst [vmem:[#allocation2 + $0x600] sm:$0xff] %v2769_v56  ;;  %6460 = vmatmul.msk.bf16.vlgmr.msrb.gmra.mxu0 %vm2389_vm0, %v7735_v17  ;;  %v6687_v56 = vld [vmem:[%s9571_s1 + $0x3bc] sm:$0xf0]  ;;  %v5375_v0 = vor.u32 %v6604_v57, %v5372_v58  ;;  %v6856_v57 = vld [vmem:[%s9571_s1 + $0x904] sm:$0xf0] }
  0xfc   :  { %4911 = vst [vmem:[#allocation2 + $0x608] sm:$0xff] %v2783_v60  ;;  %6461 = vmatmul.msk.bf16.vlgmr.msrb.gmra.mxu1 %vm2389_vm0, %v7735_v17  ;;  %3351 = vmatpush.bf16.msrb.mxu0 %v6011_v63  ;;  %v5371_v62 = vor.u32 %v6687_v56, %v5370_v55  ;;  %v6773_v58 = vld [vmem:[%s9571_s1 + $0x674] sm:$0xf] }
  0xfd   :  { %4745 = vst [vmem:[#allocation2 + $0xe0] sm:$0xff] %v2795_v61  ;;  %6462 = vmatmul.msk.bf16.vlgmr.msrb.gmra.mxu2 %vm2389_vm0, %v7735_v17  ;;  %3365 = vmatpush.bf16.msrb.mxu1 %v6015_v3  ;;  %v5367_v61 = vor.u32 %v6603_v50, %v5364_v51 }
  0xfe   :  { %4746 = vst [vmem:[#allocation2 + $0xe8] sm:$0xff] %v2809_v2  ;;  %6463 = vmatmul.msk.bf16.vlgmr.msrb.gmra.mxu3 %vm2389_vm0, %v7735_v17  ;;  %3379 = vmatpush.bf16.msrb.mxu2 %v6019_v6 }
  0xff   :  { %3393 = vmatpush.bf16.msrb.mxu3 %v6023_v7 }
 0x100   :  { %v2822_v18 = vpop.f32.mrf.mxu2  ;;  %v2796_v20 = vpop.f32.mrf.mxu0  ;;  %3352 = vmatpush.bf16.msrb.mxu0 %v5347_v14  ;;  %v6044_v14 = vld [vmem:[%s9571_s1 + $0x8f8] sm:$0xf0] }
 0x101   :  { %v2823_v21 = vadd.f32 %v2822_v18, %v422_v10  ;;  %v2836_v22 = vpop.f32.mrf.mxu3  ;;  %v2797_v24 = vadd.f32 %v2796_v20, %v420_v46  ;;  %v2810_v25 = vpop.f32.mrf.mxu1  ;;  %3366 = vmatpush.bf16.msrb.mxu1 %v5351_v15  ;;  %v5362_v46 = vld [vmem:[%s9571_s1 + $0x120] sm:$0xf]  ;;  %v6050_v15 = vld [vmem:[%s9571_s1 + $0x668] sm:$0xf]  ;;  %v6047_v31 = vor.u32 %v6771_v12, %v6044_v14  ;;  %v6607_v12 = vld [vmem:[%s9571_s1 + $0x144] sm:$0xf] }
 0x102   :  { %v2837_v26 = vadd.f32 %v2836_v22, %v423_v13  ;;  %v2811_v27 = vadd.f32 %v2810_v25, %v421_v47  ;;  %3380 = vmatpush.bf16.msrb.mxu2 %v5355_v16  ;;  %v6686_v47 = vld [vmem:[%s9571_s1 + $0x3b4] sm:$0xf0]  ;;  %v6855_v16 = vld [vmem:[%s9571_s1 + $0x8fc] sm:$0xf0]  ;;  %v6052_v22 = vld [vmem:[%s9571_s1 + $0x900] sm:$0xf0] }
 0x103   :  { %4747 = vst [vmem:[#allocation2 + $0xf0] sm:$0xff] %v2823_v21  ;;  %3394 = vmatpush.bf16.msrb.mxu3 %v5359_v19  ;;  %v5363_v60 = vor.u32 %v6686_v47, %v5362_v46  ;;  %v6772_v21 = vld [vmem:[%s9571_s1 + $0x66c] sm:$0xf]  ;;  %v6051_v34 = vor.u32 %v6855_v16, %v6050_v15  ;;  %v5402_v16 = vld [vmem:[%s9571_s1 + $0x148] sm:$0xf] }
 0x104   :  { %4912 = vst [vmem:[#allocation2 + $0x610] sm:$0xff] %v2797_v24  ;;  %v6055_v35 = vor.u32 %v6772_v21, %v6052_v22  ;;  %v5404_v21 = vld [vmem:[%s9571_s1 + $0x3e0] sm:$0xf0] }
 0x105   :  { %4913 = vst [vmem:[#allocation2 + $0x618] sm:$0xff] %v2811_v27 }
 0x106   :  { %4748 = vst [vmem:[#allocation2 + $0xf8] sm:$0xff] %v2837_v26 }
 0x108   :  { %v2824_v33 = vpop.f32.mrf.mxu2  ;;  %v2850_v39 = vpop.f32.mrf.mxu0 }
 0x109   :  { %v2825_v37 = vadd.f32 %v2824_v33, %v422_v10  ;;  %v2838_v38 = vpop.f32.mrf.mxu3  ;;  %v2851_v43 = vadd.f32 %v2850_v39, %v424_v28  ;;  %v2864_v44 = vpop.f32.mrf.mxu1  ;;  %v6042_v10 = vld [vmem:[%s9571_s1 + $0x660] sm:$0xf]  ;;  %v5380_v33 = vld [vmem:[%s9571_s1 + $0x3c8] sm:$0xf0]  ;;  %v6606_v39 = vld [vmem:[%s9571_s1 + $0x13c] sm:$0xf] }
 0x10a   :  { %v2839_v42 = vadd.f32 %v2838_v38, %v423_v13  ;;  %v2865_v48 = vadd.f32 %v2864_v44, %v425_v29  ;;  %v6043_v27 = vor.u32 %v6854_v11, %v6042_v10  ;;  %v430_v38 = vperm.slane %v8012_v52, 6  ;;  %v8137_v52 = vld [vmem:[%s9572_s2 + $0x28] sm:$0xff] }
 0x10b   :  { %4914 = vst [vmem:[#allocation2 + $0x620] sm:$0xff] %v2825_v37  ;;  %6464 = vmatmul.msk.bf16.vlgmr.msra.gmra.mxu0 %vm2389_vm0, %v7735_v17  ;;  %v6689_v37 = vld [vmem:[%s9571_s1 + $0x3cc] sm:$0xf0]  ;;  %v5391_v46 = vor.u32 %v6606_v39, %v5388_v40  ;;  %v432_v55 = vperm.slane %v8137_v52, 0  ;;  %v433_v56 = vperm.slane %v8137_v52, 1  ;;  %v435_v22 = vperm.slane %v8137_v52, 3 }
 0x10c   :  { %4915 = vst [vmem:[#allocation2 + $0x628] sm:$0xff] %v2839_v42  ;;  %6465 = vmatmul.msk.bf16.vlgmr.msra.gmra.mxu1 %vm2389_vm0, %v7735_v17  ;;  %3407 = vmatpush.bf16.msra.mxu0 %v6027_v45  ;;  %v5387_v44 = vor.u32 %v6689_v37, %v5386_v36  ;;  %v437_v36 = vperm.slane %v8137_v52, 5  ;;  %v6074_v37 = vld [vmem:[%s9571_s1 + $0x680] sm:$0xf]  ;;  %v6775_v39 = vld [vmem:[%s9571_s1 + $0x684] sm:$0xf] }
 0x10d   :  { %4749 = vst [vmem:[#allocation2 + $0x100] sm:$0xff] %v2851_v43  ;;  %6466 = vmatmul.msk.bf16.vlgmr.msra.gmra.mxu2 %vm2389_vm0, %v7735_v17  ;;  %3421 = vmatpush.bf16.msra.mxu1 %v6031_v49  ;;  %v5383_v43 = vor.u32 %v6605_v32, %v5380_v33 }
 0x10e   :  { %4750 = vst [vmem:[#allocation2 + $0x108] sm:$0xff] %v2865_v48  ;;  %6467 = vmatmul.msk.bf16.vlgmr.msra.gmra.mxu3 %vm2389_vm0, %v7735_v17  ;;  %3435 = vmatpush.bf16.msra.mxu2 %v6035_v53 }
 0x10f   :  { %3449 = vmatpush.bf16.msra.mxu3 %v6039_v54 }
 0x110   :  { %v2878_v63 = vpop.f32.mrf.mxu2  ;;  %v2852_v1 = vpop.f32.mrf.mxu0  ;;  %3408 = vmatpush.bf16.msra.mxu0 %v5363_v60  ;;  %v6060_v60 = vld [vmem:[%s9571_s1 + $0x908] sm:$0xf0] }
 0x111   :  { %v2879_v2 = vadd.f32 %v2878_v63, %v426_v23  ;;  %v2892_v3 = vpop.f32.mrf.mxu3  ;;  %v2853_v4 = vadd.f32 %v2852_v1, %v424_v28  ;;  %v2866_v5 = vpop.f32.mrf.mxu1  ;;  %3422 = vmatpush.bf16.msra.mxu1 %v5367_v61  ;;  %v5378_v28 = vld [vmem:[%s9571_s1 + $0x130] sm:$0xf]  ;;  %v6066_v61 = vld [vmem:[%s9571_s1 + $0x678] sm:$0xf]  ;;  %v6063_v11 = vor.u32 %v6773_v58, %v6060_v60  ;;  %v5412_v58 = vld [vmem:[%s9571_s1 + $0x3e8] sm:$0xf0] }
 0x112   :  { %v2893_v6 = vadd.f32 %v2892_v3, %v427_v59  ;;  %v2867_v7 = vadd.f32 %v2866_v5, %v425_v29  ;;  %3436 = vmatpush.bf16.msra.mxu2 %v5371_v62  ;;  %v6688_v29 = vld [vmem:[%s9571_s1 + $0x3c4] sm:$0xf0]  ;;  %v6857_v62 = vld [vmem:[%s9571_s1 + $0x90c] sm:$0xf0]  ;;  %v6068_v3 = vld [vmem:[%s9571_s1 + $0x910] sm:$0xf0] }
 0x113   :  { %4751 = vst [vmem:[#allocation2 + $0x110] sm:$0xff] %v2879_v2  ;;  %3450 = vmatpush.bf16.msra.mxu3 %v5375_v0  ;;  %v5379_v42 = vor.u32 %v6688_v29, %v5378_v28  ;;  %v6774_v2 = vld [vmem:[%s9571_s1 + $0x67c] sm:$0xf]  ;;  %v6067_v14 = vor.u32 %v6857_v62, %v6066_v61  ;;  %v8240_v60 = vld [vmem:[%s9570_s0] sm:$0xff]  ;;  %v5418_v62 = vld [vmem:[%s9571_s1 + $0x158] sm:$0xf] }
 0x114   :  { %4916 = vst [vmem:[#allocation2 + $0x630] sm:$0xff] %v2853_v4  ;;  %v6071_v15 = vor.u32 %v6774_v2, %v6068_v3  ;;  %v5420_v2 = vld [vmem:[%s9571_s1 + $0x3f0] sm:$0xf0]  ;;  %v439_v3 = vperm.slane %v8137_v52, 7 }
 0x115   :  { %4917 = vst [vmem:[#allocation2 + $0x638] sm:$0xff] %v2867_v7 }
 0x116   :  { %4752 = vst [vmem:[#allocation2 + $0x118] sm:$0xff] %v2893_v6 }
 0x118   :  { %v2880_v13 = vpop.f32.mrf.mxu2  ;;  %v2906_v20 = vpop.f32.mrf.mxu0 }
 0x119   :  { %v2881_v18 = vadd.f32 %v2880_v13, %v426_v23  ;;  %v2894_v19 = vpop.f32.mrf.mxu3  ;;  %v2907_v25 = vadd.f32 %v2906_v20, %v428_v8  ;;  %v2920_v26 = vpop.f32.mrf.mxu1  ;;  %v6058_v23 = vld [vmem:[%s9571_s1 + $0x670] sm:$0xf]  ;;  %v5396_v13 = vld [vmem:[%s9571_s1 + $0x3d8] sm:$0xf0]  ;;  %v6608_v20 = vld [vmem:[%s9571_s1 + $0x14c] sm:$0xf] }
 0x11a   :  { %v2895_v24 = vadd.f32 %v2894_v19, %v427_v59  ;;  %v2921_v30 = vadd.f32 %v2920_v26, %v429_v9  ;;  %v6059_v7 = vor.u32 %v6856_v57, %v6058_v23  ;;  %v434_v19 = vperm.slane %v8137_v52, 2  ;;  %v6609_v57 = vld [vmem:[%s9571_s1 + $0x154] sm:$0xf] }
 0x11b   :  { %4918 = vst [vmem:[#allocation2 + $0x640] sm:$0xff] %v2881_v18  ;;  %6468 = vmatmul.msk.bf16.vlgmr.msrb.gmra.mxu0 %vm2389_vm0, %v7735_v17  ;;  %v6691_v18 = vld [vmem:[%s9571_s1 + $0x3dc] sm:$0xf0]  ;;  %v5407_v28 = vor.u32 %v6608_v20, %v5404_v21  ;;  %v6860_v20 = vld [vmem:[%s9571_s1 + $0x924] sm:$0xf0] }
 0x11c   :  { %4919 = vst [vmem:[#allocation2 + $0x648] sm:$0xff] %v2895_v24  ;;  %6469 = vmatmul.msk.bf16.vlgmr.msrb.gmra.mxu1 %vm2389_vm0, %v7735_v17  ;;  %3463 = vmatpush.bf16.msrb.mxu0 %v6043_v27  ;;  %v5403_v26 = vor.u32 %v6691_v18, %v5402_v16  ;;  %v6777_v21 = vld [vmem:[%s9571_s1 + $0x694] sm:$0xf] }
 0x11d   :  { %4753 = vst [vmem:[#allocation2 + $0x120] sm:$0xff] %v2907_v25  ;;  %6470 = vmatmul.msk.bf16.vlgmr.msrb.gmra.mxu2 %vm2389_vm0, %v7735_v17  ;;  %3477 = vmatpush.bf16.msrb.mxu1 %v6047_v31  ;;  %v5399_v25 = vor.u32 %v6607_v12, %v5396_v13 }
 0x11e   :  { %4754 = vst [vmem:[#allocation2 + $0x128] sm:$0xff] %v2921_v30  ;;  %6471 = vmatmul.msk.bf16.vlgmr.msrb.gmra.mxu3 %vm2389_vm0, %v7735_v17  ;;  %3491 = vmatpush.bf16.msrb.mxu2 %v6051_v34 }
 0x11f   :  { %3505 = vmatpush.bf16.msrb.mxu3 %v6055_v35 }
 0x120   :  { %v2934_v45 = vpop.f32.mrf.mxu2  ;;  %v2908_v47 = vpop.f32.mrf.mxu0  ;;  %3464 = vmatpush.bf16.msrb.mxu0 %v5379_v42  ;;  %v6082_v42 = vld [vmem:[%s9571_s1 + $0x688] sm:$0xf] }
 0x121   :  { %v2935_v48 = vadd.f32 %v2934_v45, %v430_v38  ;;  %v2948_v49 = vpop.f32.mrf.mxu3  ;;  %v2909_v50 = vadd.f32 %v2908_v47, %v428_v8  ;;  %v2922_v51 = vpop.f32.mrf.mxu1  ;;  %3478 = vmatpush.bf16.msrb.mxu1 %v5383_v43  ;;  %v5394_v8 = vld [vmem:[%s9571_s1 + $0x140] sm:$0xf]  ;;  %v6776_v47 = vld [vmem:[%s9571_s1 + $0x68c] sm:$0xf] }
 0x122   :  { %v2949_v53 = vadd.f32 %v2948_v49, %v431_v41  ;;  %v2923_v54 = vadd.f32 %v2922_v51, %v429_v9  ;;  %3492 = vmatpush.bf16.msrb.mxu2 %v5387_v44  ;;  %v6690_v9 = vld [vmem:[%s9571_s1 + $0x3d4] sm:$0xf0]  ;;  %v6859_v43 = vld [vmem:[%s9571_s1 + $0x91c] sm:$0xf0] }
 0x123   :  { %4755 = vst [vmem:[#allocation2 + $0x130] sm:$0xff] %v2935_v48  ;;  %3506 = vmatpush.bf16.msrb.mxu3 %v5391_v46  ;;  %v5395_v24 = vor.u32 %v6690_v9, %v5394_v8  ;;  %v6084_v48 = vld [vmem:[%s9571_s1 + $0x920] sm:$0xf0] }
 0x124   :  { %4920 = vst [vmem:[#allocation2 + $0x650] sm:$0xff] %v2909_v50  ;;  %v6087_v61 = vor.u32 %v6776_v47, %v6084_v48  ;;  %v5436_v47 = vld [vmem:[%s9571_s1 + $0x400] sm:$0xf0] }
 0x125   :  { %4921 = vst [vmem:[#allocation2 + $0x658] sm:$0xff] %v2923_v54  ;;  %v5410_v54 = vld [vmem:[%s9571_s1 + $0x150] sm:$0xf] }
 0x126   :  { %4756 = vst [vmem:[#allocation2 + $0x138] sm:$0xff] %v2949_v53 }
 0x128   :  { %v2936_v59 = vpop.f32.mrf.mxu2  ;;  %v2962_v1 = vpop.f32.mrf.mxu0 }
 0x129   :  { %v2937_v63 = vadd.f32 %v2936_v59, %v430_v38  ;;  %v2950_v0 = vpop.f32.mrf.mxu3  ;;  %v2963_v5 = vadd.f32 %v2962_v1, %v432_v55  ;;  %v2976_v6 = vpop.f32.mrf.mxu1  ;;  %v6858_v38 = vld [vmem:[%s9571_s1 + $0x914] sm:$0xf0]  ;;  %v6083_v59 = vor.u32 %v6859_v43, %v6082_v42  ;;  %v6610_v1 = vld [vmem:[%s9571_s1 + $0x15c] sm:$0xf]  ;;  %v5434_v43 = vld [vmem:[%s9571_s1 + $0x168] sm:$0xf] }
 0x12a   :  { %v2951_v4 = vadd.f32 %v2950_v0, %v431_v41  ;;  %v2977_v10 = vadd.f32 %v2976_v6, %v433_v56  ;;  %v6076_v41 = vld [vmem:[%s9571_s1 + $0x918] sm:$0xf0]  ;;  %v6075_v53 = vor.u32 %v6858_v38, %v6074_v37  ;;  %v438_v0 = vperm.slane %v8137_v52, 6 }
 0x12b   :  { %4922 = vst [vmem:[#allocation2 + $0x660] sm:$0xff] %v2937_v63  ;;  %6472 = vmatmul.msk.bf16.vlgmr.msra.gmra.mxu0 %vm2389_vm0, %v7735_v17  ;;  %v6079_v23 = vor.u32 %v6775_v39, %v6076_v41  ;;  %v6693_v63 = vld [vmem:[%s9571_s1 + $0x3ec] sm:$0xf0]  ;;  %v5423_v8 = vor.u32 %v6610_v1, %v5420_v2  ;;  %v6611_v39 = vld [vmem:[%s9571_s1 + $0x164] sm:$0xf] }
 0x12c   :  { %4923 = vst [vmem:[#allocation2 + $0x668] sm:$0xff] %v2951_v4  ;;  %6473 = vmatmul.msk.bf16.vlgmr.msra.gmra.mxu1 %vm2389_vm0, %v7735_v17  ;;  %3519 = vmatpush.bf16.msra.mxu0 %v6059_v7  ;;  %v5419_v6 = vor.u32 %v6693_v63, %v5418_v62  ;;  %v6862_v1 = vld [vmem:[%s9571_s1 + $0x934] sm:$0xf0]  ;;  %v6779_v2 = vld [vmem:[%s9571_s1 + $0x6a4] sm:$0xf] }
 0x12d   :  { %4757 = vst [vmem:[#allocation2 + $0x140] sm:$0xff] %v2963_v5  ;;  %6474 = vmatmul.msk.bf16.vlgmr.msra.gmra.mxu2 %vm2389_vm0, %v7735_v17  ;;  %3533 = vmatpush.bf16.msra.mxu1 %v6063_v11  ;;  %v5415_v5 = vor.u32 %v6609_v57, %v5412_v58 }
 0x12e   :  { %4758 = vst [vmem:[#allocation2 + $0x148] sm:$0xff] %v2977_v10  ;;  %6475 = vmatmul.msk.bf16.vlgmr.msra.gmra.mxu3 %vm2389_vm0, %v7735_v17  ;;  %3547 = vmatpush.bf16.msra.mxu2 %v6067_v14  ;;  %v436_v17 = vperm.slane %v8137_v52, 4  ;;  %v8267_v52 = vld [vmem:[%s9572_s2 + $0x30] sm:$0xff] }
 0x12f   :  { %3561 = vmatpush.bf16.msra.mxu3 %v6071_v15  ;;  %v440_v16 = vperm.slane %v8267_v52, 0  ;;  %v441_v18 = vperm.slane %v8267_v52, 1  ;;  %v443_v48 = vperm.slane %v8267_v52, 3  ;;  %v444_v62 = vperm.slane %v8267_v52, 4 }
 0x130   :  { %v2990_v27 = vpop.f32.mrf.mxu2  ;;  %v2964_v29 = vpop.f32.mrf.mxu0  ;;  %3520 = vmatpush.bf16.msra.mxu0 %v5395_v24  ;;  %v6092_v24 = vld [vmem:[%s9571_s1 + $0x928] sm:$0xf0]  ;;  %v445_v63 = vperm.slane %v8267_v52, 5 }
 0x131   :  { %v2991_v30 = vadd.f32 %v2990_v27, %v434_v19  ;;  %v3004_v31 = vpop.f32.mrf.mxu3  ;;  %v2965_v32 = vadd.f32 %v2964_v29, %v432_v55  ;;  %v2978_v33 = vpop.f32.mrf.mxu1  ;;  %3534 = vmatpush.bf16.msra.mxu1 %v5399_v25  ;;  %v6692_v55 = vld [vmem:[%s9571_s1 + $0x3e4] sm:$0xf0]  ;;  %v6098_v25 = vld [vmem:[%s9571_s1 + $0x698] sm:$0xf]  ;;  %v6095_v38 = vor.u32 %v6777_v21, %v6092_v24  ;;  %v6613_v21 = vld [vmem:[%s9571_s1 + $0x174] sm:$0xf] }
 0x132   :  { %v3005_v34 = vadd.f32 %v3004_v31, %v435_v22  ;;  %v2979_v35 = vadd.f32 %v2978_v33, %v433_v56  ;;  %3548 = vmatpush.bf16.msra.mxu2 %v5403_v26  ;;  %v5411_v4 = vor.u32 %v6692_v55, %v5410_v54  ;;  %v6861_v26 = vld [vmem:[%s9571_s1 + $0x92c] sm:$0xf0]  ;;  %v6100_v31 = vld [vmem:[%s9571_s1 + $0x930] sm:$0xf0] }
 0x133   :  { %4759 = vst [vmem:[#allocation2 + $0x150] sm:$0xff] %v2991_v30  ;;  %3562 = vmatpush.bf16.msra.mxu3 %v5407_v28  ;;  %v6778_v30 = vld [vmem:[%s9571_s1 + $0x69c] sm:$0xf]  ;;  %v6099_v41 = vor.u32 %v6861_v26, %v6098_v25  ;;  %v5450_v26 = vld [vmem:[%s9571_s1 + $0x178] sm:$0xf] }
 0x134   :  { %4924 = vst [vmem:[#allocation2 + $0x670] sm:$0xff] %v2965_v32  ;;  %v6103_v42 = vor.u32 %v6778_v30, %v6100_v31  ;;  %v5452_v30 = vld [vmem:[%s9571_s1 + $0x410] sm:$0xf0]  ;;  %v447_v31 = vperm.slane %v8267_v52, 7 }
 0x135   :  { %4925 = vst [vmem:[#allocation2 + $0x678] sm:$0xff] %v2979_v35 }
 0x136   :  { %4760 = vst [vmem:[#allocation2 + $0x158] sm:$0xff] %v3005_v34 }
 0x138   :  { %v2992_v40 = vpop.f32.mrf.mxu2  ;;  %v3018_v46 = vpop.f32.mrf.mxu0 }
 0x139   :  { %v2993_v44 = vadd.f32 %v2992_v40, %v434_v19  ;;  %v3006_v45 = vpop.f32.mrf.mxu3  ;;  %v3019_v50 = vadd.f32 %v3018_v46, %v436_v17  ;;  %v3032_v51 = vpop.f32.mrf.mxu1  ;;  %v6090_v19 = vld [vmem:[%s9571_s1 + $0x690] sm:$0xf]  ;;  %v5428_v40 = vld [vmem:[%s9571_s1 + $0x3f8] sm:$0xf0]  ;;  %v6612_v46 = vld [vmem:[%s9571_s1 + $0x16c] sm:$0xf] }
 0x13a   :  { %v3007_v49 = vadd.f32 %v3006_v45, %v435_v22  ;;  %v3033_v56 = vadd.f32 %v3032_v51, %v437_v36  ;;  %v6091_v35 = vor.u32 %v6860_v20, %v6090_v19  ;;  %v442_v45 = vperm.slane %v8267_v52, 2 }
 0x13b   :  { %4926 = vst [vmem:[#allocation2 + $0x680] sm:$0xff] %v2993_v44  ;;  %6476 = vmatmul.msk.bf16.vlgmr.msrb.gmra.mxu0 %vm2389_vm0, %v8240_v60  ;;  %v6695_v44 = vld [vmem:[%s9571_s1 + $0x3fc] sm:$0xf0]  ;;  %v5439_v54 = vor.u32 %v6612_v46, %v5436_v47  ;;  %v6864_v46 = vld [vmem:[%s9571_s1 + $0x944] sm:$0xf0] }
 0x13c   :  { %4927 = vst [vmem:[#allocation2 + $0x688] sm:$0xff] %v3007_v49  ;;  %6477 = vmatmul.msk.bf16.vlgmr.msrb.gmra.mxu1 %vm2389_vm0, %v8240_v60  ;;  %3575 = vmatpush.bf16.msrb.mxu0 %v6075_v53  ;;  %v5435_v51 = vor.u32 %v6695_v44, %v5434_v43  ;;  %v6781_v47 = vld [vmem:[%s9571_s1 + $0x6b4] sm:$0xf] }
 0x13d   :  { %4761 = vst [vmem:[#allocation2 + $0x160] sm:$0xff] %v3019_v50  ;;  %6478 = vmatmul.msk.bf16.vlgmr.msrb.gmra.mxu2 %vm2389_vm0, %v8240_v60  ;;  %3589 = vmatpush.bf16.msrb.mxu1 %v6079_v23  ;;  %v5431_v50 = vor.u32 %v6611_v39, %v5428_v40 }
 0x13e   :  { %4762 = vst [vmem:[#allocation2 + $0x168] sm:$0xff] %v3033_v56  ;;  %6479 = vmatmul.msk.bf16.vlgmr.msrb.gmra.mxu3 %vm2389_vm0, %v8240_v60  ;;  %3603 = vmatpush.bf16.msrb.mxu2 %v6083_v59 }
 0x13f   :  { %3617 = vmatpush.bf16.msrb.mxu3 %v6087_v61 }
 0x140   :  { %v3046_v7 = vpop.f32.mrf.mxu2  ;;  %v3020_v9 = vpop.f32.mrf.mxu0  ;;  %3576 = vmatpush.bf16.msrb.mxu0 %v5411_v4  ;;  %v6108_v4 = vld [vmem:[%s9571_s1 + $0x938] sm:$0xf0] }
 0x141   :  { %v3047_v10 = vadd.f32 %v3046_v7, %v438_v0  ;;  %v3060_v11 = vpop.f32.mrf.mxu3  ;;  %v3021_v12 = vadd.f32 %v3020_v9, %v436_v17  ;;  %v3034_v13 = vpop.f32.mrf.mxu1  ;;  %3590 = vmatpush.bf16.msrb.mxu1 %v5415_v5  ;;  %v5426_v17 = vld [vmem:[%s9571_s1 + $0x160] sm:$0xf]  ;;  %v6114_v5 = vld [vmem:[%s9571_s1 + $0x6a8] sm:$0xf]  ;;  %v6111_v20 = vor.u32 %v6779_v2, %v6108_v4  ;;  %v6615_v2 = vld [vmem:[%s9571_s1 + $0x184] sm:$0xf] }
 0x142   :  { %v3061_v14 = vadd.f32 %v3060_v11, %v439_v3  ;;  %v3035_v15 = vadd.f32 %v3034_v13, %v437_v36  ;;  %3604 = vmatpush.bf16.msrb.mxu2 %v5419_v6  ;;  %v6694_v36 = vld [vmem:[%s9571_s1 + $0x3f4] sm:$0xf0]  ;;  %v6863_v6 = vld [vmem:[%s9571_s1 + $0x93c] sm:$0xf0]  ;;  %v6116_v11 = vld [vmem:[%s9571_s1 + $0x940] sm:$0xf0] }
 0x143   :  { %4763 = vst [vmem:[#allocation2 + $0x170] sm:$0xff] %v3047_v10  ;;  %3618 = vmatpush.bf16.msrb.mxu3 %v5423_v8  ;;  %v5427_v49 = vor.u32 %v6694_v36, %v5426_v17  ;;  %v6780_v10 = vld [vmem:[%s9571_s1 + $0x6ac] sm:$0xf]  ;;  %v6115_v24 = vor.u32 %v6863_v6, %v6114_v5  ;;  %v5466_v6 = vld [vmem:[%s9571_s1 + $0x188] sm:$0xf] }
 0x144   :  { %4928 = vst [vmem:[#allocation2 + $0x690] sm:$0xff] %v3021_v12  ;;  %v6119_v25 = vor.u32 %v6780_v10, %v6116_v11  ;;  %v5468_v10 = vld [vmem:[%s9571_s1 + $0x420] sm:$0xf0] }
 0x145   :  { %4929 = vst [vmem:[#allocation2 + $0x698] sm:$0xff] %v3035_v15 }
 0x146   :  { %4764 = vst [vmem:[#allocation2 + $0x178] sm:$0xff] %v3061_v14 }
 0x148   :  { %v3048_v22 = vpop.f32.mrf.mxu2  ;;  %v3074_v29 = vpop.f32.mrf.mxu0 }
 0x149   :  { %v3049_v27 = vadd.f32 %v3048_v22, %v438_v0  ;;  %v3062_v28 = vpop.f32.mrf.mxu3  ;;  %v3075_v33 = vadd.f32 %v3074_v29, %v440_v16  ;;  %v3088_v34 = vpop.f32.mrf.mxu1  ;;  %v6106_v0 = vld [vmem:[%s9571_s1 + $0x6a0] sm:$0xf]  ;;  %v5444_v22 = vld [vmem:[%s9571_s1 + $0x408] sm:$0xf0]  ;;  %v6614_v29 = vld [vmem:[%s9571_s1 + $0x17c] sm:$0xf] }
 0x14a   :  { %v3063_v32 = vadd.f32 %v3062_v28, %v439_v3  ;;  %v3089_v37 = vadd.f32 %v3088_v34, %v441_v18  ;;  %v6107_v15 = vor.u32 %v6862_v1, %v6106_v0  ;;  %v446_v28 = vperm.slane %v8267_v52, 6  ;;  %v8392_v52 = vld [vmem:[%s9572_s2 + $0x38] sm:$0xff] }
 0x14b   :  { %4930 = vst [vmem:[#allocation2 + $0x6a0] sm:$0xff] %v3049_v27  ;;  %6480 = vmatmul.msk.bf16.vlgmr.msra.gmra.mxu0 %vm2389_vm0, %v8240_v60  ;;  %v6697_v27 = vld [vmem:[%s9571_s1 + $0x40c] sm:$0xf0]  ;;  %v5455_v17 = vor.u32 %v6614_v29, %v5452_v30  ;;  %v448_v43 = vperm.slane %v8392_v52, 0  ;;  %v449_v44 = vperm.slane %v8392_v52, 1  ;;  %v451_v11 = vperm.slane %v8392_v52, 3 }
 0x14c   :  { %4931 = vst [vmem:[#allocation2 + $0x6a8] sm:$0xff] %v3063_v32  ;;  %6481 = vmatmul.msk.bf16.vlgmr.msra.gmra.mxu1 %vm2389_vm0, %v8240_v60  ;;  %3631 = vmatpush.bf16.msra.mxu0 %v6091_v35  ;;  %v5451_v34 = vor.u32 %v6697_v27, %v5450_v26  ;;  %v452_v26 = vperm.slane %v8392_v52, 4  ;;  %v453_v27 = vperm.slane %v8392_v52, 5  ;;  %v6866_v29 = vld [vmem:[%s9571_s1 + $0x954] sm:$0xf0] }
 0x14d   :  { %4765 = vst [vmem:[#allocation2 + $0x180] sm:$0xff] %v3075_v33  ;;  %6482 = vmatmul.msk.bf16.vlgmr.msra.gmra.mxu2 %vm2389_vm0, %v8240_v60  ;;  %3645 = vmatpush.bf16.msra.mxu1 %v6095_v38  ;;  %v5447_v33 = vor.u32 %v6613_v21, %v5444_v22  ;;  %v6783_v30 = vld [vmem:[%s9571_s1 + $0x6c4] sm:$0xf] }
 0x14e   :  { %4766 = vst [vmem:[#allocation2 + $0x188] sm:$0xff] %v3089_v37  ;;  %6483 = vmatmul.msk.bf16.vlgmr.msra.gmra.mxu3 %vm2389_vm0, %v8240_v60  ;;  %3659 = vmatpush.bf16.msra.mxu2 %v6099_v41 }
 0x14f   :  { %3673 = vmatpush.bf16.msra.mxu3 %v6103_v42 }
 0x150   :  { %v3102_v53 = vpop.f32.mrf.mxu2  ;;  %v3076_v55 = vpop.f32.mrf.mxu0  ;;  %3632 = vmatpush.bf16.msra.mxu0 %v5427_v49  ;;  %v6124_v49 = vld [vmem:[%s9571_s1 + $0x948] sm:$0xf0] }
 0x151   :  { %v3103_v56 = vadd.f32 %v3102_v53, %v442_v45  ;;  %v3116_v23 = vpop.f32.mrf.mxu3  ;;  %v3077_v57 = vadd.f32 %v3076_v55, %v440_v16  ;;  %v3090_v58 = vpop.f32.mrf.mxu1  ;;  %3646 = vmatpush.bf16.msra.mxu1 %v5431_v50  ;;  %v5442_v16 = vld [vmem:[%s9571_s1 + $0x170] sm:$0xf]  ;;  %v6130_v50 = vld [vmem:[%s9571_s1 + $0x6b8] sm:$0xf]  ;;  %v6127_v1 = vor.u32 %v6781_v47, %v6124_v49  ;;  %v6617_v47 = vld [vmem:[%s9571_s1 + $0x194] sm:$0xf] }
 0x152   :  { %v3117_v59 = vadd.f32 %v3116_v23, %v443_v48  ;;  %v3091_v61 = vadd.f32 %v3090_v58, %v441_v18  ;;  %3660 = vmatpush.bf16.msra.mxu2 %v5435_v51  ;;  %v6696_v18 = vld [vmem:[%s9571_s1 + $0x404] sm:$0xf0]  ;;  %v6865_v51 = vld [vmem:[%s9571_s1 + $0x94c] sm:$0xf0]  ;;  %v6132_v23 = vld [vmem:[%s9571_s1 + $0x950] sm:$0xf0] }
 0x153   :  { %4767 = vst [vmem:[#allocation2 + $0x190] sm:$0xff] %v3103_v56  ;;  %3674 = vmatpush.bf16.msra.mxu3 %v5439_v54  ;;  %v5443_v32 = vor.u32 %v6696_v18, %v5442_v16  ;;  %v6782_v56 = vld [vmem:[%s9571_s1 + $0x6bc] sm:$0xf]  ;;  %v6131_v4 = vor.u32 %v6865_v51, %v6130_v50  ;;  %v5482_v51 = vld [vmem:[%s9571_s1 + $0x198] sm:$0xf] }
 0x154   :  { %4932 = vst [vmem:[#allocation2 + $0x6b0] sm:$0xff] %v3077_v57  ;;  %v6135_v5 = vor.u32 %v6782_v56, %v6132_v23  ;;  %v5484_v56 = vld [vmem:[%s9571_s1 + $0x430] sm:$0xf0]  ;;  %v455_v23 = vperm.slane %v8392_v52, 7 }
 0x155   :  { %4933 = vst [vmem:[#allocation2 + $0x6b8] sm:$0xff] %v3091_v61 }
 0x156   :  { %4768 = vst [vmem:[#allocation2 + $0x198] sm:$0xff] %v3117_v59 }
 0x158   :  { %v3104_v3 = vpop.f32.mrf.mxu2  ;;  %v3130_v9 = vpop.f32.mrf.mxu0 }
 0x159   :  { %v3105_v7 = vadd.f32 %v3104_v3, %v442_v45  ;;  %v3118_v8 = vpop.f32.mrf.mxu3  ;;  %v3131_v13 = vadd.f32 %v3130_v9, %v444_v62  ;;  %v3144_v14 = vpop.f32.mrf.mxu1  ;;  %v6122_v45 = vld [vmem:[%s9571_s1 + $0x6b0] sm:$0xf]  ;;  %v5460_v3 = vld [vmem:[%s9571_s1 + $0x418] sm:$0xf0]  ;;  %v6616_v9 = vld [vmem:[%s9571_s1 + $0x18c] sm:$0xf] }
 0x15a   :  { %v3119_v12 = vadd.f32 %v3118_v8, %v443_v48  ;;  %v3145_v19 = vadd.f32 %v3144_v14, %v445_v63  ;;  %v6123_v61 = vor.u32 %v6864_v46, %v6122_v45  ;;  %v450_v8 = vperm.slane %v8392_v52, 2 }
 0x15b   :  { %4934 = vst [vmem:[#allocation2 + $0x6c0] sm:$0xff] %v3105_v7  ;;  %6484 = vmatmul.msk.bf16.vlgmr.msrb.gmra.mxu0 %vm2389_vm0, %v8240_v60  ;;  %v6699_v7 = vld [vmem:[%s9571_s1 + $0x41c] sm:$0xf0]  ;;  %v5471_v16 = vor.u32 %v6616_v9, %v5468_v10  ;;  %v6868_v9 = vld [vmem:[%s9571_s1 + $0x964] sm:$0xf0] }
 0x15c   :  { %4935 = vst [vmem:[#allocation2 + $0x6c8] sm:$0xff] %v3119_v12  ;;  %6485 = vmatmul.msk.bf16.vlgmr.msrb.gmra.mxu1 %vm2389_vm0, %v8240_v60  ;;  %3687 = vmatpush.bf16.msrb.mxu0 %v6107_v15  ;;  %v5467_v14 = vor.u32 %v6699_v7, %v5466_v6  ;;  %v6785_v10 = vld [vmem:[%s9571_s1 + $0x6d4] sm:$0xf] }
 0x15d   :  { %4769 = vst [vmem:[#allocation2 + $0x1a0] sm:$0xff] %v3131_v13  ;;  %6486 = vmatmul.msk.bf16.vlgmr.msrb.gmra.mxu2 %vm2389_vm0, %v8240_v60  ;;  %3701 = vmatpush.bf16.msrb.mxu1 %v6111_v20  ;;  %v5463_v13 = vor.u32 %v6615_v2, %v5460_v3 }
 0x15e   :  { %4770 = vst [vmem:[#allocation2 + $0x1a8] sm:$0xff] %v3145_v19  ;;  %6487 = vmatmul.msk.bf16.vlgmr.msrb.gmra.mxu3 %vm2389_vm0, %v8240_v60  ;;  %3715 = vmatpush.bf16.msrb.mxu2 %v6115_v24 }
 0x15f   :  { %3729 = vmatpush.bf16.msrb.mxu3 %v6119_v25 }
 0x160   :  { %v3158_v35 = vpop.f32.mrf.mxu2  ;;  %v3132_v36 = vpop.f32.mrf.mxu0  ;;  %3688 = vmatpush.bf16.msrb.mxu0 %v5443_v32  ;;  %v6140_v32 = vld [vmem:[%s9571_s1 + $0x958] sm:$0xf0] }
 0x161   :  { %v3159_v37 = vadd.f32 %v3158_v35, %v446_v28  ;;  %v3172_v38 = vpop.f32.mrf.mxu3  ;;  %v3133_v39 = vadd.f32 %v3132_v36, %v444_v62  ;;  %v3146_v40 = vpop.f32.mrf.mxu1  ;;  %3702 = vmatpush.bf16.msrb.mxu1 %v5447_v33  ;;  %v5458_v62 = vld [vmem:[%s9571_s1 + $0x180] sm:$0xf]  ;;  %v6146_v33 = vld [vmem:[%s9571_s1 + $0x6c8] sm:$0xf]  ;;  %v6143_v46 = vor.u32 %v6783_v30, %v6140_v32  ;;  %v6619_v30 = vld [vmem:[%s9571_s1 + $0x1a4] sm:$0xf] }
 0x162   :  { %v3173_v41 = vadd.f32 %v3172_v38, %v447_v31  ;;  %v3147_v42 = vadd.f32 %v3146_v40, %v445_v63  ;;  %3716 = vmatpush.bf16.msrb.mxu2 %v5451_v34  ;;  %v6698_v63 = vld [vmem:[%s9571_s1 + $0x414] sm:$0xf0]  ;;  %v6867_v34 = vld [vmem:[%s9571_s1 + $0x95c] sm:$0xf0]  ;;  %v6148_v38 = vld [vmem:[%s9571_s1 + $0x960] sm:$0xf0] }
 0x163   :  { %4771 = vst [vmem:[#allocation2 + $0x1b0] sm:$0xff] %v3159_v37  ;;  %3730 = vmatpush.bf16.msrb.mxu3 %v5455_v17  ;;  %v5459_v12 = vor.u32 %v6698_v63, %v5458_v62  ;;  %v6784_v37 = vld [vmem:[%s9571_s1 + $0x6cc] sm:$0xf]  ;;  %v6147_v49 = vor.u32 %v6867_v34, %v6146_v33  ;;  %v5498_v34 = vld [vmem:[%s9571_s1 + $0x1a8] sm:$0xf] }
 0x164   :  { %4936 = vst [vmem:[#allocation2 + $0x6d0] sm:$0xff] %v3133_v39  ;;  %v6151_v50 = vor.u32 %v6784_v37, %v6148_v38  ;;  %v5500_v37 = vld [vmem:[%s9571_s1 + $0x440] sm:$0xf0] }
 0x165   :  { %4937 = vst [vmem:[#allocation2 + $0x6d8] sm:$0xff] %v3147_v42 }
 0x166   :  { %4772 = vst [vmem:[#allocation2 + $0x1b8] sm:$0xff] %v3173_v41 }
 0x168   :  { %v3160_v48 = vpop.f32.mrf.mxu2  ;;  %v3186_v55 = vpop.f32.mrf.mxu0 }
 0x169   :  { %v3161_v53 = vadd.f32 %v3160_v48, %v446_v28  ;;  %v3174_v54 = vpop.f32.mrf.mxu3  ;;  %v3187_v58 = vadd.f32 %v3186_v55, %v448_v43  ;;  %v3200_v59 = vpop.f32.mrf.mxu1  ;;  %v6138_v28 = vld [vmem:[%s9571_s1 + $0x6c0] sm:$0xf]  ;;  %v5476_v48 = vld [vmem:[%s9571_s1 + $0x428] sm:$0xf0]  ;;  %v6618_v55 = vld [vmem:[%s9571_s1 + $0x19c] sm:$0xf] }
 0x16a   :  { %v3175_v57 = vadd.f32 %v3174_v54, %v447_v31  ;;  %v3201_v0 = vadd.f32 %v3200_v59, %v449_v44  ;;  %v6139_v42 = vor.u32 %v6866_v29, %v6138_v28  ;;  %v454_v54 = vperm.slane %v8392_v52, 6  ;;  %v8517_v52 = vld [vmem:[%s9572_s2 + $0x40] sm:$0xff] }
 0x16b   :  { %4938 = vst [vmem:[#allocation2 + $0x6e0] sm:$0xff] %v3161_v53  ;;  %6488 = vmatmul.msk.bf16.vlgmr.msra.gmra.mxu0 %vm2389_vm0, %v8240_v60  ;;  %v6701_v53 = vld [vmem:[%s9571_s1 + $0x42c] sm:$0xf0]  ;;  %v5487_v62 = vor.u32 %v6618_v55, %v5484_v56  ;;  %v456_v6 = vperm.slane %v8517_v52, 0  ;;  %v457_v7 = vperm.slane %v8517_v52, 1  ;;  %v459_v38 = vperm.slane %v8517_v52, 3 }
 0x16c   :  { %4939 = vst [vmem:[#allocation2 + $0x6e8] sm:$0xff] %v3175_v57  ;;  %6489 = vmatmul.msk.bf16.vlgmr.msra.gmra.mxu1 %vm2389_vm0, %v8240_v60  ;;  %3743 = vmatpush.bf16.msra.mxu0 %v6123_v61  ;;  %v5483_v59 = vor.u32 %v6701_v53, %v5482_v51  ;;  %v460_v51 = vperm.slane %v8517_v52, 4  ;;  %v461_v53 = vperm.slane %v8517_v52, 5  ;;  %v6870_v55 = vld [vmem:[%s9571_s1 + $0x974] sm:$0xf0] }
 0x16d   :  { %4773 = vst [vmem:[#allocation2 + $0x1c0] sm:$0xff] %v3187_v58  ;;  %6490 = vmatmul.msk.bf16.vlgmr.msra.gmra.mxu2 %vm2389_vm0, %v8240_v60  ;;  %3757 = vmatpush.bf16.msra.mxu1 %v6127_v1  ;;  %v5479_v58 = vor.u32 %v6617_v47, %v5476_v48  ;;  %v6787_v56 = vld [vmem:[%s9571_s1 + $0x6e4] sm:$0xf] }
 0x16e   :  { %4774 = vst [vmem:[#allocation2 + $0x1c8] sm:$0xff] %v3201_v0  ;;  %6491 = vmatmul.msk.bf16.vlgmr.msra.gmra.mxu3 %vm2389_vm0, %v8240_v60  ;;  %3771 = vmatpush.bf16.msra.mxu2 %v6131_v4 }
 0x16f   :  { %3785 = vmatpush.bf16.msra.mxu3 %v6135_v5 }
 0x170   :  { %v3214_v15 = vpop.f32.mrf.mxu2  ;;  %v3188_v18 = vpop.f32.mrf.mxu0  ;;  %3744 = vmatpush.bf16.msra.mxu0 %v5459_v12  ;;  %v6156_v12 = vld [vmem:[%s9571_s1 + $0x968] sm:$0xf0] }
 0x171   :  { %v3215_v19 = vadd.f32 %v3214_v15, %v450_v8  ;;  %v3228_v20 = vpop.f32.mrf.mxu3  ;;  %v3189_v21 = vadd.f32 %v3188_v18, %v448_v43  ;;  %v3202_v22 = vpop.f32.mrf.mxu1  ;;  %3758 = vmatpush.bf16.msra.mxu1 %v5463_v13  ;;  %v5474_v43 = vld [vmem:[%s9571_s1 + $0x190] sm:$0xf]  ;;  %v6162_v13 = vld [vmem:[%s9571_s1 + $0x6d8] sm:$0xf]  ;;  %v6159_v29 = vor.u32 %v6785_v10, %v6156_v12  ;;  %v6621_v10 = vld [vmem:[%s9571_s1 + $0x1b4] sm:$0xf] }
 0x172   :  { %v3229_v24 = vadd.f32 %v3228_v20, %v451_v11  ;;  %v3203_v25 = vadd.f32 %v3202_v22, %v449_v44  ;;  %3772 = vmatpush.bf16.msra.mxu2 %v5467_v14  ;;  %v6700_v44 = vld [vmem:[%s9571_s1 + $0x424] sm:$0xf0]  ;;  %v6869_v14 = vld [vmem:[%s9571_s1 + $0x96c] sm:$0xf0]  ;;  %v6164_v20 = vld [vmem:[%s9571_s1 + $0x970] sm:$0xf0] }
 0x173   :  { %4775 = vst [vmem:[#allocation2 + $0x1d0] sm:$0xff] %v3215_v19  ;;  %3786 = vmatpush.bf16.msra.mxu3 %v5471_v16  ;;  %v5475_v57 = vor.u32 %v6700_v44, %v5474_v43  ;;  %v6786_v19 = vld [vmem:[%s9571_s1 + $0x6dc] sm:$0xf]  ;;  %v6163_v32 = vor.u32 %v6869_v14, %v6162_v13  ;;  %v5514_v14 = vld [vmem:[%s9571_s1 + $0x1b8] sm:$0xf] }
 0x174   :  { %4940 = vst [vmem:[#allocation2 + $0x6f0] sm:$0xff] %v3189_v21  ;;  %v6167_v33 = vor.u32 %v6786_v19, %v6164_v20  ;;  %v5516_v19 = vld [vmem:[%s9571_s1 + $0x450] sm:$0xf0]  ;;  %v463_v20 = vperm.slane %v8517_v52, 7 }
 0x175   :  { %4941 = vst [vmem:[#allocation2 + $0x6f8] sm:$0xff] %v3203_v25 }
 0x176   :  { %4776 = vst [vmem:[#allocation2 + $0x1d8] sm:$0xff] %v3229_v24 }
 0x178   :  { %v3216_v31 = vpop.f32.mrf.mxu2  ;;  %v3242_v36 = vpop.f32.mrf.mxu0 }
 0x179   :  { %v3217_v35 = vadd.f32 %v3216_v31, %v450_v8  ;;  %v3230_v17 = vpop.f32.mrf.mxu3  ;;  %v3243_v40 = vadd.f32 %v3242_v36, %v452_v26  ;;  %v3256_v41 = vpop.f32.mrf.mxu1  ;;  %v6154_v8 = vld [vmem:[%s9571_s1 + $0x6d0] sm:$0xf]  ;;  %v5492_v31 = vld [vmem:[%s9571_s1 + $0x438] sm:$0xf0]  ;;  %v6620_v36 = vld [vmem:[%s9571_s1 + $0x1ac] sm:$0xf] }
 0x17a   :  { %v3231_v39 = vadd.f32 %v3230_v17, %v451_v11  ;;  %v3257_v45 = vadd.f32 %v3256_v41, %v453_v27  ;;  %v6155_v25 = vor.u32 %v6868_v9, %v6154_v8  ;;  %v458_v17 = vperm.slane %v8517_v52, 2 }
 0x17b   :  { %4942 = vst [vmem:[#allocation2 + $0x700] sm:$0xff] %v3217_v35  ;;  %6492 = vmatmul.msk.bf16.vlgmr.msrb.gmra.mxu0 %vm2389_vm0, %v8240_v60  ;;  %v6703_v35 = vld [vmem:[%s9571_s1 + $0x43c] sm:$0xf0]  ;;  %v5503_v43 = vor.u32 %v6620_v36, %v5500_v37  ;;  %v6872_v36 = vld [vmem:[%s9571_s1 + $0x984] sm:$0xf0] }
 0x17c   :  { %4943 = vst [vmem:[#allocation2 + $0x708] sm:$0xff] %v3231_v39  ;;  %6493 = vmatmul.msk.bf16.vlgmr.msrb.gmra.mxu1 %vm2389_vm0, %v8240_v60  ;;  %3799 = vmatpush.bf16.msrb.mxu0 %v6139_v42  ;;  %v5499_v41 = vor.u32 %v6703_v35, %v5498_v34  ;;  %v6789_v37 = vld [vmem:[%s9571_s1 + $0x6f4] sm:$0xf] }
 0x17d   :  { %4777 = vst [vmem:[#allocation2 + $0x1e0] sm:$0xff] %v3243_v40  ;;  %6494 = vmatmul.msk.bf16.vlgmr.msrb.gmra.mxu2 %vm2389_vm0, %v8240_v60  ;;  %3813 = vmatpush.bf16.msrb.mxu1 %v6143_v46  ;;  %v5495_v40 = vor.u32 %v6619_v30, %v5492_v31 }
 0x17e   :  { %4778 = vst [vmem:[#allocation2 + $0x1e8] sm:$0xff] %v3257_v45  ;;  %6495 = vmatmul.msk.bf16.vlgmr.msrb.gmra.mxu3 %vm2389_vm0, %v8240_v60  ;;  %3827 = vmatpush.bf16.msrb.mxu2 %v6147_v49 }
 0x17f   :  { %3841 = vmatpush.bf16.msrb.mxu3 %v6151_v50 }
 0x180   :  { %v3270_v61 = vpop.f32.mrf.mxu2  ;;  %v3244_v63 = vpop.f32.mrf.mxu0  ;;  %3800 = vmatpush.bf16.msrb.mxu0 %v5475_v57  ;;  %v6172_v57 = vld [vmem:[%s9571_s1 + $0x978] sm:$0xf0] }
 0x181   :  { %v3271_v0 = vadd.f32 %v3270_v61, %v454_v54  ;;  %v3284_v1 = vpop.f32.mrf.mxu3  ;;  %v3245_v2 = vadd.f32 %v3244_v63, %v452_v26  ;;  %v3258_v3 = vpop.f32.mrf.mxu1  ;;  %3814 = vmatpush.bf16.msrb.mxu1 %v5479_v58  ;;  %v5490_v26 = vld [vmem:[%s9571_s1 + $0x1a0] sm:$0xf]  ;;  %v6178_v58 = vld [vmem:[%s9571_s1 + $0x6e8] sm:$0xf]  ;;  %v6175_v9 = vor.u32 %v6787_v56, %v6172_v57  ;;  %v6623_v56 = vld [vmem:[%s9571_s1 + $0x1c4] sm:$0xf] }
 0x182   :  { %v3285_v4 = vadd.f32 %v3284_v1, %v455_v23  ;;  %v3259_v5 = vadd.f32 %v3258_v3, %v453_v27  ;;  %3828 = vmatpush.bf16.msrb.mxu2 %v5483_v59  ;;  %v6702_v27 = vld [vmem:[%s9571_s1 + $0x434] sm:$0xf0]  ;;  %v6871_v59 = vld [vmem:[%s9571_s1 + $0x97c] sm:$0xf0]  ;;  %v6180_v1 = vld [vmem:[%s9571_s1 + $0x980] sm:$0xf0] }
 0x183   :  { %4779 = vst [vmem:[#allocation2 + $0x1f0] sm:$0xff] %v3271_v0  ;;  %3842 = vmatpush.bf16.msrb.mxu3 %v5487_v62  ;;  %v5491_v39 = vor.u32 %v6702_v27, %v5490_v26  ;;  %v6788_v0 = vld [vmem:[%s9571_s1 + $0x6ec] sm:$0xf]  ;;  %v6179_v12 = vor.u32 %v6871_v59, %v6178_v58  ;;  %v5530_v59 = vld [vmem:[%s9571_s1 + $0x1c8] sm:$0xf] }
 0x184   :  { %4944 = vst [vmem:[#allocation2 + $0x710] sm:$0xff] %v3245_v2  ;;  %v6183_v13 = vor.u32 %v6788_v0, %v6180_v1  ;;  %v5532_v0 = vld [vmem:[%s9571_s1 + $0x460] sm:$0xf0] }
 0x185   :  { %4945 = vst [vmem:[#allocation2 + $0x718] sm:$0xff] %v3259_v5 }
 0x186   :  { %4780 = vst [vmem:[#allocation2 + $0x1f8] sm:$0xff] %v3285_v4 }
 0x188   :  { %v3272_v11 = vpop.f32.mrf.mxu2  ;;  %v3298_v18 = vpop.f32.mrf.mxu0 }
 0x189   :  { %v3273_v15 = vadd.f32 %v3272_v11, %v454_v54  ;;  %v3286_v16 = vpop.f32.mrf.mxu3  ;;  %v3299_v22 = vadd.f32 %v3298_v18, %v456_v6  ;;  %v3312_v24 = vpop.f32.mrf.mxu1  ;;  %v6170_v54 = vld [vmem:[%s9571_s1 + $0x6e0] sm:$0xf]  ;;  %v5508_v11 = vld [vmem:[%s9571_s1 + $0x448] sm:$0xf0]  ;;  %v6622_v18 = vld [vmem:[%s9571_s1 + $0x1bc] sm:$0xf] }
 0x18a   :  { %v3287_v21 = vadd.f32 %v3286_v16, %v455_v23  ;;  %v3313_v28 = vadd.f32 %v3312_v24, %v457_v7  ;;  %v6171_v5 = vor.u32 %v6870_v55, %v6170_v54  ;;  %v462_v16 = vperm.slane %v8517_v52, 6  ;;  %v8642_v52 = vld [vmem:[%s9572_s2 + $0x48] sm:$0xff] }
 0x18b   :  { %4946 = vst [vmem:[#allocation2 + $0x720] sm:$0xff] %v3273_v15  ;;  %6496 = vmatmul.msk.bf16.vlgmr.msra.gmra.mxu0 %vm2389_vm0, %v8240_v60  ;;  %v6705_v15 = vld [vmem:[%s9571_s1 + $0x44c] sm:$0xf0]  ;;  %v5519_v26 = vor.u32 %v6622_v18, %v5516_v19  ;;  %v464_v34 = vperm.slane %v8642_v52, 0  ;;  %v465_v35 = vperm.slane %v8642_v52, 1  ;;  %v467_v1 = vperm.slane %v8642_v52, 3 }
 0x18c   :  { %4947 = vst [vmem:[#allocation2 + $0x728] sm:$0xff] %v3287_v21  ;;  %6497 = vmatmul.msk.bf16.vlgmr.msra.gmra.mxu1 %vm2389_vm0, %v8240_v60  ;;  %3855 = vmatpush.bf16.msra.mxu0 %v6155_v25  ;;  %v5515_v24 = vor.u32 %v6705_v15, %v5514_v14  ;;  %v469_v14 = vperm.slane %v8642_v52, 5  ;;  %v6202_v15 = vld [vmem:[%s9571_s1 + $0x700] sm:$0xf]  ;;  %v6791_v18 = vld [vmem:[%s9571_s1 + $0x704] sm:$0xf] }
 0x18d   :  { %4781 = vst [vmem:[#allocation2 + $0x200] sm:$0xff] %v3299_v22  ;;  %6498 = vmatmul.msk.bf16.vlgmr.msra.gmra.mxu2 %vm2389_vm0, %v8240_v60  ;;  %3869 = vmatpush.bf16.msra.mxu1 %v6159_v29  ;;  %v5511_v22 = vor.u32 %v6621_v10, %v5508_v11 }
 0x18e   :  { %4782 = vst [vmem:[#allocation2 + $0x208] sm:$0xff] %v3313_v28  ;;  %6499 = vmatmul.msk.bf16.vlgmr.msra.gmra.mxu3 %vm2389_vm0, %v8240_v60  ;;  %3883 = vmatpush.bf16.msra.mxu2 %v6163_v32 }
 0x18f   :  { %3897 = vmatpush.bf16.msra.mxu3 %v6167_v33 }
 0x190   :  { %v3326_v42 = vpop.f32.mrf.mxu2  ;;  %v3300_v44 = vpop.f32.mrf.mxu0  ;;  %3856 = vmatpush.bf16.msra.mxu0 %v5491_v39  ;;  %v6188_v39 = vld [vmem:[%s9571_s1 + $0x988] sm:$0xf0] }
 0x191   :  { %v3327_v45 = vadd.f32 %v3326_v42, %v458_v17  ;;  %v3340_v46 = vpop.f32.mrf.mxu3  ;;  %v3301_v47 = vadd.f32 %v3300_v44, %v456_v6  ;;  %v3314_v48 = vpop.f32.mrf.mxu1  ;;  %3870 = vmatpush.bf16.msra.mxu1 %v5495_v40  ;;  %v5506_v6 = vld [vmem:[%s9571_s1 + $0x1b0] sm:$0xf]  ;;  %v6194_v40 = vld [vmem:[%s9571_s1 + $0x6f8] sm:$0xf]  ;;  %v6191_v55 = vor.u32 %v6789_v37, %v6188_v39  ;;  %v5540_v37 = vld [vmem:[%s9571_s1 + $0x468] sm:$0xf0] }
 0x192   :  { %v3341_v49 = vadd.f32 %v3340_v46, %v459_v38  ;;  %v3315_v50 = vadd.f32 %v3314_v48, %v457_v7  ;;  %3884 = vmatpush.bf16.msra.mxu2 %v5499_v41  ;;  %v6704_v7 = vld [vmem:[%s9571_s1 + $0x444] sm:$0xf0]  ;;  %v6873_v41 = vld [vmem:[%s9571_s1 + $0x98c] sm:$0xf0]  ;;  %v6196_v46 = vld [vmem:[%s9571_s1 + $0x990] sm:$0xf0] }
 0x193   :  { %4783 = vst [vmem:[#allocation2 + $0x210] sm:$0xff] %v3327_v45  ;;  %3898 = vmatpush.bf16.msra.mxu3 %v5503_v43  ;;  %v5507_v21 = vor.u32 %v6704_v7, %v5506_v6  ;;  %v6790_v45 = vld [vmem:[%s9571_s1 + $0x6fc] sm:$0xf]  ;;  %v6195_v57 = vor.u32 %v6873_v41, %v6194_v40  ;;  %v8745_v39 = vld [vmem:[%s9570_s0] sm:$0xff]  ;;  %v5546_v41 = vld [vmem:[%s9571_s1 + $0x1d8] sm:$0xf] }
 0x194   :  { %4948 = vst [vmem:[#allocation2 + $0x730] sm:$0xff] %v3301_v47  ;;  %v6199_v58 = vor.u32 %v6790_v45, %v6196_v46  ;;  %v5548_v45 = vld [vmem:[%s9571_s1 + $0x470] sm:$0xf0]  ;;  %v471_v46 = vperm.slane %v8642_v52, 7 }
 0x195   :  { %4949 = vst [vmem:[#allocation2 + $0x738] sm:$0xff] %v3315_v50 }
 0x196   :  { %4784 = vst [vmem:[#allocation2 + $0x218] sm:$0xff] %v3341_v49 }
 0x198   :  { %v3328_v23 = vpop.f32.mrf.mxu2  ;;  %v3354_v63 = vpop.f32.mrf.mxu0 }
 0x199   :  { %v3329_v61 = vadd.f32 %v3328_v23, %v458_v17  ;;  %v3342_v62 = vpop.f32.mrf.mxu3  ;;  %v3355_v3 = vadd.f32 %v3354_v63, %v460_v51  ;;  %v3368_v4 = vpop.f32.mrf.mxu1  ;;  %v6186_v17 = vld [vmem:[%s9571_s1 + $0x6f0] sm:$0xf]  ;;  %v5524_v23 = vld [vmem:[%s9571_s1 + $0x458] sm:$0xf0]  ;;  %v6624_v63 = vld [vmem:[%s9571_s1 + $0x1cc] sm:$0xf] }
 0x19a   :  { %v3343_v2 = vadd.f32 %v3342_v62, %v459_v38  ;;  %v3369_v8 = vadd.f32 %v3368_v4, %v461_v53  ;;  %v6187_v50 = vor.u32 %v6872_v36, %v6186_v17  ;;  %v466_v62 = vperm.slane %v8642_v52, 2  ;;  %v6625_v36 = vld [vmem:[%s9571_s1 + $0x1d4] sm:$0xf] }
 0x19b   :  { %4950 = vst [vmem:[#allocation2 + $0x740] sm:$0xff] %v3329_v61  ;;  %6500 = vmatmul.msk.bf16.vlgmr.msrb.gmra.mxu0 %vm2389_vm0, %v8240_v60  ;;  %v6707_v61 = vld [vmem:[%s9571_s1 + $0x45c] sm:$0xf0]  ;;  %v5535_v6 = vor.u32 %v6624_v63, %v5532_v0  ;;  %v6876_v63 = vld [vmem:[%s9571_s1 + $0x9a4] sm:$0xf0] }
 0x19c   :  { %4951 = vst [vmem:[#allocation2 + $0x748] sm:$0xff] %v3343_v2  ;;  %6501 = vmatmul.msk.bf16.vlgmr.msrb.gmra.mxu1 %vm2389_vm0, %v8240_v60  ;;  %3911 = vmatpush.bf16.msrb.mxu0 %v6171_v5  ;;  %v5531_v4 = vor.u32 %v6707_v61, %v5530_v59  ;;  %v6793_v0 = vld [vmem:[%s9571_s1 + $0x714] sm:$0xf] }
 0x19d   :  { %4785 = vst [vmem:[#allocation2 + $0x220] sm:$0xff] %v3355_v3  ;;  %6502 = vmatmul.msk.bf16.vlgmr.msrb.gmra.mxu2 %vm2389_vm0, %v8240_v60  ;;  %3925 = vmatpush.bf16.msrb.mxu1 %v6175_v9  ;;  %v5527_v3 = vor.u32 %v6623_v56, %v5524_v23 }
 0x19e   :  { %4786 = vst [vmem:[#allocation2 + $0x228] sm:$0xff] %v3369_v8  ;;  %6503 = vmatmul.msk.bf16.vlgmr.msrb.gmra.mxu3 %vm2389_vm0, %v8240_v60  ;;  %3939 = vmatpush.bf16.msrb.mxu2 %v6179_v12 }
 0x19f   :  { %3953 = vmatpush.bf16.msrb.mxu3 %v6183_v13 }
 0x1a0   :  { %v3382_v25 = vpop.f32.mrf.mxu2  ;;  %v3356_v27 = vpop.f32.mrf.mxu0  ;;  %3912 = vmatpush.bf16.msrb.mxu0 %v5507_v21  ;;  %v6210_v21 = vld [vmem:[%s9571_s1 + $0x708] sm:$0xf] }
 0x1a1   :  { %v3383_v28 = vadd.f32 %v3382_v25, %v462_v16  ;;  %v3396_v29 = vpop.f32.mrf.mxu3  ;;  %v3357_v30 = vadd.f32 %v3356_v27, %v460_v51  ;;  %v3370_v31 = vpop.f32.mrf.mxu1  ;;  %3926 = vmatpush.bf16.msrb.mxu1 %v5511_v22  ;;  %v5522_v51 = vld [vmem:[%s9571_s1 + $0x1c0] sm:$0xf]  ;;  %v6792_v27 = vld [vmem:[%s9571_s1 + $0x70c] sm:$0xf] }
 0x1a2   :  { %v3397_v32 = vadd.f32 %v3396_v29, %v463_v20  ;;  %v3371_v33 = vadd.f32 %v3370_v31, %v461_v53  ;;  %3940 = vmatpush.bf16.msrb.mxu2 %v5515_v24  ;;  %v6706_v53 = vld [vmem:[%s9571_s1 + $0x454] sm:$0xf0]  ;;  %v6875_v22 = vld [vmem:[%s9571_s1 + $0x99c] sm:$0xf0] }
 0x1a3   :  { %4787 = vst [vmem:[#allocation2 + $0x230] sm:$0xff] %v3383_v28  ;;  %3954 = vmatpush.bf16.msrb.mxu3 %v5519_v26  ;;  %v5523_v2 = vor.u32 %v6706_v53, %v5522_v51  ;;  %v6212_v28 = vld [vmem:[%s9571_s1 + $0x9a0] sm:$0xf0] }
 0x1a4   :  { %4952 = vst [vmem:[#allocation2 + $0x750] sm:$0xff] %v3357_v30  ;;  %v6215_v40 = vor.u32 %v6792_v27, %v6212_v28  ;;  %v5564_v27 = vld [vmem:[%s9571_s1 + $0x480] sm:$0xf0] }
 0x1a5   :  { %4953 = vst [vmem:[#allocation2 + $0x758] sm:$0xff] %v3371_v33  ;;  %v5538_v33 = vld [vmem:[%s9571_s1 + $0x1d0] sm:$0xf] }
 0x1a6   :  { %4788 = vst [vmem:[#allocation2 + $0x238] sm:$0xff] %v3397_v32 }
 0x1a8   :  { %v3384_v38 = vpop.f32.mrf.mxu2  ;;  %v3410_v44 = vpop.f32.mrf.mxu0 }
 0x1a9   :  { %v3385_v42 = vadd.f32 %v3384_v38, %v462_v16  ;;  %v3398_v43 = vpop.f32.mrf.mxu3  ;;  %v3411_v48 = vadd.f32 %v3410_v44, %v464_v34  ;;  %v3424_v49 = vpop.f32.mrf.mxu1  ;;  %v6874_v16 = vld [vmem:[%s9571_s1 + $0x994] sm:$0xf0]  ;;  %v6211_v38 = vor.u32 %v6875_v22, %v6210_v21  ;;  %v6626_v44 = vld [vmem:[%s9571_s1 + $0x1dc] sm:$0xf]  ;;  %v5562_v22 = vld [vmem:[%s9571_s1 + $0x1e8] sm:$0xf] }
 0x1aa   :  { %v3399_v47 = vadd.f32 %v3398_v43, %v463_v20  ;;  %v3425_v54 = vadd.f32 %v3424_v49, %v465_v35  ;;  %v6204_v20 = vld [vmem:[%s9571_s1 + $0x998] sm:$0xf0]  ;;  %v6203_v32 = vor.u32 %v6874_v16, %v6202_v15  ;;  %v470_v43 = vperm.slane %v8642_v52, 6 }
 0x1ab   :  { %4954 = vst [vmem:[#allocation2 + $0x760] sm:$0xff] %v3385_v42  ;;  %6504 = vmatmul.msk.bf16.vlgmr.msra.gmra.mxu0 %vm2389_vm0, %v8240_v60  ;;  %v6207_v17 = vor.u32 %v6791_v18, %v6204_v20  ;;  %v6709_v42 = vld [vmem:[%s9571_s1 + $0x46c] sm:$0xf0]  ;;  %v5551_v51 = vor.u32 %v6626_v44, %v5548_v45  ;;  %v6627_v18 = vld [vmem:[%s9571_s1 + $0x1e4] sm:$0xf] }
 0x1ac   :  { %4955 = vst [vmem:[#allocation2 + $0x768] sm:$0xff] %v3399_v47  ;;  %6505 = vmatmul.msk.bf16.vlgmr.msra.gmra.mxu1 %vm2389_vm0, %v8240_v60  ;;  %3967 = vmatpush.bf16.msra.mxu0 %v6187_v50  ;;  %v5547_v49 = vor.u32 %v6709_v42, %v5546_v41  ;;  %v6878_v44 = vld [vmem:[%s9571_s1 + $0x9b4] sm:$0xf0]  ;;  %v6795_v45 = vld [vmem:[%s9571_s1 + $0x724] sm:$0xf] }
 0x1ad   :  { %4789 = vst [vmem:[#allocation2 + $0x240] sm:$0xff] %v3411_v48  ;;  %6506 = vmatmul.msk.bf16.vlgmr.msra.gmra.mxu2 %vm2389_vm0, %v8240_v60  ;;  %3981 = vmatpush.bf16.msra.mxu1 %v6191_v55  ;;  %v5543_v48 = vor.u32 %v6625_v36, %v5540_v37 }
 0x1ae   :  { %4790 = vst [vmem:[#allocation2 + $0x248] sm:$0xff] %v3425_v54  ;;  %6507 = vmatmul.msk.bf16.vlgmr.msra.gmra.mxu3 %vm2389_vm0, %v8240_v60  ;;  %3995 = vmatpush.bf16.msra.mxu2 %v6195_v57  ;;  %v468_v60 = vperm.slane %v8642_v52, 4  ;;  %v8772_v52 = vld [vmem:[%s9572_s2 + $0x50] sm:$0xff] }
 0x1af   :  { %4009 = vmatpush.bf16.msra.mxu3 %v6199_v58  ;;  %v472_v59 = vperm.slane %v8772_v52, 0  ;;  %v473_v61 = vperm.slane %v8772_v52, 1  ;;  %v475_v28 = vperm.slane %v8772_v52, 3  ;;  %v476_v41 = vperm.slane %v8772_v52, 4 }
 0x1b0   :  { %v3438_v5 = vpop.f32.mrf.mxu2  ;;  %v3412_v7 = vpop.f32.mrf.mxu0  ;;  %3968 = vmatpush.bf16.msra.mxu0 %v5523_v2  ;;  %v6220_v2 = vld [vmem:[%s9571_s1 + $0x9a8] sm:$0xf0]  ;;  %v477_v42 = vperm.slane %v8772_v52, 5 }
 0x1b1   :  { %v3439_v8 = vadd.f32 %v3438_v5, %v466_v62  ;;  %v3452_v9 = vpop.f32.mrf.mxu3  ;;  %v3413_v10 = vadd.f32 %v3412_v7, %v464_v34  ;;  %v3426_v11 = vpop.f32.mrf.mxu1  ;;  %3982 = vmatpush.bf16.msra.mxu1 %v5527_v3  ;;  %v6708_v34 = vld [vmem:[%s9571_s1 + $0x464] sm:$0xf0]  ;;  %v6226_v3 = vld [vmem:[%s9571_s1 + $0x718] sm:$0xf]  ;;  %v6223_v16 = vor.u32 %v6793_v0, %v6220_v2  ;;  %v6629_v0 = vld [vmem:[%s9571_s1 + $0x1f4] sm:$0xf] }
 0x1b2   :  { %v3453_v12 = vadd.f32 %v3452_v9, %v467_v1  ;;  %v3427_v13 = vadd.f32 %v3426_v11, %v465_v35  ;;  %3996 = vmatpush.bf16.msra.mxu2 %v5531_v4  ;;  %v5539_v47 = vor.u32 %v6708_v34, %v5538_v33  ;;  %v6877_v4 = vld [vmem:[%s9571_s1 + $0x9ac] sm:$0xf0]  ;;  %v6228_v9 = vld [vmem:[%s9571_s1 + $0x9b0] sm:$0xf0] }
 0x1b3   :  { %4791 = vst [vmem:[#allocation2 + $0x250] sm:$0xff] %v3439_v8  ;;  %4010 = vmatpush.bf16.msra.mxu3 %v5535_v6  ;;  %v6794_v8 = vld [vmem:[%s9571_s1 + $0x71c] sm:$0xf]  ;;  %v6227_v20 = vor.u32 %v6877_v4, %v6226_v3  ;;  %v5578_v4 = vld [vmem:[%s9571_s1 + $0x1f8] sm:$0xf] }
 0x1b4   :  { %4956 = vst [vmem:[#allocation2 + $0x770] sm:$0xff] %v3413_v10  ;;  %v6231_v21 = vor.u32 %v6794_v8, %v6228_v9  ;;  %v5580_v8 = vld [vmem:[%s9571_s1 + $0x490] sm:$0xf0]  ;;  %v479_v9 = vperm.slane %v8772_v52, 7 }
 0x1b5   :  { %4957 = vst [vmem:[#allocation2 + $0x778] sm:$0xff] %v3427_v13 }
 0x1b6   :  { %4792 = vst [vmem:[#allocation2 + $0x258] sm:$0xff] %v3453_v12 }
 0x1b8   :  { %v3440_v19 = vpop.f32.mrf.mxu2  ;;  %v3466_v26 = vpop.f32.mrf.mxu0 }
 0x1b9   :  { %v3441_v24 = vadd.f32 %v3440_v19, %v466_v62  ;;  %v3454_v25 = vpop.f32.mrf.mxu3  ;;  %v3467_v30 = vadd.f32 %v3466_v26, %v468_v60  ;;  %v3480_v31 = vpop.f32.mrf.mxu1  ;;  %v6218_v62 = vld [vmem:[%s9571_s1 + $0x710] sm:$0xf]  ;;  %v5556_v19 = vld [vmem:[%s9571_s1 + $0x478] sm:$0xf0]  ;;  %v6628_v26 = vld [vmem:[%s9571_s1 + $0x1ec] sm:$0xf] }
 0x1ba   :  { %v3455_v29 = vadd.f32 %v3454_v25, %v467_v1  ;;  %v3481_v35 = vadd.f32 %v3480_v31, %v469_v14  ;;  %v6219_v13 = vor.u32 %v6876_v63, %v6218_v62  ;;  %v474_v25 = vperm.slane %v8772_v52, 2 }
 0x1bb   :  { %4958 = vst [vmem:[#allocation2 + $0x780] sm:$0xff] %v3441_v24  ;;  %6508 = vmatmul.msk.bf16.vlgmr.msrb.gmra.mxu0 %vm2389_vm0, %v8745_v39  ;;  %v6711_v24 = vld [vmem:[%s9571_s1 + $0x47c] sm:$0xf0]  ;;  %v5567_v33 = vor.u32 %v6628_v26, %v5564_v27  ;;  %v6880_v26 = vld [vmem:[%s9571_s1 + $0x9c4] sm:$0xf0] }
 0x1bc   :  { %4959 = vst [vmem:[#allocation2 + $0x788] sm:$0xff] %v3455_v29  ;;  %6509 = vmatmul.msk.bf16.vlgmr.msrb.gmra.mxu1 %vm2389_vm0, %v8745_v39  ;;  %4023 = vmatpush.bf16.msrb.mxu0 %v6203_v32  ;;  %v5563_v31 = vor.u32 %v6711_v24, %v5562_v22  ;;  %v6797_v27 = vld [vmem:[%s9571_s1 + $0x734] sm:$0xf] }
 0x1bd   :  { %4793 = vst [vmem:[#allocation2 + $0x260] sm:$0xff] %v3467_v30  ;;  %6510 = vmatmul.msk.bf16.vlgmr.msrb.gmra.mxu2 %vm2389_vm0, %v8745_v39  ;;  %4037 = vmatpush.bf16.msrb.mxu1 %v6207_v17  ;;  %v5559_v30 = vor.u32 %v6627_v18, %v5556_v19 }
 0x1be   :  { %4794 = vst [vmem:[#allocation2 + $0x268] sm:$0xff] %v3481_v35  ;;  %6511 = vmatmul.msk.bf16.vlgmr.msrb.gmra.mxu3 %vm2389_vm0, %v8745_v39  ;;  %4051 = vmatpush.bf16.msrb.mxu2 %v6211_v38 }
 0x1bf   :  { %4065 = vmatpush.bf16.msrb.mxu3 %v6215_v40 }
 0x1c0   :  { %v3494_v50 = vpop.f32.mrf.mxu2  ;;  %v3468_v53 = vpop.f32.mrf.mxu0  ;;  %4024 = vmatpush.bf16.msrb.mxu0 %v5539_v47  ;;  %v6236_v47 = vld [vmem:[%s9571_s1 + $0x9b8] sm:$0xf0] }
 0x1c1   :  { %v3495_v54 = vadd.f32 %v3494_v50, %v470_v43  ;;  %v3508_v55 = vpop.f32.mrf.mxu3  ;;  %v3469_v56 = vadd.f32 %v3468_v53, %v468_v60  ;;  %v3482_v23 = vpop.f32.mrf.mxu1  ;;  %4038 = vmatpush.bf16.msrb.mxu1 %v5543_v48  ;;  %v5554_v60 = vld [vmem:[%s9571_s1 + $0x1e0] sm:$0xf]  ;;  %v6242_v48 = vld [vmem:[%s9571_s1 + $0x728] sm:$0xf]  ;;  %v6239_v63 = vor.u32 %v6795_v45, %v6236_v47  ;;  %v6631_v45 = vld [vmem:[%s9571_s1 + $0x204] sm:$0xf] }
 0x1c2   :  { %v3509_v57 = vadd.f32 %v3508_v55, %v471_v46  ;;  %v3483_v58 = vadd.f32 %v3482_v23, %v469_v14  ;;  %4052 = vmatpush.bf16.msrb.mxu2 %v5547_v49  ;;  %v6710_v14 = vld [vmem:[%s9571_s1 + $0x474] sm:$0xf0]  ;;  %v6879_v49 = vld [vmem:[%s9571_s1 + $0x9bc] sm:$0xf0]  ;;  %v6244_v55 = vld [vmem:[%s9571_s1 + $0x9c0] sm:$0xf0] }
 0x1c3   :  { %4795 = vst [vmem:[#allocation2 + $0x270] sm:$0xff] %v3495_v54  ;;  %4066 = vmatpush.bf16.msrb.mxu3 %v5551_v51  ;;  %v5555_v29 = vor.u32 %v6710_v14, %v5554_v60  ;;  %v6796_v54 = vld [vmem:[%s9571_s1 + $0x72c] sm:$0xf]  ;;  %v6243_v2 = vor.u32 %v6879_v49, %v6242_v48  ;;  %v5594_v49 = vld [vmem:[%s9571_s1 + $0x208] sm:$0xf] }
 0x1c4   :  { %4960 = vst [vmem:[#allocation2 + $0x790] sm:$0xff] %v3469_v56  ;;  %v6247_v3 = vor.u32 %v6796_v54, %v6244_v55  ;;  %v5596_v54 = vld [vmem:[%s9571_s1 + $0x4a0] sm:$0xf0] }
 0x1c5   :  { %4961 = vst [vmem:[#allocation2 + $0x798] sm:$0xff] %v3483_v58 }
 0x1c6   :  { %4796 = vst [vmem:[#allocation2 + $0x278] sm:$0xff] %v3509_v57 }
 0x1c8   :  { %v3496_v1 = vpop.f32.mrf.mxu2  ;;  %v3522_v7 = vpop.f32.mrf.mxu0 }
 0x1c9   :  { %v3497_v5 = vadd.f32 %v3496_v1, %v470_v43  ;;  %v3510_v6 = vpop.f32.mrf.mxu3  ;;  %v3523_v11 = vadd.f32 %v3522_v7, %v472_v59  ;;  %v3536_v12 = vpop.f32.mrf.mxu1  ;;  %v6234_v43 = vld [vmem:[%s9571_s1 + $0x720] sm:$0xf]  ;;  %v5572_v1 = vld [vmem:[%s9571_s1 + $0x488] sm:$0xf0]  ;;  %v6630_v7 = vld [vmem:[%s9571_s1 + $0x1fc] sm:$0xf] }
 0x1ca   :  { %v3511_v10 = vadd.f32 %v3510_v6, %v471_v46  ;;  %v3537_v15 = vadd.f32 %v3536_v12, %v473_v61  ;;  %v6235_v58 = vor.u32 %v6878_v44, %v6234_v43  ;;  %v478_v6 = vperm.slane %v8772_v52, 6  ;;  %v8897_v52 = vld [vmem:[%s9572_s2 + $0x58] sm:$0xff] }
 0x1cb   :  { %4962 = vst [vmem:[#allocation2 + $0x7a0] sm:$0xff] %v3497_v5  ;;  %6512 = vmatmul.msk.bf16.vlgmr.msra.gmra.mxu0 %vm2389_vm0, %v8745_v39  ;;  %v6713_v5 = vld [vmem:[%s9571_s1 + $0x48c] sm:$0xf0]  ;;  %v5583_v60 = vor.u32 %v6630_v7, %v5580_v8  ;;  %v480_v22 = vperm.slane %v8897_v52, 0  ;;  %v481_v24 = vperm.slane %v8897_v52, 1  ;;  %v483_v55 = vperm.slane %v8897_v52, 3 }
 0x1cc   :  { %4963 = vst [vmem:[#allocation2 + $0x7a8] sm:$0xff] %v3511_v10  ;;  %6513 = vmatmul.msk.bf16.vlgmr.msra.gmra.mxu1 %vm2389_vm0, %v8745_v39  ;;  %4079 = vmatpush.bf16.msra.mxu0 %v6219_v13  ;;  %v5579_v12 = vor.u32 %v6713_v5, %v5578_v4  ;;  %v484_v4 = vperm.slane %v8897_v52, 4  ;;  %v485_v5 = vperm.slane %v8897_v52, 5  ;;  %v6882_v7 = vld [vmem:[%s9571_s1 + $0x9d4] sm:$0xf0] }
 0x1cd   :  { %4797 = vst [vmem:[#allocation2 + $0x280] sm:$0xff] %v3523_v11  ;;  %6514 = vmatmul.msk.bf16.vlgmr.msra.gmra.mxu2 %vm2389_vm0, %v8745_v39  ;;  %4093 = vmatpush.bf16.msra.mxu1 %v6223_v16  ;;  %v5575_v11 = vor.u32 %v6629_v0, %v5572_v1  ;;  %v6799_v8 = vld [vmem:[%s9571_s1 + $0x744] sm:$0xf] }
 0x1ce   :  { %4798 = vst [vmem:[#allocation2 + $0x288] sm:$0xff] %v3537_v15  ;;  %6515 = vmatmul.msk.bf16.vlgmr.msra.gmra.mxu3 %vm2389_vm0, %v8745_v39  ;;  %4107 = vmatpush.bf16.msra.mxu2 %v6227_v20 }
 0x1cf   :  { %4121 = vmatpush.bf16.msra.mxu3 %v6231_v21 }
 0x1d0   :  { %v3550_v32 = vpop.f32.mrf.mxu2  ;;  %v3524_v34 = vpop.f32.mrf.mxu0  ;;  %4080 = vmatpush.bf16.msra.mxu0 %v5555_v29  ;;  %v6252_v29 = vld [vmem:[%s9571_s1 + $0x9c8] sm:$0xf0] }
 0x1d1   :  { %v3551_v35 = vadd.f32 %v3550_v32, %v474_v25  ;;  %v3564_v17 = vpop.f32.mrf.mxu3  ;;  %v3525_v36 = vadd.f32 %v3524_v34, %v472_v59  ;;  %v3538_v37 = vpop.f32.mrf.mxu1  ;;  %4094 = vmatpush.bf16.msra.mxu1 %v5559_v30  ;;  %v5570_v59 = vld [vmem:[%s9571_s1 + $0x1f0] sm:$0xf]  ;;  %v6258_v30 = vld [vmem:[%s9571_s1 + $0x738] sm:$0xf]  ;;  %v6255_v44 = vor.u32 %v6797_v27, %v6252_v29  ;;  %v6633_v27 = vld [vmem:[%s9571_s1 + $0x214] sm:$0xf] }
 0x1d2   :  { %v3565_v38 = vadd.f32 %v3564_v17, %v475_v28  ;;  %v3539_v40 = vadd.f32 %v3538_v37, %v473_v61  ;;  %4108 = vmatpush.bf16.msra.mxu2 %v5563_v31  ;;  %v6712_v61 = vld [vmem:[%s9571_s1 + $0x484] sm:$0xf0]  ;;  %v6881_v31 = vld [vmem:[%s9571_s1 + $0x9cc] sm:$0xf0]  ;;  %v6260_v17 = vld [vmem:[%s9571_s1 + $0x9d0] sm:$0xf0] }
 0x1d3   :  { %4799 = vst [vmem:[#allocation2 + $0x290] sm:$0xff] %v3551_v35  ;;  %4122 = vmatpush.bf16.msra.mxu3 %v5567_v33  ;;  %v5571_v10 = vor.u32 %v6712_v61, %v5570_v59  ;;  %v6798_v35 = vld [vmem:[%s9571_s1 + $0x73c] sm:$0xf]  ;;  %v6259_v47 = vor.u32 %v6881_v31, %v6258_v30  ;;  %v5610_v31 = vld [vmem:[%s9571_s1 + $0x218] sm:$0xf] }
 0x1d4   :  { %4964 = vst [vmem:[#allocation2 + $0x7b0] sm:$0xff] %v3525_v36  ;;  %v6263_v48 = vor.u32 %v6798_v35, %v6260_v17  ;;  %v5612_v35 = vld [vmem:[%s9571_s1 + $0x4b0] sm:$0xf0]  ;;  %v487_v17 = vperm.slane %v8897_v52, 7 }
 0x1d5   :  { %4965 = vst [vmem:[#allocation2 + $0x7b8] sm:$0xff] %v3539_v40 }
 0x1d6   :  { %4800 = vst [vmem:[#allocation2 + $0x298] sm:$0xff] %v3565_v38 }
 0x1d8   :  { %v3552_v46 = vpop.f32.mrf.mxu2  ;;  %v3578_v53 = vpop.f32.mrf.mxu0 }
 0x1d9   :  { %v3553_v50 = vadd.f32 %v3552_v46, %v474_v25  ;;  %v3566_v51 = vpop.f32.mrf.mxu3  ;;  %v3579_v23 = vadd.f32 %v3578_v53, %v476_v41  ;;  %v3592_v57 = vpop.f32.mrf.mxu1  ;;  %v6250_v25 = vld [vmem:[%s9571_s1 + $0x730] sm:$0xf]  ;;  %v5588_v46 = vld [vmem:[%s9571_s1 + $0x498] sm:$0xf0]  ;;  %v6632_v53 = vld [vmem:[%s9571_s1 + $0x20c] sm:$0xf] }
 0x1da   :  { %v3567_v56 = vadd.f32 %v3566_v51, %v475_v28  ;;  %v3593_v62 = vadd.f32 %v3592_v57, %v477_v42  ;;  %v6251_v40 = vor.u32 %v6880_v26, %v6250_v25  ;;  %v482_v51 = vperm.slane %v8897_v52, 2 }
 0x1db   :  { %4966 = vst [vmem:[#allocation2 + $0x7c0] sm:$0xff] %v3553_v50  ;;  %6516 = vmatmul.msk.bf16.vlgmr.msrb.gmra.mxu0 %vm2389_vm0, %v8745_v39  ;;  %v6715_v50 = vld [vmem:[%s9571_s1 + $0x49c] sm:$0xf0]  ;;  %v5599_v59 = vor.u32 %v6632_v53, %v5596_v54  ;;  %v6884_v53 = vld [vmem:[%s9571_s1 + $0x9e4] sm:$0xf0] }
 0x1dc   :  { %4967 = vst [vmem:[#allocation2 + $0x7c8] sm:$0xff] %v3567_v56  ;;  %6517 = vmatmul.msk.bf16.vlgmr.msrb.gmra.mxu1 %vm2389_vm0, %v8745_v39  ;;  %4135 = vmatpush.bf16.msrb.mxu0 %v6235_v58  ;;  %v5595_v57 = vor.u32 %v6715_v50, %v5594_v49  ;;  %v6801_v54 = vld [vmem:[%s9571_s1 + $0x754] sm:$0xf] }
 0x1dd   :  { %4801 = vst [vmem:[#allocation2 + $0x2a0] sm:$0xff] %v3579_v23  ;;  %6518 = vmatmul.msk.bf16.vlgmr.msrb.gmra.mxu2 %vm2389_vm0, %v8745_v39  ;;  %4149 = vmatpush.bf16.msrb.mxu1 %v6239_v63  ;;  %v5591_v23 = vor.u32 %v6631_v45, %v5588_v46 }
 0x1de   :  { %4802 = vst [vmem:[#allocation2 + $0x2a8] sm:$0xff] %v3593_v62  ;;  %6519 = vmatmul.msk.bf16.vlgmr.msrb.gmra.mxu3 %vm2389_vm0, %v8745_v39  ;;  %4163 = vmatpush.bf16.msrb.mxu2 %v6243_v2 }
 0x1df   :  { %4177 = vmatpush.bf16.msrb.mxu3 %v6247_v3 }
 0x1e0   :  { %v3606_v13 = vpop.f32.mrf.mxu2  ;;  %v3580_v14 = vpop.f32.mrf.mxu0  ;;  %4136 = vmatpush.bf16.msrb.mxu0 %v5571_v10  ;;  %v6268_v10 = vld [vmem:[%s9571_s1 + $0x9d8] sm:$0xf0] }
 0x1e1   :  { %v3607_v15 = vadd.f32 %v3606_v13, %v478_v6  ;;  %v3620_v16 = vpop.f32.mrf.mxu3  ;;  %v3581_v18 = vadd.f32 %v3580_v14, %v476_v41  ;;  %v3594_v19 = vpop.f32.mrf.mxu1  ;;  %4150 = vmatpush.bf16.msrb.mxu1 %v5575_v11  ;;  %v5586_v41 = vld [vmem:[%s9571_s1 + $0x200] sm:$0xf]  ;;  %v6274_v11 = vld [vmem:[%s9571_s1 + $0x748] sm:$0xf]  ;;  %v6271_v26 = vor.u32 %v6799_v8, %v6268_v10  ;;  %v6635_v8 = vld [vmem:[%s9571_s1 + $0x224] sm:$0xf] }
 0x1e2   :  { %v3621_v20 = vadd.f32 %v3620_v16, %v479_v9  ;;  %v3595_v21 = vadd.f32 %v3594_v19, %v477_v42  ;;  %4164 = vmatpush.bf16.msrb.mxu2 %v5579_v12  ;;  %v6714_v42 = vld [vmem:[%s9571_s1 + $0x494] sm:$0xf0]  ;;  %v6883_v12 = vld [vmem:[%s9571_s1 + $0x9dc] sm:$0xf0]  ;;  %v6276_v16 = vld [vmem:[%s9571_s1 + $0x9e0] sm:$0xf0] }
 0x1e3   :  { %4803 = vst [vmem:[#allocation2 + $0x2b0] sm:$0xff] %v3607_v15  ;;  %4178 = vmatpush.bf16.msrb.mxu3 %v5583_v60  ;;  %v5587_v56 = vor.u32 %v6714_v42, %v5586_v41  ;;  %v6800_v15 = vld [vmem:[%s9571_s1 + $0x74c] sm:$0xf]  ;;  %v6275_v29 = vor.u32 %v6883_v12, %v6274_v11  ;;  %v5626_v12 = vld [vmem:[%s9571_s1 + $0x228] sm:$0xf] }
 0x1e4   :  { %4968 = vst [vmem:[#allocation2 + $0x7d0] sm:$0xff] %v3581_v18  ;;  %v6279_v30 = vor.u32 %v6800_v15, %v6276_v16  ;;  %v5628_v15 = vld [vmem:[%s9571_s1 + $0x4c0] sm:$0xf0] }
 0x1e5   :  { %4969 = vst [vmem:[#allocation2 + $0x7d8] sm:$0xff] %v3595_v21 }
 0x1e6   :  { %4804 = vst [vmem:[#allocation2 + $0x2b8] sm:$0xff] %v3621_v20 }
 0x1e8   :  { %v3608_v28 = vpop.f32.mrf.mxu2  ;;  %v3634_v34 = vpop.f32.mrf.mxu0 }
 0x1e9   :  { %v3609_v32 = vadd.f32 %v3608_v28, %v478_v6  ;;  %v3622_v33 = vpop.f32.mrf.mxu3  ;;  %v3635_v37 = vadd.f32 %v3634_v34, %v480_v22  ;;  %v3648_v38 = vpop.f32.mrf.mxu1  ;;  %v6266_v6 = vld [vmem:[%s9571_s1 + $0x740] sm:$0xf]  ;;  %v5604_v28 = vld [vmem:[%s9571_s1 + $0x4a8] sm:$0xf0]  ;;  %v6634_v34 = vld [vmem:[%s9571_s1 + $0x21c] sm:$0xf] }
 0x1ea   :  { %v3623_v36 = vadd.f32 %v3622_v33, %v479_v9  ;;  %v3649_v43 = vadd.f32 %v3648_v38, %v481_v24  ;;  %v6267_v21 = vor.u32 %v6882_v7, %v6266_v6  ;;  %v486_v33 = vperm.slane %v8897_v52, 6  ;;  %v9022_v52 = vld [vmem:[%s9572_s2 + $0x60] sm:$0xff] }
 0x1eb   :  { %4970 = vst [vmem:[#allocation2 + $0x7e0] sm:$0xff] %v3609_v32  ;;  %6520 = vmatmul.msk.bf16.vlgmr.msra.gmra.mxu0 %vm2389_vm0, %v8745_v39  ;;  %v6717_v32 = vld [vmem:[%s9571_s1 + $0x4ac] sm:$0xf0]  ;;  %v5615_v41 = vor.u32 %v6634_v34, %v5612_v35  ;;  %v488_v49 = vperm.slane %v9022_v52, 0  ;;  %v489_v50 = vperm.slane %v9022_v52, 1  ;;  %v491_v16 = vperm.slane %v9022_v52, 3 }
 0x1ec   :  { %4971 = vst [vmem:[#allocation2 + $0x7e8] sm:$0xff] %v3623_v36  ;;  %6521 = vmatmul.msk.bf16.vlgmr.msra.gmra.mxu1 %vm2389_vm0, %v8745_v39  ;;  %4191 = vmatpush.bf16.msra.mxu0 %v6251_v40  ;;  %v5611_v38 = vor.u32 %v6717_v32, %v5610_v31  ;;  %v492_v31 = vperm.slane %v9022_v52, 4  ;;  %v493_v32 = vperm.slane %v9022_v52, 5  ;;  %v6886_v34 = vld [vmem:[%s9571_s1 + $0x9f4] sm:$0xf0] }
 0x1ed   :  { %4805 = vst [vmem:[#allocation2 + $0x2c0] sm:$0xff] %v3635_v37  ;;  %6522 = vmatmul.msk.bf16.vlgmr.msra.gmra.mxu2 %vm2389_vm0, %v8745_v39  ;;  %4205 = vmatpush.bf16.msra.mxu1 %v6255_v44  ;;  %v5607_v37 = vor.u32 %v6633_v27, %v5604_v28  ;;  %v6803_v35 = vld [vmem:[%s9571_s1 + $0x764] sm:$0xf] }
 0x1ee   :  { %4806 = vst [vmem:[#allocation2 + $0x2c8] sm:$0xff] %v3649_v43  ;;  %6523 = vmatmul.msk.bf16.vlgmr.msra.gmra.mxu3 %vm2389_vm0, %v8745_v39  ;;  %4219 = vmatpush.bf16.msra.mxu2 %v6259_v47 }
 0x1ef   :  { %4233 = vmatpush.bf16.msra.mxu3 %v6263_v48 }
 0x1f0   :  { %v3662_v58 = vpop.f32.mrf.mxu2  ;;  %v3636_v61 = vpop.f32.mrf.mxu0  ;;  %4192 = vmatpush.bf16.msra.mxu0 %v5587_v56  ;;  %v6284_v56 = vld [vmem:[%s9571_s1 + $0x9e8] sm:$0xf0] }
 0x1f1   :  { %v3663_v62 = vadd.f32 %v3662_v58, %v482_v51  ;;  %v3676_v63 = vpop.f32.mrf.mxu3  ;;  %v3637_v0 = vadd.f32 %v3636_v61, %v480_v22  ;;  %v3650_v1 = vpop.f32.mrf.mxu1  ;;  %4206 = vmatpush.bf16.msra.mxu1 %v5591_v23  ;;  %v5602_v22 = vld [vmem:[%s9571_s1 + $0x210] sm:$0xf]  ;;  %v6290_v23 = vld [vmem:[%s9571_s1 + $0x758] sm:$0xf]  ;;  %v6287_v7 = vor.u32 %v6801_v54, %v6284_v56  ;;  %v6637_v54 = vld [vmem:[%s9571_s1 + $0x234] sm:$0xf] }
 0x1f2   :  { %v3677_v2 = vadd.f32 %v3676_v63, %v483_v55  ;;  %v3651_v3 = vadd.f32 %v3650_v1, %v481_v24  ;;  %4220 = vmatpush.bf16.msra.mxu2 %v5595_v57  ;;  %v6716_v24 = vld [vmem:[%s9571_s1 + $0x4a4] sm:$0xf0]  ;;  %v6885_v57 = vld [vmem:[%s9571_s1 + $0x9ec] sm:$0xf0]  ;;  %v6292_v63 = vld [vmem:[%s9571_s1 + $0x9f0] sm:$0xf0] }
 0x1f3   :  { %4807 = vst [vmem:[#allocation2 + $0x2d0] sm:$0xff] %v3663_v62  ;;  %4234 = vmatpush.bf16.msra.mxu3 %v5599_v59  ;;  %v5603_v36 = vor.u32 %v6716_v24, %v5602_v22  ;;  %v6802_v62 = vld [vmem:[%s9571_s1 + $0x75c] sm:$0xf]  ;;  %v6291_v10 = vor.u32 %v6885_v57, %v6290_v23  ;;  %v5642_v57 = vld [vmem:[%s9571_s1 + $0x238] sm:$0xf] }
 0x1f4   :  { %4972 = vst [vmem:[#allocation2 + $0x7f0] sm:$0xff] %v3637_v0  ;;  %v6295_v11 = vor.u32 %v6802_v62, %v6292_v63  ;;  %v5644_v62 = vld [vmem:[%s9571_s1 + $0x4d0] sm:$0xf0]  ;;  %v495_v63 = vperm.slane %v9022_v52, 7 }
 0x1f5   :  { %4973 = vst [vmem:[#allocation2 + $0x7f8] sm:$0xff] %v3651_v3 }
 0x1f6   :  { %4808 = vst [vmem:[#allocation2 + $0x2d8] sm:$0xff] %v3677_v2 }
 0x1f8   :  { %v3664_v9 = vpop.f32.mrf.mxu2  ;;  %v3690_v14 = vpop.f32.mrf.mxu0 }
 0x1f9   :  { %v3665_v13 = vadd.f32 %v3664_v9, %v482_v51  ;;  %v3678_v60 = vpop.f32.mrf.mxu3  ;;  %v3691_v19 = vadd.f32 %v3690_v14, %v484_v4  ;;  %v3704_v20 = vpop.f32.mrf.mxu1  ;;  %v6282_v51 = vld [vmem:[%s9571_s1 + $0x750] sm:$0xf]  ;;  %v5620_v9 = vld [vmem:[%s9571_s1 + $0x4b8] sm:$0xf0]  ;;  %v6636_v14 = vld [vmem:[%s9571_s1 + $0x22c] sm:$0xf] }
 0x1fa   :  { %v3679_v18 = vadd.f32 %v3678_v60, %v483_v55  ;;  %v3705_v25 = vadd.f32 %v3704_v20, %v485_v5  ;;  %v6283_v3 = vor.u32 %v6884_v53, %v6282_v51  ;;  %v490_v60 = vperm.slane %v9022_v52, 2 }
 0x1fb   :  { %4974 = vst [vmem:[#allocation2 + $0x800] sm:$0xff] %v3665_v13  ;;  %6524 = vmatmul.msk.bf16.vlgmr.msrb.gmra.mxu0 %vm2389_vm0, %v8745_v39  ;;  %v6719_v13 = vld [vmem:[%s9571_s1 + $0x4bc] sm:$0xf0]  ;;  %v5631_v22 = vor.u32 %v6636_v14, %v5628_v15  ;;  %v6888_v14 = vld [vmem:[%s9571_s1 + $0xa04] sm:$0xf0] }
 0x1fc   :  { %4975 = vst [vmem:[#allocation2 + $0x808] sm:$0xff] %v3679_v18  ;;  %6525 = vmatmul.msk.bf16.vlgmr.msrb.gmra.mxu1 %vm2389_vm0, %v8745_v39  ;;  %4247 = vmatpush.bf16.msrb.mxu0 %v6267_v21  ;;  %v5627_v20 = vor.u32 %v6719_v13, %v5626_v12  ;;  %v6805_v15 = vld [vmem:[%s9571_s1 + $0x774] sm:$0xf] }
 0x1fd   :  { %4809 = vst [vmem:[#allocation2 + $0x2e0] sm:$0xff] %v3691_v19  ;;  %6526 = vmatmul.msk.bf16.vlgmr.msrb.gmra.mxu2 %vm2389_vm0, %v8745_v39  ;;  %4261 = vmatpush.bf16.msrb.mxu1 %v6271_v26  ;;  %v5623_v19 = vor.u32 %v6635_v8, %v5620_v9 }
 0x1fe   :  { %4810 = vst [vmem:[#allocation2 + $0x2e8] sm:$0xff] %v3705_v25  ;;  %6527 = vmatmul.msk.bf16.vlgmr.msrb.gmra.mxu3 %vm2389_vm0, %v8745_v39  ;;  %4275 = vmatpush.bf16.msrb.mxu2 %v6275_v29 }
 0x1ff   :  { %4289 = vmatpush.bf16.msrb.mxu3 %v6279_v30 }
 0x200   :  { %v3718_v40 = vpop.f32.mrf.mxu2  ;;  %v3692_v42 = vpop.f32.mrf.mxu0  ;;  %4248 = vmatpush.bf16.msrb.mxu0 %v5603_v36  ;;  %v6300_v36 = vld [vmem:[%s9571_s1 + $0x9f8] sm:$0xf0] }
 0x201   :  { %v3719_v43 = vadd.f32 %v3718_v40, %v486_v33  ;;  %v3732_v44 = vpop.f32.mrf.mxu3  ;;  %v3693_v45 = vadd.f32 %v3692_v42, %v484_v4  ;;  %v3706_v46 = vpop.f32.mrf.mxu1  ;;  %4262 = vmatpush.bf16.msrb.mxu1 %v5607_v37  ;;  %v5618_v4 = vld [vmem:[%s9571_s1 + $0x220] sm:$0xf]  ;;  %v6306_v37 = vld [vmem:[%s9571_s1 + $0x768] sm:$0xf]  ;;  %v6303_v53 = vor.u32 %v6803_v35, %v6300_v36  ;;  %v6639_v35 = vld [vmem:[%s9571_s1 + $0x244] sm:$0xf] }
 0x202   :  { %v3733_v47 = vadd.f32 %v3732_v44, %v487_v17  ;;  %v3707_v48 = vadd.f32 %v3706_v46, %v485_v5  ;;  %4276 = vmatpush.bf16.msrb.mxu2 %v5611_v38  ;;  %v6718_v5 = vld [vmem:[%s9571_s1 + $0x4b4] sm:$0xf0]  ;;  %v6887_v38 = vld [vmem:[%s9571_s1 + $0x9fc] sm:$0xf0]  ;;  %v6308_v44 = vld [vmem:[%s9571_s1 + $0xa00] sm:$0xf0] }
 0x203   :  { %4811 = vst [vmem:[#allocation2 + $0x2f0] sm:$0xff] %v3719_v43  ;;  %4290 = vmatpush.bf16.msrb.mxu3 %v5615_v41  ;;  %v5619_v18 = vor.u32 %v6718_v5, %v5618_v4  ;;  %v6804_v43 = vld [vmem:[%s9571_s1 + $0x76c] sm:$0xf]  ;;  %v6307_v56 = vor.u32 %v6887_v38, %v6306_v37  ;;  %v5658_v38 = vld [vmem:[%s9571_s1 + $0x248] sm:$0xf] }
 0x204   :  { %4976 = vst [vmem:[#allocation2 + $0x810] sm:$0xff] %v3693_v45  ;;  %v6311_v23 = vor.u32 %v6804_v43, %v6308_v44  ;;  %v5660_v43 = vld [vmem:[%s9571_s1 + $0x4e0] sm:$0xf0] }
 0x205   :  { %4977 = vst [vmem:[#allocation2 + $0x818] sm:$0xff] %v3707_v48 }
 0x206   :  { %4812 = vst [vmem:[#allocation2 + $0x2f8] sm:$0xff] %v3733_v47 }
 0x208   :  { %v3720_v55 = vpop.f32.mrf.mxu2  ;;  %v3746_v61 = vpop.f32.mrf.mxu0 }
 0x209   :  { %v3721_v58 = vadd.f32 %v3720_v55, %v486_v33  ;;  %v3734_v59 = vpop.f32.mrf.mxu3  ;;  %v3747_v1 = vadd.f32 %v3746_v61, %v488_v49  ;;  %v3760_v2 = vpop.f32.mrf.mxu1  ;;  %v6298_v33 = vld [vmem:[%s9571_s1 + $0x760] sm:$0xf]  ;;  %v5636_v55 = vld [vmem:[%s9571_s1 + $0x4c8] sm:$0xf0]  ;;  %v6638_v61 = vld [vmem:[%s9571_s1 + $0x23c] sm:$0xf] }
 0x20a   :  { %v3735_v0 = vadd.f32 %v3734_v59, %v487_v17  ;;  %v3761_v6 = vadd.f32 %v3760_v2, %v489_v50  ;;  %v6299_v48 = vor.u32 %v6886_v34, %v6298_v33  ;;  %v494_v59 = vperm.slane %v9022_v52, 6  ;;  %v9147_v52 = vld [vmem:[%s9572_s2 + $0x68] sm:$0xff] }
 0x20b   :  { %4978 = vst [vmem:[#allocation2 + $0x820] sm:$0xff] %v3721_v58  ;;  %6528 = vmatmul.msk.bf16.vlgmr.msra.gmra.mxu0 %vm2389_vm0, %v8745_v39  ;;  %v6721_v58 = vld [vmem:[%s9571_s1 + $0x4cc] sm:$0xf0]  ;;  %v5647_v4 = vor.u32 %v6638_v61, %v5644_v62  ;;  %v496_v12 = vperm.slane %v9147_v52, 0  ;;  %v497_v13 = vperm.slane %v9147_v52, 1  ;;  %v499_v44 = vperm.slane %v9147_v52, 3 }
 0x20c   :  { %4979 = vst [vmem:[#allocation2 + $0x828] sm:$0xff] %v3735_v0  ;;  %6529 = vmatmul.msk.bf16.vlgmr.msra.gmra.mxu1 %vm2389_vm0, %v8745_v39  ;;  %4303 = vmatpush.bf16.msra.mxu0 %v6283_v3  ;;  %v5643_v2 = vor.u32 %v6721_v58, %v5642_v57  ;;  %v501_v57 = vperm.slane %v9147_v52, 5  ;;  %v6330_v58 = vld [vmem:[%s9571_s1 + $0x780] sm:$0xf]  ;;  %v6807_v61 = vld [vmem:[%s9571_s1 + $0x784] sm:$0xf] }
 0x20d   :  { %4813 = vst [vmem:[#allocation2 + $0x300] sm:$0xff] %v3747_v1  ;;  %6530 = vmatmul.msk.bf16.vlgmr.msra.gmra.mxu2 %vm2389_vm0, %v8745_v39  ;;  %4317 = vmatpush.bf16.msra.mxu1 %v6287_v7  ;;  %v5639_v1 = vor.u32 %v6637_v54, %v5636_v55 }
 0x20e   :  { %4814 = vst [vmem:[#allocation2 + $0x308] sm:$0xff] %v3761_v6  ;;  %6531 = vmatmul.msk.bf16.vlgmr.msra.gmra.mxu3 %vm2389_vm0, %v8745_v39  ;;  %4331 = vmatpush.bf16.msra.mxu2 %v6291_v10 }
 0x20f   :  { %4345 = vmatpush.bf16.msra.mxu3 %v6295_v11 }
 0x210   :  { %v3774_v21 = vpop.f32.mrf.mxu2  ;;  %v3748_v24 = vpop.f32.mrf.mxu0  ;;  %4304 = vmatpush.bf16.msra.mxu0 %v5619_v18  ;;  %v6316_v18 = vld [vmem:[%s9571_s1 + $0xa08] sm:$0xf0] }
 0x211   :  { %v3775_v25 = vadd.f32 %v3774_v21, %v490_v60  ;;  %v3788_v26 = vpop.f32.mrf.mxu3  ;;  %v3749_v27 = vadd.f32 %v3748_v24, %v488_v49  ;;  %v3762_v28 = vpop.f32.mrf.mxu1  ;;  %4318 = vmatpush.bf16.msra.mxu1 %v5623_v19  ;;  %v5634_v49 = vld [vmem:[%s9571_s1 + $0x230] sm:$0xf]  ;;  %v6322_v19 = vld [vmem:[%s9571_s1 + $0x778] sm:$0xf]  ;;  %v6319_v34 = vor.u32 %v6805_v15, %v6316_v18  ;;  %v5668_v15 = vld [vmem:[%s9571_s1 + $0x4e8] sm:$0xf0] }
 0x212   :  { %v3789_v29 = vadd.f32 %v3788_v26, %v491_v16  ;;  %v3763_v30 = vadd.f32 %v3762_v28, %v489_v50  ;;  %4332 = vmatpush.bf16.msra.mxu2 %v5627_v20  ;;  %v6720_v50 = vld [vmem:[%s9571_s1 + $0x4c4] sm:$0xf0]  ;;  %v6889_v20 = vld [vmem:[%s9571_s1 + $0xa0c] sm:$0xf0]  ;;  %v6324_v26 = vld [vmem:[%s9571_s1 + $0xa10] sm:$0xf0] }
 0x213   :  { %4815 = vst [vmem:[#allocation2 + $0x310] sm:$0xff] %v3775_v25  ;;  %4346 = vmatpush.bf16.msra.mxu3 %v5631_v22  ;;  %v5635_v0 = vor.u32 %v6720_v50, %v5634_v49  ;;  %v6806_v25 = vld [vmem:[%s9571_s1 + $0x77c] sm:$0xf]  ;;  %v6323_v36 = vor.u32 %v6889_v20, %v6322_v19  ;;  %v9250_v18 = vld [vmem:[%s9570_s0] sm:$0xff]  ;;  %v5674_v20 = vld [vmem:[%s9571_s1 + $0x258] sm:$0xf] }
 0x214   :  { %4980 = vst [vmem:[#allocation2 + $0x830] sm:$0xff] %v3749_v27  ;;  %v6327_v37 = vor.u32 %v6806_v25, %v6324_v26  ;;  %v5676_v25 = vld [vmem:[%s9571_s1 + $0x4f0] sm:$0xf0]  ;;  %v503_v26 = vperm.slane %v9147_v52, 7 }
 0x215   :  { %4981 = vst [vmem:[#allocation2 + $0x838] sm:$0xff] %v3763_v30 }
 0x216   :  { %4816 = vst [vmem:[#allocation2 + $0x318] sm:$0xff] %v3789_v29 }
 0x218   :  { %v3776_v17 = vpop.f32.mrf.mxu2  ;;  %v3802_v42 = vpop.f32.mrf.mxu0 }
 0x219   :  { %v3777_v40 = vadd.f32 %v3776_v17, %v490_v60  ;;  %v3790_v41 = vpop.f32.mrf.mxu3  ;;  %v3803_v46 = vadd.f32 %v3802_v42, %v492_v31  ;;  %v3816_v47 = vpop.f32.mrf.mxu1  ;;  %v6314_v60 = vld [vmem:[%s9571_s1 + $0x770] sm:$0xf]  ;;  %v5652_v17 = vld [vmem:[%s9571_s1 + $0x4d8] sm:$0xf0]  ;;  %v6640_v42 = vld [vmem:[%s9571_s1 + $0x24c] sm:$0xf] }
 0x21a   :  { %v3791_v45 = vadd.f32 %v3790_v41, %v491_v16  ;;  %v3817_v51 = vadd.f32 %v3816_v47, %v493_v32  ;;  %v6315_v30 = vor.u32 %v6888_v14, %v6314_v60  ;;  %v498_v41 = vperm.slane %v9147_v52, 2  ;;  %v6641_v14 = vld [vmem:[%s9571_s1 + $0x254] sm:$0xf] }
 0x21b   :  { %4982 = vst [vmem:[#allocation2 + $0x840] sm:$0xff] %v3777_v40  ;;  %6532 = vmatmul.msk.bf16.vlgmr.msrb.gmra.mxu0 %vm2389_vm0, %v8745_v39  ;;  %v6723_v40 = vld [vmem:[%s9571_s1 + $0x4dc] sm:$0xf0]  ;;  %v5663_v49 = vor.u32 %v6640_v42, %v5660_v43  ;;  %v6892_v42 = vld [vmem:[%s9571_s1 + $0xa24] sm:$0xf0] }
 0x21c   :  { %4983 = vst [vmem:[#allocation2 + $0x848] sm:$0xff] %v3791_v45  ;;  %6533 = vmatmul.msk.bf16.vlgmr.msrb.gmra.mxu1 %vm2389_vm0, %v8745_v39  ;;  %4359 = vmatpush.bf16.msrb.mxu0 %v6299_v48  ;;  %v5659_v47 = vor.u32 %v6723_v40, %v5658_v38  ;;  %v6809_v43 = vld [vmem:[%s9571_s1 + $0x794] sm:$0xf] }
 0x21d   :  { %4817 = vst [vmem:[#allocation2 + $0x320] sm:$0xff] %v3803_v46  ;;  %6534 = vmatmul.msk.bf16.vlgmr.msrb.gmra.mxu2 %vm2389_vm0, %v8745_v39  ;;  %4373 = vmatpush.bf16.msrb.mxu1 %v6303_v53  ;;  %v5655_v46 = vor.u32 %v6639_v35, %v5652_v17 }
 0x21e   :  { %4818 = vst [vmem:[#allocation2 + $0x328] sm:$0xff] %v3817_v51  ;;  %6535 = vmatmul.msk.bf16.vlgmr.msrb.gmra.mxu3 %vm2389_vm0, %v8745_v39  ;;  %4387 = vmatpush.bf16.msrb.mxu2 %v6307_v56 }
 0x21f   :  { %4401 = vmatpush.bf16.msrb.mxu3 %v6311_v23 }
 0x220   :  { %v3830_v3 = vpop.f32.mrf.mxu2  ;;  %v3804_v5 = vpop.f32.mrf.mxu0  ;;  %4360 = vmatpush.bf16.msrb.mxu0 %v5635_v0  ;;  %v6338_v0 = vld [vmem:[%s9571_s1 + $0x788] sm:$0xf] }
 0x221   :  { %v3831_v6 = vadd.f32 %v3830_v3, %v494_v59  ;;  %v3844_v7 = vpop.f32.mrf.mxu3  ;;  %v3805_v8 = vadd.f32 %v3804_v5, %v492_v31  ;;  %v3818_v9 = vpop.f32.mrf.mxu1  ;;  %4374 = vmatpush.bf16.msrb.mxu1 %v5639_v1  ;;  %v5650_v31 = vld [vmem:[%s9571_s1 + $0x240] sm:$0xf]  ;;  %v6808_v5 = vld [vmem:[%s9571_s1 + $0x78c] sm:$0xf] }
 0x222   :  { %v3845_v10 = vadd.f32 %v3844_v7, %v495_v63  ;;  %v3819_v11 = vadd.f32 %v3818_v9, %v493_v32  ;;  %4388 = vmatpush.bf16.msrb.mxu2 %v5643_v2  ;;  %v6722_v32 = vld [vmem:[%s9571_s1 + $0x4d4] sm:$0xf0]  ;;  %v6891_v1 = vld [vmem:[%s9571_s1 + $0xa1c] sm:$0xf0] }
 0x223   :  { %4819 = vst [vmem:[#allocation2 + $0x330] sm:$0xff] %v3831_v6  ;;  %4402 = vmatpush.bf16.msrb.mxu3 %v5647_v4  ;;  %v5651_v45 = vor.u32 %v6722_v32, %v5650_v31  ;;  %v6340_v6 = vld [vmem:[%s9571_s1 + $0xa20] sm:$0xf0] }
 0x224   :  { %4984 = vst [vmem:[#allocation2 + $0x850] sm:$0xff] %v3805_v8  ;;  %v6343_v19 = vor.u32 %v6808_v5, %v6340_v6  ;;  %v5692_v5 = vld [vmem:[%s9571_s1 + $0x500] sm:$0xf0] }
 0x225   :  { %4985 = vst [vmem:[#allocation2 + $0x858] sm:$0xff] %v3819_v11  ;;  %v5666_v11 = vld [vmem:[%s9571_s1 + $0x250] sm:$0xf] }
 0x226   :  { %4820 = vst [vmem:[#allocation2 + $0x338] sm:$0xff] %v3845_v10 }
 0x228   :  { %v3832_v16 = vpop.f32.mrf.mxu2  ;;  %v3858_v24 = vpop.f32.mrf.mxu0 }
 0x229   :  { %v3833_v21 = vadd.f32 %v3832_v16, %v494_v59  ;;  %v3846_v22 = vpop.f32.mrf.mxu3  ;;  %v3859_v28 = vadd.f32 %v3858_v24, %v496_v12  ;;  %v3872_v29 = vpop.f32.mrf.mxu1  ;;  %v6890_v59 = vld [vmem:[%s9571_s1 + $0xa14] sm:$0xf0]  ;;  %v6339_v16 = vor.u32 %v6891_v1, %v6338_v0  ;;  %v6642_v24 = vld [vmem:[%s9571_s1 + $0x25c] sm:$0xf]  ;;  %v5690_v1 = vld [vmem:[%s9571_s1 + $0x268] sm:$0xf] }
 0x22a   :  { %v3847_v27 = vadd.f32 %v3846_v22, %v495_v63  ;;  %v3873_v33 = vadd.f32 %v3872_v29, %v497_v13  ;;  %v6332_v63 = vld [vmem:[%s9571_s1 + $0xa18] sm:$0xf0]  ;;  %v6331_v10 = vor.u32 %v6890_v59, %v6330_v58  ;;  %v502_v22 = vperm.slane %v9147_v52, 6 }
 0x22b   :  { %4986 = vst [vmem:[#allocation2 + $0x860] sm:$0xff] %v3833_v21  ;;  %6536 = vmatmul.msk.bf16.vlgmr.msra.gmra.mxu0 %vm2389_vm0, %v8745_v39  ;;  %v6335_v60 = vor.u32 %v6807_v61, %v6332_v63  ;;  %v6725_v21 = vld [vmem:[%s9571_s1 + $0x4ec] sm:$0xf0]  ;;  %v5679_v31 = vor.u32 %v6642_v24, %v5676_v25  ;;  %v6643_v61 = vld [vmem:[%s9571_s1 + $0x264] sm:$0xf] }
 0x22c   :  { %4987 = vst [vmem:[#allocation2 + $0x868] sm:$0xff] %v3847_v27  ;;  %6537 = vmatmul.msk.bf16.vlgmr.msra.gmra.mxu1 %vm2389_vm0, %v8745_v39  ;;  %4415 = vmatpush.bf16.msra.mxu0 %v6315_v30  ;;  %v5675_v29 = vor.u32 %v6725_v21, %v5674_v20  ;;  %v6894_v24 = vld [vmem:[%s9571_s1 + $0xa34] sm:$0xf0]  ;;  %v6811_v25 = vld [vmem:[%s9571_s1 + $0x7a4] sm:$0xf] }
 0x22d   :  { %4821 = vst [vmem:[#allocation2 + $0x340] sm:$0xff] %v3859_v28  ;;  %6538 = vmatmul.msk.bf16.vlgmr.msra.gmra.mxu2 %vm2389_vm0, %v8745_v39  ;;  %4429 = vmatpush.bf16.msra.mxu1 %v6319_v34  ;;  %v5671_v28 = vor.u32 %v6641_v14, %v5668_v15 }
 0x22e   :  { %4822 = vst [vmem:[#allocation2 + $0x348] sm:$0xff] %v3873_v33  ;;  %6539 = vmatmul.msk.bf16.vlgmr.msra.gmra.mxu3 %vm2389_vm0, %v8745_v39  ;;  %4443 = vmatpush.bf16.msra.mxu2 %v6323_v36  ;;  %v500_v39 = vperm.slane %v9147_v52, 4  ;;  %v9277_v52 = vld [vmem:[%s9572_s2 + $0x70] sm:$0xff] }
 0x22f   :  { %4457 = vmatpush.bf16.msra.mxu3 %v6327_v37  ;;  %v504_v38 = vperm.slane %v9277_v52, 0  ;;  %v505_v40 = vperm.slane %v9277_v52, 1  ;;  %v507_v6 = vperm.slane %v9277_v52, 3  ;;  %v508_v20 = vperm.slane %v9277_v52, 4 }
 0x230   :  { %v3886_v48 = vpop.f32.mrf.mxu2  ;;  %v3860_v50 = vpop.f32.mrf.mxu0  ;;  %4416 = vmatpush.bf16.msra.mxu0 %v5651_v45  ;;  %v6348_v45 = vld [vmem:[%s9571_s1 + $0xa28] sm:$0xf0]  ;;  %v509_v21 = vperm.slane %v9277_v52, 5 }
 0x231   :  { %v3887_v51 = vadd.f32 %v3886_v48, %v498_v41  ;;  %v3900_v53 = vpop.f32.mrf.mxu3  ;;  %v3861_v54 = vadd.f32 %v3860_v50, %v496_v12  ;;  %v3874_v55 = vpop.f32.mrf.mxu1  ;;  %4430 = vmatpush.bf16.msra.mxu1 %v5655_v46  ;;  %v6724_v12 = vld [vmem:[%s9571_s1 + $0x4e4] sm:$0xf0]  ;;  %v6354_v46 = vld [vmem:[%s9571_s1 + $0x798] sm:$0xf]  ;;  %v6351_v59 = vor.u32 %v6809_v43, %v6348_v45  ;;  %v6645_v43 = vld [vmem:[%s9571_s1 + $0x274] sm:$0xf] }
 0x232   :  { %v3901_v56 = vadd.f32 %v3900_v53, %v499_v44  ;;  %v3875_v23 = vadd.f32 %v3874_v55, %v497_v13  ;;  %4444 = vmatpush.bf16.msra.mxu2 %v5659_v47  ;;  %v5667_v27 = vor.u32 %v6724_v12, %v5666_v11  ;;  %v6893_v47 = vld [vmem:[%s9571_s1 + $0xa2c] sm:$0xf0]  ;;  %v6356_v53 = vld [vmem:[%s9571_s1 + $0xa30] sm:$0xf0] }
 0x233   :  { %4823 = vst [vmem:[#allocation2 + $0x350] sm:$0xff] %v3887_v51  ;;  %4458 = vmatpush.bf16.msra.mxu3 %v5663_v49  ;;  %v6810_v51 = vld [vmem:[%s9571_s1 + $0x79c] sm:$0xf]  ;;  %v6355_v63 = vor.u32 %v6893_v47, %v6354_v46  ;;  %v5706_v47 = vld [vmem:[%s9571_s1 + $0x278] sm:$0xf] }
 0x234   :  { %4988 = vst [vmem:[#allocation2 + $0x870] sm:$0xff] %v3861_v54  ;;  %v6359_v0 = vor.u32 %v6810_v51, %v6356_v53  ;;  %v5708_v51 = vld [vmem:[%s9571_s1 + $0x510] sm:$0xf0]  ;;  %v511_v53 = vperm.slane %v9277_v52, 7 }
 0x235   :  { %4989 = vst [vmem:[#allocation2 + $0x878] sm:$0xff] %v3875_v23 }
 0x236   :  { %4824 = vst [vmem:[#allocation2 + $0x358] sm:$0xff] %v3901_v56 }
 0x238   :  { %v3888_v62 = vpop.f32.mrf.mxu2  ;;  %v3914_v4 = vpop.f32.mrf.mxu0 }
 0x239   :  { %v3889_v2 = vadd.f32 %v3888_v62, %v498_v41  ;;  %v3902_v3 = vpop.f32.mrf.mxu3  ;;  %v3915_v8 = vadd.f32 %v3914_v4, %v500_v39  ;;  %v3928_v9 = vpop.f32.mrf.mxu1  ;;  %v6346_v41 = vld [vmem:[%s9571_s1 + $0x790] sm:$0xf]  ;;  %v5684_v62 = vld [vmem:[%s9571_s1 + $0x4f8] sm:$0xf0]  ;;  %v6644_v4 = vld [vmem:[%s9571_s1 + $0x26c] sm:$0xf] }
 0x23a   :  { %v3903_v7 = vadd.f32 %v3902_v3, %v499_v44  ;;  %v3929_v13 = vadd.f32 %v3928_v9, %v501_v57  ;;  %v6347_v23 = vor.u32 %v6892_v42, %v6346_v41  ;;  %v506_v3 = vperm.slane %v9277_v52, 2 }
 0x23b   :  { %4990 = vst [vmem:[#allocation2 + $0x880] sm:$0xff] %v3889_v2  ;;  %6540 = vmatmul.msk.bf16.vlgmr.msrb.gmra.mxu0 %vm2389_vm0, %v9250_v18  ;;  %v6727_v2 = vld [vmem:[%s9571_s1 + $0x4fc] sm:$0xf0]  ;;  %v5695_v11 = vor.u32 %v6644_v4, %v5692_v5  ;;  %v6896_v4 = vld [vmem:[%s9571_s1 + $0xa44] sm:$0xf0] }
 0x23c   :  { %4991 = vst [vmem:[#allocation2 + $0x888] sm:$0xff] %v3903_v7  ;;  %6541 = vmatmul.msk.bf16.vlgmr.msrb.gmra.mxu1 %vm2389_vm0, %v9250_v18  ;;  %4471 = vmatpush.bf16.msrb.mxu0 %v6331_v10  ;;  %v5691_v9 = vor.u32 %v6727_v2, %v5690_v1  ;;  %v6813_v5 = vld [vmem:[%s9571_s1 + $0x7b4] sm:$0xf] }
 0x23d   :  { %4825 = vst [vmem:[#allocation2 + $0x360] sm:$0xff] %v3915_v8  ;;  %6542 = vmatmul.msk.bf16.vlgmr.msrb.gmra.mxu2 %vm2389_vm0, %v9250_v18  ;;  %4485 = vmatpush.bf16.msrb.mxu1 %v6335_v60  ;;  %v5687_v8 = vor.u32 %v6643_v61, %v5684_v62 }
 0x23e   :  { %4826 = vst [vmem:[#allocation2 + $0x368] sm:$0xff] %v3929_v13  ;;  %6543 = vmatmul.msk.bf16.vlgmr.msrb.gmra.mxu3 %vm2389_vm0, %v9250_v18  ;;  %4499 = vmatpush.bf16.msrb.mxu2 %v6339_v16 }
 0x23f   :  { %4513 = vmatpush.bf16.msrb.mxu3 %v6343_v19 }
 0x240   :  { %v3942_v30 = vpop.f32.mrf.mxu2  ;;  %v3916_v32 = vpop.f32.mrf.mxu0  ;;  %4472 = vmatpush.bf16.msrb.mxu0 %v5667_v27  ;;  %v6364_v27 = vld [vmem:[%s9571_s1 + $0xa38] sm:$0xf0] }
 0x241   :  { %v3943_v33 = vadd.f32 %v3942_v30, %v502_v22  ;;  %v3956_v34 = vpop.f32.mrf.mxu3  ;;  %v3917_v35 = vadd.f32 %v3916_v32, %v500_v39  ;;  %v3930_v17 = vpop.f32.mrf.mxu1  ;;  %4486 = vmatpush.bf16.msrb.mxu1 %v5671_v28  ;;  %v5682_v39 = vld [vmem:[%s9571_s1 + $0x260] sm:$0xf]  ;;  %v6370_v28 = vld [vmem:[%s9571_s1 + $0x7a8] sm:$0xf]  ;;  %v6367_v42 = vor.u32 %v6811_v25, %v6364_v27  ;;  %v6647_v25 = vld [vmem:[%s9571_s1 + $0x284] sm:$0xf] }
 0x242   :  { %v3957_v36 = vadd.f32 %v3956_v34, %v503_v26  ;;  %v3931_v37 = vadd.f32 %v3930_v17, %v501_v57  ;;  %4500 = vmatpush.bf16.msrb.mxu2 %v5675_v29  ;;  %v6726_v57 = vld [vmem:[%s9571_s1 + $0x4f4] sm:$0xf0]  ;;  %v6895_v29 = vld [vmem:[%s9571_s1 + $0xa3c] sm:$0xf0]  ;;  %v6372_v34 = vld [vmem:[%s9571_s1 + $0xa40] sm:$0xf0] }
 0x243   :  { %4827 = vst [vmem:[#allocation2 + $0x370] sm:$0xff] %v3943_v33  ;;  %4514 = vmatpush.bf16.msrb.mxu3 %v5679_v31  ;;  %v5683_v7 = vor.u32 %v6726_v57, %v5682_v39  ;;  %v6812_v33 = vld [vmem:[%s9571_s1 + $0x7ac] sm:$0xf]  ;;  %v6371_v45 = vor.u32 %v6895_v29, %v6370_v28  ;;  %v5722_v29 = vld [vmem:[%s9571_s1 + $0x288] sm:$0xf] }
 0x244   :  { %4992 = vst [vmem:[#allocation2 + $0x890] sm:$0xff] %v3917_v35  ;;  %v6375_v46 = vor.u32 %v6812_v33, %v6372_v34  ;;  %v5724_v33 = vld [vmem:[%s9571_s1 + $0x520] sm:$0xf0] }
 0x245   :  { %4993 = vst [vmem:[#allocation2 + $0x898] sm:$0xff] %v3931_v37 }
 0x246   :  { %4828 = vst [vmem:[#allocation2 + $0x378] sm:$0xff] %v3957_v36 }
 0x248   :  { %v3944_v44 = vpop.f32.mrf.mxu2  ;;  %v3970_v50 = vpop.f32.mrf.mxu0 }
 0x249   :  { %v3945_v48 = vadd.f32 %v3944_v44, %v502_v22  ;;  %v3958_v49 = vpop.f32.mrf.mxu3  ;;  %v3971_v55 = vadd.f32 %v3970_v50, %v504_v38  ;;  %v3984_v56 = vpop.f32.mrf.mxu1  ;;  %v6362_v22 = vld [vmem:[%s9571_s1 + $0x7a0] sm:$0xf]  ;;  %v5700_v44 = vld [vmem:[%s9571_s1 + $0x508] sm:$0xf0]  ;;  %v6646_v50 = vld [vmem:[%s9571_s1 + $0x27c] sm:$0xf] }
 0x24a   :  { %v3959_v54 = vadd.f32 %v3958_v49, %v503_v26  ;;  %v3985_v58 = vadd.f32 %v3984_v56, %v505_v40  ;;  %v6363_v37 = vor.u32 %v6894_v24, %v6362_v22  ;;  %v510_v49 = vperm.slane %v9277_v52, 6  ;;  %v9402_v52 = vld [vmem:[%s9572_s2 + $0x78] sm:$0xff] }
 0x24b   :  { %4994 = vst [vmem:[#allocation2 + $0x8a0] sm:$0xff] %v3945_v48  ;;  %6544 = vmatmul.msk.bf16.vlgmr.msra.gmra.mxu0 %vm2389_vm0, %v9250_v18  ;;  %v6729_v48 = vld [vmem:[%s9571_s1 + $0x50c] sm:$0xf0]  ;;  %v5711_v39 = vor.u32 %v6646_v50, %v5708_v51  ;;  %v512_v1 = vperm.slane %v9402_v52, 0  ;;  %v513_v2 = vperm.slane %v9402_v52, 1  ;;  %v515_v34 = vperm.slane %v9402_v52, 3 }
 0x24c   :  { %4995 = vst [vmem:[#allocation2 + $0x8a8] sm:$0xff] %v3959_v54  ;;  %6545 = vmatmul.msk.bf16.vlgmr.msra.gmra.mxu1 %vm2389_vm0, %v9250_v18  ;;  %4527 = vmatpush.bf16.msra.mxu0 %v6347_v23  ;;  %v5707_v56 = vor.u32 %v6729_v48, %v5706_v47  ;;  %v516_v47 = vperm.slane %v9402_v52, 4  ;;  %v517_v48 = vperm.slane %v9402_v52, 5  ;;  %v6898_v50 = vld [vmem:[%s9571_s1 + $0xa54] sm:$0xf0] }
 0x24d   :  { %4829 = vst [vmem:[#allocation2 + $0x380] sm:$0xff] %v3971_v55  ;;  %6546 = vmatmul.msk.bf16.vlgmr.msra.gmra.mxu2 %vm2389_vm0, %v9250_v18  ;;  %4541 = vmatpush.bf16.msra.mxu1 %v6351_v59  ;;  %v5703_v55 = vor.u32 %v6645_v43, %v5700_v44 }
 0x24e   :  { %4830 = vst [vmem:[#allocation2 + $0x388] sm:$0xff] %v3985_v58  ;;  %6547 = vmatmul.msk.bf16.vlgmr.msra.gmra.mxu3 %vm2389_vm0, %v9250_v18  ;;  %4555 = vmatpush.bf16.msra.mxu2 %v6355_v63 }
 0x24f   :  { %4569 = vmatpush.bf16.msra.mxu3 %v6359_v0 }
 0x250   :  { %v3998_v10 = vpop.f32.mrf.mxu2  ;;  %v3972_v12 = vpop.f32.mrf.mxu0  ;;  %4528 = vmatpush.bf16.msra.mxu0 %v5683_v7  ;;  %v6380_v7 = vld [vmem:[%s9571_s1 + $0xa48] sm:$0xf0] }
 0x251   :  { %v3999_v13 = vadd.f32 %v3998_v10, %v506_v3  ;;  %v4012_v60 = vpop.f32.mrf.mxu3  ;;  %v3973_v14 = vadd.f32 %v3972_v12, %v504_v38  ;;  %v3986_v15 = vpop.f32.mrf.mxu1  ;;  %4542 = vmatpush.bf16.msra.mxu1 %v5687_v8  ;;  %v5698_v38 = vld [vmem:[%s9571_s1 + $0x270] sm:$0xf]  ;;  %v6386_v8 = vld [vmem:[%s9571_s1 + $0x7b8] sm:$0xf]  ;;  %v6383_v24 = vor.u32 %v6813_v5, %v6380_v7 }
 0x252   :  { %v4013_v16 = vadd.f32 %v4012_v60, %v507_v6  ;;  %v3987_v19 = vadd.f32 %v3986_v15, %v505_v40  ;;  %4556 = vmatpush.bf16.msra.mxu2 %v5691_v9  ;;  %v6728_v40 = vld [vmem:[%s9571_s1 + $0x504] sm:$0xf0]  ;;  %v6897_v9 = vld [vmem:[%s9571_s1 + $0xa4c] sm:$0xf0]  ;;  %v6388_v60 = vld [vmem:[%s9571_s1 + $0xa50] sm:$0xf0] }
 0x253   :  { %4831 = vst [vmem:[#allocation2 + $0x390] sm:$0xff] %v3999_v13  ;;  %4570 = vmatpush.bf16.msra.mxu3 %v5695_v11  ;;  %v5699_v54 = vor.u32 %v6728_v40, %v5698_v38  ;;  %v6814_v13 = vld [vmem:[%s9571_s1 + $0x7bc] sm:$0xf]  ;;  %v6387_v27 = vor.u32 %v6897_v9, %v6386_v8 }
 0x254   :  { %4996 = vst [vmem:[#allocation2 + $0x8b0] sm:$0xff] %v3973_v14  ;;  %v6391_v28 = vor.u32 %v6814_v13, %v6388_v60 }
 0x255   :  { %4997 = vst [vmem:[#allocation2 + $0x8b8] sm:$0xff] %v3987_v19 }
 0x256   :  { %4832 = vst [vmem:[#allocation2 + $0x398] sm:$0xff] %v4013_v16 }
 0x258   :  { %v4000_v26 = vpop.f32.mrf.mxu2  ;;  %v4026_v32 = vpop.f32.mrf.mxu0 }
 0x259   :  { %v4001_v30 = vadd.f32 %v4000_v26, %v506_v3  ;;  %v4014_v31 = vpop.f32.mrf.mxu3  ;;  %v4027_v17 = vadd.f32 %v4026_v32, %v508_v20  ;;  %v4040_v36 = vpop.f32.mrf.mxu1  ;;  %v6378_v3 = vld [vmem:[%s9571_s1 + $0x7b0] sm:$0xf]  ;;  %v5716_v26 = vld [vmem:[%s9571_s1 + $0x518] sm:$0xf0]  ;;  %v6648_v32 = vld [vmem:[%s9571_s1 + $0x28c] sm:$0xf] }
 0x25a   :  { %v4015_v35 = vadd.f32 %v4014_v31, %v507_v6  ;;  %v4041_v41 = vadd.f32 %v4040_v36, %v509_v21  ;;  %v6379_v19 = vor.u32 %v6896_v4, %v6378_v3  ;;  %v514_v31 = vperm.slane %v9402_v52, 2 }
 0x25b   :  { %4998 = vst [vmem:[#allocation2 + $0x8c0] sm:$0xff] %v4001_v30  ;;  %6548 = vmatmul.msk.bf16.vlgmr.msrb.gmra.mxu0 %vm2389_vm0, %v9250_v18  ;;  %v6731_v30 = vld [vmem:[%s9571_s1 + $0x51c] sm:$0xf0]  ;;  %v5727_v38 = vor.u32 %v6648_v32, %v5724_v33  ;;  %v518_v3 = vperm.slane %v9402_v52, 6  ;;  %v519_v4 = vperm.slane %v9402_v52, 7 }
 0x25c   :  { %4999 = vst [vmem:[#allocation2 + $0x8c8] sm:$0xff] %v4015_v35  ;;  %6549 = vmatmul.msk.bf16.vlgmr.msrb.gmra.mxu1 %vm2389_vm0, %v9250_v18  ;;  %4583 = vmatpush.bf16.msrb.mxu0 %v6363_v37  ;;  %v5723_v36 = vor.u32 %v6731_v30, %v5722_v29 }
 0x25d   :  { %4833 = vst [vmem:[#allocation2 + $0x3a0] sm:$0xff] %v4027_v17  ;;  %6550 = vmatmul.msk.bf16.vlgmr.msrb.gmra.mxu2 %vm2389_vm0, %v9250_v18  ;;  %4597 = vmatpush.bf16.msrb.mxu1 %v6367_v42  ;;  %v5719_v17 = vor.u32 %v6647_v25, %v5716_v26 }
 0x25e   :  { %4834 = vst [vmem:[#allocation2 + $0x3a8] sm:$0xff] %v4041_v41  ;;  %6551 = vmatmul.msk.bf16.vlgmr.msrb.gmra.mxu3 %vm2389_vm0, %v9250_v18  ;;  %4611 = vmatpush.bf16.msrb.mxu2 %v6371_v45 }
 0x25f   :  { %4625 = vmatpush.bf16.msrb.mxu3 %v6375_v46 }
 0x260   :  { %v4054_v23 = vpop.f32.mrf.mxu2  ;;  %v4028_v57 = vpop.f32.mrf.mxu0  ;;  %4584 = vmatpush.bf16.msrb.mxu0 %v5699_v54  ;;  %v6396_v54 = vld [vmem:[%s9571_s1 + $0xa58] sm:$0xf0] }
 0x261   :  { %v4055_v58 = vadd.f32 %v4054_v23, %v510_v49  ;;  %v4068_v59 = vpop.f32.mrf.mxu3  ;;  %v4029_v61 = vadd.f32 %v4028_v57, %v508_v20  ;;  %v4042_v62 = vpop.f32.mrf.mxu1  ;;  %4598 = vmatpush.bf16.msrb.mxu1 %v5703_v55  ;;  %v5714_v20 = vld [vmem:[%s9571_s1 + $0x280] sm:$0xf] }
 0x262   :  { %v4069_v63 = vadd.f32 %v4068_v59, %v511_v53  ;;  %v4043_v0 = vadd.f32 %v4042_v62, %v509_v21  ;;  %4612 = vmatpush.bf16.msrb.mxu2 %v5707_v56  ;;  %v6730_v21 = vld [vmem:[%s9571_s1 + $0x514] sm:$0xf0] }
 0x263   :  { %4835 = vst [vmem:[#allocation2 + $0x3b0] sm:$0xff] %v4055_v58  ;;  %4626 = vmatpush.bf16.msrb.mxu3 %v5711_v39  ;;  %v5715_v35 = vor.u32 %v6730_v21, %v5714_v20 }
 0x264   :  { %5000 = vst [vmem:[#allocation2 + $0x8d0] sm:$0xff] %v4029_v61 }
 0x265   :  { %5001 = vst [vmem:[#allocation2 + $0x8d8] sm:$0xff] %v4043_v0  ;;  %v6732_v0 = vld [vmem:[%s9571_s1 + $0x524] sm:$0xf0] }
 0x266   :  { %4836 = vst [vmem:[#allocation2 + $0x3b8] sm:$0xff] %v4069_v63  ;;  %v5730_v63 = vld [vmem:[%s9571_s1 + $0x290] sm:$0xf] }
 0x267   :  { %v5731_v5 = vor.u32 %v6732_v0, %v5730_v63 }
 0x268   :  { %v4056_v6 = vpop.f32.mrf.mxu2  ;;  %v4082_v12 = vpop.f32.mrf.mxu0 }
 0x269   :  { %v4057_v10 = vadd.f32 %v4056_v6, %v510_v49  ;;  %v4070_v11 = vpop.f32.mrf.mxu3  ;;  %v4083_v15 = vadd.f32 %v4082_v12, %v512_v1  ;;  %v4096_v16 = vpop.f32.mrf.mxu1  ;;  %v6394_v49 = vld [vmem:[%s9571_s1 + $0x7c0] sm:$0xf] }
 0x26a   :  { %v4071_v14 = vadd.f32 %v4070_v11, %v511_v53  ;;  %v4097_v22 = vadd.f32 %v4096_v16, %v513_v2  ;;  %v6815_v53 = vld [vmem:[%s9571_s1 + $0x7c4] sm:$0xf]  ;;  %v6395_v59 = vor.u32 %v6898_v50, %v6394_v49 }
 0x26b   :  { %5002 = vst [vmem:[#allocation2 + $0x8e0] sm:$0xff] %v4057_v10  ;;  %6552 = vmatmul.msk.bf16.vlgmr.msra.gmra.mxu0 %vm2389_vm0, %v9250_v18  ;;  %v6399_v62 = vor.u32 %v6815_v53, %v6396_v54 }
 0x26c   :  { %5003 = vst [vmem:[#allocation2 + $0x8e8] sm:$0xff] %v4071_v14  ;;  %6553 = vmatmul.msk.bf16.vlgmr.msra.gmra.mxu1 %vm2389_vm0, %v9250_v18  ;;  %4639 = vmatpush.bf16.msra.mxu0 %v6379_v19  ;;  %v9503_v14 = vld [vmem:[%s9572_s2 + $0x80] sm:$0xff] }
 0x26d   :  { %4837 = vst [vmem:[#allocation2 + $0x3c0] sm:$0xff] %v4083_v15  ;;  %6554 = vmatmul.msk.bf16.vlgmr.msra.gmra.mxu2 %vm2389_vm0, %v9250_v18  ;;  %4653 = vmatpush.bf16.msra.mxu1 %v6383_v24  ;;  %v520_v52 = vperm.slane %v9503_v14, 0  ;;  %v521_v15 = vperm.slane %v9503_v14, 1 }
 0x26e   :  { %4838 = vst [vmem:[#allocation2 + $0x3c8] sm:$0xff] %v4097_v22  ;;  %6555 = vmatmul.msk.bf16.vlgmr.msra.gmra.mxu3 %vm2389_vm0, %v9250_v18  ;;  %4667 = vmatpush.bf16.msra.mxu2 %v6387_v27  ;;  %v522_v27 = vperm.slane %v9503_v14, 2 }
 0x26f   :  { %4681 = vmatpush.bf16.msra.mxu3 %v6391_v28  ;;  %v523_v28 = vperm.slane %v9503_v14, 3 }
 0x270   :  { %v4110_v37 = vpop.f32.mrf.mxu2  ;;  %v4084_v40 = vpop.f32.mrf.mxu0  ;;  %4640 = vmatpush.bf16.msra.mxu0 %v5715_v35 }
 0x271   :  { %v4111_v41 = vadd.f32 %v4110_v37, %v514_v31  ;;  %v4124_v42 = vpop.f32.mrf.mxu3  ;;  %v4085_v43 = vadd.f32 %v4084_v40, %v512_v1  ;;  %v4098_v44 = vpop.f32.mrf.mxu1  ;;  %4654 = vmatpush.bf16.msra.mxu1 %v5719_v17  ;;  %v6649_v1 = vld [vmem:[%s9571_s1 + $0x294] sm:$0xf]  ;;  %v525_v37 = vperm.slane %v9503_v14, 5 }
 0x272   :  { %v4125_v45 = vadd.f32 %v4124_v42, %v515_v34  ;;  %v4099_v46 = vadd.f32 %v4098_v44, %v513_v2  ;;  %4668 = vmatpush.bf16.msra.mxu2 %v5723_v36  ;;  %v5732_v2 = vld [vmem:[%s9571_s1 + $0x528] sm:$0xf0]  ;;  %v524_v36 = vperm.slane %v9503_v14, 4 }
 0x273   :  { %4839 = vst [vmem:[#allocation2 + $0x3d0] sm:$0xff] %v4111_v41  ;;  %4682 = vmatpush.bf16.msra.mxu3 %v5727_v38  ;;  %v5735_v6 = vor.u32 %v6649_v1, %v5732_v2 }
 0x274   :  { %5004 = vst [vmem:[#allocation2 + $0x8f0] sm:$0xff] %v4085_v43 }
 0x275   :  { %5005 = vst [vmem:[#allocation2 + $0x8f8] sm:$0xff] %v4099_v46 }
 0x276   :  { %4840 = vst [vmem:[#allocation2 + $0x3d8] sm:$0xff] %v4125_v45 }
 0x278   :  { %v4112_v51 = vpop.f32.mrf.mxu2  ;;  %v4138_v23 = vpop.f32.mrf.mxu0 }
 0x279   :  { %v4113_v55 = vadd.f32 %v4112_v51, %v514_v31  ;;  %v4126_v56 = vpop.f32.mrf.mxu3  ;;  %v4139_v57 = vadd.f32 %v4138_v23, %v516_v47  ;;  %v4152_v58 = vpop.f32.mrf.mxu1 }
 0x27a   :  { %v4127_v39 = vadd.f32 %v4126_v56, %v515_v34  ;;  %v4153_v61 = vadd.f32 %v4152_v58, %v517_v48 }
 0x27b   :  { %5006 = vst [vmem:[#allocation2 + $0x900] sm:$0xff] %v4113_v55  ;;  %6556 = vmatmul.msk.bf16.vlgmr.msrb.gmra.mxu0 %vm2389_vm0, %v9250_v18 }
 0x27c   :  { %5007 = vst [vmem:[#allocation2 + $0x908] sm:$0xff] %v4127_v39  ;;  %6557 = vmatmul.msk.bf16.vlgmr.msrb.gmra.mxu1 %vm2389_vm0, %v9250_v18  ;;  %4695 = vmatpush.bf16.msrb.mxu0 %v6395_v59  ;;  %v9528_v39 = vld [vmem:[%s9572_s2 + $0x88] sm:$0xff] }
 0x27d   :  { %4841 = vst [vmem:[#allocation2 + $0x3e0] sm:$0xff] %v4139_v57  ;;  %6558 = vmatmul.msk.bf16.vlgmr.msrb.gmra.mxu2 %vm2389_vm0, %v9250_v18  ;;  %4709 = vmatpush.bf16.msrb.mxu1 %v6399_v62  ;;  %v529_v57 = vperm.slane %v9528_v39, 1 }
 0x27e   :  { %4842 = vst [vmem:[#allocation2 + $0x3e8] sm:$0xff] %v4153_v61  ;;  %6559 = vmatmul.msk.bf16.vlgmr.msrb.gmra.mxu3 %vm2389_vm0, %v9250_v18 }
 0x280   :  { %v4166_v7 = vpop.f32.mrf.mxu2  ;;  %v4140_v8 = vpop.f32.mrf.mxu0  ;;  %4696 = vmatpush.bf16.msrb.mxu0 %v5731_v5 }
 0x281   :  { %v4167_v9 = vadd.f32 %v4166_v7, %v518_v3  ;;  %v4180_v10 = vpop.f32.mrf.mxu3  ;;  %v4141_v11 = vadd.f32 %v4140_v8, %v516_v47  ;;  %v4154_v12 = vpop.f32.mrf.mxu1  ;;  %4710 = vmatpush.bf16.msrb.mxu1 %v5735_v6  ;;  %v526_v47 = vperm.slane %v9503_v14, 6 }
 0x282   :  { %v4181_v13 = vadd.f32 %v4180_v10, %v519_v4  ;;  %v4155_v60 = vadd.f32 %v4154_v12, %v517_v48  ;;  %v527_v48 = vperm.slane %v9503_v14, 7 }
 0x283   :  { %4843 = vst [vmem:[#allocation2 + $0x3f0] sm:$0xff] %v4167_v9 }
 0x284   :  { %5008 = vst [vmem:[#allocation2 + $0x910] sm:$0xff] %v4141_v11 }
 0x285   :  { %5009 = vst [vmem:[#allocation2 + $0x918] sm:$0xff] %v4155_v60  ;;  %v533_v60 = vperm.slane %v9528_v39, 5 }
 0x286   :  { %4844 = vst [vmem:[#allocation2 + $0x3f8] sm:$0xff] %v4181_v13  ;;  %v532_v13 = vperm.slane %v9528_v39, 4 }
 0x288   :  { %v4168_v16 = vpop.f32.mrf.mxu2  ;;  %v4194_v21 = vpop.f32.mrf.mxu0 }
 0x289   :  { %v4169_v19 = vadd.f32 %v4168_v16, %v518_v3  ;;  %v4182_v20 = vpop.f32.mrf.mxu3  ;;  %v4195_v24 = vadd.f32 %v4194_v21, %v520_v52  ;;  %v4208_v25 = vpop.f32.mrf.mxu1  ;;  %v530_v3 = vperm.slane %v9528_v39, 2 }
 0x28a   :  { %v4183_v22 = vadd.f32 %v4182_v20, %v519_v4  ;;  %v4209_v26 = vadd.f32 %v4208_v25, %v521_v15  ;;  %v531_v4 = vperm.slane %v9528_v39, 3  ;;  %v535_v25 = vperm.slane %v9528_v39, 7 }
 0x28b   :  { %5010 = vst [vmem:[#allocation2 + $0x920] sm:$0xff] %v4169_v19  ;;  %6560 = vmatmul.msk.bf16.vlgmr.msra.gmra.mxu0 %vm2389_vm0, %v9250_v18 }
 0x28c   :  { %5011 = vst [vmem:[#allocation2 + $0x928] sm:$0xff] %v4183_v22  ;;  %6561 = vmatmul.msk.bf16.vlgmr.msra.gmra.mxu1 %vm2389_vm0, %v9250_v18 }
 0x28d   :  { %4845 = vst [vmem:[#allocation2 + $0x400] sm:$0xff] %v4195_v24  ;;  %6562 = vmatmul.msk.bf16.vlgmr.msra.gmra.mxu2 %vm2389_vm0, %v9250_v18  ;;  %v534_v24 = vperm.slane %v9528_v39, 6 }
 0x28e   :  { %4846 = vst [vmem:[#allocation2 + $0x408] sm:$0xff] %v4209_v26  ;;  %6563 = vmatmul.msk.bf16.vlgmr.msra.gmra.mxu3 %vm2389_vm0, %v9250_v18 }
 0x290   :  { %v4222_v29 = vpop.f32.mrf.mxu2  ;;  %v4196_v30 = vpop.f32.mrf.mxu0 }
 0x291   :  { %v4223_v31 = vadd.f32 %v4222_v29, %v522_v27  ;;  %v4236_v32 = vpop.f32.mrf.mxu3  ;;  %v4197_v33 = vadd.f32 %v4196_v30, %v520_v52  ;;  %v4210_v34 = vpop.f32.mrf.mxu1 }
 0x292   :  { %v4237_v35 = vadd.f32 %v4236_v32, %v523_v28  ;;  %v4211_v17 = vadd.f32 %v4210_v34, %v521_v15  ;;  %v9541_v34 = vld [vmem:[%s9572_s2 + $0x90] sm:$0xff] }
 0x293   :  { %4847 = vst [vmem:[#allocation2 + $0x410] sm:$0xff] %v4223_v31 }
 0x294   :  { %5012 = vst [vmem:[#allocation2 + $0x930] sm:$0xff] %v4197_v33 }
 0x295   :  { %5013 = vst [vmem:[#allocation2 + $0x938] sm:$0xff] %v4211_v17  ;;  %v537_v17 = vperm.slane %v9541_v34, 1 }
 0x296   :  { %4848 = vst [vmem:[#allocation2 + $0x418] sm:$0xff] %v4237_v35  ;;  %v536_v35 = vperm.slane %v9541_v34, 0 }
 0x298   :  { %v4224_v38 = vpop.f32.mrf.mxu2  ;;  %v4250_v42 = vpop.f32.mrf.mxu0 }
 0x299   :  { %v4225_v40 = vadd.f32 %v4224_v38, %v522_v27  ;;  %v4238_v41 = vpop.f32.mrf.mxu3  ;;  %v4251_v44 = vadd.f32 %v4250_v42, %v524_v36  ;;  %v4264_v45 = vpop.f32.mrf.mxu1 }
 0x29a   :  { %v4239_v43 = vadd.f32 %v4238_v41, %v523_v28  ;;  %v4265_v46 = vadd.f32 %v4264_v45, %v525_v37  ;;  %v538_v45 = vperm.slane %v9541_v34, 2 }
 0x29b   :  { %5014 = vst [vmem:[#allocation2 + $0x940] sm:$0xff] %v4225_v40  ;;  %6564 = vmatmul.msk.bf16.vlgmr.msrb.gmra.mxu0 %vm2389_vm0, %v9250_v18 }
 0x29c   :  { %5015 = vst [vmem:[#allocation2 + $0x948] sm:$0xff] %v4239_v43  ;;  %6565 = vmatmul.msk.bf16.vlgmr.msrb.gmra.mxu1 %vm2389_vm0, %v9250_v18  ;;  %v528_v18 = vperm.slane %v9528_v39, 0 }
 0x29d   :  { %4849 = vst [vmem:[#allocation2 + $0x420] sm:$0xff] %v4251_v44 }
 0x29e   :  { %4850 = vst [vmem:[#allocation2 + $0x428] sm:$0xff] %v4265_v46  ;;  %v539_v46 = vperm.slane %v9541_v34, 3 }
 0x2a0   :  { %v4278_v49 = vpop.f32.mrf.mxu2  ;;  %v4252_v50 = vpop.f32.mrf.mxu0 }
 0x2a1   :  { %v4279_v51 = vadd.f32 %v4278_v49, %v526_v47  ;;  %v4292_v53 = vpop.f32.mrf.mxu3  ;;  %v4253_v54 = vadd.f32 %v4252_v50, %v524_v36  ;;  %v4266_v55 = vpop.f32.mrf.mxu1 }
 0x2a2   :  { %v4293_v56 = vadd.f32 %v4292_v53, %v527_v48  ;;  %v4267_v23 = vadd.f32 %v4266_v55, %v525_v37 }
 0x2a3   :  { %4851 = vst [vmem:[#allocation2 + $0x430] sm:$0xff] %v4279_v51 }
 0x2a4   :  { %5016 = vst [vmem:[#allocation2 + $0x950] sm:$0xff] %v4253_v54 }
 0x2a5   :  { %5017 = vst [vmem:[#allocation2 + $0x958] sm:$0xff] %v4267_v23  ;;  %v541_v23 = vperm.slane %v9541_v34, 5 }
 0x2a6   :  { %4852 = vst [vmem:[#allocation2 + $0x438] sm:$0xff] %v4293_v56  ;;  %v540_v56 = vperm.slane %v9541_v34, 4 }
 0x2a8   :  { %v4280_v58 = vpop.f32.mrf.mxu2  ;;  %v4306_v62 = vpop.f32.mrf.mxu0 }
 0x2a9   :  { %v4281_v59 = vadd.f32 %v4280_v58, %v526_v47  ;;  %v4294_v61 = vpop.f32.mrf.mxu3  ;;  %v4307_v0 = vadd.f32 %v4306_v62, %v528_v18  ;;  %v4320_v1 = vpop.f32.mrf.mxu1 }
 0x2aa   :  { %v4295_v63 = vadd.f32 %v4294_v61, %v527_v48  ;;  %v4321_v2 = vadd.f32 %v4320_v1, %v529_v57  ;;  %v543_v1 = vperm.slane %v9541_v34, 7 }
 0x2ab   :  { %5018 = vst [vmem:[#allocation2 + $0x960] sm:$0xff] %v4281_v59 }
 0x2ac   :  { %5019 = vst [vmem:[#allocation2 + $0x968] sm:$0xff] %v4295_v63 }
 0x2ad   :  { %4853 = vst [vmem:[#allocation2 + $0x440] sm:$0xff] %v4307_v0  ;;  %v542_v0 = vperm.slane %v9541_v34, 6 }
 0x2ae   :  { %4854 = vst [vmem:[#allocation2 + $0x448] sm:$0xff] %v4321_v2 }
 0x2b0   :  { %v4334_v5 = vpop.f32.mrf.mxu2  ;;  %v4308_v6 = vpop.f32.mrf.mxu0 }
 0x2b1   :  { %v4335_v7 = vadd.f32 %v4334_v5, %v530_v3  ;;  %v4348_v8 = vpop.f32.mrf.mxu3  ;;  %v4309_v9 = vadd.f32 %v4308_v6, %v528_v18  ;;  %v4322_v10 = vpop.f32.mrf.mxu1 }
 0x2b2   :  { %v4349_v11 = vadd.f32 %v4348_v8, %v531_v4  ;;  %v4323_v12 = vadd.f32 %v4322_v10, %v529_v57  ;;  %v9554_v10 = vld [vmem:[%s9572_s2 + $0x98] sm:$0xff] }
 0x2b3   :  { %4855 = vst [vmem:[#allocation2 + $0x450] sm:$0xff] %v4335_v7 }
 0x2b4   :  { %5020 = vst [vmem:[#allocation2 + $0x970] sm:$0xff] %v4309_v9 }
 0x2b5   :  { %5021 = vst [vmem:[#allocation2 + $0x978] sm:$0xff] %v4323_v12  ;;  %v545_v12 = vperm.slane %v9554_v10, 1 }
 0x2b6   :  { %4856 = vst [vmem:[#allocation2 + $0x458] sm:$0xff] %v4349_v11  ;;  %v544_v11 = vperm.slane %v9554_v10, 0 }
 0x2b8   :  { %v4336_v14 = vpop.f32.mrf.mxu2  ;;  %v4362_v16 = vpop.f32.mrf.mxu0 }
 0x2b9   :  { %v4337_v52 = vadd.f32 %v4336_v14, %v530_v3  ;;  %v4350_v15 = vpop.f32.mrf.mxu3  ;;  %v4363_v20 = vadd.f32 %v4362_v16, %v532_v13  ;;  %v4376_v21 = vpop.f32.mrf.mxu1 }
 0x2ba   :  { %v4351_v19 = vadd.f32 %v4350_v15, %v531_v4  ;;  %v4377_v22 = vadd.f32 %v4376_v21, %v533_v60  ;;  %v546_v21 = vperm.slane %v9554_v10, 2 }
 0x2bb   :  { %5022 = vst [vmem:[#allocation2 + $0x980] sm:$0xff] %v4337_v52 }
 0x2bc   :  { %5023 = vst [vmem:[#allocation2 + $0x988] sm:$0xff] %v4351_v19 }
 0x2bd   :  { %4857 = vst [vmem:[#allocation2 + $0x460] sm:$0xff] %v4363_v20 }
 0x2be   :  { %4858 = vst [vmem:[#allocation2 + $0x468] sm:$0xff] %v4377_v22  ;;  %v547_v22 = vperm.slane %v9554_v10, 3 }
 0x2c0   :  { %v4390_v26 = vpop.f32.mrf.mxu2  ;;  %v4364_v27 = vpop.f32.mrf.mxu0 }
 0x2c1   :  { %v4391_v28 = vadd.f32 %v4390_v26, %v534_v24  ;;  %v4404_v29 = vpop.f32.mrf.mxu3  ;;  %v4365_v30 = vadd.f32 %v4364_v27, %v532_v13  ;;  %v4378_v31 = vpop.f32.mrf.mxu1 }
 0x2c2   :  { %v4405_v32 = vadd.f32 %v4404_v29, %v535_v25  ;;  %v4379_v33 = vadd.f32 %v4378_v31, %v533_v60 }
 0x2c3   :  { %4859 = vst [vmem:[#allocation2 + $0x470] sm:$0xff] %v4391_v28 }
 0x2c4   :  { %5024 = vst [vmem:[#allocation2 + $0x990] sm:$0xff] %v4365_v30 }
 0x2c5   :  { %5025 = vst [vmem:[#allocation2 + $0x998] sm:$0xff] %v4379_v33  ;;  %v549_v33 = vperm.slane %v9554_v10, 5 }
 0x2c6   :  { %4860 = vst [vmem:[#allocation2 + $0x478] sm:$0xff] %v4405_v32  ;;  %v548_v32 = vperm.slane %v9554_v10, 4 }
 0x2c8   :  { %v4392_v36 = vpop.f32.mrf.mxu2  ;;  %v4418_v40 = vpop.f32.mrf.mxu0 }
 0x2c9   :  { %v4393_v37 = vadd.f32 %v4392_v36, %v534_v24  ;;  %v4406_v38 = vpop.f32.mrf.mxu3  ;;  %v4419_v42 = vadd.f32 %v4418_v40, %v536_v35  ;;  %v4432_v43 = vpop.f32.mrf.mxu1 }
 0x2ca   :  { %v4407_v41 = vadd.f32 %v4406_v38, %v535_v25  ;;  %v4433_v44 = vadd.f32 %v4432_v43, %v537_v17  ;;  %v551_v43 = vperm.slane %v9554_v10, 7 }
 0x2cb   :  { %5026 = vst [vmem:[#allocation2 + $0x9a0] sm:$0xff] %v4393_v37 }
 0x2cc   :  { %5027 = vst [vmem:[#allocation2 + $0x9a8] sm:$0xff] %v4407_v41 }
 0x2cd   :  { %4861 = vst [vmem:[#allocation2 + $0x480] sm:$0xff] %v4419_v42  ;;  %v550_v42 = vperm.slane %v9554_v10, 6 }
 0x2ce   :  { %4862 = vst [vmem:[#allocation2 + $0x488] sm:$0xff] %v4433_v44 }
 0x2d0   :  { %v4446_v47 = vpop.f32.mrf.mxu2  ;;  %v4420_v48 = vpop.f32.mrf.mxu0 }
 0x2d1   :  { %v4447_v49 = vadd.f32 %v4446_v47, %v538_v45  ;;  %v4460_v50 = vpop.f32.mrf.mxu3  ;;  %v4421_v51 = vadd.f32 %v4420_v48, %v536_v35  ;;  %v4434_v53 = vpop.f32.mrf.mxu1 }
 0x2d2   :  { %v4461_v54 = vadd.f32 %v4460_v50, %v539_v46  ;;  %v4435_v55 = vadd.f32 %v4434_v53, %v537_v17  ;;  %v370_v53 = vld [vmem:[%s9572_s2 + $0xa0] sm:$0x3f]  ;;  %s6932_s2 = smov [#allocation2]  }
 0x2d3   :  { %4863 = vst [vmem:[#allocation2 + $0x490] sm:$0xff] %v4447_v49  ;;  %s5054_s9 = sshll.u32 %s6932_s2, 4  ;;  %s5055_s9 = int_to_ptr.vmem [resolvable:$true] %s5054_s9 }
 0x2d4   :  { %5028 = vst [vmem:[#allocation2 + $0x9b0] sm:$0xff] %v4421_v51 }
 0x2d5   :  { %5029 = vst [vmem:[#allocation2 + $0x9b8] sm:$0xff] %v4435_v55  ;;  %v553_v55 = vperm.slane %v370_v53, 1 }
 0x2d6   :  { %4864 = vst [vmem:[#allocation2 + $0x498] sm:$0xff] %v4461_v54  ;;  %v552_v54 = vperm.slane %v370_v53, 0 }
 0x2d8   :  { %v4448_v39 = vpop.f32.mrf.mxu2  ;;  %v4474_v58 = vpop.f32.mrf.mxu0 }
 0x2d9   :  { %v4449_v18 = vadd.f32 %v4448_v39, %v538_v45  ;;  %v4462_v57 = vpop.f32.mrf.mxu3  ;;  %v4475_v61 = vadd.f32 %v4474_v58, %v540_v56  ;;  %v4488_v62 = vpop.f32.mrf.mxu1 }
 0x2da   :  { %v4463_v59 = vadd.f32 %v4462_v57, %v539_v46  ;;  %v4489_v63 = vadd.f32 %v4488_v62, %v541_v23  ;;  %v554_v62 = vperm.slane %v370_v53, 2 }
 0x2db   :  { %5030 = vst [vmem:[#allocation2 + $0x9c0] sm:$0xff] %v4449_v18 }
 0x2dc   :  { %5031 = vst [vmem:[#allocation2 + $0x9c8] sm:$0xff] %v4463_v59 }
 0x2dd   :  { %4865 = vst [vmem:[#allocation2 + $0x4a0] sm:$0xff] %v4475_v61 }
 0x2de   :  { %4866 = vst [vmem:[#allocation2 + $0x4a8] sm:$0xff] %v4489_v63  ;;  %v555_v63 = vperm.slane %v370_v53, 3 }
 0x2e0   :  { %v4502_v2 = vpop.f32.mrf.mxu2  ;;  %v4476_v3 = vpop.f32.mrf.mxu0 }
 0x2e1   :  { %v4503_v4 = vadd.f32 %v4502_v2, %v542_v0  ;;  %v4516_v5 = vpop.f32.mrf.mxu3  ;;  %v4477_v6 = vadd.f32 %v4476_v3, %v540_v56  ;;  %v4490_v7 = vpop.f32.mrf.mxu1 }
 0x2e2   :  { %v4517_v8 = vadd.f32 %v4516_v5, %v543_v1  ;;  %v4491_v9 = vadd.f32 %v4490_v7, %v541_v23 }
 0x2e3   :  { %4867 = vst [vmem:[#allocation2 + $0x4b0] sm:$0xff] %v4503_v4 }
 0x2e4   :  { %5032 = vst [vmem:[#allocation2 + $0x9d0] sm:$0xff] %v4477_v6 }
 0x2e5   :  { %5033 = vst [vmem:[#allocation2 + $0x9d8] sm:$0xff] %v4491_v9  ;;  %v557_v9 = vperm.slane %v370_v53, 5 }
 0x2e6   :  { %4868 = vst [vmem:[#allocation2 + $0x4b8] sm:$0xff] %v4517_v8  ;;  %v556_v8 = vperm.slane %v370_v53, 4 }
 0x2e8   :  { %v4504_v13 = vpop.f32.mrf.mxu2  ;;  %v4530_v52 = vpop.f32.mrf.mxu0 }
 0x2e9   :  { %v4505_v60 = vadd.f32 %v4504_v13, %v542_v0  ;;  %v4518_v14 = vpop.f32.mrf.mxu3  ;;  %v4531_v16 = vadd.f32 %v4530_v52, %v544_v11  ;;  %v4544_v19 = vpop.f32.mrf.mxu1 }
 0x2ea   :  { %v4519_v15 = vadd.f32 %v4518_v14, %v543_v1  ;;  %v4545_v20 = vadd.f32 %v4544_v19, %v545_v12 }
 0x2eb   :  { %5034 = vst [vmem:[#allocation2 + $0x9e0] sm:$0xff] %v4505_v60 }
 0x2ec   :  { %5035 = vst [vmem:[#allocation2 + $0x9e8] sm:$0xff] %v4519_v15 }
 0x2ed   :  { %4869 = vst [vmem:[#allocation2 + $0x4c0] sm:$0xff] %v4531_v16 }
 0x2ee   :  { %4870 = vst [vmem:[#allocation2 + $0x4c8] sm:$0xff] %v4545_v20 }
 0x2f0   :  { %v4558_v24 = vpop.f32.mrf.mxu2  ;;  %v4532_v25 = vpop.f32.mrf.mxu0 }
 0x2f1   :  { %v4559_v26 = vadd.f32 %v4558_v24, %v546_v21  ;;  %v4572_v27 = vpop.f32.mrf.mxu3  ;;  %v4533_v28 = vadd.f32 %v4532_v25, %v544_v11  ;;  %v4546_v29 = vpop.f32.mrf.mxu1 }
 0x2f2   :  { %v4573_v30 = vadd.f32 %v4572_v27, %v547_v22  ;;  %v4547_v31 = vadd.f32 %v4546_v29, %v545_v12 }
 0x2f3   :  { %4871 = vst [vmem:[#allocation2 + $0x4d0] sm:$0xff] %v4559_v26 }
 0x2f4   :  { %5036 = vst [vmem:[#allocation2 + $0x9f0] sm:$0xff] %v4533_v28 }
 0x2f5   :  { %5037 = vst [vmem:[#allocation2 + $0x9f8] sm:$0xff] %v4547_v31 }
 0x2f6   :  { %4872 = vst [vmem:[#allocation2 + $0x4d8] sm:$0xff] %v4573_v30 }
 0x2f8   :  { %v4560_v34 = vpop.f32.mrf.mxu2  ;;  %v4586_v36 = vpop.f32.mrf.mxu0 }
 0x2f9   :  { %v4561_v35 = vadd.f32 %v4560_v34, %v546_v21  ;;  %v4574_v17 = vpop.f32.mrf.mxu3  ;;  %v4587_v38 = vadd.f32 %v4586_v36, %v548_v32  ;;  %v4600_v40 = vpop.f32.mrf.mxu1 }
 0x2fa   :  { %v4575_v37 = vadd.f32 %v4574_v17, %v547_v22  ;;  %v4601_v41 = vadd.f32 %v4600_v40, %v549_v33 }
 0x2fb   :  { %5038 = vst [vmem:[#allocation2 + $0xa00] sm:$0xff] %v4561_v35 }
 0x2fc   :  { %5039 = vst [vmem:[#allocation2 + $0xa08] sm:$0xff] %v4575_v37 }
 0x2fd   :  { %4873 = vst [vmem:[#allocation2 + $0x4e0] sm:$0xff] %v4587_v38 }
 0x2fe   :  { %4874 = vst [vmem:[#allocation2 + $0x4e8] sm:$0xff] %v4601_v41 }
 0x300   :  { %v4614_v44 = vpop.f32.mrf.mxu2  ;;  %v4588_v45 = vpop.f32.mrf.mxu0 }
 0x301   :  { %v4615_v46 = vadd.f32 %v4614_v44, %v550_v42  ;;  %v4628_v47 = vpop.f32.mrf.mxu3  ;;  %v4589_v48 = vadd.f32 %v4588_v45, %v548_v32  ;;  %v4602_v49 = vpop.f32.mrf.mxu1 }
 0x302   :  { %v4629_v50 = vadd.f32 %v4628_v47, %v551_v43  ;;  %v4603_v51 = vadd.f32 %v4602_v49, %v549_v33 }
 0x303   :  { %4875 = vst [vmem:[#allocation2 + $0x4f0] sm:$0xff] %v4615_v46 }
 0x304   :  { %5040 = vst [vmem:[#allocation2 + $0xa10] sm:$0xff] %v4589_v48 }
 0x305   :  { %5041 = vst [vmem:[#allocation2 + $0xa18] sm:$0xff] %v4603_v51 }
 0x306   :  { %4876 = vst [vmem:[#allocation2 + $0x4f8] sm:$0xff] %v4629_v50 }
 0x308   :  { %v4616_v56 = vpop.f32.mrf.mxu2  ;;  %v4642_v18 = vpop.f32.mrf.mxu0 }
 0x309   :  { %v4617_v23 = vadd.f32 %v4616_v56, %v550_v42  ;;  %v4630_v39 = vpop.f32.mrf.mxu3  ;;  %v4643_v58 = vadd.f32 %v4642_v18, %v552_v54  ;;  %v4656_v59 = vpop.f32.mrf.mxu1 }
 0x30a   :  { %v4631_v57 = vadd.f32 %v4630_v39, %v551_v43  ;;  %v4657_v61 = vadd.f32 %v4656_v59, %v553_v55 }
 0x30b   :  { %5042 = vst [vmem:[#allocation2 + $0xa20] sm:$0xff] %v4617_v23 }
 0x30c   :  { %5043 = vst [vmem:[#allocation2 + $0xa28] sm:$0xff] %v4631_v57 }
 0x30d   :  { %4877 = vst [vmem:[#allocation2 + $0x500] sm:$0xff] %v4643_v58 }
 0x30e   :  { %4878 = vst [vmem:[#allocation2 + $0x508] sm:$0xff] %v4657_v61 }
 0x310   :  { %v4670_v0 = vpop.f32.mrf.mxu2  ;;  %v4644_v1 = vpop.f32.mrf.mxu0 }
 0x311   :  { %v4671_v2 = vadd.f32 %v4670_v0, %v554_v62  ;;  %v4684_v3 = vpop.f32.mrf.mxu3  ;;  %v4645_v4 = vadd.f32 %v4644_v1, %v552_v54  ;;  %v4658_v5 = vpop.f32.mrf.mxu1 }
 0x312   :  { %v4685_v6 = vadd.f32 %v4684_v3, %v555_v63  ;;  %v4659_v7 = vadd.f32 %v4658_v5, %v553_v55 }
 0x313   :  { %4879 = vst [vmem:[#allocation2 + $0x510] sm:$0xff] %v4671_v2 }
 0x314   :  { %5044 = vst [vmem:[#allocation2 + $0xa30] sm:$0xff] %v4645_v4 }
 0x315   :  { %5045 = vst [vmem:[#allocation2 + $0xa38] sm:$0xff] %v4659_v7 }
 0x316   :  { %4880 = vst [vmem:[#allocation2 + $0x518] sm:$0xff] %v4685_v6 }
 0x318   :  { %v4672_v10 = vpop.f32.mrf.mxu2  ;;  %v4698_v13 = vpop.f32.mrf.mxu0 }
 0x319   :  { %v4673_v11 = vadd.f32 %v4672_v10, %v554_v62  ;;  %v4686_v12 = vpop.f32.mrf.mxu3  ;;  %v4699_v14 = vadd.f32 %v4698_v13, %v556_v8  ;;  %v4712_v52 = vpop.f32.mrf.mxu1 }
 0x31a   :  { %v4687_v60 = vadd.f32 %v4686_v12, %v555_v63  ;;  %v4713_v15 = vadd.f32 %v4712_v52, %v557_v9 }
 0x31b   :  { %5046 = vst [vmem:[#allocation2 + $0xa40] sm:$0xff] %v4673_v11 }
 0x31c   :  { %5047 = vst [vmem:[#allocation2 + $0xa48] sm:$0xff] %v4687_v60 }
 0x31d   :  { %4881 = vst [vmem:[#allocation2 + $0x520] sm:$0xff] %v4699_v14 }
 0x31e   :  { %4883 = vst.msk [vmem:[#allocation2 + $0x528] sm:$0xff] %vm4882_vm1, %v4713_v15 }
 0x320   :  { %v4700_v16 = vpop.f32.mrf.mxu0 }
 0x321   :  { %v4701_v19 = vadd.f32 %v4700_v16, %v556_v8  ;;  %v4714_v20 = vpop.f32.mrf.mxu1 }
 0x322   :  { %v4715_v21 = vadd.f32 %v4714_v20, %v557_v9 }
 0x323   :  { %5048 = vst [vmem:[#allocation2 + $0xa50] sm:$0xff] %v4701_v19 }
 0x324   :  { %5049 = vst.msk [vmem:[#allocation2 + $0xa58] sm:$0xff] %vm4882_vm1, %v4715_v21 }
 0x325   :  { %5062 = dma.vmem_to_hbm [thread:$0]  %s5055_s9, 42496, %s5057_s12, [#allocation3], %s6933_s13, %s6933_s13, %s6934_s14  }
 0x326   :  { %6930 = dma.done.wait [#allocation3], 42496  }
 0x327   :  { %6931 = vsyncadd [#allocation3], 4294924800 }
 0x328   :  { %5067 = vsyncpa [#allocation3], 1 }

</bundles_post_ra>
